<compile_context>
chip_gen: v5e
topology: v5e:2x2
jax: 0.10.0
libtpu: 0.0.40
codegen_flags: <defaults>
</compile_context>

<pallas_src>
import math

import jax
import jax.numpy as jnp
from jax.experimental import pallas as pl
from jax.experimental.pallas import tpu as pltpu

_LANES = 128
_CHUNK = 16          # query rows per inner-loop step (multiple of 8 sublanes)


def _round_up(a, b):
    return -(-a // b) * b


def _num_tensorcores():
    """Best-effort TensorCore count per Pallas device (2 on v7x, else 1)."""
    try:
        kind = jax.devices()[0].device_kind.lower()
    except Exception:
        return 1
    return 2 if ("v7" in kind or "7x" in kind) else 1


def _make_pyramid_kernel(tex_shapes):
    n_tex = len(tex_shapes)

    def kernel(*refs):
        uv_ref = refs[0]                       # (2, TR, 128): [0]=u, [1]=v
        tex_refs = refs[1:1 + n_tex]           # flat textures in SMEM
        o_ref = refs[1 + n_tex]                # (TR, 128)
        n_chunks = o_ref.shape[0] // _CHUNK

        @pl.loop(0, n_chunks)
        def _(i):
            row0 = pl.multiple_of(i * _CHUNK, _CHUNK)
            u = uv_ref[0, pl.ds(row0, _CHUNK), :]      # (CHUNK, 128) in [0,1]
            v = uv_ref[1, pl.ds(row0, _CHUNK), :]
            total = jnp.zeros_like(u)
            # Levels are pre-sorted smallest -> largest by the wrapper so u/v
            # are dead before the 16x16 MAC loop (lower vreg pressure there).
            for t_ref, (th, tw) in zip(tex_refs, tex_shapes):
                # x*2-1 followed by align_corners=True remap collapses to:
                ix = u * float(tw - 1)
                iy = v * float(th - 1)
                # tent (bilinear) weight per texture column, cached in vregs
                wx = [jnp.maximum(1.0 - jnp.abs(ix - float(c)), 0.0)
                      for c in range(tw)]
                for r in range(th):
                    wy_r = jnp.maximum(1.0 - jnp.abs(iy - float(r)), 0.0)
                    base = r * tw
                    if tw >= 8:
                        # two partial sums -> shorter serial dependency chain
                        half = tw // 2
                        s0 = wx[0] * t_ref[base]
                        s1 = wx[half] * t_ref[base + half]
                        for c in range(1, half):
                            s0 = s0 + wx[c] * t_ref[base + c]
                        for c in range(half + 1, tw):
                            s1 = s1 + wx[c] * t_ref[base + c]
                        s_r = s0 + s1
                    else:
                        s_r = wx[0] * t_ref[base]
                        for c in range(1, tw):
                            s_r = s_r + wx[c] * t_ref[base + c]
                    total = total + wy_r * s_r
            o_ref[pl.ds(row0, _CHUNK), :] = total

    return kernel


def laplacian_pyramid_forward(x, layers, *, rows_per_tile=2048):
    """x: (B, H, W, 2) UV in [0, 1]; layers: list of (1, 1, th, tw) params.
    Returns (B, 1, H, W), matching the PyTorch module (sum of grid_samples)."""
    B, H, W, _ = x.shape
    M = B * H * W
    x = x.astype(jnp.float32)

    # Flatten textures into compact SMEM layout.  Note: PyTorch grid x indexes
    # shape[-1] (the module names it 'height'); kernel uses tw = shape[-1],
    # th = shape[-2], matching F.grid_sample semantics for non-square textures.
    texs, shapes = [], []
    for l in layers:
        t = jnp.asarray(l, jnp.float32).reshape(l.shape[-2], l.shape[-1])
        shapes.append((t.shape[0], t.shape[1]))
        texs.append(t.reshape(-1))
    order = sorted(range(len(texs)), key=lambda i: shapes[i][0] * shapes[i][1])
    texs = [texs[i] for i in order]
    tex_shapes = [shapes[i] for i in order]

    # Lane-dense query layout: (rows, 128) with the lane axis fully used.
    rows = -(-M // _LANES)
    n_cores = _num_tensorcores()
    grid_n = max(1, -(-rows // rows_per_tile))
    if n_cores > 1 and rows >= n_cores * _CHUNK:
        # v7x: even, balanced step count so both TensorCores get equal work.
        grid_n = _round_up(max(grid_n, n_cores), n_cores)
    tr = _round_up(max(1, -(-rows // grid_n)), _CHUNK)
    rows_padded = tr * grid_n
    m_padded = rows_padded * _LANES

    # Single fused transpose + pad: (M, 2) -> (2, rows_padded, 128).
    uv = jnp.pad(x.reshape(M, 2).T, ((0, 0), (0, m_padded - M))).reshape(
        2, rows_padded, _LANES)

    uv_spec = pl.BlockSpec((2, tr, _LANES), lambda i: (0, i, 0))
    out_spec = pl.BlockSpec((tr, _LANES), lambda i: (i, 0))
    smem_spec = pl.BlockSpec(memory_space=pltpu.MemorySpace.SMEM)

    out = pl.pallas_call(
        _make_pyramid_kernel(tex_shapes),
        out_shape=jax.ShapeDtypeStruct((rows_padded, _LANES), jnp.float32),
        grid_spec=pltpu.PrefetchScalarGridSpec(
            num_scalar_prefetch=0,
            grid=(grid_n,),
            in_specs=[uv_spec] + [smem_spec] * len(texs),
            out_specs=out_spec,
        ),
        compiler_params=pltpu.CompilerParams(
            dimension_semantics=("parallel",)),
    )(uv, *texs)

    flat = out.reshape(-1)
    if m_padded != M:
        flat = flat[:M]          # pad-only crop; skipped when no padding
    return flat.reshape(B, H, W)[:, None, :, :]


# ------------------------- pure-JAX reference -------------------------

def _ref_grid_sample(tex, grid):
    """grid_sample, bilinear, zeros padding, align_corners=True.
    tex: (Th, Tw), grid: (B, H, W, 2) in [-1, 1] -> (B, H, W)."""
    th, tw = tex.shape
    ix = (grid[..., 0] + 1.0) * 0.5 * (tw - 1)
    iy = (grid[..., 1] + 1.0) * 0.5 * (th - 1)
    x0 = jnp.floor(ix)
    y0 = jnp.floor(iy)
    x1 = x0 + 1.0
    y1 = y0 + 1.0

    def gather(yy, xx):
        valid = (xx >= 0) & (xx <= tw - 1) & (yy >= 0) & (yy <= th - 1)
        xc = jnp.clip(xx, 0, tw - 1).astype(jnp.int32)
        yc = jnp.clip(yy, 0, th - 1).astype(jnp.int32)
        return jnp.where(valid, tex[yc, xc], 0.0)

    wx1 = ix - x0
    wx0 = 1.0 - wx1
    wy1 = iy - y0
    wy0 = 1.0 - wy1
    return (wy0 * wx0 * gather(y0, x0) + wy0 * wx1 * gather(y0, x1)
            + wy1 * wx0 * gather(y1, x0) + wy1 * wx1 * gather(y1, x1))


def _reference_forward(x, layers):
    grid = x * 2.0 - 1.0
    acc = 0.0
    for l in layers:
        tex = jnp.asarray(l, jnp.float32).reshape(l.shape[-2], l.shape[-1])
        acc = acc + _ref_grid_sample(tex, grid)
    return acc[:, None, :, :]


# ------------------------------ setup ---------------------------------

def _xavier_uniform(key, shape):
    # PyTorch xavier_uniform_ on (1, 1, w, h): fan_in = fan_out = w * h
    fan = shape[-2] * shape[-1]
    bound = math.sqrt(6.0 / (2.0 * fan))
    return jax.random.uniform(key, shape, jnp.float32, -bound, bound)


if __name__ == "__main__":
    width, height = 16, 16          # texture resolution (layer1)
    B, H, W = 2, 16, 16             # query grid

    key = jax.random.PRNGKey(0)
    k1, k2, k3, k4, kx = jax.random.split(key, 5)
    layers = [
        _xavier_uniform(k1, (1, 1, width, height)),
        _xavier_uniform(k2, (1, 1, width // 2, height // 2)),
        _xavier_uniform(k3, (1, 1, width // 4, height // 4)),
        _xavier_uniform(k4, (1, 1, width // 8, height // 8)),
    ]
    # UV coordinates in [0, 1]
    x = jax.random.uniform(kx, (B, H, W, 2), jnp.float32)

    y = laplacian_pyramid_forward(x, layers)
    y = jax.block_until_ready(y)
    assert y.shape == (B, 1, H, W), y.shape

    y_ref = _reference_forward(x, layers)
    assert jnp.allclose(y, y_ref, atol=1e-5, rtol=1e-5), (
        float(jnp.max(jnp.abs(y - y_ref))))

    print("KERNEL_OK")
</pallas_src>

<mosaic_0001>
module attributes {stable_mosaic.version = 11 : i64} {
  func.func @kernel(%arg0: i32, %arg1: memref<2x16x128xf32, #tpu.memory_space<vmem>>, %arg2: memref<4xf32, #tpu.memory_space<smem>>, %arg3: memref<16xf32, #tpu.memory_space<smem>>, %arg4: memref<64xf32, #tpu.memory_space<smem>>, %arg5: memref<256xf32, #tpu.memory_space<smem>>, %arg6: memref<16x128xf32, #tpu.memory_space<vmem>>) attributes {dimension_semantics = [#tpu.dimension_semantics<parallel>], iteration_bounds = array<i64: 1>, scalar_prefetch = 0 : i64, scratch_operands = 0 : i64, tpu.core_type = #tpu.core_type<tc>, window_params = [{transform_indices = @transform_0, window_bounds = array<i64: 2, 16, 128>}, {transform_indices = @transform_1, window_bounds = array<i64: 4>}, {transform_indices = @transform_2, window_bounds = array<i64: 16>}, {transform_indices = @transform_3, window_bounds = array<i64: 64>}, {transform_indices = @transform_4, window_bounds = array<i64: 256>}, {transform_indices = @transform_5, window_bounds = array<i64: 16, 128>}]} {
    %c0_i32 = arith.constant 0 : i32
    %c1_i32 = arith.constant 1 : i32
    %0 = arith.muli %c0_i32, %c1_i32 : i32
    %c0_i32_0 = arith.constant 0 : i32
    %1 = arith.addi %c0_i32_0, %0 : i32
    %c16_i32 = arith.constant 16 : i32
    %2 = arith.muli %1, %c16_i32 : i32
    %3 = tpu.assume_multiple %2, 16 : i32
    %c0 = arith.constant 0 : index
    %4 = arith.index_cast %3 : i32 to index
    %c0_1 = arith.constant 0 : index
    %5 = vector.load %arg1[%c0, %4, %c0_1] : memref<2x16x128xf32, #tpu.memory_space<vmem>>, vector<1x16x128xf32>
    %6 = vector.shape_cast %5 : vector<1x16x128xf32> to vector<16x128xf32>
    %c1 = arith.constant 1 : index
    %7 = arith.index_cast %3 : i32 to index
    %c0_2 = arith.constant 0 : index
    %8 = vector.load %arg1[%c1, %7, %c0_2] : memref<2x16x128xf32, #tpu.memory_space<vmem>>, vector<1x16x128xf32>
    %9 = vector.shape_cast %8 : vector<1x16x128xf32> to vector<16x128xf32>
    %cst = arith.constant 0.000000e+00 : f32
    %10 = vector.broadcast %cst : f32 to vector<16x128xf32>
    %cst_3 = arith.constant 1.000000e+00 : f32
    %11 = vector.broadcast %cst_3 : f32 to vector<16x128xf32>
    %12 = arith.mulf %6, %11 : vector<16x128xf32>
    %cst_4 = arith.constant 1.000000e+00 : f32
    %13 = vector.broadcast %cst_4 : f32 to vector<16x128xf32>
    %14 = arith.mulf %9, %13 : vector<16x128xf32>
    %cst_5 = arith.constant 0.000000e+00 : f32
    %15 = vector.broadcast %cst_5 : f32 to vector<16x128xf32>
    %16 = arith.subf %12, %15 : vector<16x128xf32>
    %17 = math.absf %16 : vector<16x128xf32>
    %cst_6 = arith.constant 1.000000e+00 : f32
    %18 = vector.broadcast %cst_6 : f32 to vector<16x128xf32>
    %19 = arith.subf %18, %17 : vector<16x128xf32>
    %cst_7 = arith.constant 0.000000e+00 : f32
    %20 = vector.broadcast %cst_7 : f32 to vector<16x128xf32>
    %21 = arith.maximumf %19, %20 : vector<16x128xf32>
    %cst_8 = arith.constant 1.000000e+00 : f32
    %22 = vector.broadcast %cst_8 : f32 to vector<16x128xf32>
    %23 = arith.subf %12, %22 : vector<16x128xf32>
    %24 = math.absf %23 : vector<16x128xf32>
    %cst_9 = arith.constant 1.000000e+00 : f32
    %25 = vector.broadcast %cst_9 : f32 to vector<16x128xf32>
    %26 = arith.subf %25, %24 : vector<16x128xf32>
    %cst_10 = arith.constant 0.000000e+00 : f32
    %27 = vector.broadcast %cst_10 : f32 to vector<16x128xf32>
    %28 = arith.maximumf %26, %27 : vector<16x128xf32>
    %cst_11 = arith.constant 0.000000e+00 : f32
    %29 = vector.broadcast %cst_11 : f32 to vector<16x128xf32>
    %30 = arith.subf %14, %29 : vector<16x128xf32>
    %31 = math.absf %30 : vector<16x128xf32>
    %cst_12 = arith.constant 1.000000e+00 : f32
    %32 = vector.broadcast %cst_12 : f32 to vector<16x128xf32>
    %33 = arith.subf %32, %31 : vector<16x128xf32>
    %cst_13 = arith.constant 0.000000e+00 : f32
    %34 = vector.broadcast %cst_13 : f32 to vector<16x128xf32>
    %35 = arith.maximumf %33, %34 : vector<16x128xf32>
    %c0_14 = arith.constant 0 : index
    %36 = memref.load %arg2[%c0_14] : memref<4xf32, #tpu.memory_space<smem>>
    %37 = vector.broadcast %36 : f32 to vector<16x128xf32>
    %38 = arith.mulf %21, %37 : vector<16x128xf32>
    %c1_15 = arith.constant 1 : index
    %39 = memref.load %arg2[%c1_15] : memref<4xf32, #tpu.memory_space<smem>>
    %40 = vector.broadcast %39 : f32 to vector<16x128xf32>
    %41 = arith.mulf %28, %40 : vector<16x128xf32>
    %42 = arith.addf %38, %41 : vector<16x128xf32>
    %43 = arith.mulf %35, %42 : vector<16x128xf32>
    %44 = arith.addf %10, %43 : vector<16x128xf32>
    %cst_16 = arith.constant 1.000000e+00 : f32
    %45 = vector.broadcast %cst_16 : f32 to vector<16x128xf32>
    %46 = arith.subf %14, %45 : vector<16x128xf32>
    %47 = math.absf %46 : vector<16x128xf32>
    %cst_17 = arith.constant 1.000000e+00 : f32
    %48 = vector.broadcast %cst_17 : f32 to vector<16x128xf32>
    %49 = arith.subf %48, %47 : vector<16x128xf32>
    %cst_18 = arith.constant 0.000000e+00 : f32
    %50 = vector.broadcast %cst_18 : f32 to vector<16x128xf32>
    %51 = arith.maximumf %49, %50 : vector<16x128xf32>
    %c2 = arith.constant 2 : index
    %52 = memref.load %arg2[%c2] : memref<4xf32, #tpu.memory_space<smem>>
    %53 = vector.broadcast %52 : f32 to vector<16x128xf32>
    %54 = arith.mulf %21, %53 : vector<16x128xf32>
    %c3 = arith.constant 3 : index
    %55 = memref.load %arg2[%c3] : memref<4xf32, #tpu.memory_space<smem>>
    %56 = vector.broadcast %55 : f32 to vector<16x128xf32>
    %57 = arith.mulf %28, %56 : vector<16x128xf32>
    %58 = arith.addf %54, %57 : vector<16x128xf32>
    %59 = arith.mulf %51, %58 : vector<16x128xf32>
    %60 = arith.addf %44, %59 : vector<16x128xf32>
    %cst_19 = arith.constant 3.000000e+00 : f32
    %61 = vector.broadcast %cst_19 : f32 to vector<16x128xf32>
    %62 = arith.mulf %6, %61 : vector<16x128xf32>
    %cst_20 = arith.constant 3.000000e+00 : f32
    %63 = vector.broadcast %cst_20 : f32 to vector<16x128xf32>
    %64 = arith.mulf %9, %63 : vector<16x128xf32>
    %cst_21 = arith.constant 0.000000e+00 : f32
    %65 = vector.broadcast %cst_21 : f32 to vector<16x128xf32>
    %66 = arith.subf %62, %65 : vector<16x128xf32>
    %67 = math.absf %66 : vector<16x128xf32>
    %cst_22 = arith.constant 1.000000e+00 : f32
    %68 = vector.broadcast %cst_22 : f32 to vector<16x128xf32>
    %69 = arith.subf %68, %67 : vector<16x128xf32>
    %cst_23 = arith.constant 0.000000e+00 : f32
    %70 = vector.broadcast %cst_23 : f32 to vector<16x128xf32>
    %71 = arith.maximumf %69, %70 : vector<16x128xf32>
    %cst_24 = arith.constant 1.000000e+00 : f32
    %72 = vector.broadcast %cst_24 : f32 to vector<16x128xf32>
    %73 = arith.subf %62, %72 : vector<16x128xf32>
    %74 = math.absf %73 : vector<16x128xf32>
    %cst_25 = arith.constant 1.000000e+00 : f32
    %75 = vector.broadcast %cst_25 : f32 to vector<16x128xf32>
    %76 = arith.subf %75, %74 : vector<16x128xf32>
    %cst_26 = arith.constant 0.000000e+00 : f32
    %77 = vector.broadcast %cst_26 : f32 to vector<16x128xf32>
    %78 = arith.maximumf %76, %77 : vector<16x128xf32>
    %cst_27 = arith.constant 2.000000e+00 : f32
    %79 = vector.broadcast %cst_27 : f32 to vector<16x128xf32>
    %80 = arith.subf %62, %79 : vector<16x128xf32>
    %81 = math.absf %80 : vector<16x128xf32>
    %cst_28 = arith.constant 1.000000e+00 : f32
    %82 = vector.broadcast %cst_28 : f32 to vector<16x128xf32>
    %83 = arith.subf %82, %81 : vector<16x128xf32>
    %cst_29 = arith.constant 0.000000e+00 : f32
    %84 = vector.broadcast %cst_29 : f32 to vector<16x128xf32>
    %85 = arith.maximumf %83, %84 : vector<16x128xf32>
    %cst_30 = arith.constant 3.000000e+00 : f32
    %86 = vector.broadcast %cst_30 : f32 to vector<16x128xf32>
    %87 = arith.subf %62, %86 : vector<16x128xf32>
    %88 = math.absf %87 : vector<16x128xf32>
    %cst_31 = arith.constant 1.000000e+00 : f32
    %89 = vector.broadcast %cst_31 : f32 to vector<16x128xf32>
    %90 = arith.subf %89, %88 : vector<16x128xf32>
    %cst_32 = arith.constant 0.000000e+00 : f32
    %91 = vector.broadcast %cst_32 : f32 to vector<16x128xf32>
    %92 = arith.maximumf %90, %91 : vector<16x128xf32>
    %cst_33 = arith.constant 0.000000e+00 : f32
    %93 = vector.broadcast %cst_33 : f32 to vector<16x128xf32>
    %94 = arith.subf %64, %93 : vector<16x128xf32>
    %95 = math.absf %94 : vector<16x128xf32>
    %cst_34 = arith.constant 1.000000e+00 : f32
    %96 = vector.broadcast %cst_34 : f32 to vector<16x128xf32>
    %97 = arith.subf %96, %95 : vector<16x128xf32>
    %cst_35 = arith.constant 0.000000e+00 : f32
    %98 = vector.broadcast %cst_35 : f32 to vector<16x128xf32>
    %99 = arith.maximumf %97, %98 : vector<16x128xf32>
    %c0_36 = arith.constant 0 : index
    %100 = memref.load %arg3[%c0_36] : memref<16xf32, #tpu.memory_space<smem>>
    %101 = vector.broadcast %100 : f32 to vector<16x128xf32>
    %102 = arith.mulf %71, %101 : vector<16x128xf32>
    %c1_37 = arith.constant 1 : index
    %103 = memref.load %arg3[%c1_37] : memref<16xf32, #tpu.memory_space<smem>>
    %104 = vector.broadcast %103 : f32 to vector<16x128xf32>
    %105 = arith.mulf %78, %104 : vector<16x128xf32>
    %106 = arith.addf %102, %105 : vector<16x128xf32>
    %c2_38 = arith.constant 2 : index
    %107 = memref.load %arg3[%c2_38] : memref<16xf32, #tpu.memory_space<smem>>
    %108 = vector.broadcast %107 : f32 to vector<16x128xf32>
    %109 = arith.mulf %85, %108 : vector<16x128xf32>
    %110 = arith.addf %106, %109 : vector<16x128xf32>
    %c3_39 = arith.constant 3 : index
    %111 = memref.load %arg3[%c3_39] : memref<16xf32, #tpu.memory_space<smem>>
    %112 = vector.broadcast %111 : f32 to vector<16x128xf32>
    %113 = arith.mulf %92, %112 : vector<16x128xf32>
    %114 = arith.addf %110, %113 : vector<16x128xf32>
    %115 = arith.mulf %99, %114 : vector<16x128xf32>
    %116 = arith.addf %60, %115 : vector<16x128xf32>
    %cst_40 = arith.constant 1.000000e+00 : f32
    %117 = vector.broadcast %cst_40 : f32 to vector<16x128xf32>
    %118 = arith.subf %64, %117 : vector<16x128xf32>
    %119 = math.absf %118 : vector<16x128xf32>
    %cst_41 = arith.constant 1.000000e+00 : f32
    %120 = vector.broadcast %cst_41 : f32 to vector<16x128xf32>
    %121 = arith.subf %120, %119 : vector<16x128xf32>
    %cst_42 = arith.constant 0.000000e+00 : f32
    %122 = vector.broadcast %cst_42 : f32 to vector<16x128xf32>
    %123 = arith.maximumf %121, %122 : vector<16x128xf32>
    %c4 = arith.constant 4 : index
    %124 = memref.load %arg3[%c4] : memref<16xf32, #tpu.memory_space<smem>>
    %125 = vector.broadcast %124 : f32 to vector<16x128xf32>
    %126 = arith.mulf %71, %125 : vector<16x128xf32>
    %c5 = arith.constant 5 : index
    %127 = memref.load %arg3[%c5] : memref<16xf32, #tpu.memory_space<smem>>
    %128 = vector.broadcast %127 : f32 to vector<16x128xf32>
    %129 = arith.mulf %78, %128 : vector<16x128xf32>
    %130 = arith.addf %126, %129 : vector<16x128xf32>
    %c6 = arith.constant 6 : index
    %131 = memref.load %arg3[%c6] : memref<16xf32, #tpu.memory_space<smem>>
    %132 = vector.broadcast %131 : f32 to vector<16x128xf32>
    %133 = arith.mulf %85, %132 : vector<16x128xf32>
    %134 = arith.addf %130, %133 : vector<16x128xf32>
    %c7 = arith.constant 7 : index
    %135 = memref.load %arg3[%c7] : memref<16xf32, #tpu.memory_space<smem>>
    %136 = vector.broadcast %135 : f32 to vector<16x128xf32>
    %137 = arith.mulf %92, %136 : vector<16x128xf32>
    %138 = arith.addf %134, %137 : vector<16x128xf32>
    %139 = arith.mulf %123, %138 : vector<16x128xf32>
    %140 = arith.addf %116, %139 : vector<16x128xf32>
    %cst_43 = arith.constant 2.000000e+00 : f32
    %141 = vector.broadcast %cst_43 : f32 to vector<16x128xf32>
    %142 = arith.subf %64, %141 : vector<16x128xf32>
    %143 = math.absf %142 : vector<16x128xf32>
    %cst_44 = arith.constant 1.000000e+00 : f32
    %144 = vector.broadcast %cst_44 : f32 to vector<16x128xf32>
    %145 = arith.subf %144, %143 : vector<16x128xf32>
    %cst_45 = arith.constant 0.000000e+00 : f32
    %146 = vector.broadcast %cst_45 : f32 to vector<16x128xf32>
    %147 = arith.maximumf %145, %146 : vector<16x128xf32>
    %c8 = arith.constant 8 : index
    %148 = memref.load %arg3[%c8] : memref<16xf32, #tpu.memory_space<smem>>
    %149 = vector.broadcast %148 : f32 to vector<16x128xf32>
    %150 = arith.mulf %71, %149 : vector<16x128xf32>
    %c9 = arith.constant 9 : index
    %151 = memref.load %arg3[%c9] : memref<16xf32, #tpu.memory_space<smem>>
    %152 = vector.broadcast %151 : f32 to vector<16x128xf32>
    %153 = arith.mulf %78, %152 : vector<16x128xf32>
    %154 = arith.addf %150, %153 : vector<16x128xf32>
    %c10 = arith.constant 10 : index
    %155 = memref.load %arg3[%c10] : memref<16xf32, #tpu.memory_space<smem>>
    %156 = vector.broadcast %155 : f32 to vector<16x128xf32>
    %157 = arith.mulf %85, %156 : vector<16x128xf32>
    %158 = arith.addf %154, %157 : vector<16x128xf32>
    %c11 = arith.constant 11 : index
    %159 = memref.load %arg3[%c11] : memref<16xf32, #tpu.memory_space<smem>>
    %160 = vector.broadcast %159 : f32 to vector<16x128xf32>
    %161 = arith.mulf %92, %160 : vector<16x128xf32>
    %162 = arith.addf %158, %161 : vector<16x128xf32>
    %163 = arith.mulf %147, %162 : vector<16x128xf32>
    %164 = arith.addf %140, %163 : vector<16x128xf32>
    %cst_46 = arith.constant 3.000000e+00 : f32
    %165 = vector.broadcast %cst_46 : f32 to vector<16x128xf32>
    %166 = arith.subf %64, %165 : vector<16x128xf32>
    %167 = math.absf %166 : vector<16x128xf32>
    %cst_47 = arith.constant 1.000000e+00 : f32
    %168 = vector.broadcast %cst_47 : f32 to vector<16x128xf32>
    %169 = arith.subf %168, %167 : vector<16x128xf32>
    %cst_48 = arith.constant 0.000000e+00 : f32
    %170 = vector.broadcast %cst_48 : f32 to vector<16x128xf32>
    %171 = arith.maximumf %169, %170 : vector<16x128xf32>
    %c12 = arith.constant 12 : index
    %172 = memref.load %arg3[%c12] : memref<16xf32, #tpu.memory_space<smem>>
    %173 = vector.broadcast %172 : f32 to vector<16x128xf32>
    %174 = arith.mulf %71, %173 : vector<16x128xf32>
    %c13 = arith.constant 13 : index
    %175 = memref.load %arg3[%c13] : memref<16xf32, #tpu.memory_space<smem>>
    %176 = vector.broadcast %175 : f32 to vector<16x128xf32>
    %177 = arith.mulf %78, %176 : vector<16x128xf32>
    %178 = arith.addf %174, %177 : vector<16x128xf32>
    %c14 = arith.constant 14 : index
    %179 = memref.load %arg3[%c14] : memref<16xf32, #tpu.memory_space<smem>>
    %180 = vector.broadcast %179 : f32 to vector<16x128xf32>
    %181 = arith.mulf %85, %180 : vector<16x128xf32>
    %182 = arith.addf %178, %181 : vector<16x128xf32>
    %c15 = arith.constant 15 : index
    %183 = memref.load %arg3[%c15] : memref<16xf32, #tpu.memory_space<smem>>
    %184 = vector.broadcast %183 : f32 to vector<16x128xf32>
    %185 = arith.mulf %92, %184 : vector<16x128xf32>
    %186 = arith.addf %182, %185 : vector<16x128xf32>
    %187 = arith.mulf %171, %186 : vector<16x128xf32>
    %188 = arith.addf %164, %187 : vector<16x128xf32>
    %cst_49 = arith.constant 7.000000e+00 : f32
    %189 = vector.broadcast %cst_49 : f32 to vector<16x128xf32>
    %190 = arith.mulf %6, %189 : vector<16x128xf32>
    %cst_50 = arith.constant 7.000000e+00 : f32
    %191 = vector.broadcast %cst_50 : f32 to vector<16x128xf32>
    %192 = arith.mulf %9, %191 : vector<16x128xf32>
    %cst_51 = arith.constant 0.000000e+00 : f32
    %193 = vector.broadcast %cst_51 : f32 to vector<16x128xf32>
    %194 = arith.subf %190, %193 : vector<16x128xf32>
    %195 = math.absf %194 : vector<16x128xf32>
    %cst_52 = arith.constant 1.000000e+00 : f32
    %196 = vector.broadcast %cst_52 : f32 to vector<16x128xf32>
    %197 = arith.subf %196, %195 : vector<16x128xf32>
    %cst_53 = arith.constant 0.000000e+00 : f32
    %198 = vector.broadcast %cst_53 : f32 to vector<16x128xf32>
    %199 = arith.maximumf %197, %198 : vector<16x128xf32>
    %cst_54 = arith.constant 1.000000e+00 : f32
    %200 = vector.broadcast %cst_54 : f32 to vector<16x128xf32>
    %201 = arith.subf %190, %200 : vector<16x128xf32>
    %202 = math.absf %201 : vector<16x128xf32>
    %cst_55 = arith.constant 1.000000e+00 : f32
    %203 = vector.broadcast %cst_55 : f32 to vector<16x128xf32>
    %204 = arith.subf %203, %202 : vector<16x128xf32>
    %cst_56 = arith.constant 0.000000e+00 : f32
    %205 = vector.broadcast %cst_56 : f32 to vector<16x128xf32>
    %206 = arith.maximumf %204, %205 : vector<16x128xf32>
    %cst_57 = arith.constant 2.000000e+00 : f32
    %207 = vector.broadcast %cst_57 : f32 to vector<16x128xf32>
    %208 = arith.subf %190, %207 : vector<16x128xf32>
    %209 = math.absf %208 : vector<16x128xf32>
    %cst_58 = arith.constant 1.000000e+00 : f32
    %210 = vector.broadcast %cst_58 : f32 to vector<16x128xf32>
    %211 = arith.subf %210, %209 : vector<16x128xf32>
    %cst_59 = arith.constant 0.000000e+00 : f32
    %212 = vector.broadcast %cst_59 : f32 to vector<16x128xf32>
    %213 = arith.maximumf %211, %212 : vector<16x128xf32>
    %cst_60 = arith.constant 3.000000e+00 : f32
    %214 = vector.broadcast %cst_60 : f32 to vector<16x128xf32>
    %215 = arith.subf %190, %214 : vector<16x128xf32>
    %216 = math.absf %215 : vector<16x128xf32>
    %cst_61 = arith.constant 1.000000e+00 : f32
    %217 = vector.broadcast %cst_61 : f32 to vector<16x128xf32>
    %218 = arith.subf %217, %216 : vector<16x128xf32>
    %cst_62 = arith.constant 0.000000e+00 : f32
    %219 = vector.broadcast %cst_62 : f32 to vector<16x128xf32>
    %220 = arith.maximumf %218, %219 : vector<16x128xf32>
    %cst_63 = arith.constant 4.000000e+00 : f32
    %221 = vector.broadcast %cst_63 : f32 to vector<16x128xf32>
    %222 = arith.subf %190, %221 : vector<16x128xf32>
    %223 = math.absf %222 : vector<16x128xf32>
    %cst_64 = arith.constant 1.000000e+00 : f32
    %224 = vector.broadcast %cst_64 : f32 to vector<16x128xf32>
    %225 = arith.subf %224, %223 : vector<16x128xf32>
    %cst_65 = arith.constant 0.000000e+00 : f32
    %226 = vector.broadcast %cst_65 : f32 to vector<16x128xf32>
    %227 = arith.maximumf %225, %226 : vector<16x128xf32>
    %cst_66 = arith.constant 5.000000e+00 : f32
    %228 = vector.broadcast %cst_66 : f32 to vector<16x128xf32>
    %229 = arith.subf %190, %228 : vector<16x128xf32>
    %230 = math.absf %229 : vector<16x128xf32>
    %cst_67 = arith.constant 1.000000e+00 : f32
    %231 = vector.broadcast %cst_67 : f32 to vector<16x128xf32>
    %232 = arith.subf %231, %230 : vector<16x128xf32>
    %cst_68 = arith.constant 0.000000e+00 : f32
    %233 = vector.broadcast %cst_68 : f32 to vector<16x128xf32>
    %234 = arith.maximumf %232, %233 : vector<16x128xf32>
    %cst_69 = arith.constant 6.000000e+00 : f32
    %235 = vector.broadcast %cst_69 : f32 to vector<16x128xf32>
    %236 = arith.subf %190, %235 : vector<16x128xf32>
    %237 = math.absf %236 : vector<16x128xf32>
    %cst_70 = arith.constant 1.000000e+00 : f32
    %238 = vector.broadcast %cst_70 : f32 to vector<16x128xf32>
    %239 = arith.subf %238, %237 : vector<16x128xf32>
    %cst_71 = arith.constant 0.000000e+00 : f32
    %240 = vector.broadcast %cst_71 : f32 to vector<16x128xf32>
    %241 = arith.maximumf %239, %240 : vector<16x128xf32>
    %cst_72 = arith.constant 7.000000e+00 : f32
    %242 = vector.broadcast %cst_72 : f32 to vector<16x128xf32>
    %243 = arith.subf %190, %242 : vector<16x128xf32>
    %244 = math.absf %243 : vector<16x128xf32>
    %cst_73 = arith.constant 1.000000e+00 : f32
    %245 = vector.broadcast %cst_73 : f32 to vector<16x128xf32>
    %246 = arith.subf %245, %244 : vector<16x128xf32>
    %cst_74 = arith.constant 0.000000e+00 : f32
    %247 = vector.broadcast %cst_74 : f32 to vector<16x128xf32>
    %248 = arith.maximumf %246, %247 : vector<16x128xf32>
    %cst_75 = arith.constant 0.000000e+00 : f32
    %249 = vector.broadcast %cst_75 : f32 to vector<16x128xf32>
    %250 = arith.subf %192, %249 : vector<16x128xf32>
    %251 = math.absf %250 : vector<16x128xf32>
    %cst_76 = arith.constant 1.000000e+00 : f32
    %252 = vector.broadcast %cst_76 : f32 to vector<16x128xf32>
    %253 = arith.subf %252, %251 : vector<16x128xf32>
    %cst_77 = arith.constant 0.000000e+00 : f32
    %254 = vector.broadcast %cst_77 : f32 to vector<16x128xf32>
    %255 = arith.maximumf %253, %254 : vector<16x128xf32>
    %c0_78 = arith.constant 0 : index
    %256 = memref.load %arg4[%c0_78] : memref<64xf32, #tpu.memory_space<smem>>
    %257 = vector.broadcast %256 : f32 to vector<16x128xf32>
    %258 = arith.mulf %199, %257 : vector<16x128xf32>
    %c4_79 = arith.constant 4 : index
    %259 = memref.load %arg4[%c4_79] : memref<64xf32, #tpu.memory_space<smem>>
    %260 = vector.broadcast %259 : f32 to vector<16x128xf32>
    %261 = arith.mulf %227, %260 : vector<16x128xf32>
    %c1_80 = arith.constant 1 : index
    %262 = memref.load %arg4[%c1_80] : memref<64xf32, #tpu.memory_space<smem>>
    %263 = vector.broadcast %262 : f32 to vector<16x128xf32>
    %264 = arith.mulf %206, %263 : vector<16x128xf32>
    %265 = arith.addf %258, %264 : vector<16x128xf32>
    %c2_81 = arith.constant 2 : index
    %266 = memref.load %arg4[%c2_81] : memref<64xf32, #tpu.memory_space<smem>>
    %267 = vector.broadcast %266 : f32 to vector<16x128xf32>
    %268 = arith.mulf %213, %267 : vector<16x128xf32>
    %269 = arith.addf %265, %268 : vector<16x128xf32>
    %c3_82 = arith.constant 3 : index
    %270 = memref.load %arg4[%c3_82] : memref<64xf32, #tpu.memory_space<smem>>
    %271 = vector.broadcast %270 : f32 to vector<16x128xf32>
    %272 = arith.mulf %220, %271 : vector<16x128xf32>
    %273 = arith.addf %269, %272 : vector<16x128xf32>
    %c5_83 = arith.constant 5 : index
    %274 = memref.load %arg4[%c5_83] : memref<64xf32, #tpu.memory_space<smem>>
    %275 = vector.broadcast %274 : f32 to vector<16x128xf32>
    %276 = arith.mulf %234, %275 : vector<16x128xf32>
    %277 = arith.addf %261, %276 : vector<16x128xf32>
    %c6_84 = arith.constant 6 : index
    %278 = memref.load %arg4[%c6_84] : memref<64xf32, #tpu.memory_space<smem>>
    %279 = vector.broadcast %278 : f32 to vector<16x128xf32>
    %280 = arith.mulf %241, %279 : vector<16x128xf32>
    %281 = arith.addf %277, %280 : vector<16x128xf32>
    %c7_85 = arith.constant 7 : index
    %282 = memref.load %arg4[%c7_85] : memref<64xf32, #tpu.memory_space<smem>>
    %283 = vector.broadcast %282 : f32 to vector<16x128xf32>
    %284 = arith.mulf %248, %283 : vector<16x128xf32>
    %285 = arith.addf %281, %284 : vector<16x128xf32>
    %286 = arith.addf %273, %285 : vector<16x128xf32>
    %287 = arith.mulf %255, %286 : vector<16x128xf32>
    %288 = arith.addf %188, %287 : vector<16x128xf32>
    %cst_86 = arith.constant 1.000000e+00 : f32
    %289 = vector.broadcast %cst_86 : f32 to vector<16x128xf32>
    %290 = arith.subf %192, %289 : vector<16x128xf32>
    %291 = math.absf %290 : vector<16x128xf32>
    %cst_87 = arith.constant 1.000000e+00 : f32
    %292 = vector.broadcast %cst_87 : f32 to vector<16x128xf32>
    %293 = arith.subf %292, %291 : vector<16x128xf32>
    %cst_88 = arith.constant 0.000000e+00 : f32
    %294 = vector.broadcast %cst_88 : f32 to vector<16x128xf32>
    %295 = arith.maximumf %293, %294 : vector<16x128xf32>
    %c8_89 = arith.constant 8 : index
    %296 = memref.load %arg4[%c8_89] : memref<64xf32, #tpu.memory_space<smem>>
    %297 = vector.broadcast %296 : f32 to vector<16x128xf32>
    %298 = arith.mulf %199, %297 : vector<16x128xf32>
    %c12_90 = arith.constant 12 : index
    %299 = memref.load %arg4[%c12_90] : memref<64xf32, #tpu.memory_space<smem>>
    %300 = vector.broadcast %299 : f32 to vector<16x128xf32>
    %301 = arith.mulf %227, %300 : vector<16x128xf32>
    %c9_91 = arith.constant 9 : index
    %302 = memref.load %arg4[%c9_91] : memref<64xf32, #tpu.memory_space<smem>>
    %303 = vector.broadcast %302 : f32 to vector<16x128xf32>
    %304 = arith.mulf %206, %303 : vector<16x128xf32>
    %305 = arith.addf %298, %304 : vector<16x128xf32>
    %c10_92 = arith.constant 10 : index
    %306 = memref.load %arg4[%c10_92] : memref<64xf32, #tpu.memory_space<smem>>
    %307 = vector.broadcast %306 : f32 to vector<16x128xf32>
    %308 = arith.mulf %213, %307 : vector<16x128xf32>
    %309 = arith.addf %305, %308 : vector<16x128xf32>
    %c11_93 = arith.constant 11 : index
    %310 = memref.load %arg4[%c11_93] : memref<64xf32, #tpu.memory_space<smem>>
    %311 = vector.broadcast %310 : f32 to vector<16x128xf32>
    %312 = arith.mulf %220, %311 : vector<16x128xf32>
    %313 = arith.addf %309, %312 : vector<16x128xf32>
    %c13_94 = arith.constant 13 : index
    %314 = memref.load %arg4[%c13_94] : memref<64xf32, #tpu.memory_space<smem>>
    %315 = vector.broadcast %314 : f32 to vector<16x128xf32>
    %316 = arith.mulf %234, %315 : vector<16x128xf32>
    %317 = arith.addf %301, %316 : vector<16x128xf32>
    %c14_95 = arith.constant 14 : index
    %318 = memref.load %arg4[%c14_95] : memref<64xf32, #tpu.memory_space<smem>>
    %319 = vector.broadcast %318 : f32 to vector<16x128xf32>
    %320 = arith.mulf %241, %319 : vector<16x128xf32>
    %321 = arith.addf %317, %320 : vector<16x128xf32>
    %c15_96 = arith.constant 15 : index
    %322 = memref.load %arg4[%c15_96] : memref<64xf32, #tpu.memory_space<smem>>
    %323 = vector.broadcast %322 : f32 to vector<16x128xf32>
    %324 = arith.mulf %248, %323 : vector<16x128xf32>
    %325 = arith.addf %321, %324 : vector<16x128xf32>
    %326 = arith.addf %313, %325 : vector<16x128xf32>
    %327 = arith.mulf %295, %326 : vector<16x128xf32>
    %328 = arith.addf %288, %327 : vector<16x128xf32>
    %cst_97 = arith.constant 2.000000e+00 : f32
    %329 = vector.broadcast %cst_97 : f32 to vector<16x128xf32>
    %330 = arith.subf %192, %329 : vector<16x128xf32>
    %331 = math.absf %330 : vector<16x128xf32>
    %cst_98 = arith.constant 1.000000e+00 : f32
    %332 = vector.broadcast %cst_98 : f32 to vector<16x128xf32>
    %333 = arith.subf %332, %331 : vector<16x128xf32>
    %cst_99 = arith.constant 0.000000e+00 : f32
    %334 = vector.broadcast %cst_99 : f32 to vector<16x128xf32>
    %335 = arith.maximumf %333, %334 : vector<16x128xf32>
    %c16 = arith.constant 16 : index
    %336 = memref.load %arg4[%c16] : memref<64xf32, #tpu.memory_space<smem>>
    %337 = vector.broadcast %336 : f32 to vector<16x128xf32>
    %338 = arith.mulf %199, %337 : vector<16x128xf32>
    %c20 = arith.constant 20 : index
    %339 = memref.load %arg4[%c20] : memref<64xf32, #tpu.memory_space<smem>>
    %340 = vector.broadcast %339 : f32 to vector<16x128xf32>
    %341 = arith.mulf %227, %340 : vector<16x128xf32>
    %c17 = arith.constant 17 : index
    %342 = memref.load %arg4[%c17] : memref<64xf32, #tpu.memory_space<smem>>
    %343 = vector.broadcast %342 : f32 to vector<16x128xf32>
    %344 = arith.mulf %206, %343 : vector<16x128xf32>
    %345 = arith.addf %338, %344 : vector<16x128xf32>
    %c18 = arith.constant 18 : index
    %346 = memref.load %arg4[%c18] : memref<64xf32, #tpu.memory_space<smem>>
    %347 = vector.broadcast %346 : f32 to vector<16x128xf32>
    %348 = arith.mulf %213, %347 : vector<16x128xf32>
    %349 = arith.addf %345, %348 : vector<16x128xf32>
    %c19 = arith.constant 19 : index
    %350 = memref.load %arg4[%c19] : memref<64xf32, #tpu.memory_space<smem>>
    %351 = vector.broadcast %350 : f32 to vector<16x128xf32>
    %352 = arith.mulf %220, %351 : vector<16x128xf32>
    %353 = arith.addf %349, %352 : vector<16x128xf32>
    %c21 = arith.constant 21 : index
    %354 = memref.load %arg4[%c21] : memref<64xf32, #tpu.memory_space<smem>>
    %355 = vector.broadcast %354 : f32 to vector<16x128xf32>
    %356 = arith.mulf %234, %355 : vector<16x128xf32>
    %357 = arith.addf %341, %356 : vector<16x128xf32>
    %c22 = arith.constant 22 : index
    %358 = memref.load %arg4[%c22] : memref<64xf32, #tpu.memory_space<smem>>
    %359 = vector.broadcast %358 : f32 to vector<16x128xf32>
    %360 = arith.mulf %241, %359 : vector<16x128xf32>
    %361 = arith.addf %357, %360 : vector<16x128xf32>
    %c23 = arith.constant 23 : index
    %362 = memref.load %arg4[%c23] : memref<64xf32, #tpu.memory_space<smem>>
    %363 = vector.broadcast %362 : f32 to vector<16x128xf32>
    %364 = arith.mulf %248, %363 : vector<16x128xf32>
    %365 = arith.addf %361, %364 : vector<16x128xf32>
    %366 = arith.addf %353, %365 : vector<16x128xf32>
    %367 = arith.mulf %335, %366 : vector<16x128xf32>
    %368 = arith.addf %328, %367 : vector<16x128xf32>
    %cst_100 = arith.constant 3.000000e+00 : f32
    %369 = vector.broadcast %cst_100 : f32 to vector<16x128xf32>
    %370 = arith.subf %192, %369 : vector<16x128xf32>
    %371 = math.absf %370 : vector<16x128xf32>
    %cst_101 = arith.constant 1.000000e+00 : f32
    %372 = vector.broadcast %cst_101 : f32 to vector<16x128xf32>
    %373 = arith.subf %372, %371 : vector<16x128xf32>
    %cst_102 = arith.constant 0.000000e+00 : f32
    %374 = vector.broadcast %cst_102 : f32 to vector<16x128xf32>
    %375 = arith.maximumf %373, %374 : vector<16x128xf32>
    %c24 = arith.constant 24 : index
    %376 = memref.load %arg4[%c24] : memref<64xf32, #tpu.memory_space<smem>>
    %377 = vector.broadcast %376 : f32 to vector<16x128xf32>
    %378 = arith.mulf %199, %377 : vector<16x128xf32>
    %c28 = arith.constant 28 : index
    %379 = memref.load %arg4[%c28] : memref<64xf32, #tpu.memory_space<smem>>
    %380 = vector.broadcast %379 : f32 to vector<16x128xf32>
    %381 = arith.mulf %227, %380 : vector<16x128xf32>
    %c25 = arith.constant 25 : index
    %382 = memref.load %arg4[%c25] : memref<64xf32, #tpu.memory_space<smem>>
    %383 = vector.broadcast %382 : f32 to vector<16x128xf32>
    %384 = arith.mulf %206, %383 : vector<16x128xf32>
    %385 = arith.addf %378, %384 : vector<16x128xf32>
    %c26 = arith.constant 26 : index
    %386 = memref.load %arg4[%c26] : memref<64xf32, #tpu.memory_space<smem>>
    %387 = vector.broadcast %386 : f32 to vector<16x128xf32>
    %388 = arith.mulf %213, %387 : vector<16x128xf32>
    %389 = arith.addf %385, %388 : vector<16x128xf32>
    %c27 = arith.constant 27 : index
    %390 = memref.load %arg4[%c27] : memref<64xf32, #tpu.memory_space<smem>>
    %391 = vector.broadcast %390 : f32 to vector<16x128xf32>
    %392 = arith.mulf %220, %391 : vector<16x128xf32>
    %393 = arith.addf %389, %392 : vector<16x128xf32>
    %c29 = arith.constant 29 : index
    %394 = memref.load %arg4[%c29] : memref<64xf32, #tpu.memory_space<smem>>
    %395 = vector.broadcast %394 : f32 to vector<16x128xf32>
    %396 = arith.mulf %234, %395 : vector<16x128xf32>
    %397 = arith.addf %381, %396 : vector<16x128xf32>
    %c30 = arith.constant 30 : index
    %398 = memref.load %arg4[%c30] : memref<64xf32, #tpu.memory_space<smem>>
    %399 = vector.broadcast %398 : f32 to vector<16x128xf32>
    %400 = arith.mulf %241, %399 : vector<16x128xf32>
    %401 = arith.addf %397, %400 : vector<16x128xf32>
    %c31 = arith.constant 31 : index
    %402 = memref.load %arg4[%c31] : memref<64xf32, #tpu.memory_space<smem>>
    %403 = vector.broadcast %402 : f32 to vector<16x128xf32>
    %404 = arith.mulf %248, %403 : vector<16x128xf32>
    %405 = arith.addf %401, %404 : vector<16x128xf32>
    %406 = arith.addf %393, %405 : vector<16x128xf32>
    %407 = arith.mulf %375, %406 : vector<16x128xf32>
    %408 = arith.addf %368, %407 : vector<16x128xf32>
    %cst_103 = arith.constant 4.000000e+00 : f32
    %409 = vector.broadcast %cst_103 : f32 to vector<16x128xf32>
    %410 = arith.subf %192, %409 : vector<16x128xf32>
    %411 = math.absf %410 : vector<16x128xf32>
    %cst_104 = arith.constant 1.000000e+00 : f32
    %412 = vector.broadcast %cst_104 : f32 to vector<16x128xf32>
    %413 = arith.subf %412, %411 : vector<16x128xf32>
    %cst_105 = arith.constant 0.000000e+00 : f32
    %414 = vector.broadcast %cst_105 : f32 to vector<16x128xf32>
    %415 = arith.maximumf %413, %414 : vector<16x128xf32>
    %c32 = arith.constant 32 : index
    %416 = memref.load %arg4[%c32] : memref<64xf32, #tpu.memory_space<smem>>
    %417 = vector.broadcast %416 : f32 to vector<16x128xf32>
    %418 = arith.mulf %199, %417 : vector<16x128xf32>
    %c36 = arith.constant 36 : index
    %419 = memref.load %arg4[%c36] : memref<64xf32, #tpu.memory_space<smem>>
    %420 = vector.broadcast %419 : f32 to vector<16x128xf32>
    %421 = arith.mulf %227, %420 : vector<16x128xf32>
    %c33 = arith.constant 33 : index
    %422 = memref.load %arg4[%c33] : memref<64xf32, #tpu.memory_space<smem>>
    %423 = vector.broadcast %422 : f32 to vector<16x128xf32>
    %424 = arith.mulf %206, %423 : vector<16x128xf32>
    %425 = arith.addf %418, %424 : vector<16x128xf32>
    %c34 = arith.constant 34 : index
    %426 = memref.load %arg4[%c34] : memref<64xf32, #tpu.memory_space<smem>>
    %427 = vector.broadcast %426 : f32 to vector<16x128xf32>
    %428 = arith.mulf %213, %427 : vector<16x128xf32>
    %429 = arith.addf %425, %428 : vector<16x128xf32>
    %c35 = arith.constant 35 : index
    %430 = memref.load %arg4[%c35] : memref<64xf32, #tpu.memory_space<smem>>
    %431 = vector.broadcast %430 : f32 to vector<16x128xf32>
    %432 = arith.mulf %220, %431 : vector<16x128xf32>
    %433 = arith.addf %429, %432 : vector<16x128xf32>
    %c37 = arith.constant 37 : index
    %434 = memref.load %arg4[%c37] : memref<64xf32, #tpu.memory_space<smem>>
    %435 = vector.broadcast %434 : f32 to vector<16x128xf32>
    %436 = arith.mulf %234, %435 : vector<16x128xf32>
    %437 = arith.addf %421, %436 : vector<16x128xf32>
    %c38 = arith.constant 38 : index
    %438 = memref.load %arg4[%c38] : memref<64xf32, #tpu.memory_space<smem>>
    %439 = vector.broadcast %438 : f32 to vector<16x128xf32>
    %440 = arith.mulf %241, %439 : vector<16x128xf32>
    %441 = arith.addf %437, %440 : vector<16x128xf32>
    %c39 = arith.constant 39 : index
    %442 = memref.load %arg4[%c39] : memref<64xf32, #tpu.memory_space<smem>>
    %443 = vector.broadcast %442 : f32 to vector<16x128xf32>
    %444 = arith.mulf %248, %443 : vector<16x128xf32>
    %445 = arith.addf %441, %444 : vector<16x128xf32>
    %446 = arith.addf %433, %445 : vector<16x128xf32>
    %447 = arith.mulf %415, %446 : vector<16x128xf32>
    %448 = arith.addf %408, %447 : vector<16x128xf32>
    %cst_106 = arith.constant 5.000000e+00 : f32
    %449 = vector.broadcast %cst_106 : f32 to vector<16x128xf32>
    %450 = arith.subf %192, %449 : vector<16x128xf32>
    %451 = math.absf %450 : vector<16x128xf32>
    %cst_107 = arith.constant 1.000000e+00 : f32
    %452 = vector.broadcast %cst_107 : f32 to vector<16x128xf32>
    %453 = arith.subf %452, %451 : vector<16x128xf32>
    %cst_108 = arith.constant 0.000000e+00 : f32
    %454 = vector.broadcast %cst_108 : f32 to vector<16x128xf32>
    %455 = arith.maximumf %453, %454 : vector<16x128xf32>
    %c40 = arith.constant 40 : index
    %456 = memref.load %arg4[%c40] : memref<64xf32, #tpu.memory_space<smem>>
    %457 = vector.broadcast %456 : f32 to vector<16x128xf32>
    %458 = arith.mulf %199, %457 : vector<16x128xf32>
    %c44 = arith.constant 44 : index
    %459 = memref.load %arg4[%c44] : memref<64xf32, #tpu.memory_space<smem>>
    %460 = vector.broadcast %459 : f32 to vector<16x128xf32>
    %461 = arith.mulf %227, %460 : vector<16x128xf32>
    %c41 = arith.constant 41 : index
    %462 = memref.load %arg4[%c41] : memref<64xf32, #tpu.memory_space<smem>>
    %463 = vector.broadcast %462 : f32 to vector<16x128xf32>
    %464 = arith.mulf %206, %463 : vector<16x128xf32>
    %465 = arith.addf %458, %464 : vector<16x128xf32>
    %c42 = arith.constant 42 : index
    %466 = memref.load %arg4[%c42] : memref<64xf32, #tpu.memory_space<smem>>
    %467 = vector.broadcast %466 : f32 to vector<16x128xf32>
    %468 = arith.mulf %213, %467 : vector<16x128xf32>
    %469 = arith.addf %465, %468 : vector<16x128xf32>
    %c43 = arith.constant 43 : index
    %470 = memref.load %arg4[%c43] : memref<64xf32, #tpu.memory_space<smem>>
    %471 = vector.broadcast %470 : f32 to vector<16x128xf32>
    %472 = arith.mulf %220, %471 : vector<16x128xf32>
    %473 = arith.addf %469, %472 : vector<16x128xf32>
    %c45 = arith.constant 45 : index
    %474 = memref.load %arg4[%c45] : memref<64xf32, #tpu.memory_space<smem>>
    %475 = vector.broadcast %474 : f32 to vector<16x128xf32>
    %476 = arith.mulf %234, %475 : vector<16x128xf32>
    %477 = arith.addf %461, %476 : vector<16x128xf32>
    %c46 = arith.constant 46 : index
    %478 = memref.load %arg4[%c46] : memref<64xf32, #tpu.memory_space<smem>>
    %479 = vector.broadcast %478 : f32 to vector<16x128xf32>
    %480 = arith.mulf %241, %479 : vector<16x128xf32>
    %481 = arith.addf %477, %480 : vector<16x128xf32>
    %c47 = arith.constant 47 : index
    %482 = memref.load %arg4[%c47] : memref<64xf32, #tpu.memory_space<smem>>
    %483 = vector.broadcast %482 : f32 to vector<16x128xf32>
    %484 = arith.mulf %248, %483 : vector<16x128xf32>
    %485 = arith.addf %481, %484 : vector<16x128xf32>
    %486 = arith.addf %473, %485 : vector<16x128xf32>
    %487 = arith.mulf %455, %486 : vector<16x128xf32>
    %488 = arith.addf %448, %487 : vector<16x128xf32>
    %cst_109 = arith.constant 6.000000e+00 : f32
    %489 = vector.broadcast %cst_109 : f32 to vector<16x128xf32>
    %490 = arith.subf %192, %489 : vector<16x128xf32>
    %491 = math.absf %490 : vector<16x128xf32>
    %cst_110 = arith.constant 1.000000e+00 : f32
    %492 = vector.broadcast %cst_110 : f32 to vector<16x128xf32>
    %493 = arith.subf %492, %491 : vector<16x128xf32>
    %cst_111 = arith.constant 0.000000e+00 : f32
    %494 = vector.broadcast %cst_111 : f32 to vector<16x128xf32>
    %495 = arith.maximumf %493, %494 : vector<16x128xf32>
    %c48 = arith.constant 48 : index
    %496 = memref.load %arg4[%c48] : memref<64xf32, #tpu.memory_space<smem>>
    %497 = vector.broadcast %496 : f32 to vector<16x128xf32>
    %498 = arith.mulf %199, %497 : vector<16x128xf32>
    %c52 = arith.constant 52 : index
    %499 = memref.load %arg4[%c52] : memref<64xf32, #tpu.memory_space<smem>>
    %500 = vector.broadcast %499 : f32 to vector<16x128xf32>
    %501 = arith.mulf %227, %500 : vector<16x128xf32>
    %c49 = arith.constant 49 : index
    %502 = memref.load %arg4[%c49] : memref<64xf32, #tpu.memory_space<smem>>
    %503 = vector.broadcast %502 : f32 to vector<16x128xf32>
    %504 = arith.mulf %206, %503 : vector<16x128xf32>
    %505 = arith.addf %498, %504 : vector<16x128xf32>
    %c50 = arith.constant 50 : index
    %506 = memref.load %arg4[%c50] : memref<64xf32, #tpu.memory_space<smem>>
    %507 = vector.broadcast %506 : f32 to vector<16x128xf32>
    %508 = arith.mulf %213, %507 : vector<16x128xf32>
    %509 = arith.addf %505, %508 : vector<16x128xf32>
    %c51 = arith.constant 51 : index
    %510 = memref.load %arg4[%c51] : memref<64xf32, #tpu.memory_space<smem>>
    %511 = vector.broadcast %510 : f32 to vector<16x128xf32>
    %512 = arith.mulf %220, %511 : vector<16x128xf32>
    %513 = arith.addf %509, %512 : vector<16x128xf32>
    %c53 = arith.constant 53 : index
    %514 = memref.load %arg4[%c53] : memref<64xf32, #tpu.memory_space<smem>>
    %515 = vector.broadcast %514 : f32 to vector<16x128xf32>
    %516 = arith.mulf %234, %515 : vector<16x128xf32>
    %517 = arith.addf %501, %516 : vector<16x128xf32>
    %c54 = arith.constant 54 : index
    %518 = memref.load %arg4[%c54] : memref<64xf32, #tpu.memory_space<smem>>
    %519 = vector.broadcast %518 : f32 to vector<16x128xf32>
    %520 = arith.mulf %241, %519 : vector<16x128xf32>
    %521 = arith.addf %517, %520 : vector<16x128xf32>
    %c55 = arith.constant 55 : index
    %522 = memref.load %arg4[%c55] : memref<64xf32, #tpu.memory_space<smem>>
    %523 = vector.broadcast %522 : f32 to vector<16x128xf32>
    %524 = arith.mulf %248, %523 : vector<16x128xf32>
    %525 = arith.addf %521, %524 : vector<16x128xf32>
    %526 = arith.addf %513, %525 : vector<16x128xf32>
    %527 = arith.mulf %495, %526 : vector<16x128xf32>
    %528 = arith.addf %488, %527 : vector<16x128xf32>
    %cst_112 = arith.constant 7.000000e+00 : f32
    %529 = vector.broadcast %cst_112 : f32 to vector<16x128xf32>
    %530 = arith.subf %192, %529 : vector<16x128xf32>
    %531 = math.absf %530 : vector<16x128xf32>
    %cst_113 = arith.constant 1.000000e+00 : f32
    %532 = vector.broadcast %cst_113 : f32 to vector<16x128xf32>
    %533 = arith.subf %532, %531 : vector<16x128xf32>
    %cst_114 = arith.constant 0.000000e+00 : f32
    %534 = vector.broadcast %cst_114 : f32 to vector<16x128xf32>
    %535 = arith.maximumf %533, %534 : vector<16x128xf32>
    %c56 = arith.constant 56 : index
    %536 = memref.load %arg4[%c56] : memref<64xf32, #tpu.memory_space<smem>>
    %537 = vector.broadcast %536 : f32 to vector<16x128xf32>
    %538 = arith.mulf %199, %537 : vector<16x128xf32>
    %c60 = arith.constant 60 : index
    %539 = memref.load %arg4[%c60] : memref<64xf32, #tpu.memory_space<smem>>
    %540 = vector.broadcast %539 : f32 to vector<16x128xf32>
    %541 = arith.mulf %227, %540 : vector<16x128xf32>
    %c57 = arith.constant 57 : index
    %542 = memref.load %arg4[%c57] : memref<64xf32, #tpu.memory_space<smem>>
    %543 = vector.broadcast %542 : f32 to vector<16x128xf32>
    %544 = arith.mulf %206, %543 : vector<16x128xf32>
    %545 = arith.addf %538, %544 : vector<16x128xf32>
    %c58 = arith.constant 58 : index
    %546 = memref.load %arg4[%c58] : memref<64xf32, #tpu.memory_space<smem>>
    %547 = vector.broadcast %546 : f32 to vector<16x128xf32>
    %548 = arith.mulf %213, %547 : vector<16x128xf32>
    %549 = arith.addf %545, %548 : vector<16x128xf32>
    %c59 = arith.constant 59 : index
    %550 = memref.load %arg4[%c59] : memref<64xf32, #tpu.memory_space<smem>>
    %551 = vector.broadcast %550 : f32 to vector<16x128xf32>
    %552 = arith.mulf %220, %551 : vector<16x128xf32>
    %553 = arith.addf %549, %552 : vector<16x128xf32>
    %c61 = arith.constant 61 : index
    %554 = memref.load %arg4[%c61] : memref<64xf32, #tpu.memory_space<smem>>
    %555 = vector.broadcast %554 : f32 to vector<16x128xf32>
    %556 = arith.mulf %234, %555 : vector<16x128xf32>
    %557 = arith.addf %541, %556 : vector<16x128xf32>
    %c62 = arith.constant 62 : index
    %558 = memref.load %arg4[%c62] : memref<64xf32, #tpu.memory_space<smem>>
    %559 = vector.broadcast %558 : f32 to vector<16x128xf32>
    %560 = arith.mulf %241, %559 : vector<16x128xf32>
    %561 = arith.addf %557, %560 : vector<16x128xf32>
    %c63 = arith.constant 63 : index
    %562 = memref.load %arg4[%c63] : memref<64xf32, #tpu.memory_space<smem>>
    %563 = vector.broadcast %562 : f32 to vector<16x128xf32>
    %564 = arith.mulf %248, %563 : vector<16x128xf32>
    %565 = arith.addf %561, %564 : vector<16x128xf32>
    %566 = arith.addf %553, %565 : vector<16x128xf32>
    %567 = arith.mulf %535, %566 : vector<16x128xf32>
    %568 = arith.addf %528, %567 : vector<16x128xf32>
    %cst_115 = arith.constant 1.500000e+01 : f32
    %569 = vector.broadcast %cst_115 : f32 to vector<16x128xf32>
    %570 = arith.mulf %6, %569 : vector<16x128xf32>
    %cst_116 = arith.constant 1.500000e+01 : f32
    %571 = vector.broadcast %cst_116 : f32 to vector<16x128xf32>
    %572 = arith.mulf %9, %571 : vector<16x128xf32>
    %cst_117 = arith.constant 0.000000e+00 : f32
    %573 = vector.broadcast %cst_117 : f32 to vector<16x128xf32>
    %574 = arith.subf %570, %573 : vector<16x128xf32>
    %575 = math.absf %574 : vector<16x128xf32>
    %cst_118 = arith.constant 1.000000e+00 : f32
    %576 = vector.broadcast %cst_118 : f32 to vector<16x128xf32>
    %577 = arith.subf %576, %575 : vector<16x128xf32>
    %cst_119 = arith.constant 0.000000e+00 : f32
    %578 = vector.broadcast %cst_119 : f32 to vector<16x128xf32>
    %579 = arith.maximumf %577, %578 : vector<16x128xf32>
    %cst_120 = arith.constant 1.000000e+00 : f32
    %580 = vector.broadcast %cst_120 : f32 to vector<16x128xf32>
    %581 = arith.subf %570, %580 : vector<16x128xf32>
    %582 = math.absf %581 : vector<16x128xf32>
    %cst_121 = arith.constant 1.000000e+00 : f32
    %583 = vector.broadcast %cst_121 : f32 to vector<16x128xf32>
    %584 = arith.subf %583, %582 : vector<16x128xf32>
    %cst_122 = arith.constant 0.000000e+00 : f32
    %585 = vector.broadcast %cst_122 : f32 to vector<16x128xf32>
    %586 = arith.maximumf %584, %585 : vector<16x128xf32>
    %cst_123 = arith.constant 2.000000e+00 : f32
    %587 = vector.broadcast %cst_123 : f32 to vector<16x128xf32>
    %588 = arith.subf %570, %587 : vector<16x128xf32>
    %589 = math.absf %588 : vector<16x128xf32>
    %cst_124 = arith.constant 1.000000e+00 : f32
    %590 = vector.broadcast %cst_124 : f32 to vector<16x128xf32>
    %591 = arith.subf %590, %589 : vector<16x128xf32>
    %cst_125 = arith.constant 0.000000e+00 : f32
    %592 = vector.broadcast %cst_125 : f32 to vector<16x128xf32>
    %593 = arith.maximumf %591, %592 : vector<16x128xf32>
    %cst_126 = arith.constant 3.000000e+00 : f32
    %594 = vector.broadcast %cst_126 : f32 to vector<16x128xf32>
    %595 = arith.subf %570, %594 : vector<16x128xf32>
    %596 = math.absf %595 : vector<16x128xf32>
    %cst_127 = arith.constant 1.000000e+00 : f32
    %597 = vector.broadcast %cst_127 : f32 to vector<16x128xf32>
    %598 = arith.subf %597, %596 : vector<16x128xf32>
    %cst_128 = arith.constant 0.000000e+00 : f32
    %599 = vector.broadcast %cst_128 : f32 to vector<16x128xf32>
    %600 = arith.maximumf %598, %599 : vector<16x128xf32>
    %cst_129 = arith.constant 4.000000e+00 : f32
    %601 = vector.broadcast %cst_129 : f32 to vector<16x128xf32>
    %602 = arith.subf %570, %601 : vector<16x128xf32>
    %603 = math.absf %602 : vector<16x128xf32>
    %cst_130 = arith.constant 1.000000e+00 : f32
    %604 = vector.broadcast %cst_130 : f32 to vector<16x128xf32>
    %605 = arith.subf %604, %603 : vector<16x128xf32>
    %cst_131 = arith.constant 0.000000e+00 : f32
    %606 = vector.broadcast %cst_131 : f32 to vector<16x128xf32>
    %607 = arith.maximumf %605, %606 : vector<16x128xf32>
    %cst_132 = arith.constant 5.000000e+00 : f32
    %608 = vector.broadcast %cst_132 : f32 to vector<16x128xf32>
    %609 = arith.subf %570, %608 : vector<16x128xf32>
    %610 = math.absf %609 : vector<16x128xf32>
    %cst_133 = arith.constant 1.000000e+00 : f32
    %611 = vector.broadcast %cst_133 : f32 to vector<16x128xf32>
    %612 = arith.subf %611, %610 : vector<16x128xf32>
    %cst_134 = arith.constant 0.000000e+00 : f32
    %613 = vector.broadcast %cst_134 : f32 to vector<16x128xf32>
    %614 = arith.maximumf %612, %613 : vector<16x128xf32>
    %cst_135 = arith.constant 6.000000e+00 : f32
    %615 = vector.broadcast %cst_135 : f32 to vector<16x128xf32>
    %616 = arith.subf %570, %615 : vector<16x128xf32>
    %617 = math.absf %616 : vector<16x128xf32>
    %cst_136 = arith.constant 1.000000e+00 : f32
    %618 = vector.broadcast %cst_136 : f32 to vector<16x128xf32>
    %619 = arith.subf %618, %617 : vector<16x128xf32>
    %cst_137 = arith.constant 0.000000e+00 : f32
    %620 = vector.broadcast %cst_137 : f32 to vector<16x128xf32>
    %621 = arith.maximumf %619, %620 : vector<16x128xf32>
    %cst_138 = arith.constant 7.000000e+00 : f32
    %622 = vector.broadcast %cst_138 : f32 to vector<16x128xf32>
    %623 = arith.subf %570, %622 : vector<16x128xf32>
    %624 = math.absf %623 : vector<16x128xf32>
    %cst_139 = arith.constant 1.000000e+00 : f32
    %625 = vector.broadcast %cst_139 : f32 to vector<16x128xf32>
    %626 = arith.subf %625, %624 : vector<16x128xf32>
    %cst_140 = arith.constant 0.000000e+00 : f32
    %627 = vector.broadcast %cst_140 : f32 to vector<16x128xf32>
    %628 = arith.maximumf %626, %627 : vector<16x128xf32>
    %cst_141 = arith.constant 8.000000e+00 : f32
    %629 = vector.broadcast %cst_141 : f32 to vector<16x128xf32>
    %630 = arith.subf %570, %629 : vector<16x128xf32>
    %631 = math.absf %630 : vector<16x128xf32>
    %cst_142 = arith.constant 1.000000e+00 : f32
    %632 = vector.broadcast %cst_142 : f32 to vector<16x128xf32>
    %633 = arith.subf %632, %631 : vector<16x128xf32>
    %cst_143 = arith.constant 0.000000e+00 : f32
    %634 = vector.broadcast %cst_143 : f32 to vector<16x128xf32>
    %635 = arith.maximumf %633, %634 : vector<16x128xf32>
    %cst_144 = arith.constant 9.000000e+00 : f32
    %636 = vector.broadcast %cst_144 : f32 to vector<16x128xf32>
    %637 = arith.subf %570, %636 : vector<16x128xf32>
    %638 = math.absf %637 : vector<16x128xf32>
    %cst_145 = arith.constant 1.000000e+00 : f32
    %639 = vector.broadcast %cst_145 : f32 to vector<16x128xf32>
    %640 = arith.subf %639, %638 : vector<16x128xf32>
    %cst_146 = arith.constant 0.000000e+00 : f32
    %641 = vector.broadcast %cst_146 : f32 to vector<16x128xf32>
    %642 = arith.maximumf %640, %641 : vector<16x128xf32>
    %cst_147 = arith.constant 1.000000e+01 : f32
    %643 = vector.broadcast %cst_147 : f32 to vector<16x128xf32>
    %644 = arith.subf %570, %643 : vector<16x128xf32>
    %645 = math.absf %644 : vector<16x128xf32>
    %cst_148 = arith.constant 1.000000e+00 : f32
    %646 = vector.broadcast %cst_148 : f32 to vector<16x128xf32>
    %647 = arith.subf %646, %645 : vector<16x128xf32>
    %cst_149 = arith.constant 0.000000e+00 : f32
    %648 = vector.broadcast %cst_149 : f32 to vector<16x128xf32>
    %649 = arith.maximumf %647, %648 : vector<16x128xf32>
    %cst_150 = arith.constant 1.100000e+01 : f32
    %650 = vector.broadcast %cst_150 : f32 to vector<16x128xf32>
    %651 = arith.subf %570, %650 : vector<16x128xf32>
    %652 = math.absf %651 : vector<16x128xf32>
    %cst_151 = arith.constant 1.000000e+00 : f32
    %653 = vector.broadcast %cst_151 : f32 to vector<16x128xf32>
    %654 = arith.subf %653, %652 : vector<16x128xf32>
    %cst_152 = arith.constant 0.000000e+00 : f32
    %655 = vector.broadcast %cst_152 : f32 to vector<16x128xf32>
    %656 = arith.maximumf %654, %655 : vector<16x128xf32>
    %cst_153 = arith.constant 1.200000e+01 : f32
    %657 = vector.broadcast %cst_153 : f32 to vector<16x128xf32>
    %658 = arith.subf %570, %657 : vector<16x128xf32>
    %659 = math.absf %658 : vector<16x128xf32>
    %cst_154 = arith.constant 1.000000e+00 : f32
    %660 = vector.broadcast %cst_154 : f32 to vector<16x128xf32>
    %661 = arith.subf %660, %659 : vector<16x128xf32>
    %cst_155 = arith.constant 0.000000e+00 : f32
    %662 = vector.broadcast %cst_155 : f32 to vector<16x128xf32>
    %663 = arith.maximumf %661, %662 : vector<16x128xf32>
    %cst_156 = arith.constant 1.300000e+01 : f32
    %664 = vector.broadcast %cst_156 : f32 to vector<16x128xf32>
    %665 = arith.subf %570, %664 : vector<16x128xf32>
    %666 = math.absf %665 : vector<16x128xf32>
    %cst_157 = arith.constant 1.000000e+00 : f32
    %667 = vector.broadcast %cst_157 : f32 to vector<16x128xf32>
    %668 = arith.subf %667, %666 : vector<16x128xf32>
    %cst_158 = arith.constant 0.000000e+00 : f32
    %669 = vector.broadcast %cst_158 : f32 to vector<16x128xf32>
    %670 = arith.maximumf %668, %669 : vector<16x128xf32>
    %cst_159 = arith.constant 1.400000e+01 : f32
    %671 = vector.broadcast %cst_159 : f32 to vector<16x128xf32>
    %672 = arith.subf %570, %671 : vector<16x128xf32>
    %673 = math.absf %672 : vector<16x128xf32>
    %cst_160 = arith.constant 1.000000e+00 : f32
    %674 = vector.broadcast %cst_160 : f32 to vector<16x128xf32>
    %675 = arith.subf %674, %673 : vector<16x128xf32>
    %cst_161 = arith.constant 0.000000e+00 : f32
    %676 = vector.broadcast %cst_161 : f32 to vector<16x128xf32>
    %677 = arith.maximumf %675, %676 : vector<16x128xf32>
    %cst_162 = arith.constant 1.500000e+01 : f32
    %678 = vector.broadcast %cst_162 : f32 to vector<16x128xf32>
    %679 = arith.subf %570, %678 : vector<16x128xf32>
    %680 = math.absf %679 : vector<16x128xf32>
    %cst_163 = arith.constant 1.000000e+00 : f32
    %681 = vector.broadcast %cst_163 : f32 to vector<16x128xf32>
    %682 = arith.subf %681, %680 : vector<16x128xf32>
    %cst_164 = arith.constant 0.000000e+00 : f32
    %683 = vector.broadcast %cst_164 : f32 to vector<16x128xf32>
    %684 = arith.maximumf %682, %683 : vector<16x128xf32>
    %cst_165 = arith.constant 0.000000e+00 : f32
    %685 = vector.broadcast %cst_165 : f32 to vector<16x128xf32>
    %686 = arith.subf %572, %685 : vector<16x128xf32>
    %687 = math.absf %686 : vector<16x128xf32>
    %cst_166 = arith.constant 1.000000e+00 : f32
    %688 = vector.broadcast %cst_166 : f32 to vector<16x128xf32>
    %689 = arith.subf %688, %687 : vector<16x128xf32>
    %cst_167 = arith.constant 0.000000e+00 : f32
    %690 = vector.broadcast %cst_167 : f32 to vector<16x128xf32>
    %691 = arith.maximumf %689, %690 : vector<16x128xf32>
    %c0_168 = arith.constant 0 : index
    %692 = memref.load %arg5[%c0_168] : memref<256xf32, #tpu.memory_space<smem>>
    %693 = vector.broadcast %692 : f32 to vector<16x128xf32>
    %694 = arith.mulf %579, %693 : vector<16x128xf32>
    %c8_169 = arith.constant 8 : index
    %695 = memref.load %arg5[%c8_169] : memref<256xf32, #tpu.memory_space<smem>>
    %696 = vector.broadcast %695 : f32 to vector<16x128xf32>
    %697 = arith.mulf %635, %696 : vector<16x128xf32>
    %c1_170 = arith.constant 1 : index
    %698 = memref.load %arg5[%c1_170] : memref<256xf32, #tpu.memory_space<smem>>
    %699 = vector.broadcast %698 : f32 to vector<16x128xf32>
    %700 = arith.mulf %586, %699 : vector<16x128xf32>
    %701 = arith.addf %694, %700 : vector<16x128xf32>
    %c2_171 = arith.constant 2 : index
    %702 = memref.load %arg5[%c2_171] : memref<256xf32, #tpu.memory_space<smem>>
    %703 = vector.broadcast %702 : f32 to vector<16x128xf32>
    %704 = arith.mulf %593, %703 : vector<16x128xf32>
    %705 = arith.addf %701, %704 : vector<16x128xf32>
    %c3_172 = arith.constant 3 : index
    %706 = memref.load %arg5[%c3_172] : memref<256xf32, #tpu.memory_space<smem>>
    %707 = vector.broadcast %706 : f32 to vector<16x128xf32>
    %708 = arith.mulf %600, %707 : vector<16x128xf32>
    %709 = arith.addf %705, %708 : vector<16x128xf32>
    %c4_173 = arith.constant 4 : index
    %710 = memref.load %arg5[%c4_173] : memref<256xf32, #tpu.memory_space<smem>>
    %711 = vector.broadcast %710 : f32 to vector<16x128xf32>
    %712 = arith.mulf %607, %711 : vector<16x128xf32>
    %713 = arith.addf %709, %712 : vector<16x128xf32>
    %c5_174 = arith.constant 5 : index
    %714 = memref.load %arg5[%c5_174] : memref<256xf32, #tpu.memory_space<smem>>
    %715 = vector.broadcast %714 : f32 to vector<16x128xf32>
    %716 = arith.mulf %614, %715 : vector<16x128xf32>
    %717 = arith.addf %713, %716 : vector<16x128xf32>
    %c6_175 = arith.constant 6 : index
    %718 = memref.load %arg5[%c6_175] : memref<256xf32, #tpu.memory_space<smem>>
    %719 = vector.broadcast %718 : f32 to vector<16x128xf32>
    %720 = arith.mulf %621, %719 : vector<16x128xf32>
    %721 = arith.addf %717, %720 : vector<16x128xf32>
    %c7_176 = arith.constant 7 : index
    %722 = memref.load %arg5[%c7_176] : memref<256xf32, #tpu.memory_space<smem>>
    %723 = vector.broadcast %722 : f32 to vector<16x128xf32>
    %724 = arith.mulf %628, %723 : vector<16x128xf32>
    %725 = arith.addf %721, %724 : vector<16x128xf32>
    %c9_177 = arith.constant 9 : index
    %726 = memref.load %arg5[%c9_177] : memref<256xf32, #tpu.memory_space<smem>>
    %727 = vector.broadcast %726 : f32 to vector<16x128xf32>
    %728 = arith.mulf %642, %727 : vector<16x128xf32>
    %729 = arith.addf %697, %728 : vector<16x128xf32>
    %c10_178 = arith.constant 10 : index
    %730 = memref.load %arg5[%c10_178] : memref<256xf32, #tpu.memory_space<smem>>
    %731 = vector.broadcast %730 : f32 to vector<16x128xf32>
    %732 = arith.mulf %649, %731 : vector<16x128xf32>
    %733 = arith.addf %729, %732 : vector<16x128xf32>
    %c11_179 = arith.constant 11 : index
    %734 = memref.load %arg5[%c11_179] : memref<256xf32, #tpu.memory_space<smem>>
    %735 = vector.broadcast %734 : f32 to vector<16x128xf32>
    %736 = arith.mulf %656, %735 : vector<16x128xf32>
    %737 = arith.addf %733, %736 : vector<16x128xf32>
    %c12_180 = arith.constant 12 : index
    %738 = memref.load %arg5[%c12_180] : memref<256xf32, #tpu.memory_space<smem>>
    %739 = vector.broadcast %738 : f32 to vector<16x128xf32>
    %740 = arith.mulf %663, %739 : vector<16x128xf32>
    %741 = arith.addf %737, %740 : vector<16x128xf32>
    %c13_181 = arith.constant 13 : index
    %742 = memref.load %arg5[%c13_181] : memref<256xf32, #tpu.memory_space<smem>>
    %743 = vector.broadcast %742 : f32 to vector<16x128xf32>
    %744 = arith.mulf %670, %743 : vector<16x128xf32>
    %745 = arith.addf %741, %744 : vector<16x128xf32>
    %c14_182 = arith.constant 14 : index
    %746 = memref.load %arg5[%c14_182] : memref<256xf32, #tpu.memory_space<smem>>
    %747 = vector.broadcast %746 : f32 to vector<16x128xf32>
    %748 = arith.mulf %677, %747 : vector<16x128xf32>
    %749 = arith.addf %745, %748 : vector<16x128xf32>
    %c15_183 = arith.constant 15 : index
    %750 = memref.load %arg5[%c15_183] : memref<256xf32, #tpu.memory_space<smem>>
    %751 = vector.broadcast %750 : f32 to vector<16x128xf32>
    %752 = arith.mulf %684, %751 : vector<16x128xf32>
    %753 = arith.addf %749, %752 : vector<16x128xf32>
    %754 = arith.addf %725, %753 : vector<16x128xf32>
    %755 = arith.mulf %691, %754 : vector<16x128xf32>
    %756 = arith.addf %568, %755 : vector<16x128xf32>
    %cst_184 = arith.constant 1.000000e+00 : f32
    %757 = vector.broadcast %cst_184 : f32 to vector<16x128xf32>
    %758 = arith.subf %572, %757 : vector<16x128xf32>
    %759 = math.absf %758 : vector<16x128xf32>
    %cst_185 = arith.constant 1.000000e+00 : f32
    %760 = vector.broadcast %cst_185 : f32 to vector<16x128xf32>
    %761 = arith.subf %760, %759 : vector<16x128xf32>
    %cst_186 = arith.constant 0.000000e+00 : f32
    %762 = vector.broadcast %cst_186 : f32 to vector<16x128xf32>
    %763 = arith.maximumf %761, %762 : vector<16x128xf32>
    %c16_187 = arith.constant 16 : index
    %764 = memref.load %arg5[%c16_187] : memref<256xf32, #tpu.memory_space<smem>>
    %765 = vector.broadcast %764 : f32 to vector<16x128xf32>
    %766 = arith.mulf %579, %765 : vector<16x128xf32>
    %c24_188 = arith.constant 24 : index
    %767 = memref.load %arg5[%c24_188] : memref<256xf32, #tpu.memory_space<smem>>
    %768 = vector.broadcast %767 : f32 to vector<16x128xf32>
    %769 = arith.mulf %635, %768 : vector<16x128xf32>
    %c17_189 = arith.constant 17 : index
    %770 = memref.load %arg5[%c17_189] : memref<256xf32, #tpu.memory_space<smem>>
    %771 = vector.broadcast %770 : f32 to vector<16x128xf32>
    %772 = arith.mulf %586, %771 : vector<16x128xf32>
    %773 = arith.addf %766, %772 : vector<16x128xf32>
    %c18_190 = arith.constant 18 : index
    %774 = memref.load %arg5[%c18_190] : memref<256xf32, #tpu.memory_space<smem>>
    %775 = vector.broadcast %774 : f32 to vector<16x128xf32>
    %776 = arith.mulf %593, %775 : vector<16x128xf32>
    %777 = arith.addf %773, %776 : vector<16x128xf32>
    %c19_191 = arith.constant 19 : index
    %778 = memref.load %arg5[%c19_191] : memref<256xf32, #tpu.memory_space<smem>>
    %779 = vector.broadcast %778 : f32 to vector<16x128xf32>
    %780 = arith.mulf %600, %779 : vector<16x128xf32>
    %781 = arith.addf %777, %780 : vector<16x128xf32>
    %c20_192 = arith.constant 20 : index
    %782 = memref.load %arg5[%c20_192] : memref<256xf32, #tpu.memory_space<smem>>
    %783 = vector.broadcast %782 : f32 to vector<16x128xf32>
    %784 = arith.mulf %607, %783 : vector<16x128xf32>
    %785 = arith.addf %781, %784 : vector<16x128xf32>
    %c21_193 = arith.constant 21 : index
    %786 = memref.load %arg5[%c21_193] : memref<256xf32, #tpu.memory_space<smem>>
    %787 = vector.broadcast %786 : f32 to vector<16x128xf32>
    %788 = arith.mulf %614, %787 : vector<16x128xf32>
    %789 = arith.addf %785, %788 : vector<16x128xf32>
    %c22_194 = arith.constant 22 : index
    %790 = memref.load %arg5[%c22_194] : memref<256xf32, #tpu.memory_space<smem>>
    %791 = vector.broadcast %790 : f32 to vector<16x128xf32>
    %792 = arith.mulf %621, %791 : vector<16x128xf32>
    %793 = arith.addf %789, %792 : vector<16x128xf32>
    %c23_195 = arith.constant 23 : index
    %794 = memref.load %arg5[%c23_195] : memref<256xf32, #tpu.memory_space<smem>>
    %795 = vector.broadcast %794 : f32 to vector<16x128xf32>
    %796 = arith.mulf %628, %795 : vector<16x128xf32>
    %797 = arith.addf %793, %796 : vector<16x128xf32>
    %c25_196 = arith.constant 25 : index
    %798 = memref.load %arg5[%c25_196] : memref<256xf32, #tpu.memory_space<smem>>
    %799 = vector.broadcast %798 : f32 to vector<16x128xf32>
    %800 = arith.mulf %642, %799 : vector<16x128xf32>
    %801 = arith.addf %769, %800 : vector<16x128xf32>
    %c26_197 = arith.constant 26 : index
    %802 = memref.load %arg5[%c26_197] : memref<256xf32, #tpu.memory_space<smem>>
    %803 = vector.broadcast %802 : f32 to vector<16x128xf32>
    %804 = arith.mulf %649, %803 : vector<16x128xf32>
    %805 = arith.addf %801, %804 : vector<16x128xf32>
    %c27_198 = arith.constant 27 : index
    %806 = memref.load %arg5[%c27_198] : memref<256xf32, #tpu.memory_space<smem>>
    %807 = vector.broadcast %806 : f32 to vector<16x128xf32>
    %808 = arith.mulf %656, %807 : vector<16x128xf32>
    %809 = arith.addf %805, %808 : vector<16x128xf32>
    %c28_199 = arith.constant 28 : index
    %810 = memref.load %arg5[%c28_199] : memref<256xf32, #tpu.memory_space<smem>>
    %811 = vector.broadcast %810 : f32 to vector<16x128xf32>
    %812 = arith.mulf %663, %811 : vector<16x128xf32>
    %813 = arith.addf %809, %812 : vector<16x128xf32>
    %c29_200 = arith.constant 29 : index
    %814 = memref.load %arg5[%c29_200] : memref<256xf32, #tpu.memory_space<smem>>
    %815 = vector.broadcast %814 : f32 to vector<16x128xf32>
    %816 = arith.mulf %670, %815 : vector<16x128xf32>
    %817 = arith.addf %813, %816 : vector<16x128xf32>
    %c30_201 = arith.constant 30 : index
    %818 = memref.load %arg5[%c30_201] : memref<256xf32, #tpu.memory_space<smem>>
    %819 = vector.broadcast %818 : f32 to vector<16x128xf32>
    %820 = arith.mulf %677, %819 : vector<16x128xf32>
    %821 = arith.addf %817, %820 : vector<16x128xf32>
    %c31_202 = arith.constant 31 : index
    %822 = memref.load %arg5[%c31_202] : memref<256xf32, #tpu.memory_space<smem>>
    %823 = vector.broadcast %822 : f32 to vector<16x128xf32>
    %824 = arith.mulf %684, %823 : vector<16x128xf32>
    %825 = arith.addf %821, %824 : vector<16x128xf32>
    %826 = arith.addf %797, %825 : vector<16x128xf32>
    %827 = arith.mulf %763, %826 : vector<16x128xf32>
    %828 = arith.addf %756, %827 : vector<16x128xf32>
    %cst_203 = arith.constant 2.000000e+00 : f32
    %829 = vector.broadcast %cst_203 : f32 to vector<16x128xf32>
    %830 = arith.subf %572, %829 : vector<16x128xf32>
    %831 = math.absf %830 : vector<16x128xf32>
    %cst_204 = arith.constant 1.000000e+00 : f32
    %832 = vector.broadcast %cst_204 : f32 to vector<16x128xf32>
    %833 = arith.subf %832, %831 : vector<16x128xf32>
    %cst_205 = arith.constant 0.000000e+00 : f32
    %834 = vector.broadcast %cst_205 : f32 to vector<16x128xf32>
    %835 = arith.maximumf %833, %834 : vector<16x128xf32>
    %c32_206 = arith.constant 32 : index
    %836 = memref.load %arg5[%c32_206] : memref<256xf32, #tpu.memory_space<smem>>
    %837 = vector.broadcast %836 : f32 to vector<16x128xf32>
    %838 = arith.mulf %579, %837 : vector<16x128xf32>
    %c40_207 = arith.constant 40 : index
    %839 = memref.load %arg5[%c40_207] : memref<256xf32, #tpu.memory_space<smem>>
    %840 = vector.broadcast %839 : f32 to vector<16x128xf32>
    %841 = arith.mulf %635, %840 : vector<16x128xf32>
    %c33_208 = arith.constant 33 : index
    %842 = memref.load %arg5[%c33_208] : memref<256xf32, #tpu.memory_space<smem>>
    %843 = vector.broadcast %842 : f32 to vector<16x128xf32>
    %844 = arith.mulf %586, %843 : vector<16x128xf32>
    %845 = arith.addf %838, %844 : vector<16x128xf32>
    %c34_209 = arith.constant 34 : index
    %846 = memref.load %arg5[%c34_209] : memref<256xf32, #tpu.memory_space<smem>>
    %847 = vector.broadcast %846 : f32 to vector<16x128xf32>
    %848 = arith.mulf %593, %847 : vector<16x128xf32>
    %849 = arith.addf %845, %848 : vector<16x128xf32>
    %c35_210 = arith.constant 35 : index
    %850 = memref.load %arg5[%c35_210] : memref<256xf32, #tpu.memory_space<smem>>
    %851 = vector.broadcast %850 : f32 to vector<16x128xf32>
    %852 = arith.mulf %600, %851 : vector<16x128xf32>
    %853 = arith.addf %849, %852 : vector<16x128xf32>
    %c36_211 = arith.constant 36 : index
    %854 = memref.load %arg5[%c36_211] : memref<256xf32, #tpu.memory_space<smem>>
    %855 = vector.broadcast %854 : f32 to vector<16x128xf32>
    %856 = arith.mulf %607, %855 : vector<16x128xf32>
    %857 = arith.addf %853, %856 : vector<16x128xf32>
    %c37_212 = arith.constant 37 : index
    %858 = memref.load %arg5[%c37_212] : memref<256xf32, #tpu.memory_space<smem>>
    %859 = vector.broadcast %858 : f32 to vector<16x128xf32>
    %860 = arith.mulf %614, %859 : vector<16x128xf32>
    %861 = arith.addf %857, %860 : vector<16x128xf32>
    %c38_213 = arith.constant 38 : index
    %862 = memref.load %arg5[%c38_213] : memref<256xf32, #tpu.memory_space<smem>>
    %863 = vector.broadcast %862 : f32 to vector<16x128xf32>
    %864 = arith.mulf %621, %863 : vector<16x128xf32>
    %865 = arith.addf %861, %864 : vector<16x128xf32>
    %c39_214 = arith.constant 39 : index
    %866 = memref.load %arg5[%c39_214] : memref<256xf32, #tpu.memory_space<smem>>
    %867 = vector.broadcast %866 : f32 to vector<16x128xf32>
    %868 = arith.mulf %628, %867 : vector<16x128xf32>
    %869 = arith.addf %865, %868 : vector<16x128xf32>
    %c41_215 = arith.constant 41 : index
    %870 = memref.load %arg5[%c41_215] : memref<256xf32, #tpu.memory_space<smem>>
    %871 = vector.broadcast %870 : f32 to vector<16x128xf32>
    %872 = arith.mulf %642, %871 : vector<16x128xf32>
    %873 = arith.addf %841, %872 : vector<16x128xf32>
    %c42_216 = arith.constant 42 : index
    %874 = memref.load %arg5[%c42_216] : memref<256xf32, #tpu.memory_space<smem>>
    %875 = vector.broadcast %874 : f32 to vector<16x128xf32>
    %876 = arith.mulf %649, %875 : vector<16x128xf32>
    %877 = arith.addf %873, %876 : vector<16x128xf32>
    %c43_217 = arith.constant 43 : index
    %878 = memref.load %arg5[%c43_217] : memref<256xf32, #tpu.memory_space<smem>>
    %879 = vector.broadcast %878 : f32 to vector<16x128xf32>
    %880 = arith.mulf %656, %879 : vector<16x128xf32>
    %881 = arith.addf %877, %880 : vector<16x128xf32>
    %c44_218 = arith.constant 44 : index
    %882 = memref.load %arg5[%c44_218] : memref<256xf32, #tpu.memory_space<smem>>
    %883 = vector.broadcast %882 : f32 to vector<16x128xf32>
    %884 = arith.mulf %663, %883 : vector<16x128xf32>
    %885 = arith.addf %881, %884 : vector<16x128xf32>
    %c45_219 = arith.constant 45 : index
    %886 = memref.load %arg5[%c45_219] : memref<256xf32, #tpu.memory_space<smem>>
    %887 = vector.broadcast %886 : f32 to vector<16x128xf32>
    %888 = arith.mulf %670, %887 : vector<16x128xf32>
    %889 = arith.addf %885, %888 : vector<16x128xf32>
    %c46_220 = arith.constant 46 : index
    %890 = memref.load %arg5[%c46_220] : memref<256xf32, #tpu.memory_space<smem>>
    %891 = vector.broadcast %890 : f32 to vector<16x128xf32>
    %892 = arith.mulf %677, %891 : vector<16x128xf32>
    %893 = arith.addf %889, %892 : vector<16x128xf32>
    %c47_221 = arith.constant 47 : index
    %894 = memref.load %arg5[%c47_221] : memref<256xf32, #tpu.memory_space<smem>>
    %895 = vector.broadcast %894 : f32 to vector<16x128xf32>
    %896 = arith.mulf %684, %895 : vector<16x128xf32>
    %897 = arith.addf %893, %896 : vector<16x128xf32>
    %898 = arith.addf %869, %897 : vector<16x128xf32>
    %899 = arith.mulf %835, %898 : vector<16x128xf32>
    %900 = arith.addf %828, %899 : vector<16x128xf32>
    %cst_222 = arith.constant 3.000000e+00 : f32
    %901 = vector.broadcast %cst_222 : f32 to vector<16x128xf32>
    %902 = arith.subf %572, %901 : vector<16x128xf32>
    %903 = math.absf %902 : vector<16x128xf32>
    %cst_223 = arith.constant 1.000000e+00 : f32
    %904 = vector.broadcast %cst_223 : f32 to vector<16x128xf32>
    %905 = arith.subf %904, %903 : vector<16x128xf32>
    %cst_224 = arith.constant 0.000000e+00 : f32
    %906 = vector.broadcast %cst_224 : f32 to vector<16x128xf32>
    %907 = arith.maximumf %905, %906 : vector<16x128xf32>
    %c48_225 = arith.constant 48 : index
    %908 = memref.load %arg5[%c48_225] : memref<256xf32, #tpu.memory_space<smem>>
    %909 = vector.broadcast %908 : f32 to vector<16x128xf32>
    %910 = arith.mulf %579, %909 : vector<16x128xf32>
    %c56_226 = arith.constant 56 : index
    %911 = memref.load %arg5[%c56_226] : memref<256xf32, #tpu.memory_space<smem>>
    %912 = vector.broadcast %911 : f32 to vector<16x128xf32>
    %913 = arith.mulf %635, %912 : vector<16x128xf32>
    %c49_227 = arith.constant 49 : index
    %914 = memref.load %arg5[%c49_227] : memref<256xf32, #tpu.memory_space<smem>>
    %915 = vector.broadcast %914 : f32 to vector<16x128xf32>
    %916 = arith.mulf %586, %915 : vector<16x128xf32>
    %917 = arith.addf %910, %916 : vector<16x128xf32>
    %c50_228 = arith.constant 50 : index
    %918 = memref.load %arg5[%c50_228] : memref<256xf32, #tpu.memory_space<smem>>
    %919 = vector.broadcast %918 : f32 to vector<16x128xf32>
    %920 = arith.mulf %593, %919 : vector<16x128xf32>
    %921 = arith.addf %917, %920 : vector<16x128xf32>
    %c51_229 = arith.constant 51 : index
    %922 = memref.load %arg5[%c51_229] : memref<256xf32, #tpu.memory_space<smem>>
    %923 = vector.broadcast %922 : f32 to vector<16x128xf32>
    %924 = arith.mulf %600, %923 : vector<16x128xf32>
    %925 = arith.addf %921, %924 : vector<16x128xf32>
    %c52_230 = arith.constant 52 : index
    %926 = memref.load %arg5[%c52_230] : memref<256xf32, #tpu.memory_space<smem>>
    %927 = vector.broadcast %926 : f32 to vector<16x128xf32>
    %928 = arith.mulf %607, %927 : vector<16x128xf32>
    %929 = arith.addf %925, %928 : vector<16x128xf32>
    %c53_231 = arith.constant 53 : index
    %930 = memref.load %arg5[%c53_231] : memref<256xf32, #tpu.memory_space<smem>>
    %931 = vector.broadcast %930 : f32 to vector<16x128xf32>
    %932 = arith.mulf %614, %931 : vector<16x128xf32>
    %933 = arith.addf %929, %932 : vector<16x128xf32>
    %c54_232 = arith.constant 54 : index
    %934 = memref.load %arg5[%c54_232] : memref<256xf32, #tpu.memory_space<smem>>
    %935 = vector.broadcast %934 : f32 to vector<16x128xf32>
    %936 = arith.mulf %621, %935 : vector<16x128xf32>
    %937 = arith.addf %933, %936 : vector<16x128xf32>
    %c55_233 = arith.constant 55 : index
    %938 = memref.load %arg5[%c55_233] : memref<256xf32, #tpu.memory_space<smem>>
    %939 = vector.broadcast %938 : f32 to vector<16x128xf32>
    %940 = arith.mulf %628, %939 : vector<16x128xf32>
    %941 = arith.addf %937, %940 : vector<16x128xf32>
    %c57_234 = arith.constant 57 : index
    %942 = memref.load %arg5[%c57_234] : memref<256xf32, #tpu.memory_space<smem>>
    %943 = vector.broadcast %942 : f32 to vector<16x128xf32>
    %944 = arith.mulf %642, %943 : vector<16x128xf32>
    %945 = arith.addf %913, %944 : vector<16x128xf32>
    %c58_235 = arith.constant 58 : index
    %946 = memref.load %arg5[%c58_235] : memref<256xf32, #tpu.memory_space<smem>>
    %947 = vector.broadcast %946 : f32 to vector<16x128xf32>
    %948 = arith.mulf %649, %947 : vector<16x128xf32>
    %949 = arith.addf %945, %948 : vector<16x128xf32>
    %c59_236 = arith.constant 59 : index
    %950 = memref.load %arg5[%c59_236] : memref<256xf32, #tpu.memory_space<smem>>
    %951 = vector.broadcast %950 : f32 to vector<16x128xf32>
    %952 = arith.mulf %656, %951 : vector<16x128xf32>
    %953 = arith.addf %949, %952 : vector<16x128xf32>
    %c60_237 = arith.constant 60 : index
    %954 = memref.load %arg5[%c60_237] : memref<256xf32, #tpu.memory_space<smem>>
    %955 = vector.broadcast %954 : f32 to vector<16x128xf32>
    %956 = arith.mulf %663, %955 : vector<16x128xf32>
    %957 = arith.addf %953, %956 : vector<16x128xf32>
    %c61_238 = arith.constant 61 : index
    %958 = memref.load %arg5[%c61_238] : memref<256xf32, #tpu.memory_space<smem>>
    %959 = vector.broadcast %958 : f32 to vector<16x128xf32>
    %960 = arith.mulf %670, %959 : vector<16x128xf32>
    %961 = arith.addf %957, %960 : vector<16x128xf32>
    %c62_239 = arith.constant 62 : index
    %962 = memref.load %arg5[%c62_239] : memref<256xf32, #tpu.memory_space<smem>>
    %963 = vector.broadcast %962 : f32 to vector<16x128xf32>
    %964 = arith.mulf %677, %963 : vector<16x128xf32>
    %965 = arith.addf %961, %964 : vector<16x128xf32>
    %c63_240 = arith.constant 63 : index
    %966 = memref.load %arg5[%c63_240] : memref<256xf32, #tpu.memory_space<smem>>
    %967 = vector.broadcast %966 : f32 to vector<16x128xf32>
    %968 = arith.mulf %684, %967 : vector<16x128xf32>
    %969 = arith.addf %965, %968 : vector<16x128xf32>
    %970 = arith.addf %941, %969 : vector<16x128xf32>
    %971 = arith.mulf %907, %970 : vector<16x128xf32>
    %972 = arith.addf %900, %971 : vector<16x128xf32>
    %cst_241 = arith.constant 4.000000e+00 : f32
    %973 = vector.broadcast %cst_241 : f32 to vector<16x128xf32>
    %974 = arith.subf %572, %973 : vector<16x128xf32>
    %975 = math.absf %974 : vector<16x128xf32>
    %cst_242 = arith.constant 1.000000e+00 : f32
    %976 = vector.broadcast %cst_242 : f32 to vector<16x128xf32>
    %977 = arith.subf %976, %975 : vector<16x128xf32>
    %cst_243 = arith.constant 0.000000e+00 : f32
    %978 = vector.broadcast %cst_243 : f32 to vector<16x128xf32>
    %979 = arith.maximumf %977, %978 : vector<16x128xf32>
    %c64 = arith.constant 64 : index
    %980 = memref.load %arg5[%c64] : memref<256xf32, #tpu.memory_space<smem>>
    %981 = vector.broadcast %980 : f32 to vector<16x128xf32>
    %982 = arith.mulf %579, %981 : vector<16x128xf32>
    %c72 = arith.constant 72 : index
    %983 = memref.load %arg5[%c72] : memref<256xf32, #tpu.memory_space<smem>>
    %984 = vector.broadcast %983 : f32 to vector<16x128xf32>
    %985 = arith.mulf %635, %984 : vector<16x128xf32>
    %c65 = arith.constant 65 : index
    %986 = memref.load %arg5[%c65] : memref<256xf32, #tpu.memory_space<smem>>
    %987 = vector.broadcast %986 : f32 to vector<16x128xf32>
    %988 = arith.mulf %586, %987 : vector<16x128xf32>
    %989 = arith.addf %982, %988 : vector<16x128xf32>
    %c66 = arith.constant 66 : index
    %990 = memref.load %arg5[%c66] : memref<256xf32, #tpu.memory_space<smem>>
    %991 = vector.broadcast %990 : f32 to vector<16x128xf32>
    %992 = arith.mulf %593, %991 : vector<16x128xf32>
    %993 = arith.addf %989, %992 : vector<16x128xf32>
    %c67 = arith.constant 67 : index
    %994 = memref.load %arg5[%c67] : memref<256xf32, #tpu.memory_space<smem>>
    %995 = vector.broadcast %994 : f32 to vector<16x128xf32>
    %996 = arith.mulf %600, %995 : vector<16x128xf32>
    %997 = arith.addf %993, %996 : vector<16x128xf32>
    %c68 = arith.constant 68 : index
    %998 = memref.load %arg5[%c68] : memref<256xf32, #tpu.memory_space<smem>>
    %999 = vector.broadcast %998 : f32 to vector<16x128xf32>
    %1000 = arith.mulf %607, %999 : vector<16x128xf32>
    %1001 = arith.addf %997, %1000 : vector<16x128xf32>
    %c69 = arith.constant 69 : index
    %1002 = memref.load %arg5[%c69] : memref<256xf32, #tpu.memory_space<smem>>
    %1003 = vector.broadcast %1002 : f32 to vector<16x128xf32>
    %1004 = arith.mulf %614, %1003 : vector<16x128xf32>
    %1005 = arith.addf %1001, %1004 : vector<16x128xf32>
    %c70 = arith.constant 70 : index
    %1006 = memref.load %arg5[%c70] : memref<256xf32, #tpu.memory_space<smem>>
    %1007 = vector.broadcast %1006 : f32 to vector<16x128xf32>
    %1008 = arith.mulf %621, %1007 : vector<16x128xf32>
    %1009 = arith.addf %1005, %1008 : vector<16x128xf32>
    %c71 = arith.constant 71 : index
    %1010 = memref.load %arg5[%c71] : memref<256xf32, #tpu.memory_space<smem>>
    %1011 = vector.broadcast %1010 : f32 to vector<16x128xf32>
    %1012 = arith.mulf %628, %1011 : vector<16x128xf32>
    %1013 = arith.addf %1009, %1012 : vector<16x128xf32>
    %c73 = arith.constant 73 : index
    %1014 = memref.load %arg5[%c73] : memref<256xf32, #tpu.memory_space<smem>>
    %1015 = vector.broadcast %1014 : f32 to vector<16x128xf32>
    %1016 = arith.mulf %642, %1015 : vector<16x128xf32>
    %1017 = arith.addf %985, %1016 : vector<16x128xf32>
    %c74 = arith.constant 74 : index
    %1018 = memref.load %arg5[%c74] : memref<256xf32, #tpu.memory_space<smem>>
    %1019 = vector.broadcast %1018 : f32 to vector<16x128xf32>
    %1020 = arith.mulf %649, %1019 : vector<16x128xf32>
    %1021 = arith.addf %1017, %1020 : vector<16x128xf32>
    %c75 = arith.constant 75 : index
    %1022 = memref.load %arg5[%c75] : memref<256xf32, #tpu.memory_space<smem>>
    %1023 = vector.broadcast %1022 : f32 to vector<16x128xf32>
    %1024 = arith.mulf %656, %1023 : vector<16x128xf32>
    %1025 = arith.addf %1021, %1024 : vector<16x128xf32>
    %c76 = arith.constant 76 : index
    %1026 = memref.load %arg5[%c76] : memref<256xf32, #tpu.memory_space<smem>>
    %1027 = vector.broadcast %1026 : f32 to vector<16x128xf32>
    %1028 = arith.mulf %663, %1027 : vector<16x128xf32>
    %1029 = arith.addf %1025, %1028 : vector<16x128xf32>
    %c77 = arith.constant 77 : index
    %1030 = memref.load %arg5[%c77] : memref<256xf32, #tpu.memory_space<smem>>
    %1031 = vector.broadcast %1030 : f32 to vector<16x128xf32>
    %1032 = arith.mulf %670, %1031 : vector<16x128xf32>
    %1033 = arith.addf %1029, %1032 : vector<16x128xf32>
    %c78 = arith.constant 78 : index
    %1034 = memref.load %arg5[%c78] : memref<256xf32, #tpu.memory_space<smem>>
    %1035 = vector.broadcast %1034 : f32 to vector<16x128xf32>
    %1036 = arith.mulf %677, %1035 : vector<16x128xf32>
    %1037 = arith.addf %1033, %1036 : vector<16x128xf32>
    %c79 = arith.constant 79 : index
    %1038 = memref.load %arg5[%c79] : memref<256xf32, #tpu.memory_space<smem>>
    %1039 = vector.broadcast %1038 : f32 to vector<16x128xf32>
    %1040 = arith.mulf %684, %1039 : vector<16x128xf32>
    %1041 = arith.addf %1037, %1040 : vector<16x128xf32>
    %1042 = arith.addf %1013, %1041 : vector<16x128xf32>
    %1043 = arith.mulf %979, %1042 : vector<16x128xf32>
    %1044 = arith.addf %972, %1043 : vector<16x128xf32>
    %cst_244 = arith.constant 5.000000e+00 : f32
    %1045 = vector.broadcast %cst_244 : f32 to vector<16x128xf32>
    %1046 = arith.subf %572, %1045 : vector<16x128xf32>
    %1047 = math.absf %1046 : vector<16x128xf32>
    %cst_245 = arith.constant 1.000000e+00 : f32
    %1048 = vector.broadcast %cst_245 : f32 to vector<16x128xf32>
    %1049 = arith.subf %1048, %1047 : vector<16x128xf32>
    %cst_246 = arith.constant 0.000000e+00 : f32
    %1050 = vector.broadcast %cst_246 : f32 to vector<16x128xf32>
    %1051 = arith.maximumf %1049, %1050 : vector<16x128xf32>
    %c80 = arith.constant 80 : index
    %1052 = memref.load %arg5[%c80] : memref<256xf32, #tpu.memory_space<smem>>
    %1053 = vector.broadcast %1052 : f32 to vector<16x128xf32>
    %1054 = arith.mulf %579, %1053 : vector<16x128xf32>
    %c88 = arith.constant 88 : index
    %1055 = memref.load %arg5[%c88] : memref<256xf32, #tpu.memory_space<smem>>
    %1056 = vector.broadcast %1055 : f32 to vector<16x128xf32>
    %1057 = arith.mulf %635, %1056 : vector<16x128xf32>
    %c81 = arith.constant 81 : index
    %1058 = memref.load %arg5[%c81] : memref<256xf32, #tpu.memory_space<smem>>
    %1059 = vector.broadcast %1058 : f32 to vector<16x128xf32>
    %1060 = arith.mulf %586, %1059 : vector<16x128xf32>
    %1061 = arith.addf %1054, %1060 : vector<16x128xf32>
    %c82 = arith.constant 82 : index
    %1062 = memref.load %arg5[%c82] : memref<256xf32, #tpu.memory_space<smem>>
    %1063 = vector.broadcast %1062 : f32 to vector<16x128xf32>
    %1064 = arith.mulf %593, %1063 : vector<16x128xf32>
    %1065 = arith.addf %1061, %1064 : vector<16x128xf32>
    %c83 = arith.constant 83 : index
    %1066 = memref.load %arg5[%c83] : memref<256xf32, #tpu.memory_space<smem>>
    %1067 = vector.broadcast %1066 : f32 to vector<16x128xf32>
    %1068 = arith.mulf %600, %1067 : vector<16x128xf32>
    %1069 = arith.addf %1065, %1068 : vector<16x128xf32>
    %c84 = arith.constant 84 : index
    %1070 = memref.load %arg5[%c84] : memref<256xf32, #tpu.memory_space<smem>>
    %1071 = vector.broadcast %1070 : f32 to vector<16x128xf32>
    %1072 = arith.mulf %607, %1071 : vector<16x128xf32>
    %1073 = arith.addf %1069, %1072 : vector<16x128xf32>
    %c85 = arith.constant 85 : index
    %1074 = memref.load %arg5[%c85] : memref<256xf32, #tpu.memory_space<smem>>
    %1075 = vector.broadcast %1074 : f32 to vector<16x128xf32>
    %1076 = arith.mulf %614, %1075 : vector<16x128xf32>
    %1077 = arith.addf %1073, %1076 : vector<16x128xf32>
    %c86 = arith.constant 86 : index
    %1078 = memref.load %arg5[%c86] : memref<256xf32, #tpu.memory_space<smem>>
    %1079 = vector.broadcast %1078 : f32 to vector<16x128xf32>
    %1080 = arith.mulf %621, %1079 : vector<16x128xf32>
    %1081 = arith.addf %1077, %1080 : vector<16x128xf32>
    %c87 = arith.constant 87 : index
    %1082 = memref.load %arg5[%c87] : memref<256xf32, #tpu.memory_space<smem>>
    %1083 = vector.broadcast %1082 : f32 to vector<16x128xf32>
    %1084 = arith.mulf %628, %1083 : vector<16x128xf32>
    %1085 = arith.addf %1081, %1084 : vector<16x128xf32>
    %c89 = arith.constant 89 : index
    %1086 = memref.load %arg5[%c89] : memref<256xf32, #tpu.memory_space<smem>>
    %1087 = vector.broadcast %1086 : f32 to vector<16x128xf32>
    %1088 = arith.mulf %642, %1087 : vector<16x128xf32>
    %1089 = arith.addf %1057, %1088 : vector<16x128xf32>
    %c90 = arith.constant 90 : index
    %1090 = memref.load %arg5[%c90] : memref<256xf32, #tpu.memory_space<smem>>
    %1091 = vector.broadcast %1090 : f32 to vector<16x128xf32>
    %1092 = arith.mulf %649, %1091 : vector<16x128xf32>
    %1093 = arith.addf %1089, %1092 : vector<16x128xf32>
    %c91 = arith.constant 91 : index
    %1094 = memref.load %arg5[%c91] : memref<256xf32, #tpu.memory_space<smem>>
    %1095 = vector.broadcast %1094 : f32 to vector<16x128xf32>
    %1096 = arith.mulf %656, %1095 : vector<16x128xf32>
    %1097 = arith.addf %1093, %1096 : vector<16x128xf32>
    %c92 = arith.constant 92 : index
    %1098 = memref.load %arg5[%c92] : memref<256xf32, #tpu.memory_space<smem>>
    %1099 = vector.broadcast %1098 : f32 to vector<16x128xf32>
    %1100 = arith.mulf %663, %1099 : vector<16x128xf32>
    %1101 = arith.addf %1097, %1100 : vector<16x128xf32>
    %c93 = arith.constant 93 : index
    %1102 = memref.load %arg5[%c93] : memref<256xf32, #tpu.memory_space<smem>>
    %1103 = vector.broadcast %1102 : f32 to vector<16x128xf32>
    %1104 = arith.mulf %670, %1103 : vector<16x128xf32>
    %1105 = arith.addf %1101, %1104 : vector<16x128xf32>
    %c94 = arith.constant 94 : index
    %1106 = memref.load %arg5[%c94] : memref<256xf32, #tpu.memory_space<smem>>
    %1107 = vector.broadcast %1106 : f32 to vector<16x128xf32>
    %1108 = arith.mulf %677, %1107 : vector<16x128xf32>
    %1109 = arith.addf %1105, %1108 : vector<16x128xf32>
    %c95 = arith.constant 95 : index
    %1110 = memref.load %arg5[%c95] : memref<256xf32, #tpu.memory_space<smem>>
    %1111 = vector.broadcast %1110 : f32 to vector<16x128xf32>
    %1112 = arith.mulf %684, %1111 : vector<16x128xf32>
    %1113 = arith.addf %1109, %1112 : vector<16x128xf32>
    %1114 = arith.addf %1085, %1113 : vector<16x128xf32>
    %1115 = arith.mulf %1051, %1114 : vector<16x128xf32>
    %1116 = arith.addf %1044, %1115 : vector<16x128xf32>
    %cst_247 = arith.constant 6.000000e+00 : f32
    %1117 = vector.broadcast %cst_247 : f32 to vector<16x128xf32>
    %1118 = arith.subf %572, %1117 : vector<16x128xf32>
    %1119 = math.absf %1118 : vector<16x128xf32>
    %cst_248 = arith.constant 1.000000e+00 : f32
    %1120 = vector.broadcast %cst_248 : f32 to vector<16x128xf32>
    %1121 = arith.subf %1120, %1119 : vector<16x128xf32>
    %cst_249 = arith.constant 0.000000e+00 : f32
    %1122 = vector.broadcast %cst_249 : f32 to vector<16x128xf32>
    %1123 = arith.maximumf %1121, %1122 : vector<16x128xf32>
    %c96 = arith.constant 96 : index
    %1124 = memref.load %arg5[%c96] : memref<256xf32, #tpu.memory_space<smem>>
    %1125 = vector.broadcast %1124 : f32 to vector<16x128xf32>
    %1126 = arith.mulf %579, %1125 : vector<16x128xf32>
    %c104 = arith.constant 104 : index
    %1127 = memref.load %arg5[%c104] : memref<256xf32, #tpu.memory_space<smem>>
    %1128 = vector.broadcast %1127 : f32 to vector<16x128xf32>
    %1129 = arith.mulf %635, %1128 : vector<16x128xf32>
    %c97 = arith.constant 97 : index
    %1130 = memref.load %arg5[%c97] : memref<256xf32, #tpu.memory_space<smem>>
    %1131 = vector.broadcast %1130 : f32 to vector<16x128xf32>
    %1132 = arith.mulf %586, %1131 : vector<16x128xf32>
    %1133 = arith.addf %1126, %1132 : vector<16x128xf32>
    %c98 = arith.constant 98 : index
    %1134 = memref.load %arg5[%c98] : memref<256xf32, #tpu.memory_space<smem>>
    %1135 = vector.broadcast %1134 : f32 to vector<16x128xf32>
    %1136 = arith.mulf %593, %1135 : vector<16x128xf32>
    %1137 = arith.addf %1133, %1136 : vector<16x128xf32>
    %c99 = arith.constant 99 : index
    %1138 = memref.load %arg5[%c99] : memref<256xf32, #tpu.memory_space<smem>>
    %1139 = vector.broadcast %1138 : f32 to vector<16x128xf32>
    %1140 = arith.mulf %600, %1139 : vector<16x128xf32>
    %1141 = arith.addf %1137, %1140 : vector<16x128xf32>
    %c100 = arith.constant 100 : index
    %1142 = memref.load %arg5[%c100] : memref<256xf32, #tpu.memory_space<smem>>
    %1143 = vector.broadcast %1142 : f32 to vector<16x128xf32>
    %1144 = arith.mulf %607, %1143 : vector<16x128xf32>
    %1145 = arith.addf %1141, %1144 : vector<16x128xf32>
    %c101 = arith.constant 101 : index
    %1146 = memref.load %arg5[%c101] : memref<256xf32, #tpu.memory_space<smem>>
    %1147 = vector.broadcast %1146 : f32 to vector<16x128xf32>
    %1148 = arith.mulf %614, %1147 : vector<16x128xf32>
    %1149 = arith.addf %1145, %1148 : vector<16x128xf32>
    %c102 = arith.constant 102 : index
    %1150 = memref.load %arg5[%c102] : memref<256xf32, #tpu.memory_space<smem>>
    %1151 = vector.broadcast %1150 : f32 to vector<16x128xf32>
    %1152 = arith.mulf %621, %1151 : vector<16x128xf32>
    %1153 = arith.addf %1149, %1152 : vector<16x128xf32>
    %c103 = arith.constant 103 : index
    %1154 = memref.load %arg5[%c103] : memref<256xf32, #tpu.memory_space<smem>>
    %1155 = vector.broadcast %1154 : f32 to vector<16x128xf32>
    %1156 = arith.mulf %628, %1155 : vector<16x128xf32>
    %1157 = arith.addf %1153, %1156 : vector<16x128xf32>
    %c105 = arith.constant 105 : index
    %1158 = memref.load %arg5[%c105] : memref<256xf32, #tpu.memory_space<smem>>
    %1159 = vector.broadcast %1158 : f32 to vector<16x128xf32>
    %1160 = arith.mulf %642, %1159 : vector<16x128xf32>
    %1161 = arith.addf %1129, %1160 : vector<16x128xf32>
    %c106 = arith.constant 106 : index
    %1162 = memref.load %arg5[%c106] : memref<256xf32, #tpu.memory_space<smem>>
    %1163 = vector.broadcast %1162 : f32 to vector<16x128xf32>
    %1164 = arith.mulf %649, %1163 : vector<16x128xf32>
    %1165 = arith.addf %1161, %1164 : vector<16x128xf32>
    %c107 = arith.constant 107 : index
    %1166 = memref.load %arg5[%c107] : memref<256xf32, #tpu.memory_space<smem>>
    %1167 = vector.broadcast %1166 : f32 to vector<16x128xf32>
    %1168 = arith.mulf %656, %1167 : vector<16x128xf32>
    %1169 = arith.addf %1165, %1168 : vector<16x128xf32>
    %c108 = arith.constant 108 : index
    %1170 = memref.load %arg5[%c108] : memref<256xf32, #tpu.memory_space<smem>>
    %1171 = vector.broadcast %1170 : f32 to vector<16x128xf32>
    %1172 = arith.mulf %663, %1171 : vector<16x128xf32>
    %1173 = arith.addf %1169, %1172 : vector<16x128xf32>
    %c109 = arith.constant 109 : index
    %1174 = memref.load %arg5[%c109] : memref<256xf32, #tpu.memory_space<smem>>
    %1175 = vector.broadcast %1174 : f32 to vector<16x128xf32>
    %1176 = arith.mulf %670, %1175 : vector<16x128xf32>
    %1177 = arith.addf %1173, %1176 : vector<16x128xf32>
    %c110 = arith.constant 110 : index
    %1178 = memref.load %arg5[%c110] : memref<256xf32, #tpu.memory_space<smem>>
    %1179 = vector.broadcast %1178 : f32 to vector<16x128xf32>
    %1180 = arith.mulf %677, %1179 : vector<16x128xf32>
    %1181 = arith.addf %1177, %1180 : vector<16x128xf32>
    %c111 = arith.constant 111 : index
    %1182 = memref.load %arg5[%c111] : memref<256xf32, #tpu.memory_space<smem>>
    %1183 = vector.broadcast %1182 : f32 to vector<16x128xf32>
    %1184 = arith.mulf %684, %1183 : vector<16x128xf32>
    %1185 = arith.addf %1181, %1184 : vector<16x128xf32>
    %1186 = arith.addf %1157, %1185 : vector<16x128xf32>
    %1187 = arith.mulf %1123, %1186 : vector<16x128xf32>
    %1188 = arith.addf %1116, %1187 : vector<16x128xf32>
    %cst_250 = arith.constant 7.000000e+00 : f32
    %1189 = vector.broadcast %cst_250 : f32 to vector<16x128xf32>
    %1190 = arith.subf %572, %1189 : vector<16x128xf32>
    %1191 = math.absf %1190 : vector<16x128xf32>
    %cst_251 = arith.constant 1.000000e+00 : f32
    %1192 = vector.broadcast %cst_251 : f32 to vector<16x128xf32>
    %1193 = arith.subf %1192, %1191 : vector<16x128xf32>
    %cst_252 = arith.constant 0.000000e+00 : f32
    %1194 = vector.broadcast %cst_252 : f32 to vector<16x128xf32>
    %1195 = arith.maximumf %1193, %1194 : vector<16x128xf32>
    %c112 = arith.constant 112 : index
    %1196 = memref.load %arg5[%c112] : memref<256xf32, #tpu.memory_space<smem>>
    %1197 = vector.broadcast %1196 : f32 to vector<16x128xf32>
    %1198 = arith.mulf %579, %1197 : vector<16x128xf32>
    %c120 = arith.constant 120 : index
    %1199 = memref.load %arg5[%c120] : memref<256xf32, #tpu.memory_space<smem>>
    %1200 = vector.broadcast %1199 : f32 to vector<16x128xf32>
    %1201 = arith.mulf %635, %1200 : vector<16x128xf32>
    %c113 = arith.constant 113 : index
    %1202 = memref.load %arg5[%c113] : memref<256xf32, #tpu.memory_space<smem>>
    %1203 = vector.broadcast %1202 : f32 to vector<16x128xf32>
    %1204 = arith.mulf %586, %1203 : vector<16x128xf32>
    %1205 = arith.addf %1198, %1204 : vector<16x128xf32>
    %c114 = arith.constant 114 : index
    %1206 = memref.load %arg5[%c114] : memref<256xf32, #tpu.memory_space<smem>>
    %1207 = vector.broadcast %1206 : f32 to vector<16x128xf32>
    %1208 = arith.mulf %593, %1207 : vector<16x128xf32>
    %1209 = arith.addf %1205, %1208 : vector<16x128xf32>
    %c115 = arith.constant 115 : index
    %1210 = memref.load %arg5[%c115] : memref<256xf32, #tpu.memory_space<smem>>
    %1211 = vector.broadcast %1210 : f32 to vector<16x128xf32>
    %1212 = arith.mulf %600, %1211 : vector<16x128xf32>
    %1213 = arith.addf %1209, %1212 : vector<16x128xf32>
    %c116 = arith.constant 116 : index
    %1214 = memref.load %arg5[%c116] : memref<256xf32, #tpu.memory_space<smem>>
    %1215 = vector.broadcast %1214 : f32 to vector<16x128xf32>
    %1216 = arith.mulf %607, %1215 : vector<16x128xf32>
    %1217 = arith.addf %1213, %1216 : vector<16x128xf32>
    %c117 = arith.constant 117 : index
    %1218 = memref.load %arg5[%c117] : memref<256xf32, #tpu.memory_space<smem>>
    %1219 = vector.broadcast %1218 : f32 to vector<16x128xf32>
    %1220 = arith.mulf %614, %1219 : vector<16x128xf32>
    %1221 = arith.addf %1217, %1220 : vector<16x128xf32>
    %c118 = arith.constant 118 : index
    %1222 = memref.load %arg5[%c118] : memref<256xf32, #tpu.memory_space<smem>>
    %1223 = vector.broadcast %1222 : f32 to vector<16x128xf32>
    %1224 = arith.mulf %621, %1223 : vector<16x128xf32>
    %1225 = arith.addf %1221, %1224 : vector<16x128xf32>
    %c119 = arith.constant 119 : index
    %1226 = memref.load %arg5[%c119] : memref<256xf32, #tpu.memory_space<smem>>
    %1227 = vector.broadcast %1226 : f32 to vector<16x128xf32>
    %1228 = arith.mulf %628, %1227 : vector<16x128xf32>
    %1229 = arith.addf %1225, %1228 : vector<16x128xf32>
    %c121 = arith.constant 121 : index
    %1230 = memref.load %arg5[%c121] : memref<256xf32, #tpu.memory_space<smem>>
    %1231 = vector.broadcast %1230 : f32 to vector<16x128xf32>
    %1232 = arith.mulf %642, %1231 : vector<16x128xf32>
    %1233 = arith.addf %1201, %1232 : vector<16x128xf32>
    %c122 = arith.constant 122 : index
    %1234 = memref.load %arg5[%c122] : memref<256xf32, #tpu.memory_space<smem>>
    %1235 = vector.broadcast %1234 : f32 to vector<16x128xf32>
    %1236 = arith.mulf %649, %1235 : vector<16x128xf32>
    %1237 = arith.addf %1233, %1236 : vector<16x128xf32>
    %c123 = arith.constant 123 : index
    %1238 = memref.load %arg5[%c123] : memref<256xf32, #tpu.memory_space<smem>>
    %1239 = vector.broadcast %1238 : f32 to vector<16x128xf32>
    %1240 = arith.mulf %656, %1239 : vector<16x128xf32>
    %1241 = arith.addf %1237, %1240 : vector<16x128xf32>
    %c124 = arith.constant 124 : index
    %1242 = memref.load %arg5[%c124] : memref<256xf32, #tpu.memory_space<smem>>
    %1243 = vector.broadcast %1242 : f32 to vector<16x128xf32>
    %1244 = arith.mulf %663, %1243 : vector<16x128xf32>
    %1245 = arith.addf %1241, %1244 : vector<16x128xf32>
    %c125 = arith.constant 125 : index
    %1246 = memref.load %arg5[%c125] : memref<256xf32, #tpu.memory_space<smem>>
    %1247 = vector.broadcast %1246 : f32 to vector<16x128xf32>
    %1248 = arith.mulf %670, %1247 : vector<16x128xf32>
    %1249 = arith.addf %1245, %1248 : vector<16x128xf32>
    %c126 = arith.constant 126 : index
    %1250 = memref.load %arg5[%c126] : memref<256xf32, #tpu.memory_space<smem>>
    %1251 = vector.broadcast %1250 : f32 to vector<16x128xf32>
    %1252 = arith.mulf %677, %1251 : vector<16x128xf32>
    %1253 = arith.addf %1249, %1252 : vector<16x128xf32>
    %c127 = arith.constant 127 : index
    %1254 = memref.load %arg5[%c127] : memref<256xf32, #tpu.memory_space<smem>>
    %1255 = vector.broadcast %1254 : f32 to vector<16x128xf32>
    %1256 = arith.mulf %684, %1255 : vector<16x128xf32>
    %1257 = arith.addf %1253, %1256 : vector<16x128xf32>
    %1258 = arith.addf %1229, %1257 : vector<16x128xf32>
    %1259 = arith.mulf %1195, %1258 : vector<16x128xf32>
    %1260 = arith.addf %1188, %1259 : vector<16x128xf32>
    %cst_253 = arith.constant 8.000000e+00 : f32
    %1261 = vector.broadcast %cst_253 : f32 to vector<16x128xf32>
    %1262 = arith.subf %572, %1261 : vector<16x128xf32>
    %1263 = math.absf %1262 : vector<16x128xf32>
    %cst_254 = arith.constant 1.000000e+00 : f32
    %1264 = vector.broadcast %cst_254 : f32 to vector<16x128xf32>
    %1265 = arith.subf %1264, %1263 : vector<16x128xf32>
    %cst_255 = arith.constant 0.000000e+00 : f32
    %1266 = vector.broadcast %cst_255 : f32 to vector<16x128xf32>
    %1267 = arith.maximumf %1265, %1266 : vector<16x128xf32>
    %c128 = arith.constant 128 : index
    %1268 = memref.load %arg5[%c128] : memref<256xf32, #tpu.memory_space<smem>>
    %1269 = vector.broadcast %1268 : f32 to vector<16x128xf32>
    %1270 = arith.mulf %579, %1269 : vector<16x128xf32>
    %c136 = arith.constant 136 : index
    %1271 = memref.load %arg5[%c136] : memref<256xf32, #tpu.memory_space<smem>>
    %1272 = vector.broadcast %1271 : f32 to vector<16x128xf32>
    %1273 = arith.mulf %635, %1272 : vector<16x128xf32>
    %c129 = arith.constant 129 : index
    %1274 = memref.load %arg5[%c129] : memref<256xf32, #tpu.memory_space<smem>>
    %1275 = vector.broadcast %1274 : f32 to vector<16x128xf32>
    %1276 = arith.mulf %586, %1275 : vector<16x128xf32>
    %1277 = arith.addf %1270, %1276 : vector<16x128xf32>
    %c130 = arith.constant 130 : index
    %1278 = memref.load %arg5[%c130] : memref<256xf32, #tpu.memory_space<smem>>
    %1279 = vector.broadcast %1278 : f32 to vector<16x128xf32>
    %1280 = arith.mulf %593, %1279 : vector<16x128xf32>
    %1281 = arith.addf %1277, %1280 : vector<16x128xf32>
    %c131 = arith.constant 131 : index
    %1282 = memref.load %arg5[%c131] : memref<256xf32, #tpu.memory_space<smem>>
    %1283 = vector.broadcast %1282 : f32 to vector<16x128xf32>
    %1284 = arith.mulf %600, %1283 : vector<16x128xf32>
    %1285 = arith.addf %1281, %1284 : vector<16x128xf32>
    %c132 = arith.constant 132 : index
    %1286 = memref.load %arg5[%c132] : memref<256xf32, #tpu.memory_space<smem>>
    %1287 = vector.broadcast %1286 : f32 to vector<16x128xf32>
    %1288 = arith.mulf %607, %1287 : vector<16x128xf32>
    %1289 = arith.addf %1285, %1288 : vector<16x128xf32>
    %c133 = arith.constant 133 : index
    %1290 = memref.load %arg5[%c133] : memref<256xf32, #tpu.memory_space<smem>>
    %1291 = vector.broadcast %1290 : f32 to vector<16x128xf32>
    %1292 = arith.mulf %614, %1291 : vector<16x128xf32>
    %1293 = arith.addf %1289, %1292 : vector<16x128xf32>
    %c134 = arith.constant 134 : index
    %1294 = memref.load %arg5[%c134] : memref<256xf32, #tpu.memory_space<smem>>
    %1295 = vector.broadcast %1294 : f32 to vector<16x128xf32>
    %1296 = arith.mulf %621, %1295 : vector<16x128xf32>
    %1297 = arith.addf %1293, %1296 : vector<16x128xf32>
    %c135 = arith.constant 135 : index
    %1298 = memref.load %arg5[%c135] : memref<256xf32, #tpu.memory_space<smem>>
    %1299 = vector.broadcast %1298 : f32 to vector<16x128xf32>
    %1300 = arith.mulf %628, %1299 : vector<16x128xf32>
    %1301 = arith.addf %1297, %1300 : vector<16x128xf32>
    %c137 = arith.constant 137 : index
    %1302 = memref.load %arg5[%c137] : memref<256xf32, #tpu.memory_space<smem>>
    %1303 = vector.broadcast %1302 : f32 to vector<16x128xf32>
    %1304 = arith.mulf %642, %1303 : vector<16x128xf32>
    %1305 = arith.addf %1273, %1304 : vector<16x128xf32>
    %c138 = arith.constant 138 : index
    %1306 = memref.load %arg5[%c138] : memref<256xf32, #tpu.memory_space<smem>>
    %1307 = vector.broadcast %1306 : f32 to vector<16x128xf32>
    %1308 = arith.mulf %649, %1307 : vector<16x128xf32>
    %1309 = arith.addf %1305, %1308 : vector<16x128xf32>
    %c139 = arith.constant 139 : index
    %1310 = memref.load %arg5[%c139] : memref<256xf32, #tpu.memory_space<smem>>
    %1311 = vector.broadcast %1310 : f32 to vector<16x128xf32>
    %1312 = arith.mulf %656, %1311 : vector<16x128xf32>
    %1313 = arith.addf %1309, %1312 : vector<16x128xf32>
    %c140 = arith.constant 140 : index
    %1314 = memref.load %arg5[%c140] : memref<256xf32, #tpu.memory_space<smem>>
    %1315 = vector.broadcast %1314 : f32 to vector<16x128xf32>
    %1316 = arith.mulf %663, %1315 : vector<16x128xf32>
    %1317 = arith.addf %1313, %1316 : vector<16x128xf32>
    %c141 = arith.constant 141 : index
    %1318 = memref.load %arg5[%c141] : memref<256xf32, #tpu.memory_space<smem>>
    %1319 = vector.broadcast %1318 : f32 to vector<16x128xf32>
    %1320 = arith.mulf %670, %1319 : vector<16x128xf32>
    %1321 = arith.addf %1317, %1320 : vector<16x128xf32>
    %c142 = arith.constant 142 : index
    %1322 = memref.load %arg5[%c142] : memref<256xf32, #tpu.memory_space<smem>>
    %1323 = vector.broadcast %1322 : f32 to vector<16x128xf32>
    %1324 = arith.mulf %677, %1323 : vector<16x128xf32>
    %1325 = arith.addf %1321, %1324 : vector<16x128xf32>
    %c143 = arith.constant 143 : index
    %1326 = memref.load %arg5[%c143] : memref<256xf32, #tpu.memory_space<smem>>
    %1327 = vector.broadcast %1326 : f32 to vector<16x128xf32>
    %1328 = arith.mulf %684, %1327 : vector<16x128xf32>
    %1329 = arith.addf %1325, %1328 : vector<16x128xf32>
    %1330 = arith.addf %1301, %1329 : vector<16x128xf32>
    %1331 = arith.mulf %1267, %1330 : vector<16x128xf32>
    %1332 = arith.addf %1260, %1331 : vector<16x128xf32>
    %cst_256 = arith.constant 9.000000e+00 : f32
    %1333 = vector.broadcast %cst_256 : f32 to vector<16x128xf32>
    %1334 = arith.subf %572, %1333 : vector<16x128xf32>
    %1335 = math.absf %1334 : vector<16x128xf32>
    %cst_257 = arith.constant 1.000000e+00 : f32
    %1336 = vector.broadcast %cst_257 : f32 to vector<16x128xf32>
    %1337 = arith.subf %1336, %1335 : vector<16x128xf32>
    %cst_258 = arith.constant 0.000000e+00 : f32
    %1338 = vector.broadcast %cst_258 : f32 to vector<16x128xf32>
    %1339 = arith.maximumf %1337, %1338 : vector<16x128xf32>
    %c144 = arith.constant 144 : index
    %1340 = memref.load %arg5[%c144] : memref<256xf32, #tpu.memory_space<smem>>
    %1341 = vector.broadcast %1340 : f32 to vector<16x128xf32>
    %1342 = arith.mulf %579, %1341 : vector<16x128xf32>
    %c152 = arith.constant 152 : index
    %1343 = memref.load %arg5[%c152] : memref<256xf32, #tpu.memory_space<smem>>
    %1344 = vector.broadcast %1343 : f32 to vector<16x128xf32>
    %1345 = arith.mulf %635, %1344 : vector<16x128xf32>
    %c145 = arith.constant 145 : index
    %1346 = memref.load %arg5[%c145] : memref<256xf32, #tpu.memory_space<smem>>
    %1347 = vector.broadcast %1346 : f32 to vector<16x128xf32>
    %1348 = arith.mulf %586, %1347 : vector<16x128xf32>
    %1349 = arith.addf %1342, %1348 : vector<16x128xf32>
    %c146 = arith.constant 146 : index
    %1350 = memref.load %arg5[%c146] : memref<256xf32, #tpu.memory_space<smem>>
    %1351 = vector.broadcast %1350 : f32 to vector<16x128xf32>
    %1352 = arith.mulf %593, %1351 : vector<16x128xf32>
    %1353 = arith.addf %1349, %1352 : vector<16x128xf32>
    %c147 = arith.constant 147 : index
    %1354 = memref.load %arg5[%c147] : memref<256xf32, #tpu.memory_space<smem>>
    %1355 = vector.broadcast %1354 : f32 to vector<16x128xf32>
    %1356 = arith.mulf %600, %1355 : vector<16x128xf32>
    %1357 = arith.addf %1353, %1356 : vector<16x128xf32>
    %c148 = arith.constant 148 : index
    %1358 = memref.load %arg5[%c148] : memref<256xf32, #tpu.memory_space<smem>>
    %1359 = vector.broadcast %1358 : f32 to vector<16x128xf32>
    %1360 = arith.mulf %607, %1359 : vector<16x128xf32>
    %1361 = arith.addf %1357, %1360 : vector<16x128xf32>
    %c149 = arith.constant 149 : index
    %1362 = memref.load %arg5[%c149] : memref<256xf32, #tpu.memory_space<smem>>
    %1363 = vector.broadcast %1362 : f32 to vector<16x128xf32>
    %1364 = arith.mulf %614, %1363 : vector<16x128xf32>
    %1365 = arith.addf %1361, %1364 : vector<16x128xf32>
    %c150 = arith.constant 150 : index
    %1366 = memref.load %arg5[%c150] : memref<256xf32, #tpu.memory_space<smem>>
    %1367 = vector.broadcast %1366 : f32 to vector<16x128xf32>
    %1368 = arith.mulf %621, %1367 : vector<16x128xf32>
    %1369 = arith.addf %1365, %1368 : vector<16x128xf32>
    %c151 = arith.constant 151 : index
    %1370 = memref.load %arg5[%c151] : memref<256xf32, #tpu.memory_space<smem>>
    %1371 = vector.broadcast %1370 : f32 to vector<16x128xf32>
    %1372 = arith.mulf %628, %1371 : vector<16x128xf32>
    %1373 = arith.addf %1369, %1372 : vector<16x128xf32>
    %c153 = arith.constant 153 : index
    %1374 = memref.load %arg5[%c153] : memref<256xf32, #tpu.memory_space<smem>>
    %1375 = vector.broadcast %1374 : f32 to vector<16x128xf32>
    %1376 = arith.mulf %642, %1375 : vector<16x128xf32>
    %1377 = arith.addf %1345, %1376 : vector<16x128xf32>
    %c154 = arith.constant 154 : index
    %1378 = memref.load %arg5[%c154] : memref<256xf32, #tpu.memory_space<smem>>
    %1379 = vector.broadcast %1378 : f32 to vector<16x128xf32>
    %1380 = arith.mulf %649, %1379 : vector<16x128xf32>
    %1381 = arith.addf %1377, %1380 : vector<16x128xf32>
    %c155 = arith.constant 155 : index
    %1382 = memref.load %arg5[%c155] : memref<256xf32, #tpu.memory_space<smem>>
    %1383 = vector.broadcast %1382 : f32 to vector<16x128xf32>
    %1384 = arith.mulf %656, %1383 : vector<16x128xf32>
    %1385 = arith.addf %1381, %1384 : vector<16x128xf32>
    %c156 = arith.constant 156 : index
    %1386 = memref.load %arg5[%c156] : memref<256xf32, #tpu.memory_space<smem>>
    %1387 = vector.broadcast %1386 : f32 to vector<16x128xf32>
    %1388 = arith.mulf %663, %1387 : vector<16x128xf32>
    %1389 = arith.addf %1385, %1388 : vector<16x128xf32>
    %c157 = arith.constant 157 : index
    %1390 = memref.load %arg5[%c157] : memref<256xf32, #tpu.memory_space<smem>>
    %1391 = vector.broadcast %1390 : f32 to vector<16x128xf32>
    %1392 = arith.mulf %670, %1391 : vector<16x128xf32>
    %1393 = arith.addf %1389, %1392 : vector<16x128xf32>
    %c158 = arith.constant 158 : index
    %1394 = memref.load %arg5[%c158] : memref<256xf32, #tpu.memory_space<smem>>
    %1395 = vector.broadcast %1394 : f32 to vector<16x128xf32>
    %1396 = arith.mulf %677, %1395 : vector<16x128xf32>
    %1397 = arith.addf %1393, %1396 : vector<16x128xf32>
    %c159 = arith.constant 159 : index
    %1398 = memref.load %arg5[%c159] : memref<256xf32, #tpu.memory_space<smem>>
    %1399 = vector.broadcast %1398 : f32 to vector<16x128xf32>
    %1400 = arith.mulf %684, %1399 : vector<16x128xf32>
    %1401 = arith.addf %1397, %1400 : vector<16x128xf32>
    %1402 = arith.addf %1373, %1401 : vector<16x128xf32>
    %1403 = arith.mulf %1339, %1402 : vector<16x128xf32>
    %1404 = arith.addf %1332, %1403 : vector<16x128xf32>
    %cst_259 = arith.constant 1.000000e+01 : f32
    %1405 = vector.broadcast %cst_259 : f32 to vector<16x128xf32>
    %1406 = arith.subf %572, %1405 : vector<16x128xf32>
    %1407 = math.absf %1406 : vector<16x128xf32>
    %cst_260 = arith.constant 1.000000e+00 : f32
    %1408 = vector.broadcast %cst_260 : f32 to vector<16x128xf32>
    %1409 = arith.subf %1408, %1407 : vector<16x128xf32>
    %cst_261 = arith.constant 0.000000e+00 : f32
    %1410 = vector.broadcast %cst_261 : f32 to vector<16x128xf32>
    %1411 = arith.maximumf %1409, %1410 : vector<16x128xf32>
    %c160 = arith.constant 160 : index
    %1412 = memref.load %arg5[%c160] : memref<256xf32, #tpu.memory_space<smem>>
    %1413 = vector.broadcast %1412 : f32 to vector<16x128xf32>
    %1414 = arith.mulf %579, %1413 : vector<16x128xf32>
    %c168 = arith.constant 168 : index
    %1415 = memref.load %arg5[%c168] : memref<256xf32, #tpu.memory_space<smem>>
    %1416 = vector.broadcast %1415 : f32 to vector<16x128xf32>
    %1417 = arith.mulf %635, %1416 : vector<16x128xf32>
    %c161 = arith.constant 161 : index
    %1418 = memref.load %arg5[%c161] : memref<256xf32, #tpu.memory_space<smem>>
    %1419 = vector.broadcast %1418 : f32 to vector<16x128xf32>
    %1420 = arith.mulf %586, %1419 : vector<16x128xf32>
    %1421 = arith.addf %1414, %1420 : vector<16x128xf32>
    %c162 = arith.constant 162 : index
    %1422 = memref.load %arg5[%c162] : memref<256xf32, #tpu.memory_space<smem>>
    %1423 = vector.broadcast %1422 : f32 to vector<16x128xf32>
    %1424 = arith.mulf %593, %1423 : vector<16x128xf32>
    %1425 = arith.addf %1421, %1424 : vector<16x128xf32>
    %c163 = arith.constant 163 : index
    %1426 = memref.load %arg5[%c163] : memref<256xf32, #tpu.memory_space<smem>>
    %1427 = vector.broadcast %1426 : f32 to vector<16x128xf32>
    %1428 = arith.mulf %600, %1427 : vector<16x128xf32>
    %1429 = arith.addf %1425, %1428 : vector<16x128xf32>
    %c164 = arith.constant 164 : index
    %1430 = memref.load %arg5[%c164] : memref<256xf32, #tpu.memory_space<smem>>
    %1431 = vector.broadcast %1430 : f32 to vector<16x128xf32>
    %1432 = arith.mulf %607, %1431 : vector<16x128xf32>
    %1433 = arith.addf %1429, %1432 : vector<16x128xf32>
    %c165 = arith.constant 165 : index
    %1434 = memref.load %arg5[%c165] : memref<256xf32, #tpu.memory_space<smem>>
    %1435 = vector.broadcast %1434 : f32 to vector<16x128xf32>
    %1436 = arith.mulf %614, %1435 : vector<16x128xf32>
    %1437 = arith.addf %1433, %1436 : vector<16x128xf32>
    %c166 = arith.constant 166 : index
    %1438 = memref.load %arg5[%c166] : memref<256xf32, #tpu.memory_space<smem>>
    %1439 = vector.broadcast %1438 : f32 to vector<16x128xf32>
    %1440 = arith.mulf %621, %1439 : vector<16x128xf32>
    %1441 = arith.addf %1437, %1440 : vector<16x128xf32>
    %c167 = arith.constant 167 : index
    %1442 = memref.load %arg5[%c167] : memref<256xf32, #tpu.memory_space<smem>>
    %1443 = vector.broadcast %1442 : f32 to vector<16x128xf32>
    %1444 = arith.mulf %628, %1443 : vector<16x128xf32>
    %1445 = arith.addf %1441, %1444 : vector<16x128xf32>
    %c169 = arith.constant 169 : index
    %1446 = memref.load %arg5[%c169] : memref<256xf32, #tpu.memory_space<smem>>
    %1447 = vector.broadcast %1446 : f32 to vector<16x128xf32>
    %1448 = arith.mulf %642, %1447 : vector<16x128xf32>
    %1449 = arith.addf %1417, %1448 : vector<16x128xf32>
    %c170 = arith.constant 170 : index
    %1450 = memref.load %arg5[%c170] : memref<256xf32, #tpu.memory_space<smem>>
    %1451 = vector.broadcast %1450 : f32 to vector<16x128xf32>
    %1452 = arith.mulf %649, %1451 : vector<16x128xf32>
    %1453 = arith.addf %1449, %1452 : vector<16x128xf32>
    %c171 = arith.constant 171 : index
    %1454 = memref.load %arg5[%c171] : memref<256xf32, #tpu.memory_space<smem>>
    %1455 = vector.broadcast %1454 : f32 to vector<16x128xf32>
    %1456 = arith.mulf %656, %1455 : vector<16x128xf32>
    %1457 = arith.addf %1453, %1456 : vector<16x128xf32>
    %c172 = arith.constant 172 : index
    %1458 = memref.load %arg5[%c172] : memref<256xf32, #tpu.memory_space<smem>>
    %1459 = vector.broadcast %1458 : f32 to vector<16x128xf32>
    %1460 = arith.mulf %663, %1459 : vector<16x128xf32>
    %1461 = arith.addf %1457, %1460 : vector<16x128xf32>
    %c173 = arith.constant 173 : index
    %1462 = memref.load %arg5[%c173] : memref<256xf32, #tpu.memory_space<smem>>
    %1463 = vector.broadcast %1462 : f32 to vector<16x128xf32>
    %1464 = arith.mulf %670, %1463 : vector<16x128xf32>
    %1465 = arith.addf %1461, %1464 : vector<16x128xf32>
    %c174 = arith.constant 174 : index
    %1466 = memref.load %arg5[%c174] : memref<256xf32, #tpu.memory_space<smem>>
    %1467 = vector.broadcast %1466 : f32 to vector<16x128xf32>
    %1468 = arith.mulf %677, %1467 : vector<16x128xf32>
    %1469 = arith.addf %1465, %1468 : vector<16x128xf32>
    %c175 = arith.constant 175 : index
    %1470 = memref.load %arg5[%c175] : memref<256xf32, #tpu.memory_space<smem>>
    %1471 = vector.broadcast %1470 : f32 to vector<16x128xf32>
    %1472 = arith.mulf %684, %1471 : vector<16x128xf32>
    %1473 = arith.addf %1469, %1472 : vector<16x128xf32>
    %1474 = arith.addf %1445, %1473 : vector<16x128xf32>
    %1475 = arith.mulf %1411, %1474 : vector<16x128xf32>
    %1476 = arith.addf %1404, %1475 : vector<16x128xf32>
    %cst_262 = arith.constant 1.100000e+01 : f32
    %1477 = vector.broadcast %cst_262 : f32 to vector<16x128xf32>
    %1478 = arith.subf %572, %1477 : vector<16x128xf32>
    %1479 = math.absf %1478 : vector<16x128xf32>
    %cst_263 = arith.constant 1.000000e+00 : f32
    %1480 = vector.broadcast %cst_263 : f32 to vector<16x128xf32>
    %1481 = arith.subf %1480, %1479 : vector<16x128xf32>
    %cst_264 = arith.constant 0.000000e+00 : f32
    %1482 = vector.broadcast %cst_264 : f32 to vector<16x128xf32>
    %1483 = arith.maximumf %1481, %1482 : vector<16x128xf32>
    %c176 = arith.constant 176 : index
    %1484 = memref.load %arg5[%c176] : memref<256xf32, #tpu.memory_space<smem>>
    %1485 = vector.broadcast %1484 : f32 to vector<16x128xf32>
    %1486 = arith.mulf %579, %1485 : vector<16x128xf32>
    %c184 = arith.constant 184 : index
    %1487 = memref.load %arg5[%c184] : memref<256xf32, #tpu.memory_space<smem>>
    %1488 = vector.broadcast %1487 : f32 to vector<16x128xf32>
    %1489 = arith.mulf %635, %1488 : vector<16x128xf32>
    %c177 = arith.constant 177 : index
    %1490 = memref.load %arg5[%c177] : memref<256xf32, #tpu.memory_space<smem>>
    %1491 = vector.broadcast %1490 : f32 to vector<16x128xf32>
    %1492 = arith.mulf %586, %1491 : vector<16x128xf32>
    %1493 = arith.addf %1486, %1492 : vector<16x128xf32>
    %c178 = arith.constant 178 : index
    %1494 = memref.load %arg5[%c178] : memref<256xf32, #tpu.memory_space<smem>>
    %1495 = vector.broadcast %1494 : f32 to vector<16x128xf32>
    %1496 = arith.mulf %593, %1495 : vector<16x128xf32>
    %1497 = arith.addf %1493, %1496 : vector<16x128xf32>
    %c179 = arith.constant 179 : index
    %1498 = memref.load %arg5[%c179] : memref<256xf32, #tpu.memory_space<smem>>
    %1499 = vector.broadcast %1498 : f32 to vector<16x128xf32>
    %1500 = arith.mulf %600, %1499 : vector<16x128xf32>
    %1501 = arith.addf %1497, %1500 : vector<16x128xf32>
    %c180 = arith.constant 180 : index
    %1502 = memref.load %arg5[%c180] : memref<256xf32, #tpu.memory_space<smem>>
    %1503 = vector.broadcast %1502 : f32 to vector<16x128xf32>
    %1504 = arith.mulf %607, %1503 : vector<16x128xf32>
    %1505 = arith.addf %1501, %1504 : vector<16x128xf32>
    %c181 = arith.constant 181 : index
    %1506 = memref.load %arg5[%c181] : memref<256xf32, #tpu.memory_space<smem>>
    %1507 = vector.broadcast %1506 : f32 to vector<16x128xf32>
    %1508 = arith.mulf %614, %1507 : vector<16x128xf32>
    %1509 = arith.addf %1505, %1508 : vector<16x128xf32>
    %c182 = arith.constant 182 : index
    %1510 = memref.load %arg5[%c182] : memref<256xf32, #tpu.memory_space<smem>>
    %1511 = vector.broadcast %1510 : f32 to vector<16x128xf32>
    %1512 = arith.mulf %621, %1511 : vector<16x128xf32>
    %1513 = arith.addf %1509, %1512 : vector<16x128xf32>
    %c183 = arith.constant 183 : index
    %1514 = memref.load %arg5[%c183] : memref<256xf32, #tpu.memory_space<smem>>
    %1515 = vector.broadcast %1514 : f32 to vector<16x128xf32>
    %1516 = arith.mulf %628, %1515 : vector<16x128xf32>
    %1517 = arith.addf %1513, %1516 : vector<16x128xf32>
    %c185 = arith.constant 185 : index
    %1518 = memref.load %arg5[%c185] : memref<256xf32, #tpu.memory_space<smem>>
    %1519 = vector.broadcast %1518 : f32 to vector<16x128xf32>
    %1520 = arith.mulf %642, %1519 : vector<16x128xf32>
    %1521 = arith.addf %1489, %1520 : vector<16x128xf32>
    %c186 = arith.constant 186 : index
    %1522 = memref.load %arg5[%c186] : memref<256xf32, #tpu.memory_space<smem>>
    %1523 = vector.broadcast %1522 : f32 to vector<16x128xf32>
    %1524 = arith.mulf %649, %1523 : vector<16x128xf32>
    %1525 = arith.addf %1521, %1524 : vector<16x128xf32>
    %c187 = arith.constant 187 : index
    %1526 = memref.load %arg5[%c187] : memref<256xf32, #tpu.memory_space<smem>>
    %1527 = vector.broadcast %1526 : f32 to vector<16x128xf32>
    %1528 = arith.mulf %656, %1527 : vector<16x128xf32>
    %1529 = arith.addf %1525, %1528 : vector<16x128xf32>
    %c188 = arith.constant 188 : index
    %1530 = memref.load %arg5[%c188] : memref<256xf32, #tpu.memory_space<smem>>
    %1531 = vector.broadcast %1530 : f32 to vector<16x128xf32>
    %1532 = arith.mulf %663, %1531 : vector<16x128xf32>
    %1533 = arith.addf %1529, %1532 : vector<16x128xf32>
    %c189 = arith.constant 189 : index
    %1534 = memref.load %arg5[%c189] : memref<256xf32, #tpu.memory_space<smem>>
    %1535 = vector.broadcast %1534 : f32 to vector<16x128xf32>
    %1536 = arith.mulf %670, %1535 : vector<16x128xf32>
    %1537 = arith.addf %1533, %1536 : vector<16x128xf32>
    %c190 = arith.constant 190 : index
    %1538 = memref.load %arg5[%c190] : memref<256xf32, #tpu.memory_space<smem>>
    %1539 = vector.broadcast %1538 : f32 to vector<16x128xf32>
    %1540 = arith.mulf %677, %1539 : vector<16x128xf32>
    %1541 = arith.addf %1537, %1540 : vector<16x128xf32>
    %c191 = arith.constant 191 : index
    %1542 = memref.load %arg5[%c191] : memref<256xf32, #tpu.memory_space<smem>>
    %1543 = vector.broadcast %1542 : f32 to vector<16x128xf32>
    %1544 = arith.mulf %684, %1543 : vector<16x128xf32>
    %1545 = arith.addf %1541, %1544 : vector<16x128xf32>
    %1546 = arith.addf %1517, %1545 : vector<16x128xf32>
    %1547 = arith.mulf %1483, %1546 : vector<16x128xf32>
    %1548 = arith.addf %1476, %1547 : vector<16x128xf32>
    %cst_265 = arith.constant 1.200000e+01 : f32
    %1549 = vector.broadcast %cst_265 : f32 to vector<16x128xf32>
    %1550 = arith.subf %572, %1549 : vector<16x128xf32>
    %1551 = math.absf %1550 : vector<16x128xf32>
    %cst_266 = arith.constant 1.000000e+00 : f32
    %1552 = vector.broadcast %cst_266 : f32 to vector<16x128xf32>
    %1553 = arith.subf %1552, %1551 : vector<16x128xf32>
    %cst_267 = arith.constant 0.000000e+00 : f32
    %1554 = vector.broadcast %cst_267 : f32 to vector<16x128xf32>
    %1555 = arith.maximumf %1553, %1554 : vector<16x128xf32>
    %c192 = arith.constant 192 : index
    %1556 = memref.load %arg5[%c192] : memref<256xf32, #tpu.memory_space<smem>>
    %1557 = vector.broadcast %1556 : f32 to vector<16x128xf32>
    %1558 = arith.mulf %579, %1557 : vector<16x128xf32>
    %c200 = arith.constant 200 : index
    %1559 = memref.load %arg5[%c200] : memref<256xf32, #tpu.memory_space<smem>>
    %1560 = vector.broadcast %1559 : f32 to vector<16x128xf32>
    %1561 = arith.mulf %635, %1560 : vector<16x128xf32>
    %c193 = arith.constant 193 : index
    %1562 = memref.load %arg5[%c193] : memref<256xf32, #tpu.memory_space<smem>>
    %1563 = vector.broadcast %1562 : f32 to vector<16x128xf32>
    %1564 = arith.mulf %586, %1563 : vector<16x128xf32>
    %1565 = arith.addf %1558, %1564 : vector<16x128xf32>
    %c194 = arith.constant 194 : index
    %1566 = memref.load %arg5[%c194] : memref<256xf32, #tpu.memory_space<smem>>
    %1567 = vector.broadcast %1566 : f32 to vector<16x128xf32>
    %1568 = arith.mulf %593, %1567 : vector<16x128xf32>
    %1569 = arith.addf %1565, %1568 : vector<16x128xf32>
    %c195 = arith.constant 195 : index
    %1570 = memref.load %arg5[%c195] : memref<256xf32, #tpu.memory_space<smem>>
    %1571 = vector.broadcast %1570 : f32 to vector<16x128xf32>
    %1572 = arith.mulf %600, %1571 : vector<16x128xf32>
    %1573 = arith.addf %1569, %1572 : vector<16x128xf32>
    %c196 = arith.constant 196 : index
    %1574 = memref.load %arg5[%c196] : memref<256xf32, #tpu.memory_space<smem>>
    %1575 = vector.broadcast %1574 : f32 to vector<16x128xf32>
    %1576 = arith.mulf %607, %1575 : vector<16x128xf32>
    %1577 = arith.addf %1573, %1576 : vector<16x128xf32>
    %c197 = arith.constant 197 : index
    %1578 = memref.load %arg5[%c197] : memref<256xf32, #tpu.memory_space<smem>>
    %1579 = vector.broadcast %1578 : f32 to vector<16x128xf32>
    %1580 = arith.mulf %614, %1579 : vector<16x128xf32>
    %1581 = arith.addf %1577, %1580 : vector<16x128xf32>
    %c198 = arith.constant 198 : index
    %1582 = memref.load %arg5[%c198] : memref<256xf32, #tpu.memory_space<smem>>
    %1583 = vector.broadcast %1582 : f32 to vector<16x128xf32>
    %1584 = arith.mulf %621, %1583 : vector<16x128xf32>
    %1585 = arith.addf %1581, %1584 : vector<16x128xf32>
    %c199 = arith.constant 199 : index
    %1586 = memref.load %arg5[%c199] : memref<256xf32, #tpu.memory_space<smem>>
    %1587 = vector.broadcast %1586 : f32 to vector<16x128xf32>
    %1588 = arith.mulf %628, %1587 : vector<16x128xf32>
    %1589 = arith.addf %1585, %1588 : vector<16x128xf32>
    %c201 = arith.constant 201 : index
    %1590 = memref.load %arg5[%c201] : memref<256xf32, #tpu.memory_space<smem>>
    %1591 = vector.broadcast %1590 : f32 to vector<16x128xf32>
    %1592 = arith.mulf %642, %1591 : vector<16x128xf32>
    %1593 = arith.addf %1561, %1592 : vector<16x128xf32>
    %c202 = arith.constant 202 : index
    %1594 = memref.load %arg5[%c202] : memref<256xf32, #tpu.memory_space<smem>>
    %1595 = vector.broadcast %1594 : f32 to vector<16x128xf32>
    %1596 = arith.mulf %649, %1595 : vector<16x128xf32>
    %1597 = arith.addf %1593, %1596 : vector<16x128xf32>
    %c203 = arith.constant 203 : index
    %1598 = memref.load %arg5[%c203] : memref<256xf32, #tpu.memory_space<smem>>
    %1599 = vector.broadcast %1598 : f32 to vector<16x128xf32>
    %1600 = arith.mulf %656, %1599 : vector<16x128xf32>
    %1601 = arith.addf %1597, %1600 : vector<16x128xf32>
    %c204 = arith.constant 204 : index
    %1602 = memref.load %arg5[%c204] : memref<256xf32, #tpu.memory_space<smem>>
    %1603 = vector.broadcast %1602 : f32 to vector<16x128xf32>
    %1604 = arith.mulf %663, %1603 : vector<16x128xf32>
    %1605 = arith.addf %1601, %1604 : vector<16x128xf32>
    %c205 = arith.constant 205 : index
    %1606 = memref.load %arg5[%c205] : memref<256xf32, #tpu.memory_space<smem>>
    %1607 = vector.broadcast %1606 : f32 to vector<16x128xf32>
    %1608 = arith.mulf %670, %1607 : vector<16x128xf32>
    %1609 = arith.addf %1605, %1608 : vector<16x128xf32>
    %c206 = arith.constant 206 : index
    %1610 = memref.load %arg5[%c206] : memref<256xf32, #tpu.memory_space<smem>>
    %1611 = vector.broadcast %1610 : f32 to vector<16x128xf32>
    %1612 = arith.mulf %677, %1611 : vector<16x128xf32>
    %1613 = arith.addf %1609, %1612 : vector<16x128xf32>
    %c207 = arith.constant 207 : index
    %1614 = memref.load %arg5[%c207] : memref<256xf32, #tpu.memory_space<smem>>
    %1615 = vector.broadcast %1614 : f32 to vector<16x128xf32>
    %1616 = arith.mulf %684, %1615 : vector<16x128xf32>
    %1617 = arith.addf %1613, %1616 : vector<16x128xf32>
    %1618 = arith.addf %1589, %1617 : vector<16x128xf32>
    %1619 = arith.mulf %1555, %1618 : vector<16x128xf32>
    %1620 = arith.addf %1548, %1619 : vector<16x128xf32>
    %cst_268 = arith.constant 1.300000e+01 : f32
    %1621 = vector.broadcast %cst_268 : f32 to vector<16x128xf32>
    %1622 = arith.subf %572, %1621 : vector<16x128xf32>
    %1623 = math.absf %1622 : vector<16x128xf32>
    %cst_269 = arith.constant 1.000000e+00 : f32
    %1624 = vector.broadcast %cst_269 : f32 to vector<16x128xf32>
    %1625 = arith.subf %1624, %1623 : vector<16x128xf32>
    %cst_270 = arith.constant 0.000000e+00 : f32
    %1626 = vector.broadcast %cst_270 : f32 to vector<16x128xf32>
    %1627 = arith.maximumf %1625, %1626 : vector<16x128xf32>
    %c208 = arith.constant 208 : index
    %1628 = memref.load %arg5[%c208] : memref<256xf32, #tpu.memory_space<smem>>
    %1629 = vector.broadcast %1628 : f32 to vector<16x128xf32>
    %1630 = arith.mulf %579, %1629 : vector<16x128xf32>
    %c216 = arith.constant 216 : index
    %1631 = memref.load %arg5[%c216] : memref<256xf32, #tpu.memory_space<smem>>
    %1632 = vector.broadcast %1631 : f32 to vector<16x128xf32>
    %1633 = arith.mulf %635, %1632 : vector<16x128xf32>
    %c209 = arith.constant 209 : index
    %1634 = memref.load %arg5[%c209] : memref<256xf32, #tpu.memory_space<smem>>
    %1635 = vector.broadcast %1634 : f32 to vector<16x128xf32>
    %1636 = arith.mulf %586, %1635 : vector<16x128xf32>
    %1637 = arith.addf %1630, %1636 : vector<16x128xf32>
    %c210 = arith.constant 210 : index
    %1638 = memref.load %arg5[%c210] : memref<256xf32, #tpu.memory_space<smem>>
    %1639 = vector.broadcast %1638 : f32 to vector<16x128xf32>
    %1640 = arith.mulf %593, %1639 : vector<16x128xf32>
    %1641 = arith.addf %1637, %1640 : vector<16x128xf32>
    %c211 = arith.constant 211 : index
    %1642 = memref.load %arg5[%c211] : memref<256xf32, #tpu.memory_space<smem>>
    %1643 = vector.broadcast %1642 : f32 to vector<16x128xf32>
    %1644 = arith.mulf %600, %1643 : vector<16x128xf32>
    %1645 = arith.addf %1641, %1644 : vector<16x128xf32>
    %c212 = arith.constant 212 : index
    %1646 = memref.load %arg5[%c212] : memref<256xf32, #tpu.memory_space<smem>>
    %1647 = vector.broadcast %1646 : f32 to vector<16x128xf32>
    %1648 = arith.mulf %607, %1647 : vector<16x128xf32>
    %1649 = arith.addf %1645, %1648 : vector<16x128xf32>
    %c213 = arith.constant 213 : index
    %1650 = memref.load %arg5[%c213] : memref<256xf32, #tpu.memory_space<smem>>
    %1651 = vector.broadcast %1650 : f32 to vector<16x128xf32>
    %1652 = arith.mulf %614, %1651 : vector<16x128xf32>
    %1653 = arith.addf %1649, %1652 : vector<16x128xf32>
    %c214 = arith.constant 214 : index
    %1654 = memref.load %arg5[%c214] : memref<256xf32, #tpu.memory_space<smem>>
    %1655 = vector.broadcast %1654 : f32 to vector<16x128xf32>
    %1656 = arith.mulf %621, %1655 : vector<16x128xf32>
    %1657 = arith.addf %1653, %1656 : vector<16x128xf32>
    %c215 = arith.constant 215 : index
    %1658 = memref.load %arg5[%c215] : memref<256xf32, #tpu.memory_space<smem>>
    %1659 = vector.broadcast %1658 : f32 to vector<16x128xf32>
    %1660 = arith.mulf %628, %1659 : vector<16x128xf32>
    %1661 = arith.addf %1657, %1660 : vector<16x128xf32>
    %c217 = arith.constant 217 : index
    %1662 = memref.load %arg5[%c217] : memref<256xf32, #tpu.memory_space<smem>>
    %1663 = vector.broadcast %1662 : f32 to vector<16x128xf32>
    %1664 = arith.mulf %642, %1663 : vector<16x128xf32>
    %1665 = arith.addf %1633, %1664 : vector<16x128xf32>
    %c218 = arith.constant 218 : index
    %1666 = memref.load %arg5[%c218] : memref<256xf32, #tpu.memory_space<smem>>
    %1667 = vector.broadcast %1666 : f32 to vector<16x128xf32>
    %1668 = arith.mulf %649, %1667 : vector<16x128xf32>
    %1669 = arith.addf %1665, %1668 : vector<16x128xf32>
    %c219 = arith.constant 219 : index
    %1670 = memref.load %arg5[%c219] : memref<256xf32, #tpu.memory_space<smem>>
    %1671 = vector.broadcast %1670 : f32 to vector<16x128xf32>
    %1672 = arith.mulf %656, %1671 : vector<16x128xf32>
    %1673 = arith.addf %1669, %1672 : vector<16x128xf32>
    %c220 = arith.constant 220 : index
    %1674 = memref.load %arg5[%c220] : memref<256xf32, #tpu.memory_space<smem>>
    %1675 = vector.broadcast %1674 : f32 to vector<16x128xf32>
    %1676 = arith.mulf %663, %1675 : vector<16x128xf32>
    %1677 = arith.addf %1673, %1676 : vector<16x128xf32>
    %c221 = arith.constant 221 : index
    %1678 = memref.load %arg5[%c221] : memref<256xf32, #tpu.memory_space<smem>>
    %1679 = vector.broadcast %1678 : f32 to vector<16x128xf32>
    %1680 = arith.mulf %670, %1679 : vector<16x128xf32>
    %1681 = arith.addf %1677, %1680 : vector<16x128xf32>
    %c222 = arith.constant 222 : index
    %1682 = memref.load %arg5[%c222] : memref<256xf32, #tpu.memory_space<smem>>
    %1683 = vector.broadcast %1682 : f32 to vector<16x128xf32>
    %1684 = arith.mulf %677, %1683 : vector<16x128xf32>
    %1685 = arith.addf %1681, %1684 : vector<16x128xf32>
    %c223 = arith.constant 223 : index
    %1686 = memref.load %arg5[%c223] : memref<256xf32, #tpu.memory_space<smem>>
    %1687 = vector.broadcast %1686 : f32 to vector<16x128xf32>
    %1688 = arith.mulf %684, %1687 : vector<16x128xf32>
    %1689 = arith.addf %1685, %1688 : vector<16x128xf32>
    %1690 = arith.addf %1661, %1689 : vector<16x128xf32>
    %1691 = arith.mulf %1627, %1690 : vector<16x128xf32>
    %1692 = arith.addf %1620, %1691 : vector<16x128xf32>
    %cst_271 = arith.constant 1.400000e+01 : f32
    %1693 = vector.broadcast %cst_271 : f32 to vector<16x128xf32>
    %1694 = arith.subf %572, %1693 : vector<16x128xf32>
    %1695 = math.absf %1694 : vector<16x128xf32>
    %cst_272 = arith.constant 1.000000e+00 : f32
    %1696 = vector.broadcast %cst_272 : f32 to vector<16x128xf32>
    %1697 = arith.subf %1696, %1695 : vector<16x128xf32>
    %cst_273 = arith.constant 0.000000e+00 : f32
    %1698 = vector.broadcast %cst_273 : f32 to vector<16x128xf32>
    %1699 = arith.maximumf %1697, %1698 : vector<16x128xf32>
    %c224 = arith.constant 224 : index
    %1700 = memref.load %arg5[%c224] : memref<256xf32, #tpu.memory_space<smem>>
    %1701 = vector.broadcast %1700 : f32 to vector<16x128xf32>
    %1702 = arith.mulf %579, %1701 : vector<16x128xf32>
    %c232 = arith.constant 232 : index
    %1703 = memref.load %arg5[%c232] : memref<256xf32, #tpu.memory_space<smem>>
    %1704 = vector.broadcast %1703 : f32 to vector<16x128xf32>
    %1705 = arith.mulf %635, %1704 : vector<16x128xf32>
    %c225 = arith.constant 225 : index
    %1706 = memref.load %arg5[%c225] : memref<256xf32, #tpu.memory_space<smem>>
    %1707 = vector.broadcast %1706 : f32 to vector<16x128xf32>
    %1708 = arith.mulf %586, %1707 : vector<16x128xf32>
    %1709 = arith.addf %1702, %1708 : vector<16x128xf32>
    %c226 = arith.constant 226 : index
    %1710 = memref.load %arg5[%c226] : memref<256xf32, #tpu.memory_space<smem>>
    %1711 = vector.broadcast %1710 : f32 to vector<16x128xf32>
    %1712 = arith.mulf %593, %1711 : vector<16x128xf32>
    %1713 = arith.addf %1709, %1712 : vector<16x128xf32>
    %c227 = arith.constant 227 : index
    %1714 = memref.load %arg5[%c227] : memref<256xf32, #tpu.memory_space<smem>>
    %1715 = vector.broadcast %1714 : f32 to vector<16x128xf32>
    %1716 = arith.mulf %600, %1715 : vector<16x128xf32>
    %1717 = arith.addf %1713, %1716 : vector<16x128xf32>
    %c228 = arith.constant 228 : index
    %1718 = memref.load %arg5[%c228] : memref<256xf32, #tpu.memory_space<smem>>
    %1719 = vector.broadcast %1718 : f32 to vector<16x128xf32>
    %1720 = arith.mulf %607, %1719 : vector<16x128xf32>
    %1721 = arith.addf %1717, %1720 : vector<16x128xf32>
    %c229 = arith.constant 229 : index
    %1722 = memref.load %arg5[%c229] : memref<256xf32, #tpu.memory_space<smem>>
    %1723 = vector.broadcast %1722 : f32 to vector<16x128xf32>
    %1724 = arith.mulf %614, %1723 : vector<16x128xf32>
    %1725 = arith.addf %1721, %1724 : vector<16x128xf32>
    %c230 = arith.constant 230 : index
    %1726 = memref.load %arg5[%c230] : memref<256xf32, #tpu.memory_space<smem>>
    %1727 = vector.broadcast %1726 : f32 to vector<16x128xf32>
    %1728 = arith.mulf %621, %1727 : vector<16x128xf32>
    %1729 = arith.addf %1725, %1728 : vector<16x128xf32>
    %c231 = arith.constant 231 : index
    %1730 = memref.load %arg5[%c231] : memref<256xf32, #tpu.memory_space<smem>>
    %1731 = vector.broadcast %1730 : f32 to vector<16x128xf32>
    %1732 = arith.mulf %628, %1731 : vector<16x128xf32>
    %1733 = arith.addf %1729, %1732 : vector<16x128xf32>
    %c233 = arith.constant 233 : index
    %1734 = memref.load %arg5[%c233] : memref<256xf32, #tpu.memory_space<smem>>
    %1735 = vector.broadcast %1734 : f32 to vector<16x128xf32>
    %1736 = arith.mulf %642, %1735 : vector<16x128xf32>
    %1737 = arith.addf %1705, %1736 : vector<16x128xf32>
    %c234 = arith.constant 234 : index
    %1738 = memref.load %arg5[%c234] : memref<256xf32, #tpu.memory_space<smem>>
    %1739 = vector.broadcast %1738 : f32 to vector<16x128xf32>
    %1740 = arith.mulf %649, %1739 : vector<16x128xf32>
    %1741 = arith.addf %1737, %1740 : vector<16x128xf32>
    %c235 = arith.constant 235 : index
    %1742 = memref.load %arg5[%c235] : memref<256xf32, #tpu.memory_space<smem>>
    %1743 = vector.broadcast %1742 : f32 to vector<16x128xf32>
    %1744 = arith.mulf %656, %1743 : vector<16x128xf32>
    %1745 = arith.addf %1741, %1744 : vector<16x128xf32>
    %c236 = arith.constant 236 : index
    %1746 = memref.load %arg5[%c236] : memref<256xf32, #tpu.memory_space<smem>>
    %1747 = vector.broadcast %1746 : f32 to vector<16x128xf32>
    %1748 = arith.mulf %663, %1747 : vector<16x128xf32>
    %1749 = arith.addf %1745, %1748 : vector<16x128xf32>
    %c237 = arith.constant 237 : index
    %1750 = memref.load %arg5[%c237] : memref<256xf32, #tpu.memory_space<smem>>
    %1751 = vector.broadcast %1750 : f32 to vector<16x128xf32>
    %1752 = arith.mulf %670, %1751 : vector<16x128xf32>
    %1753 = arith.addf %1749, %1752 : vector<16x128xf32>
    %c238 = arith.constant 238 : index
    %1754 = memref.load %arg5[%c238] : memref<256xf32, #tpu.memory_space<smem>>
    %1755 = vector.broadcast %1754 : f32 to vector<16x128xf32>
    %1756 = arith.mulf %677, %1755 : vector<16x128xf32>
    %1757 = arith.addf %1753, %1756 : vector<16x128xf32>
    %c239 = arith.constant 239 : index
    %1758 = memref.load %arg5[%c239] : memref<256xf32, #tpu.memory_space<smem>>
    %1759 = vector.broadcast %1758 : f32 to vector<16x128xf32>
    %1760 = arith.mulf %684, %1759 : vector<16x128xf32>
    %1761 = arith.addf %1757, %1760 : vector<16x128xf32>
    %1762 = arith.addf %1733, %1761 : vector<16x128xf32>
    %1763 = arith.mulf %1699, %1762 : vector<16x128xf32>
    %1764 = arith.addf %1692, %1763 : vector<16x128xf32>
    %cst_274 = arith.constant 1.500000e+01 : f32
    %1765 = vector.broadcast %cst_274 : f32 to vector<16x128xf32>
    %1766 = arith.subf %572, %1765 : vector<16x128xf32>
    %1767 = math.absf %1766 : vector<16x128xf32>
    %cst_275 = arith.constant 1.000000e+00 : f32
    %1768 = vector.broadcast %cst_275 : f32 to vector<16x128xf32>
    %1769 = arith.subf %1768, %1767 : vector<16x128xf32>
    %cst_276 = arith.constant 0.000000e+00 : f32
    %1770 = vector.broadcast %cst_276 : f32 to vector<16x128xf32>
    %1771 = arith.maximumf %1769, %1770 : vector<16x128xf32>
    %c240 = arith.constant 240 : index
    %1772 = memref.load %arg5[%c240] : memref<256xf32, #tpu.memory_space<smem>>
    %1773 = vector.broadcast %1772 : f32 to vector<16x128xf32>
    %1774 = arith.mulf %579, %1773 : vector<16x128xf32>
    %c248 = arith.constant 248 : index
    %1775 = memref.load %arg5[%c248] : memref<256xf32, #tpu.memory_space<smem>>
    %1776 = vector.broadcast %1775 : f32 to vector<16x128xf32>
    %1777 = arith.mulf %635, %1776 : vector<16x128xf32>
    %c241 = arith.constant 241 : index
    %1778 = memref.load %arg5[%c241] : memref<256xf32, #tpu.memory_space<smem>>
    %1779 = vector.broadcast %1778 : f32 to vector<16x128xf32>
    %1780 = arith.mulf %586, %1779 : vector<16x128xf32>
    %1781 = arith.addf %1774, %1780 : vector<16x128xf32>
    %c242 = arith.constant 242 : index
    %1782 = memref.load %arg5[%c242] : memref<256xf32, #tpu.memory_space<smem>>
    %1783 = vector.broadcast %1782 : f32 to vector<16x128xf32>
    %1784 = arith.mulf %593, %1783 : vector<16x128xf32>
    %1785 = arith.addf %1781, %1784 : vector<16x128xf32>
    %c243 = arith.constant 243 : index
    %1786 = memref.load %arg5[%c243] : memref<256xf32, #tpu.memory_space<smem>>
    %1787 = vector.broadcast %1786 : f32 to vector<16x128xf32>
    %1788 = arith.mulf %600, %1787 : vector<16x128xf32>
    %1789 = arith.addf %1785, %1788 : vector<16x128xf32>
    %c244 = arith.constant 244 : index
    %1790 = memref.load %arg5[%c244] : memref<256xf32, #tpu.memory_space<smem>>
    %1791 = vector.broadcast %1790 : f32 to vector<16x128xf32>
    %1792 = arith.mulf %607, %1791 : vector<16x128xf32>
    %1793 = arith.addf %1789, %1792 : vector<16x128xf32>
    %c245 = arith.constant 245 : index
    %1794 = memref.load %arg5[%c245] : memref<256xf32, #tpu.memory_space<smem>>
    %1795 = vector.broadcast %1794 : f32 to vector<16x128xf32>
    %1796 = arith.mulf %614, %1795 : vector<16x128xf32>
    %1797 = arith.addf %1793, %1796 : vector<16x128xf32>
    %c246 = arith.constant 246 : index
    %1798 = memref.load %arg5[%c246] : memref<256xf32, #tpu.memory_space<smem>>
    %1799 = vector.broadcast %1798 : f32 to vector<16x128xf32>
    %1800 = arith.mulf %621, %1799 : vector<16x128xf32>
    %1801 = arith.addf %1797, %1800 : vector<16x128xf32>
    %c247 = arith.constant 247 : index
    %1802 = memref.load %arg5[%c247] : memref<256xf32, #tpu.memory_space<smem>>
    %1803 = vector.broadcast %1802 : f32 to vector<16x128xf32>
    %1804 = arith.mulf %628, %1803 : vector<16x128xf32>
    %1805 = arith.addf %1801, %1804 : vector<16x128xf32>
    %c249 = arith.constant 249 : index
    %1806 = memref.load %arg5[%c249] : memref<256xf32, #tpu.memory_space<smem>>
    %1807 = vector.broadcast %1806 : f32 to vector<16x128xf32>
    %1808 = arith.mulf %642, %1807 : vector<16x128xf32>
    %1809 = arith.addf %1777, %1808 : vector<16x128xf32>
    %c250 = arith.constant 250 : index
    %1810 = memref.load %arg5[%c250] : memref<256xf32, #tpu.memory_space<smem>>
    %1811 = vector.broadcast %1810 : f32 to vector<16x128xf32>
    %1812 = arith.mulf %649, %1811 : vector<16x128xf32>
    %1813 = arith.addf %1809, %1812 : vector<16x128xf32>
    %c251 = arith.constant 251 : index
    %1814 = memref.load %arg5[%c251] : memref<256xf32, #tpu.memory_space<smem>>
    %1815 = vector.broadcast %1814 : f32 to vector<16x128xf32>
    %1816 = arith.mulf %656, %1815 : vector<16x128xf32>
    %1817 = arith.addf %1813, %1816 : vector<16x128xf32>
    %c252 = arith.constant 252 : index
    %1818 = memref.load %arg5[%c252] : memref<256xf32, #tpu.memory_space<smem>>
    %1819 = vector.broadcast %1818 : f32 to vector<16x128xf32>
    %1820 = arith.mulf %663, %1819 : vector<16x128xf32>
    %1821 = arith.addf %1817, %1820 : vector<16x128xf32>
    %c253 = arith.constant 253 : index
    %1822 = memref.load %arg5[%c253] : memref<256xf32, #tpu.memory_space<smem>>
    %1823 = vector.broadcast %1822 : f32 to vector<16x128xf32>
    %1824 = arith.mulf %670, %1823 : vector<16x128xf32>
    %1825 = arith.addf %1821, %1824 : vector<16x128xf32>
    %c254 = arith.constant 254 : index
    %1826 = memref.load %arg5[%c254] : memref<256xf32, #tpu.memory_space<smem>>
    %1827 = vector.broadcast %1826 : f32 to vector<16x128xf32>
    %1828 = arith.mulf %677, %1827 : vector<16x128xf32>
    %1829 = arith.addf %1825, %1828 : vector<16x128xf32>
    %c255 = arith.constant 255 : index
    %1830 = memref.load %arg5[%c255] : memref<256xf32, #tpu.memory_space<smem>>
    %1831 = vector.broadcast %1830 : f32 to vector<16x128xf32>
    %1832 = arith.mulf %684, %1831 : vector<16x128xf32>
    %1833 = arith.addf %1829, %1832 : vector<16x128xf32>
    %1834 = arith.addf %1805, %1833 : vector<16x128xf32>
    %1835 = arith.mulf %1771, %1834 : vector<16x128xf32>
    %1836 = arith.addf %1764, %1835 : vector<16x128xf32>
    %1837 = arith.index_cast %3 : i32 to index
    %c0_277 = arith.constant 0 : index
    %1838 = vector.load %arg6[%1837, %c0_277] : memref<16x128xf32, #tpu.memory_space<vmem>>, vector<16x128xf32>
    tpu.vector_store %arg6[%1837, %c0_277], %1836 {strides = array<i32>} : memref<16x128xf32, #tpu.memory_space<vmem>>, vector<16x128xf32>,
    %c1_i32_278 = arith.constant 1 : i32
    return
  }
  func.func @transform_0(%arg0: i32) -> (i32, i32, i32) {
    %c0_i32 = arith.constant 0 : i32
    %c0_i32_0 = arith.constant 0 : i32
    %c0_i32_1 = arith.constant 0 : i32
    return %c0_i32, %arg0, %c0_i32_0 : i32, i32, i32
  }
  func.func @transform_1(%arg0: i32) -> i32 {
    %c0_i32 = arith.constant 0 : i32
    %c0_i32_0 = arith.constant 0 : i32
    return %c0_i32 : i32
  }
  func.func @transform_2(%arg0: i32) -> i32 {
    %c0_i32 = arith.constant 0 : i32
    %c0_i32_0 = arith.constant 0 : i32
    return %c0_i32 : i32
  }
  func.func @transform_3(%arg0: i32) -> i32 {
    %c0_i32 = arith.constant 0 : i32
    %c0_i32_0 = arith.constant 0 : i32
    return %c0_i32 : i32
  }
  func.func @transform_4(%arg0: i32) -> i32 {
    %c0_i32 = arith.constant 0 : i32
    %c0_i32_0 = arith.constant 0 : i32
    return %c0_i32 : i32
  }
  func.func @transform_5(%arg0: i32) -> (i32, i32) {
    %c0_i32 = arith.constant 0 : i32
    %c0_i32_0 = arith.constant 0 : i32
    return %arg0, %c0_i32 : i32, i32
  }
}

</mosaic_0001>

<bundles_post_ra>
// kernel: tpu_custom_call.1
= control target key start
LH: loop header
LB: loop body
LE: loop exit
PB: predicated region body
PF: predicated region fallthrough
CT: control target
= control target key end

     0   :  { %10 = vsyncpa [#allocation3], 0  ;;  %s5590_s0 = inlined_call_operand.hbm [shape: f32[2,16,128], index: 0, kind: input, shape index: {}]   ;;  %s5591_s1 = inlined_call_operand.hbm [shape: f32[4], index: 1, kind: input, shape index: {}]   ;;  %s5592_s2 = inlined_call_operand.vmem [shape: f32[16], index: 2, kind: input, shape index: {}]   ;;  %s5593_s3 = inlined_call_operand.hbm [shape: f32[64], index: 3, kind: input, shape index: {}]   ;;  %s5594_s4 = inlined_call_operand.vmem [shape: f32[256], index: 4, kind: input, shape index: {}]   ;;  %s5595_s5 = inlined_call_operand.hbm [shape: f32[16,128], index: 5, kind: output, shape index: {}]  }
   0x1   :  { %11 = vsyncpa [#allocation5], 0 }
   0x2   :  { %12 = vsyncpa [#allocation6], 0 }
   0x3   :  { %13 = vsyncpa [#allocation10], 0 }
   0x4   :  { %14 = vsyncpa [#allocation12], 0 }
   0x5   :  { %15 = vsyncpa [#allocation4], 0  ;;  %s20_s20 = sshll.u32 %s5590_s0, 4  ;;  %s3254_s21 = smov [#allocation2]   ;;  %s21_s20 = int_to_ptr.hbm [resolvable:$true] %s20_s20 }
   0x6   :  { %s22_s22 = sshll.u32 %s3254_s21, 4  ;;  %s34_s25 = sshll.u32 %s5591_s1, 4  ;;  %s23_s22 = int_to_ptr.vmem [resolvable:$true] %s22_s22  ;;  %s35_s25 = int_to_ptr.hbm [resolvable:$true] %s34_s25 }
   0x7   :  { %s3255_s26 = smov 128   ;;  %s3256_s27 = smov 8  }
   0x8   :  { %28 = dma.hbm_to_vmem [thread:$0]  %s21_s20, 512, %s23_s22, [#allocation3], %s3255_s26, %s3255_s26, %s3256_s27  }
   0x9   :  { %s3257_s28 = smov [#allocation7]   ;;  %s43_s0 = sshll.u32 %s5592_s2, 4  ;;  %s44_s0 = int_to_ptr.vmem [resolvable:$true] %s43_s0 }
   0xa   :  { %37 = dma.hbm_to_smem %s35_s25, 16, %s3257_s28, [#allocation5]  }
   0xb   :  { %s52_s8 = sshll.u32 %s5593_s3, 4  ;;  %s3258_s9 = smov [#allocation8]   ;;  %s53_s8 = int_to_ptr.hbm [resolvable:$true] %s52_s8 }
   0xc   :  { %46 = dma.vmem_to_smem %s44_s0, 16, %s3258_s9, [#allocation6]  }
   0xd   :  { %s3259_s1 = smov [#allocation9]   ;;  %s61_s12 = sshll.u32 %s5594_s4, 4  ;;  %s62_s12 = int_to_ptr.vmem [resolvable:$true] %s61_s12 }
   0xe   :  { %55 = dma.hbm_to_smem %s53_s8, 16, %s3259_s1, [#allocation10]  }
   0xf   :  { %s3260_s13 = smov [#allocation11]  }
  0x10   :  { %64 = dma.vmem_to_smem %s62_s12, 32, %s3260_s13, [#allocation12]  }
  0x11   :  { %3242 = dma.done.wait [#allocation3], 512  }
  0x12   :  { %3243 = vsyncadd [#allocation3], 4294966784 }
  0x13   :  { %3244 = dma.done.wait [#allocation5], 16  }
  0x14   :  { %3245 = vsyncadd [#allocation5], 4294967280 }
  0x15   :  { %3246 = dma.done.wait [#allocation6], 16  }
  0x16   :  { %3247 = vsyncadd [#allocation6], 4294967280 }
  0x17   :  { %3248 = dma.done.wait [#allocation10], 16  }
  0x18   :  { %3249 = vsyncadd [#allocation10], 4294967280 }
  0x19   :  { %3250 = dma.done.wait [#allocation12], 32  }
  0x1a   :  { %3251 = vsyncadd [#allocation12], 4294967264 }
  0x1b   :  { %85 = sfence }
  0x1c   :  { %v3310_v0 = vld [vmem:[#allocation2] sm:$0xff]  ;;  %v3312_v1 = vld [vmem:[#allocation2 + $0x8] sm:$0xff]  ;;  %v3314_v2 = vld [vmem:[#allocation2 + $0x10] sm:$0xff]  ;;  %s112_s2 = sld [smem:[#allocation7]] }
  0x1d   :  { %v3316_v3 = vld [vmem:[#allocation2 + $0x18] sm:$0xff]  ;;  %v92_v4 = vand.u32 2147483647, %v3310_v0  ;;  %v93_v5 = vand.u32 2147483647, %v3312_v1  ;;  %v2694_v6 = vadd.f32 -1.0, %v3310_v0 }
  0x1e   :  { %v2695_v7 = vadd.f32 -1.0, %v3312_v1  ;;  %v106_v8 = vand.u32 2147483647, %v3314_v2  ;;  %v107_v9 = vand.u32 2147483647, %v3316_v3  ;;  %v2697_v10 = vadd.f32 -1.0, %v3314_v2 }
  0x1f   :  { %v94_v11 = vsub.f32 1.0, %v92_v4  ;;  %v95_v12 = vsub.f32 1.0, %v93_v5  ;;  %v100_v13 = vand.u32 2147483647, %v2694_v6  ;;  %s2696_s3 = sld [smem:[#allocation7 + $0x1]]  ;;  %v2698_v17 = vadd.f32 -1.0, %v3316_v3 }
  0x20   :  { %v101_v14 = vand.u32 2147483647, %v2695_v7  ;;  %v108_v15 = vsub.f32 1.0, %v106_v8  ;;  %v109_v16 = vsub.f32 1.0, %v107_v9  ;;  %v128_v21 = vand.u32 2147483647, %v2697_v10 }
  0x21   :  { %v96_v18 = vmax.f32 %v94_v11, 0.0  ;;  %v97_v19 = vmax.f32 %v95_v12, 0.0  ;;  %v102_v20 = vsub.f32 1.0, %v100_v13  ;;  %s2699_s4 = sld [smem:[#allocation7 + $0x2]]  ;;  %v129_v27 = vand.u32 2147483647, %v2698_v17 }
  0x22   :  { %v103_v22 = vsub.f32 1.0, %v101_v14  ;;  %v113_v23 = vstv %s112_s2  ;;  %s2700_s14 = sld [smem:[#allocation7 + $0x3]]  ;;  %v130_v29 = vsub.f32 1.0, %v128_v21  ;;  %v148_v30 = vmul.f32 3.0, %v3310_v0 }
  0x23   :  { %v104_v24 = vmax.f32 %v102_v20, 0.0  ;;  %v114_v25 = vmul.f32 %v113_v23, %v96_v18  ;;  %v115_v26 = vmul.f32 %v113_v23, %v97_v19  ;;  %v149_v31 = vmul.f32 3.0, %v3312_v1  ;;  %s3334_s15 = sld [smem:[#allocation8]] }
  0x24   :  { %v105_v28 = vmax.f32 %v103_v22, 0.0  ;;  %v110_v32 = vmax.f32 %v108_v15, 0.0  ;;  %v111_v33 = vmax.f32 %v109_v16, 0.0  ;;  %v131_v35 = vsub.f32 1.0, %v129_v27  ;;  %s3336_s16 = sld [smem:[#allocation8 + $0x1]] }
  0x25   :  { %v117_v34 = vstv %s2696_s3  ;;  %v3329_v38 = vmul.f32 3.0, %v3314_v2  ;;  %v152_v39 = vand.u32 2147483647, %v148_v30  ;;  %v3332_v40 = vmul.f32 3.0, %v3316_v3  ;;  %s3342_s17 = sld [smem:[#allocation8 + $0x2]] }
  0x26   :  { %v118_v36 = vmul.f32 %v117_v34, %v104_v24  ;;  %v119_v37 = vmul.f32 %v117_v34, %v105_v28  ;;  %v153_v41 = vand.u32 2147483647, %v149_v31  ;;  %v2701_v42 = vadd.f32 -1.0, %v148_v30  ;;  %s3344_s18 = sld [smem:[#allocation8 + $0x3]] }
  0x27   :  { %v2702_v43 = vadd.f32 -1.0, %v149_v31  ;;  %v132_v46 = vmax.f32 %v130_v29, 0.0  ;;  %v135_v47 = vstv %s2699_s4  ;;  %v133_v48 = vmax.f32 %v131_v35, 0.0  ;;  %s3350_s19 = sld [smem:[#allocation8 + $0x4]] }
  0x28   :  { %v120_v44 = vadd.f32 %v118_v36, %v114_v25  ;;  %v121_v45 = vadd.f32 %v119_v37, %v115_v26  ;;  %v136_v49 = vmul.f32 %v135_v47, %v96_v18  ;;  %v137_v50 = vmul.f32 %v135_v47, %v97_v19  ;;  %s3356_s20 = sld [smem:[#allocation8 + $0x5]] }
  0x29   :  { %v139_v51 = vstv %s2700_s14  ;;  %v154_v54 = vsub.f32 1.0, %v152_v39  ;;  %v155_v55 = vsub.f32 1.0, %v153_v41  ;;  %v160_v58 = vand.u32 2147483647, %v2701_v42  ;;  %s3366_s21 = sld [smem:[#allocation8 + $0x6]] }
  0x2a   :  { %v140_v52 = vmul.f32 %v139_v51, %v104_v24  ;;  %v141_v53 = vmul.f32 %v139_v51, %v105_v28  ;;  %v3338_v56 = vmul.f32 %v120_v44, %v110_v32  ;;  %v3340_v57 = vmul.f32 %v121_v45, %v111_v33  ;;  %s3372_s22 = sld [smem:[#allocation8 + $0x7]] }
  0x2b   :  { %v161_v59 = vand.u32 2147483647, %v2702_v43  ;;  %v2703_v62 = vadd.f32 -2.0, %v148_v30  ;;  %v2704_v63 = vadd.f32 -2.0, %v149_v31  ;;  %v162_v4 = vsub.f32 1.0, %v160_v58  ;;  %s3386_s23 = sld [smem:[#allocation8 + $0x8]] }
  0x2c   :  { %v142_v60 = vadd.f32 %v140_v52, %v136_v49  ;;  %v143_v61 = vadd.f32 %v141_v53, %v137_v50  ;;  %v2705_v6 = vadd.f32 -3.0, %v148_v30  ;;  %v2706_v7 = vadd.f32 -3.0, %v149_v31  ;;  %s3390_s24 = sld [smem:[#allocation8 + $0x9]] }
  0x2d   :  { %v163_v5 = vsub.f32 1.0, %v161_v59  ;;  %v3346_v8 = vmax.f32 %v154_v54, 0.0  ;;  %v3348_v9 = vmax.f32 %v155_v55, 0.0  ;;  %v168_v10 = vand.u32 2147483647, %v2703_v62  ;;  %s3394_s25 = sld [smem:[#allocation8 + $0xa]] }
  0x2e   :  { %v169_v11 = vand.u32 2147483647, %v2704_v63  ;;  %v144_v12 = vmul.f32 %v142_v60, %v132_v46  ;;  %v145_v13 = vmul.f32 %v143_v61, %v133_v48  ;;  %v176_v14 = vand.u32 2147483647, %v2705_v6  ;;  %s3400_s28 = sld [smem:[#allocation8 + $0xb]] }
  0x2f   :  { %v177_v15 = vand.u32 2147483647, %v2706_v7  ;;  %v3352_v16 = vmax.f32 %v162_v4, 0.0  ;;  %v3354_v17 = vmax.f32 %v163_v5, 0.0  ;;  %v170_v18 = vsub.f32 1.0, %v168_v10  ;;  %s3408_s29 = sld [smem:[#allocation8 + $0xc]] }
  0x30   :  { %v171_v19 = vsub.f32 1.0, %v169_v11  ;;  %v178_v20 = vsub.f32 1.0, %v176_v14  ;;  %v182_v22 = vand.u32 2147483647, %v3329_v38  ;;  %v183_v23 = vand.u32 2147483647, %v3332_v40 }
  0x31   :  { %v179_v21 = vsub.f32 1.0, %v177_v15  ;;  %v3360_v24 = vmax.f32 %v170_v18, 0.0  ;;  %v189_v26 = vstv %s3334_s15  ;;  %v193_v27 = vstv %s3336_s16  ;;  %s3412_s30 = sld [smem:[#allocation8 + $0xd]] }
  0x32   :  { %v3362_v25 = vmax.f32 %v171_v19, 0.0  ;;  %v3368_v28 = vmax.f32 %v178_v20, 0.0  ;;  %v184_v30 = vsub.f32 1.0, %v182_v22  ;;  %v185_v31 = vsub.f32 1.0, %v183_v23  ;;  %s3417_s0 = sld [smem:[#allocation8 + $0xe]] }
  0x33   :  { %v3370_v29 = vmax.f32 %v179_v21, 0.0  ;;  %v190_v32 = vmul.f32 %v189_v26, %v3346_v8  ;;  %v191_v33 = vmul.f32 %v189_v26, %v3348_v9  ;;  %v194_v34 = vmul.f32 %v193_v27, %v3352_v16  ;;  %s3423_s6 = sld [smem:[#allocation8 + $0xf]] }
  0x34   :  { %v195_v35 = vmul.f32 %v193_v27, %v3354_v17  ;;  %v186_v36 = vmax.f32 %v184_v30, 0.0  ;;  %v187_v37 = vmax.f32 %v185_v31, 0.0  ;;  %v199_v39 = vstv %s3342_s17  ;;  %s3440_s7 = sld [smem:[#allocation9]] }
  0x35   :  { %v205_v41 = vstv %s3344_s18  ;;  %v196_v42 = vadd.f32 %v194_v34, %v190_v32  ;;  %v200_v44 = vmul.f32 %v199_v39, %v3360_v24  ;;  %v201_v45 = vmul.f32 %v199_v39, %v3362_v25  ;;  %s3444_s8 = sld [smem:[#allocation9 + $0x4]] }
  0x36   :  { %v197_v43 = vadd.f32 %v195_v35, %v191_v33  ;;  %v206_v46 = vmul.f32 %v205_v41, %v3368_v28  ;;  %v207_v47 = vmul.f32 %v205_v41, %v3370_v29  ;;  %v2710_v48 = vadd.f32 -1.0, %v3329_v38  ;;  %s3460_s9 = sld [smem:[#allocation9 + $0x1]] }
  0x37   :  { %v2711_v49 = vadd.f32 -1.0, %v3332_v40  ;;  %v202_v50 = vadd.f32 %v200_v44, %v196_v42  ;;  %v223_v52 = vstv %s3350_s19  ;;  %v227_v53 = vstv %s3356_s20  ;;  %s3485_s1 = sld [smem:[#allocation9 + $0x2]] }
  0x38   :  { %v203_v51 = vadd.f32 %v201_v45, %v197_v43  ;;  %v216_v54 = vand.u32 2147483647, %v2710_v48  ;;  %v224_v58 = vmul.f32 %v223_v52, %v3346_v8  ;;  %v225_v59 = vmul.f32 %v223_v52, %v3348_v9  ;;  %s3493_s10 = sld [smem:[#allocation9 + $0x3]] }
  0x39   :  { %v217_v55 = vand.u32 2147483647, %v2711_v49  ;;  %v208_v60 = vadd.f32 %v206_v46, %v202_v50  ;;  %v228_v62 = vmul.f32 %v227_v53, %v3352_v16  ;;  %v229_v63 = vmul.f32 %v227_v53, %v3354_v17  ;;  %s3501_s11 = sld [smem:[#allocation9 + $0x5]] }
  0x3a   :  { %v209_v61 = vadd.f32 %v207_v47, %v203_v51  ;;  %v233_v4 = vstv %s3366_s21  ;;  %v239_v5 = vstv %s3372_s22  ;;  %v218_v6 = vsub.f32 1.0, %v216_v54  ;;  %s3507_s12 = sld [smem:[#allocation9 + $0x6]] }
  0x3b   :  { %v219_v7 = vsub.f32 1.0, %v217_v55  ;;  %v230_v10 = vadd.f32 %v228_v62, %v224_v58  ;;  %v231_v11 = vadd.f32 %v229_v63, %v225_v59  ;;  %v146_v14 = vadd.f32 %v144_v12, %v3338_v56  ;;  %s3515_s13 = sld [smem:[#allocation9 + $0x7]] }
  0x3c   :  { %v147_v15 = vadd.f32 %v145_v13, %v3340_v57  ;;  %v234_v18 = vmul.f32 %v233_v4, %v3360_v24  ;;  %v235_v19 = vmul.f32 %v233_v4, %v3362_v25  ;;  %v210_v20 = vmul.f32 %v208_v60, %v186_v36  ;;  %s3537_s2 = sld [smem:[#allocation9 + $0x8]] }
  0x3d   :  { %v211_v21 = vmul.f32 %v209_v61, %v187_v37  ;;  %v240_v22 = vmul.f32 %v239_v5, %v3368_v28  ;;  %v241_v23 = vmul.f32 %v239_v5, %v3370_v29  ;;  %v2716_v56 = vadd.f32 -2.0, %v3329_v38  ;;  %s3545_s3 = sld [smem:[#allocation9 + $0xc]] }
  0x3e   :  { %v236_v26 = vadd.f32 %v234_v18, %v230_v10  ;;  %v237_v27 = vadd.f32 %v235_v19, %v231_v11  ;;  %v2717_v57 = vadd.f32 -2.0, %v3332_v40  ;;  %v220_v12 = vmax.f32 %v218_v6, 0.0  ;;  %s3553_s4 = sld [smem:[#allocation9 + $0x9]] }
  0x3f   :  { %v221_v13 = vmax.f32 %v219_v7, 0.0  ;;  %v257_v30 = vstv %s3386_s23  ;;  %v261_v31 = vstv %s3390_s24  ;;  %v250_v33 = vand.u32 2147483647, %v2716_v56  ;;  %s3557_s14 = sld [smem:[#allocation9 + $0xa]] }
  0x40   :  { %v242_v32 = vadd.f32 %v240_v22, %v236_v26  ;;  %v251_v34 = vand.u32 2147483647, %v2717_v57  ;;  %v267_v35 = vstv %s3394_s25  ;;  %v258_v36 = vmul.f32 %v257_v30, %v3346_v8  ;;  %s3567_s15 = sld [smem:[#allocation9 + $0xb]] }
  0x41   :  { %v259_v37 = vmul.f32 %v257_v30, %v3348_v9  ;;  %v262_v39 = vmul.f32 %v261_v31, %v3352_v16  ;;  %v263_v41 = vmul.f32 %v261_v31, %v3354_v17  ;;  %v212_v42 = vadd.f32 %v210_v20, %v146_v14  ;;  %s3571_s16 = sld [smem:[#allocation9 + $0xd]] }
  0x42   :  { %v243_v43 = vadd.f32 %v241_v23, %v237_v27  ;;  %v252_v44 = vsub.f32 1.0, %v250_v33  ;;  %v273_v45 = vstv %s3400_s28  ;;  %v268_v48 = vmul.f32 %v267_v35, %v3360_v24  ;;  %s3579_s17 = sld [smem:[#allocation9 + $0xe]] }
  0x43   :  { %v264_v46 = vadd.f32 %v262_v39, %v258_v36  ;;  %v265_v47 = vadd.f32 %v263_v41, %v259_v37  ;;  %v269_v49 = vmul.f32 %v267_v35, %v3362_v25  ;;  %v213_v50 = vadd.f32 %v211_v21, %v147_v15  ;;  %s3586_s18 = sld [smem:[#allocation9 + $0xf]] }
  0x44   :  { %v244_v51 = vmul.f32 %v242_v32, %v220_v12  ;;  %v253_v52 = vsub.f32 1.0, %v251_v34  ;;  %v254_v53 = vmax.f32 %v252_v44, 0.0  ;;  %v274_v58 = vmul.f32 %v273_v45, %v3368_v28  ;;  %s3594_s19 = sld [smem:[#allocation9 + $0x10]] }
  0x45   :  { %v270_v54 = vadd.f32 %v268_v48, %v264_v46  ;;  %v271_v55 = vadd.f32 %v269_v49, %v265_v47  ;;  %v275_v59 = vmul.f32 %v273_v45, %v3370_v29  ;;  %v2722_v60 = vadd.f32 -3.0, %v3329_v38  ;;  %s3600_s20 = sld [smem:[#allocation9 + $0x14]] }
  0x46   :  { %v2723_v61 = vadd.f32 -3.0, %v3332_v40  ;;  %v291_v62 = vstv %s3408_s29  ;;  %v295_v63 = vstv %s3412_s30  ;;  %v245_v4 = vmul.f32 %v243_v43, %v221_v13  ;;  %s3604_s21 = sld [smem:[#allocation9 + $0x11]] }
  0x47   :  { %v276_v5 = vadd.f32 %v274_v58, %v270_v54  ;;  %v292_v6 = vmul.f32 %v291_v62, %v3346_v8  ;;  %v293_v7 = vmul.f32 %v291_v62, %v3348_v9  ;;  %v246_v10 = vadd.f32 %v244_v51, %v212_v42  ;;  %s3611_s22 = sld [smem:[#allocation9 + $0x12]] }
  0x48   :  { %v284_v11 = vand.u32 2147483647, %v2722_v60  ;;  %v296_v14 = vmul.f32 %v295_v63, %v3352_v16  ;;  %v297_v15 = vmul.f32 %v295_v63, %v3354_v17  ;;  %v255_v18 = vmax.f32 %v253_v52, 0.0  ;;  %s3619_s23 = sld [smem:[#allocation9 + $0x13]] }
  0x49   :  { %v285_v19 = vand.u32 2147483647, %v2723_v61  ;;  %v301_v20 = vstv %s3417_s0  ;;  %v307_v38 = vstv %s3423_s6  ;;  %v277_v21 = vadd.f32 %v275_v59, %v271_v55  ;;  %s3622_s24 = sld [smem:[#allocation9 + $0x15]] }
  0x4a   :  { %v278_v40 = vmul.f32 %v276_v5, %v254_v53  ;;  %v286_v22 = vsub.f32 1.0, %v284_v11  ;;  %v298_v23 = vadd.f32 %v296_v14, %v292_v6  ;;  %v299_v26 = vadd.f32 %v297_v15, %v293_v7  ;;  %s3632_s25 = sld [smem:[#allocation9 + $0x16]] }
  0x4b   :  { %v302_v8 = vmul.f32 %v301_v20, %v3360_v24  ;;  %v303_v9 = vmul.f32 %v301_v20, %v3362_v25  ;;  %v247_v16 = vadd.f32 %v245_v4, %v213_v50  ;;  %v308_v17 = vmul.f32 %v307_v38, %v3368_v28  ;;  %s3635_s28 = sld [smem:[#allocation9 + $0x17]] }
  0x4c   :  { %v3447_v27 = vsub.f32 1.0, %v285_v19  ;;  %v3450_v57 = vmul.f32 7.0, %v3310_v0  ;;  %v3453_v12 = vmul.f32 7.0, %v3312_v1  ;;  %v279_v13 = vmul.f32 %v277_v21, %v255_v18  ;;  %s3644_s29 = sld [smem:[#allocation9 + $0x18]] }
  0x4d   :  { %v304_v56 = vadd.f32 %v302_v8, %v298_v23  ;;  %v3455_v30 = vadd.f32 %v278_v40, %v246_v10  ;;  %v288_v24 = vmax.f32 %v286_v22, 0.0  ;;  %v309_v25 = vmul.f32 %v307_v38, %v3370_v29  ;;  %s3649_s30 = sld [smem:[#allocation9 + $0x1c]] }
  0x4e   :  { %v305_v31 = vadd.f32 %v303_v9, %v299_v26  ;;  %v320_v33 = vand.u32 2147483647, %v3450_v57  ;;  %v321_v28 = vand.u32 2147483647, %v3453_v12  ;;  %v2728_v0 = vadd.f32 -1.0, %v3450_v57  ;;  %s3653_s0 = sld [smem:[#allocation9 + $0x19]] }
  0x4f   :  { %v310_v32 = vadd.f32 %v308_v17, %v304_v56  ;;  %v2729_v1 = vadd.f32 -1.0, %v3453_v12  ;;  %v2730_v34 = vadd.f32 -2.0, %v3450_v57  ;;  %v2731_v35 = vadd.f32 -2.0, %v3453_v12  ;;  %s3658_s6 = sld [smem:[#allocation9 + $0x1a]] }
  0x50   :  { %v289_v29 = vmax.f32 %v3447_v27, 0.0  ;;  %v3468_v36 = vmul.f32 7.0, %v3314_v2  ;;  %v322_v37 = vsub.f32 1.0, %v320_v33  ;;  %v323_v39 = vsub.f32 1.0, %v321_v28 }
  0x51   :  { %v3470_v41 = vadd.f32 %v279_v13, %v247_v16  ;;  %v328_v42 = vand.u32 2147483647, %v2728_v0  ;;  %v329_v43 = vand.u32 2147483647, %v2729_v1  ;;  %v336_v44 = vand.u32 2147483647, %v2730_v34 }
  0x52   :  { %v3472_v45 = vadd.f32 %v309_v25, %v305_v31  ;;  %v3475_v46 = vmul.f32 7.0, %v3316_v3  ;;  %v389_v47 = vstv %s3440_s7  ;;  %v393_v48 = vstv %s3444_s8  ;;  %s3666_s7 = sld [smem:[#allocation9 + $0x1b]] }
  0x53   :  { %v3479_v49 = vmul.f32 %v310_v32, %v288_v24  ;;  %v330_v50 = vsub.f32 1.0, %v328_v42  ;;  %v331_v2 = vsub.f32 1.0, %v329_v43  ;;  %v337_v51 = vand.u32 2147483647, %v2731_v35  ;;  %s3672_s8 = sld [smem:[#allocation9 + $0x1d]] }
  0x54   :  { %v2732_v52 = vadd.f32 -3.0, %v3450_v57  ;;  %v2733_v53 = vadd.f32 -3.0, %v3453_v12  ;;  %v2734_v54 = vadd.f32 -4.0, %v3450_v57  ;;  %v2735_v55 = vadd.f32 -4.0, %v3453_v12 }
  0x55   :  { %v3487_v3 = vmax.f32 %v322_v37, 0.0  ;;  %v3489_v58 = vmax.f32 %v323_v39, 0.0  ;;  %v3491_v59 = vmax.f32 %v330_v50, 0.0  ;;  %v338_v60 = vsub.f32 1.0, %v336_v44 }
  0x56   :  { %v344_v61 = vand.u32 2147483647, %v2732_v52  ;;  %v345_v62 = vand.u32 2147483647, %v2733_v53  ;;  %v352_v63 = vand.u32 2147483647, %v2734_v54  ;;  %v397_v4 = vstv %s3460_s9 }
  0x57   :  { %v339_v5 = vsub.f32 1.0, %v337_v51  ;;  %v353_v6 = vand.u32 2147483647, %v2735_v55  ;;  %v2736_v7 = vadd.f32 -5.0, %v3450_v57  ;;  %v2737_v10 = vadd.f32 -5.0, %v3453_v12  ;;  %s3677_s9 = sld [smem:[#allocation9 + $0x1e]] }
  0x58   :  { %v3498_v11 = vmax.f32 %v331_v2, 0.0  ;;  %v346_v14 = vsub.f32 1.0, %v344_v61  ;;  %v354_v15 = vsub.f32 1.0, %v352_v63  ;;  %v2738_v18 = vadd.f32 -6.0, %v3450_v57 }
  0x59   :  { %v355_v19 = vsub.f32 1.0, %v353_v6  ;;  %v360_v20 = vand.u32 2147483647, %v2736_v7  ;;  %v361_v38 = vand.u32 2147483647, %v2737_v10  ;;  %v2739_v21 = vadd.f32 -6.0, %v3453_v12 }
  0x5a   :  { %v3504_v40 = vmax.f32 %v338_v60, 0.0  ;;  %v347_v22 = vsub.f32 1.0, %v345_v62  ;;  %v368_v23 = vand.u32 2147483647, %v2738_v18  ;;  %v390_v26 = vmul.f32 %v389_v47, %v3487_v3 }
  0x5b   :  { %v3509_v8 = vmax.f32 %v339_v5, 0.0  ;;  %v362_v9 = vsub.f32 1.0, %v360_v20  ;;  %v363_v16 = vsub.f32 1.0, %v361_v38  ;;  %v369_v17 = vand.u32 2147483647, %v2739_v21 }
  0x5c   :  { %v3511_v56 = vmax.f32 %v354_v15, 0.0  ;;  %v370_v13 = vsub.f32 1.0, %v368_v23  ;;  %v2740_v24 = vadd.f32 -7.0, %v3450_v57  ;;  %v2741_v25 = vadd.f32 -7.0, %v3453_v12 }
  0x5d   :  { %v3517_v31 = vmax.f32 %v346_v14, 0.0  ;;  %v3519_v32 = vmax.f32 %v355_v19, 0.0  ;;  %v371_v33 = vsub.f32 1.0, %v369_v17  ;;  %v382_v28 = vand.u32 2147483647, %v3468_v36 }
  0x5e   :  { %v3522_v0 = vmax.f32 %v347_v22, 0.0  ;;  %v3524_v1 = vmax.f32 %v362_v9, 0.0  ;;  %v376_v34 = vand.u32 2147483647, %v2740_v24  ;;  %v377_v57 = vand.u32 2147483647, %v2741_v25 }
  0x5f   :  { %v3526_v35 = vmax.f32 %v363_v16, 0.0  ;;  %v3528_v12 = vmax.f32 %v370_v13, 0.0  ;;  %v383_v37 = vand.u32 2147483647, %v3475_v46  ;;  %v391_v39 = vmul.f32 %v389_v47, %v3489_v58 }
  0x60   :  { %v3532_v42 = vmax.f32 %v371_v33, 0.0  ;;  %v378_v43 = vsub.f32 1.0, %v376_v34  ;;  %v379_v44 = vsub.f32 1.0, %v377_v57  ;;  %v394_v50 = vmul.f32 %v393_v48, %v3511_v56 }
  0x61   :  { %v395_v2 = vmul.f32 %v393_v48, %v3519_v32  ;;  %v398_v51 = vmul.f32 %v397_v4, %v3491_v59  ;;  %v399_v52 = vmul.f32 %v397_v4, %v3498_v11  ;;  %v403_v53 = vstv %s3485_s1  ;;  %s3682_s1 = sld [smem:[#allocation9 + $0x1f]] }
  0x62   :  { %v3547_v47 = vmax.f32 %v378_v43, 0.0  ;;  %v3549_v54 = vmax.f32 %v379_v44, 0.0  ;;  %v404_v55 = vmul.f32 %v403_v53, %v3504_v40  ;;  %v405_v60 = vmul.f32 %v403_v53, %v3509_v8 }
  0x63   :  { %v400_v48 = vadd.f32 %v398_v51, %v390_v26  ;;  %v401_v61 = vadd.f32 %v399_v52, %v391_v39  ;;  %v409_v62 = vstv %s3493_s10  ;;  %v415_v63 = vstv %s3501_s11  ;;  %s3691_s10 = sld [smem:[#allocation9 + $0x20]] }
  0x64   :  { %v410_v4 = vmul.f32 %v409_v62, %v3517_v31  ;;  %v411_v5 = vmul.f32 %v409_v62, %v3522_v0  ;;  %v416_v6 = vmul.f32 %v415_v63, %v3524_v1  ;;  %v417_v7 = vmul.f32 %v415_v63, %v3526_v35  ;;  %s3694_s11 = sld [smem:[#allocation9 + $0x24]] }
  0x65   :  { %v406_v10 = vadd.f32 %v404_v55, %v400_v48  ;;  %v407_v14 = vadd.f32 %v405_v60, %v401_v61  ;;  %v421_v15 = vstv %s3507_s12  ;;  %v427_v18 = vstv %s3515_s13  ;;  %s3700_s12 = sld [smem:[#allocation9 + $0x21]] }
  0x66   :  { %v418_v19 = vadd.f32 %v416_v6, %v394_v50  ;;  %v419_v20 = vadd.f32 %v417_v7, %v395_v2  ;;  %v422_v38 = vmul.f32 %v421_v15, %v3528_v12  ;;  %v423_v21 = vmul.f32 %v421_v15, %v3532_v42  ;;  %s3706_s13 = sld [smem:[#allocation9 + $0x22]] }
  0x67   :  { %v384_v22 = vsub.f32 1.0, %v382_v28  ;;  %v412_v23 = vadd.f32 %v410_v4, %v406_v10  ;;  %v428_v26 = vmul.f32 %v427_v18, %v3547_v47  ;;  %v429_v9 = vmul.f32 %v427_v18, %v3549_v54 }
  0x68   :  { %v424_v16 = vadd.f32 %v422_v38, %v418_v19  ;;  %v425_v17 = vadd.f32 %v423_v21, %v419_v20  ;;  %v2749_v13 = vadd.f32 -1.0, %v3468_v36  ;;  %v2750_v24 = vadd.f32 -1.0, %v3475_v46 }
  0x69   :  { %v313_v25 = vmul.f32 %v3472_v45, %v289_v29  ;;  %v385_v33 = vsub.f32 1.0, %v383_v37  ;;  %v413_v28 = vadd.f32 %v411_v5, %v407_v14  ;;  %v447_v34 = vstv %s3537_s2  ;;  %s3713_s2 = sld [smem:[#allocation9 + $0x23]] }
  0x6a   :  { %v3583_v57 = vadd.f32 %v3479_v49, %v3455_v30  ;;  %v430_v39 = vadd.f32 %v428_v26, %v424_v16  ;;  %v431_v43 = vadd.f32 %v429_v9, %v425_v17  ;;  %v455_v44 = vstv %s3553_s4  ;;  %s3722_s4 = sld [smem:[#allocation9 + $0x26]] }
  0x6b   :  { %v448_v50 = vmul.f32 %v447_v34, %v3487_v3  ;;  %v449_v27 = vmul.f32 %v447_v34, %v3489_v58  ;;  %v451_v2 = vstv %s3545_s3  ;;  %v461_v29 = vstv %s3557_s14  ;;  %s3717_s3 = sld [smem:[#allocation9 + $0x25]] }
  0x6c   :  { %v386_v45 = vmax.f32 %v384_v22, 0.0  ;;  %v432_v37 = vadd.f32 %v430_v39, %v412_v23  ;;  %v440_v51 = vand.u32 2147483647, %v2749_v13  ;;  %v441_v52 = vand.u32 2147483647, %v2750_v24  ;;  %s3726_s14 = sld [smem:[#allocation9 + $0x27]] }
  0x6d   :  { %v387_v53 = vmax.f32 %v385_v33, 0.0  ;;  %v433_v30 = vadd.f32 %v431_v43, %v413_v28  ;;  %v456_v49 = vmul.f32 %v455_v44, %v3491_v59  ;;  %v457_v55 = vmul.f32 %v455_v44, %v3498_v11 }
  0x6e   :  { %v452_v60 = vmul.f32 %v451_v2, %v3511_v56  ;;  %v453_v48 = vmul.f32 %v451_v2, %v3519_v32  ;;  %v462_v61 = vmul.f32 %v461_v29, %v3504_v40  ;;  %v463_v62 = vmul.f32 %v461_v29, %v3509_v8 }
  0x6f   :  { %v458_v63 = vadd.f32 %v456_v49, %v448_v50  ;;  %v459_v4 = vadd.f32 %v457_v55, %v449_v27  ;;  %v467_v5 = vstv %s3567_s15  ;;  %v473_v6 = vstv %s3571_s16  ;;  %s3741_s15 = sld [smem:[#allocation9 + $0x28]] }
  0x70   :  { %v315_v7 = vadd.f32 %v313_v25, %v3470_v41  ;;  %v434_v10 = vmul.f32 %v432_v37, %v386_v45  ;;  %v3607_v14 = vsub.f32 1.0, %v440_v51  ;;  %v3609_v15 = vsub.f32 1.0, %v441_v52  ;;  %s3746_s16 = sld [smem:[#allocation9 + $0x2c]] }
  0x71   :  { %v435_v18 = vmul.f32 %v433_v30, %v387_v53  ;;  %v468_v19 = vmul.f32 %v467_v5, %v3517_v31  ;;  %v474_v20 = vmul.f32 %v473_v6, %v3524_v1  ;;  %v475_v38 = vmul.f32 %v473_v6, %v3526_v35 }
  0x72   :  { %v464_v21 = vadd.f32 %v462_v61, %v458_v63  ;;  %v469_v22 = vmul.f32 %v467_v5, %v3522_v0  ;;  %v479_v23 = vstv %s3579_s17  ;;  %v485_v41 = vstv %s3586_s18  ;;  %s3749_s17 = sld [smem:[#allocation9 + $0x29]] }
  0x73   :  { %v465_v26 = vadd.f32 %v463_v62, %v459_v4  ;;  %v476_v9 = vadd.f32 %v474_v20, %v452_v60  ;;  %v477_v16 = vadd.f32 %v475_v38, %v453_v48  ;;  %v2759_v17 = vadd.f32 -2.0, %v3468_v36  ;;  %s3754_s18 = sld [smem:[#allocation9 + $0x2a]] }
  0x74   :  { %v480_v13 = vmul.f32 %v479_v23, %v3528_v12  ;;  %v481_v24 = vmul.f32 %v479_v23, %v3532_v42  ;;  %v486_v25 = vmul.f32 %v485_v41, %v3547_v47  ;;  %v487_v33 = vmul.f32 %v485_v41, %v3549_v54 }
  0x75   :  { %v444_v28 = vmax.f32 %v3607_v14, 0.0  ;;  %v445_v34 = vmax.f32 %v3609_v15, 0.0  ;;  %v2760_v39 = vadd.f32 -2.0, %v3475_v46  ;;  %v505_v43 = vstv %s3594_s19  ;;  %s3769_s19 = sld [smem:[#allocation9 + $0x2b]] }
  0x76   :  { %v470_v44 = vadd.f32 %v468_v19, %v464_v21  ;;  %v482_v50 = vadd.f32 %v480_v13, %v476_v9  ;;  %v483_v27 = vadd.f32 %v481_v24, %v477_v16  ;;  %v509_v2 = vstv %s3600_s20  ;;  %s3772_s20 = sld [smem:[#allocation9 + $0x2d]] }
  0x77   :  { %v471_v29 = vadd.f32 %v469_v22, %v465_v26  ;;  %v498_v45 = vand.u32 2147483647, %v2759_v17  ;;  %v506_v37 = vmul.f32 %v505_v43, %v3487_v3  ;;  %v507_v51 = vmul.f32 %v505_v43, %v3489_v58 }
  0x78   :  { %v488_v52 = vadd.f32 %v486_v25, %v482_v50  ;;  %v489_v53 = vadd.f32 %v487_v33, %v483_v27  ;;  %v513_v30 = vstv %s3604_s21  ;;  %v519_v49 = vstv %s3611_s22  ;;  %s3778_s21 = sld [smem:[#allocation9 + $0x2e]] }
  0x79   :  { %v499_v55 = vand.u32 2147483647, %v2760_v39  ;;  %v510_v60 = vmul.f32 %v509_v2, %v3511_v56  ;;  %v514_v48 = vmul.f32 %v513_v30, %v3491_v59  ;;  %v515_v61 = vmul.f32 %v513_v30, %v3498_v11  ;;  %s3783_s22 = sld [smem:[#allocation9 + $0x2f]] }
  0x7a   :  { %v490_v62 = vadd.f32 %v488_v52, %v470_v44  ;;  %v511_v63 = vmul.f32 %v509_v2, %v3519_v32  ;;  %v520_v4 = vmul.f32 %v519_v49, %v3504_v40  ;;  %v521_v5 = vmul.f32 %v519_v49, %v3509_v8 }
  0x7b   :  { %v516_v6 = vadd.f32 %v514_v48, %v506_v37  ;;  %v517_v14 = vadd.f32 %v515_v61, %v507_v51  ;;  %v525_v15 = vstv %s3619_s23  ;;  %v531_v19 = vstv %s3622_s24  ;;  %s3797_s23 = sld [smem:[#allocation9 + $0x30]] }
  0x7c   :  { %v436_v20 = vadd.f32 %v434_v10, %v3583_v57  ;;  %v437_v38 = vadd.f32 %v435_v18, %v315_v7  ;;  %v491_v21 = vadd.f32 %v489_v53, %v471_v29  ;;  %v3656_v22 = vsub.f32 1.0, %v498_v45  ;;  %s3803_s24 = sld [smem:[#allocation9 + $0x34]] }
  0x7d   :  { %v526_v23 = vmul.f32 %v525_v15, %v3517_v31  ;;  %v527_v41 = vmul.f32 %v525_v15, %v3522_v0  ;;  %v532_v26 = vmul.f32 %v531_v19, %v3524_v1  ;;  %v533_v9 = vmul.f32 %v531_v19, %v3526_v35 }
  0x7e   :  { %v522_v16 = vadd.f32 %v520_v4, %v516_v6  ;;  %v523_v17 = vadd.f32 %v521_v5, %v517_v14  ;;  %v537_v13 = vstv %s3632_s25  ;;  %v543_v24 = vstv %s3635_s28  ;;  %s3809_s25 = sld [smem:[#allocation9 + $0x31]] }
  0x7f   :  { %v492_v57 = vmul.f32 %v490_v62, %v444_v28  ;;  %v501_v7 = vsub.f32 1.0, %v499_v55  ;;  %v534_v10 = vadd.f32 %v532_v26, %v510_v60  ;;  %v535_v18 = vadd.f32 %v533_v9, %v511_v63  ;;  %s3814_s28 = sld [smem:[#allocation9 + $0x32]] }
  0x80   :  { %v538_v25 = vmul.f32 %v537_v13, %v3528_v12  ;;  %v539_v33 = vmul.f32 %v537_v13, %v3532_v42  ;;  %v544_v39 = vmul.f32 %v543_v24, %v3547_v47  ;;  %v545_v43 = vmul.f32 %v543_v24, %v3549_v54 }
  0x81   :  { %v493_v44 = vmul.f32 %v491_v21, %v445_v34  ;;  %v2769_v28 = vadd.f32 -3.0, %v3468_v36  ;;  %v2770_v50 = vadd.f32 -3.0, %v3475_v46  ;;  %v563_v27 = vstv %s3644_s29  ;;  %s3824_s29 = sld [smem:[#allocation9 + $0x35]] }
  0x82   :  { %v528_v2 = vadd.f32 %v526_v23, %v522_v16  ;;  %v529_v29 = vadd.f32 %v527_v41, %v523_v17  ;;  %v540_v45 = vadd.f32 %v538_v25, %v534_v10  ;;  %v541_v37 = vadd.f32 %v539_v33, %v535_v18 }
  0x83   :  { %v556_v51 = vand.u32 2147483647, %v2769_v28  ;;  %v564_v52 = vmul.f32 %v563_v27, %v3487_v3  ;;  %v565_v53 = vmul.f32 %v563_v27, %v3489_v58  ;;  %v567_v30 = vstv %s3649_s30  ;;  %s3830_s30 = sld [smem:[#allocation9 + $0x36]] }
  0x84   :  { %v546_v34 = vadd.f32 %v544_v39, %v540_v45  ;;  %v547_v49 = vadd.f32 %v545_v43, %v541_v37  ;;  %v571_v55 = vstv %s3653_s0  ;;  %v577_v60 = vstv %s3658_s6  ;;  %s3833_s0 = sld [smem:[#allocation9 + $0x33]] }
  0x85   :  { %v557_v48 = vand.u32 2147483647, %v2770_v50  ;;  %v3686_v61 = vsub.f32 1.0, %v556_v51  ;;  %v572_v62 = vmul.f32 %v571_v55, %v3491_v59  ;;  %v573_v63 = vmul.f32 %v571_v55, %v3498_v11  ;;  %s3836_s6 = sld [smem:[#allocation9 + $0x37]] }
  0x86   :  { %v502_v4 = vmax.f32 %v3656_v22, 0.0  ;;  %v503_v5 = vmax.f32 %v501_v7, 0.0  ;;  %v548_v6 = vadd.f32 %v546_v34, %v528_v2  ;;  %v549_v14 = vadd.f32 %v547_v49, %v529_v29 }
  0x87   :  { %v494_v15 = vadd.f32 %v492_v57, %v436_v20  ;;  %v495_v19 = vadd.f32 %v493_v44, %v437_v38  ;;  %v574_v21 = vadd.f32 %v572_v62, %v564_v52  ;;  %v578_v23 = vmul.f32 %v577_v60, %v3504_v40 }
  0x88   :  { %v568_v41 = vmul.f32 %v567_v30, %v3511_v56  ;;  %v569_v26 = vmul.f32 %v567_v30, %v3519_v32  ;;  %v583_v9 = vstv %s3666_s7  ;;  %v589_v22 = vstv %s3672_s8  ;;  %s3846_s7 = sld [smem:[#allocation9 + $0x38]] }
  0x89   :  { %v3702_v16 = vsub.f32 1.0, %v557_v48  ;;  %v560_v20 = vmax.f32 %v3686_v61, 0.0  ;;  %v575_v38 = vadd.f32 %v573_v63, %v565_v53  ;;  %v579_v17 = vmul.f32 %v577_v60, %v3509_v8  ;;  %s3851_s8 = sld [smem:[#allocation9 + $0x3c]] }
  0x8a   :  { %v550_v13 = vmul.f32 %v548_v6, %v502_v4  ;;  %v551_v24 = vmul.f32 %v549_v14, %v503_v5  ;;  %v590_v57 = vmul.f32 %v589_v22, %v3524_v1  ;;  %v591_v7 = vmul.f32 %v589_v22, %v3526_v35 }
  0x8b   :  { %v580_v10 = vadd.f32 %v578_v23, %v574_v21  ;;  %v584_v18 = vmul.f32 %v583_v9, %v3517_v31  ;;  %v595_v25 = vstv %s3677_s9  ;;  %v601_v33 = vstv %s3682_s1  ;;  %s3857_s9 = sld [smem:[#allocation9 + $0x39]] }
  0x8c   :  { %v592_v39 = vadd.f32 %v590_v57, %v568_v41  ;;  %v593_v43 = vadd.f32 %v591_v7, %v569_v26  ;;  %v596_v44 = vmul.f32 %v595_v25, %v3528_v12  ;;  %v597_v28 = vmul.f32 %v595_v25, %v3532_v42  ;;  %s3861_s1 = sld [smem:[#allocation9 + $0x3a]] }
  0x8d   :  { %v581_v50 = vadd.f32 %v579_v17, %v575_v38  ;;  %v585_v27 = vmul.f32 %v583_v9, %v3522_v0  ;;  %v602_v2 = vmul.f32 %v601_v33, %v3547_v47  ;;  %v603_v29 = vmul.f32 %v601_v33, %v3549_v54 }
  0x8e   :  { %v598_v45 = vadd.f32 %v596_v44, %v592_v39  ;;  %v599_v37 = vadd.f32 %v597_v28, %v593_v43  ;;  %v2779_v51 = vadd.f32 -4.0, %v3468_v36  ;;  %v621_v52 = vstv %s3691_s10  ;;  %s3873_s10 = sld [smem:[#allocation9 + $0x3b]] }
  0x8f   :  { %v3728_v53 = vadd.f32 %v550_v13, %v494_v15  ;;  %v561_v30 = vmax.f32 %v3702_v16, 0.0  ;;  %v586_v34 = vadd.f32 %v584_v18, %v580_v10  ;;  %v2780_v49 = vadd.f32 -4.0, %v3475_v46 }
  0x90   :  { %v604_v55 = vadd.f32 %v602_v2, %v598_v45  ;;  %v622_v60 = vmul.f32 %v621_v52, %v3487_v3  ;;  %v623_v48 = vmul.f32 %v621_v52, %v3489_v58  ;;  %v625_v62 = vstv %s3694_s11  ;;  %s3877_s11 = sld [smem:[#allocation9 + $0x3d]] }
  0x91   :  { %v587_v63 = vadd.f32 %v585_v27, %v581_v50  ;;  %v605_v4 = vadd.f32 %v603_v29, %v599_v37  ;;  %v629_v5 = vstv %s3700_s12  ;;  %v635_v6 = vstv %s3706_s13  ;;  %s3886_s12 = sld [smem:[#allocation9 + $0x3e]] }
  0x92   :  { %v3737_v14 = vadd.f32 %v551_v24, %v495_v19  ;;  %v614_v15 = vand.u32 2147483647, %v2779_v51  ;;  %v630_v21 = vmul.f32 %v629_v5, %v3491_v59  ;;  %v631_v23 = vmul.f32 %v629_v5, %v3498_v11  ;;  %s3890_s13 = sld [smem:[#allocation9 + $0x3f]] }
  0x93   :  { %v615_v41 = vand.u32 2147483647, %v2780_v49  ;;  %v626_v26 = vmul.f32 %v625_v62, %v3511_v56  ;;  %v636_v9 = vmul.f32 %v635_v6, %v3504_v40  ;;  %v637_v22 = vmul.f32 %v635_v6, %v3509_v8 }
  0x94   :  { %v606_v19 = vadd.f32 %v604_v55, %v586_v34  ;;  %v627_v16 = vmul.f32 %v625_v62, %v3519_v32  ;;  %v632_v38 = vadd.f32 %v630_v21, %v622_v60  ;;  %v633_v17 = vadd.f32 %v631_v23, %v623_v48 }
  0x95   :  { %v607_v13 = vadd.f32 %v605_v4, %v587_v63  ;;  %v641_v24 = vstv %s3713_s2  ;;  %v647_v57 = vstv %s3717_s3  ;;  %v653_v7 = vstv %s3722_s4  ;;  %s3937_s2 = sld [smem:[#allocation11]] }
  0x96   :  { %v3756_v10 = vsub.f32 1.0, %v614_v15  ;;  %v638_v18 = vadd.f32 %v636_v9, %v632_v38  ;;  %v639_v25 = vadd.f32 %v637_v22, %v633_v17  ;;  %v659_v33 = vstv %s3726_s14  ;;  %s3969_s3 = sld [smem:[#allocation11 + $0x8]] }
  0x97   :  { %v642_v39 = vmul.f32 %v641_v24, %v3517_v31  ;;  %v643_v43 = vmul.f32 %v641_v24, %v3522_v0  ;;  %v648_v44 = vmul.f32 %v647_v57, %v3524_v1  ;;  %v649_v28 = vmul.f32 %v647_v57, %v3526_v35  ;;  %s3975_s4 = sld [smem:[#allocation11 + $0x1]] }
  0x98   :  { %v608_v50 = vmul.f32 %v606_v19, %v560_v20  ;;  %v3765_v27 = vsub.f32 1.0, %v615_v41  ;;  %v654_v2 = vmul.f32 %v653_v7, %v3528_v12  ;;  %v655_v29 = vmul.f32 %v653_v7, %v3532_v42  ;;  %s3985_s14 = sld [smem:[#allocation11 + $0x2]] }
  0x99   :  { %v609_v45 = vmul.f32 %v607_v13, %v561_v30  ;;  %v650_v37 = vadd.f32 %v648_v44, %v626_v26  ;;  %v651_v51 = vadd.f32 %v649_v28, %v627_v16  ;;  %v660_v52 = vmul.f32 %v659_v33, %v3547_v47 }
  0x9a   :  { %v661_v34 = vmul.f32 %v659_v33, %v3549_v54  ;;  %v2789_v61 = vadd.f32 -5.0, %v3468_v36  ;;  %v2790_v20 = vadd.f32 -5.0, %v3475_v46  ;;  %v679_v49 = vstv %s3741_s15  ;;  %s4002_s15 = sld [smem:[#allocation11 + $0x3]] }
  0x9b   :  { %v644_v55 = vadd.f32 %v642_v39, %v638_v18  ;;  %v645_v60 = vadd.f32 %v643_v43, %v639_v25  ;;  %v656_v48 = vadd.f32 %v654_v2, %v650_v37  ;;  %v657_v30 = vadd.f32 %v655_v29, %v651_v51 }
  0x9c   :  { %v672_v62 = vand.u32 2147483647, %v2789_v61  ;;  %v680_v63 = vmul.f32 %v679_v49, %v3487_v3  ;;  %v681_v4 = vmul.f32 %v679_v49, %v3489_v58  ;;  %v683_v5 = vstv %s3746_s16  ;;  %s4007_s16 = sld [smem:[#allocation11 + $0x4]] }
  0x9d   :  { %v662_v6 = vadd.f32 %v660_v52, %v656_v48  ;;  %v673_v15 = vand.u32 2147483647, %v2790_v20  ;;  %v687_v21 = vstv %s3749_s17  ;;  %v693_v23 = vstv %s3754_s18  ;;  %s4013_s17 = sld [smem:[#allocation11 + $0x5]] }
  0x9e   :  { %v663_v41 = vadd.f32 %v661_v34, %v657_v30  ;;  %v3787_v26 = vsub.f32 1.0, %v672_v62  ;;  %v688_v9 = vmul.f32 %v687_v21, %v3491_v59  ;;  %v689_v22 = vmul.f32 %v687_v21, %v3498_v11  ;;  %s4024_s18 = sld [smem:[#allocation11 + $0x6]] }
  0x9f   :  { %v3792_v19 = vadd.f32 %v608_v50, %v3728_v53  ;;  %v618_v16 = vmax.f32 %v3756_v10, 0.0  ;;  %v619_v38 = vmax.f32 %v3765_v27, 0.0  ;;  %v694_v17 = vmul.f32 %v693_v23, %v3504_v40 }
  0xa0   :  { %v3800_v13 = vadd.f32 %v609_v45, %v3737_v14  ;;  %v690_v24 = vadd.f32 %v688_v9, %v680_v63  ;;  %v691_v57 = vadd.f32 %v689_v22, %v681_v4  ;;  %v695_v7 = vmul.f32 %v693_v23, %v3509_v8 }
  0xa1   :  { %v684_v53 = vmul.f32 %v683_v5, %v3511_v56  ;;  %v685_v10 = vmul.f32 %v683_v5, %v3519_v32  ;;  %v699_v18 = vstv %s3769_s19  ;;  %v705_v25 = vstv %s3772_s20  ;;  %s4034_s19 = sld [smem:[#allocation11 + $0x9]] }
  0xa2   :  { %v664_v33 = vadd.f32 %v662_v6, %v644_v55  ;;  %v665_v39 = vadd.f32 %v663_v41, %v645_v60  ;;  %v3811_v14 = vsub.f32 1.0, %v673_v15  ;;  %v676_v43 = vmax.f32 %v3787_v26, 0.0  ;;  %s4046_s20 = sld [smem:[#allocation11 + $0xa]] }
  0xa3   :  { %v696_v44 = vadd.f32 %v694_v17, %v690_v24  ;;  %v700_v28 = vmul.f32 %v699_v18, %v3517_v31  ;;  %v706_v50 = vmul.f32 %v705_v25, %v3524_v1  ;;  %v707_v27 = vmul.f32 %v705_v25, %v3526_v35 }
  0xa4   :  { %v697_v2 = vadd.f32 %v695_v7, %v691_v57  ;;  %v701_v29 = vmul.f32 %v699_v18, %v3522_v0  ;;  %v711_v45 = vstv %s3778_s21  ;;  %v717_v37 = vstv %s3783_s22  ;;  %s4056_s21 = sld [smem:[#allocation11 + $0xb]] }
  0xa5   :  { %v708_v51 = vadd.f32 %v706_v50, %v684_v53  ;;  %v709_v52 = vadd.f32 %v707_v27, %v685_v10  ;;  %v712_v34 = vmul.f32 %v711_v45, %v3528_v12  ;;  %v713_v61 = vmul.f32 %v711_v45, %v3532_v42  ;;  %s4064_s22 = sld [smem:[#allocation11 + $0xc]] }
  0xa6   :  { %v718_v20 = vmul.f32 %v717_v37, %v3547_v47  ;;  %v719_v49 = vmul.f32 %v717_v37, %v3549_v54  ;;  %v2799_v55 = vadd.f32 -6.0, %v3468_v36  ;;  %v2800_v60 = vadd.f32 -6.0, %v3475_v46 }
  0xa7   :  { %v702_v48 = vadd.f32 %v700_v28, %v696_v44  ;;  %v714_v30 = vadd.f32 %v712_v34, %v708_v51  ;;  %v715_v62 = vadd.f32 %v713_v61, %v709_v52  ;;  %v737_v63 = vstv %s3797_s23  ;;  %s4069_s23 = sld [smem:[#allocation11 + $0xd]] }
  0xa8   :  { %v666_v4 = vmul.f32 %v664_v33, %v618_v16  ;;  %v703_v5 = vadd.f32 %v701_v29, %v697_v2  ;;  %v730_v6 = vand.u32 2147483647, %v2799_v55  ;;  %v731_v15 = vand.u32 2147483647, %v2800_v60 }
  0xa9   :  { %v667_v21 = vmul.f32 %v665_v39, %v619_v38  ;;  %v720_v23 = vadd.f32 %v718_v20, %v714_v30  ;;  %v721_v41 = vadd.f32 %v719_v49, %v715_v62  ;;  %v741_v26 = vstv %s3803_s24  ;;  %s4079_s24 = sld [smem:[#allocation11 + $0x7]] }
  0xaa   :  { %v738_v9 = vmul.f32 %v737_v63, %v3487_v3  ;;  %v739_v22 = vmul.f32 %v737_v63, %v3489_v58  ;;  %v745_v17 = vstv %s3809_s25  ;;  %v751_v24 = vstv %s3814_s28  ;;  %s4083_s25 = sld [smem:[#allocation11 + $0xe]] }
  0xab   :  { %v722_v57 = vadd.f32 %v720_v23, %v702_v48  ;;  %v3842_v16 = vsub.f32 1.0, %v730_v6  ;;  %v746_v7 = vmul.f32 %v745_v17, %v3491_v59  ;;  %v747_v38 = vmul.f32 %v745_v17, %v3498_v11  ;;  %s4093_s28 = sld [smem:[#allocation11 + $0xf]] }
  0xac   :  { %v677_v53 = vmax.f32 %v3811_v14, 0.0  ;;  %v723_v10 = vadd.f32 %v721_v41, %v703_v5  ;;  %v3849_v18 = vsub.f32 1.0, %v731_v15  ;;  %v668_v25 = vadd.f32 %v666_v4, %v3792_v19 }
  0xad   :  { %v742_v33 = vmul.f32 %v741_v26, %v3511_v56  ;;  %v743_v39 = vmul.f32 %v741_v26, %v3519_v32  ;;  %v752_v44 = vmul.f32 %v751_v24, %v3504_v40  ;;  %v724_v28 = vmul.f32 %v722_v57, %v676_v43 }
  0xae   :  { %v748_v50 = vadd.f32 %v746_v7, %v738_v9  ;;  %v763_v14 = vstv %s3824_s29  ;;  %v769_v27 = vstv %s3830_s30  ;;  %v669_v2 = vadd.f32 %v667_v21, %v3800_v13  ;;  %s4097_s29 = sld [smem:[#allocation11 + $0x10]] }
  0xaf   :  { %v734_v19 = vmax.f32 %v3842_v16, 0.0  ;;  %v749_v29 = vadd.f32 %v747_v38, %v739_v22  ;;  %v753_v45 = vmul.f32 %v751_v24, %v3509_v8  ;;  %v725_v37 = vmul.f32 %v723_v10, %v677_v53  ;;  %s4104_s30 = sld [smem:[#allocation11 + $0x11]] }
  0xb0   :  { %v735_v51 = vmax.f32 %v3849_v18, 0.0  ;;  %v764_v52 = vmul.f32 %v763_v14, %v3524_v1  ;;  %v765_v43 = vmul.f32 %v763_v14, %v3526_v35  ;;  %v757_v34 = vstv %s3833_s0  ;;  %s4109_s0 = sld [smem:[#allocation11 + $0x12]] }
  0xb1   :  { %v770_v61 = vmul.f32 %v769_v27, %v3528_v12  ;;  %v771_v20 = vmul.f32 %v769_v27, %v3532_v42  ;;  %v775_v49 = vstv %s3836_s6  ;;  %v3875_v13 = vadd.f32 %v724_v28, %v668_v25  ;;  %s4113_s6 = sld [smem:[#allocation11 + $0x18]] }
  0xb2   :  { %v754_v55 = vadd.f32 %v752_v44, %v748_v50  ;;  %v766_v60 = vadd.f32 %v764_v52, %v742_v33  ;;  %v767_v48 = vadd.f32 %v765_v43, %v743_v39  ;;  %v755_v30 = vadd.f32 %v753_v45, %v749_v29 }
  0xb3   :  { %v2809_v62 = vadd.f32 -7.0, %v3468_v36  ;;  %v2810_v63 = vadd.f32 -7.0, %v3475_v46  ;;  %v795_v4 = vstv %s3846_s7  ;;  %v758_v5 = vmul.f32 %v757_v34, %v3517_v31  ;;  %s4121_s7 = sld [smem:[#allocation11 + $0x13]] }
  0xb4   :  { %v759_v6 = vmul.f32 %v757_v34, %v3522_v0  ;;  %v776_v15 = vmul.f32 %v775_v49, %v3547_v47  ;;  %v777_v21 = vmul.f32 %v775_v49, %v3549_v54  ;;  %v772_v23 = vadd.f32 %v770_v61, %v766_v60  ;;  %v3142_v60 = vld [vmem:[#allocation2] sm:$0xff] }
  0xb5   :  { %v773_v41 = vadd.f32 %v771_v20, %v767_v48  ;;  %v796_v26 = vmul.f32 %v795_v4, %v3487_v3  ;;  %v797_v36 = vmul.f32 %v795_v4, %v3489_v58  ;;  %v3892_v46 = vadd.f32 %v725_v37, %v669_v2 }
  0xb6   :  { %v799_v9 = vstv %s3851_s8  ;;  %v803_v22 = vstv %s3857_s9  ;;  %v809_v17 = vstv %s3861_s1  ;;  %v788_v24 = vand.u32 2147483647, %v2809_v62  ;;  %s4126_s8 = sld [smem:[#allocation11 + $0x14]] }
  0xb7   :  { %v789_v57 = vand.u32 2147483647, %v2810_v63  ;;  %v804_v7 = vmul.f32 %v803_v22, %v3491_v59  ;;  %v805_v38 = vmul.f32 %v803_v22, %v3498_v11  ;;  %v760_v53 = vadd.f32 %v758_v5, %v754_v55  ;;  %s4131_s9 = sld [smem:[#allocation11 + $0x15]] }
  0xb8   :  { %v761_v10 = vadd.f32 %v759_v6, %v755_v30  ;;  %v810_v3 = vmul.f32 %v809_v17, %v3504_v40  ;;  %v811_v58 = vmul.f32 %v809_v17, %v3509_v8  ;;  %v778_v25 = vadd.f32 %v776_v15, %v772_v23  ;;  %v3144_v17 = vld [vmem:[#allocation2 + $0x10] sm:$0xff]  ;;  %s4136_s1 = sld [smem:[#allocation11 + $0x16]] }
  0xb9   :  { %v779_v33 = vadd.f32 %v777_v21, %v773_v41  ;;  %v806_v39 = vadd.f32 %v804_v7, %v796_v26  ;;  %v807_v44 = vadd.f32 %v805_v38, %v797_v36  ;;  %v800_v28 = vmul.f32 %v799_v9, %v3511_v56 }
  0xba   :  { %v801_v50 = vmul.f32 %v799_v9, %v3519_v32  ;;  %v815_v14 = vstv %s3873_s10  ;;  %v821_v59 = vstv %s3877_s11  ;;  %v790_v27 = vsub.f32 1.0, %v788_v24  ;;  %s4140_s10 = sld [smem:[#allocation11 + $0x19]] }
  0xbb   :  { %v791_v11 = vsub.f32 1.0, %v789_v57  ;;  %v812_v2 = vadd.f32 %v810_v3, %v806_v39  ;;  %v813_v29 = vadd.f32 %v811_v58, %v807_v44  ;;  %v816_v40 = vmul.f32 %v815_v14, %v3517_v31  ;;  %v3145_v57 = vld [vmem:[#allocation2 + $0x18] sm:$0xff]  ;;  %s4145_s11 = sld [smem:[#allocation11 + $0x1a]] }
  0xbc   :  { %v817_v8 = vmul.f32 %v815_v14, %v3522_v0  ;;  %v822_v45 = vmul.f32 %v821_v59, %v3524_v1  ;;  %v823_v37 = vmul.f32 %v821_v59, %v3526_v35  ;;  %v780_v52 = vadd.f32 %v778_v25, %v760_v53  ;;  %v3143_v1 = vld [vmem:[#allocation2 + $0x8] sm:$0xff] }
  0xbd   :  { %v781_v43 = vadd.f32 %v779_v33, %v761_v10  ;;  %v827_v34 = vstv %s3886_s12  ;;  %v833_v56 = vstv %s3890_s13  ;;  %v3915_v0 = vmul.f32 15.0, %v3142_v60  ;;  %s4150_s12 = sld [smem:[#allocation11 + $0x1b]] }
  0xbe   :  { %v824_v61 = vadd.f32 %v822_v45, %v800_v28  ;;  %v825_v32 = vadd.f32 %v823_v37, %v801_v50  ;;  %v828_v20 = vmul.f32 %v827_v34, %v3528_v12  ;;  %v829_v49 = vmul.f32 %v827_v34, %v3532_v42  ;;  %s4155_s13 = sld [smem:[#allocation11 + $0x17]] }
  0xbf   :  { %v834_v55 = vmul.f32 %v833_v56, %v3547_v47  ;;  %v835_v31 = vmul.f32 %v833_v56, %v3549_v54  ;;  %v3917_v48 = vmul.f32 15.0, %v3143_v1  ;;  %v818_v35 = vadd.f32 %v816_v40, %v812_v2 }
  0xc0   :  { %v819_v30 = vadd.f32 %v817_v8, %v813_v29  ;;  %v830_v62 = vadd.f32 %v828_v20, %v824_v61  ;;  %v831_v63 = vadd.f32 %v829_v49, %v825_v32  ;;  %v782_v4 = vmul.f32 %v780_v52, %v734_v19 }
  0xc1   :  { %v783_v12 = vmul.f32 %v781_v43, %v735_v51  ;;  %v2819_v42 = vadd.f32 -1.0, %v3915_v0  ;;  %v2820_v47 = vadd.f32 -1.0, %v3917_v48  ;;  %v2821_v6 = vadd.f32 -2.0, %v3915_v0 }
  0xc2   :  { %v836_v54 = vadd.f32 %v834_v55, %v830_v62  ;;  %v837_v5 = vadd.f32 %v835_v31, %v831_v63  ;;  %v2822_v15 = vadd.f32 -2.0, %v3917_v48  ;;  %v792_v21 = vmax.f32 %v790_v27, 0.0 }
  0xc3   :  { %v793_v23 = vmax.f32 %v791_v11, 0.0  ;;  %v848_v41 = vand.u32 2147483647, %v3915_v0  ;;  %v849_v16 = vand.u32 2147483647, %v3917_v48  ;;  %v784_v36 = vadd.f32 %v782_v4, %v3875_v13 }
  0xc4   :  { %v838_v19 = vadd.f32 %v836_v54, %v818_v35  ;;  %v839_v26 = vadd.f32 %v837_v5, %v819_v30  ;;  %v856_v18 = vand.u32 2147483647, %v2819_v42  ;;  %v857_v51 = vand.u32 2147483647, %v2820_v47 }
  0xc5   :  { %v864_v9 = vand.u32 2147483647, %v2821_v6  ;;  %v785_v22 = vadd.f32 %v783_v12, %v3892_v46  ;;  %v3931_v24 = vmul.f32 15.0, %v3144_v17  ;;  %v3933_v7 = vmul.f32 15.0, %v3145_v57 }
  0xc6   :  { %v865_v38 = vand.u32 2147483647, %v2822_v15  ;;  %v850_v53 = vsub.f32 1.0, %v848_v41  ;;  %v851_v10 = vsub.f32 1.0, %v849_v16  ;;  %v2823_v3 = vadd.f32 -3.0, %v3915_v0 }
  0xc7   :  { %5648 = vst [vmem:[#allocation20_spill] sm:$0xff] %v3931_v24  ;;  %v2824_v58 = vadd.f32 -3.0, %v3917_v48  ;;  %v840_v25 = vmul.f32 %v838_v19, %v792_v21  ;;  %v841_v33 = vmul.f32 %v839_v26, %v793_v23  ;;  %v858_v39 = vsub.f32 1.0, %v856_v18 }
  0xc8   :  { %5649 = vst [vmem:[#allocation21_spill] sm:$0xff] %v3933_v7  ;;  %v859_v13 = vsub.f32 1.0, %v857_v51  ;;  %v866_v46 = vsub.f32 1.0, %v864_v9  ;;  %v872_v44 = vand.u32 2147483647, %v2823_v3  ;;  %v2825_v28 = vadd.f32 -4.0, %v3915_v0 }
  0xc9   :  { %v2826_v50 = vadd.f32 -4.0, %v3917_v48  ;;  %v867_v14 = vsub.f32 1.0, %v865_v38  ;;  %v2827_v59 = vadd.f32 -5.0, %v3915_v0  ;;  %v2828_v27 = vadd.f32 -5.0, %v3917_v48 }
  0xca   :  { %v2829_v11 = vadd.f32 -6.0, %v3915_v0  ;;  %v3944_v2 = vmax.f32 %v850_v53, 0.0  ;;  %v3946_v29 = vmax.f32 %v851_v10, 0.0  ;;  %v873_v40 = vand.u32 2147483647, %v2824_v58 }
  0xcb   :  { %v2830_v8 = vadd.f32 -6.0, %v3917_v48  ;;  %v3949_v45 = vmax.f32 %v858_v39, 0.0  ;;  %v874_v37 = vsub.f32 1.0, %v872_v44  ;;  %v880_v52 = vand.u32 2147483647, %v2825_v28 }
  0xcc   :  { %v881_v43 = vand.u32 2147483647, %v2826_v50  ;;  %v3951_v34 = vadd.f32 %v840_v25, %v784_v36  ;;  %v3953_v56 = vadd.f32 %v841_v33, %v785_v22  ;;  %v3955_v61 = vmax.f32 %v859_v13, 0.0 }
  0xcd   :  { %v888_v32 = vand.u32 2147483647, %v2827_v59  ;;  %v3957_v20 = vmax.f32 %v866_v46, 0.0  ;;  %v3959_v49 = vmax.f32 %v867_v14, 0.0  ;;  %v889_v55 = vand.u32 2147483647, %v2828_v27 }
  0xce   :  { %5650 = vst [vmem:[#allocation22_spill] sm:$0xff] %v3951_v34  ;;  %v896_v31 = vand.u32 2147483647, %v2829_v11  ;;  %v875_v60 = vsub.f32 1.0, %v873_v40  ;;  %v897_v1 = vand.u32 2147483647, %v2830_v8  ;;  %v981_v12 = vstv %s3937_s2 }
  0xcf   :  { %5651 = vst [vmem:[#allocation23_spill] sm:$0xff] %v3953_v56  ;;  %v2831_v35 = vadd.f32 -7.0, %v3915_v0  ;;  %v2832_v30 = vadd.f32 -7.0, %v3917_v48  ;;  %v3963_v62 = vmax.f32 %v874_v37, 0.0  ;;  %v882_v63 = vsub.f32 1.0, %v880_v52  ;;  %s4162_s2 = sld [smem:[#allocation11 + $0x1c]] }
  0xd0   :  { %5652 = vst [vmem:[#allocation24_spill] sm:$0xff] %v3955_v61  ;;  %v883_v4 = vsub.f32 1.0, %v881_v43  ;;  %v890_v42 = vsub.f32 1.0, %v888_v32  ;;  %v2833_v5 = vadd.f32 -8.0, %v3915_v0  ;;  %v891_v6 = vsub.f32 1.0, %v889_v55 }
  0xd1   :  { %5653 = vst [vmem:[#allocation25_spill] sm:$0xff] %v3957_v20  ;;  %v904_v47 = vand.u32 2147483647, %v2831_v35  ;;  %v905_v54 = vand.u32 2147483647, %v2832_v30  ;;  %v898_v15 = vsub.f32 1.0, %v896_v31  ;;  %v1107_v56 = vstv %s4121_s7 }
  0xd2   :  { %5654 = vst [vmem:[#allocation26_spill] sm:$0xff] %v3959_v49  ;;  %v2834_v21 = vadd.f32 -8.0, %v3917_v48  ;;  %v2835_v23 = vadd.f32 -9.0, %v3915_v0  ;;  %v3971_v41 = vmax.f32 %v875_v60, 0.0  ;;  %v899_v16 = vsub.f32 1.0, %v897_v1  ;;  %s4290_s7 = sld [smem:[#allocation11 + $0x30]] }
  0xd3   :  { %v2836_v19 = vadd.f32 -9.0, %v3917_v48  ;;  %v2837_v26 = vadd.f32 -10.0, %v3915_v0  ;;  %v906_v18 = vsub.f32 1.0, %v904_v47  ;;  %v907_v51 = vsub.f32 1.0, %v905_v54 }
  0xd4   :  { %5655 = vst [vmem:[#allocation27_spill] sm:$0xff] %v3971_v41  ;;  %v912_v36 = vand.u32 2147483647, %v2833_v5  ;;  %v2838_v9 = vadd.f32 -10.0, %v3917_v48  ;;  %v3978_v22 = vmax.f32 %v882_v63, 0.0  ;;  %v3980_v17 = vmax.f32 %v883_v4, 0.0 }
  0xd5   :  { %v3982_v57 = vmax.f32 %v890_v42, 0.0  ;;  %v2839_v38 = vadd.f32 -11.0, %v3915_v0  ;;  %v3987_v53 = vmax.f32 %v891_v6, 0.0  ;;  %v3989_v10 = vmax.f32 %v898_v15, 0.0 }
  0xd6   :  { %v913_v3 = vand.u32 2147483647, %v2834_v21  ;;  %v920_v58 = vand.u32 2147483647, %v2835_v23  ;;  %v3991_v25 = vmax.f32 %v899_v16, 0.0  ;;  %v2840_v13 = vadd.f32 -11.0, %v3917_v48 }
  0xd7   :  { %5656 = vst [vmem:[#allocation28_spill] sm:$0xff] %v3989_v10  ;;  %v921_v33 = vand.u32 2147483647, %v2836_v19  ;;  %v928_v39 = vand.u32 2147483647, %v2837_v26  ;;  %v3994_v46 = vmax.f32 %v906_v18, 0.0  ;;  %v1113_v34 = vstv %s4126_s8 }
  0xd8   :  { %v3996_v44 = vmax.f32 %v907_v51, 0.0  ;;  %v914_v28 = vsub.f32 1.0, %v912_v36  ;;  %v929_v50 = vand.u32 2147483647, %v2838_v9  ;;  %v936_v14 = vand.u32 2147483647, %v2839_v38 }
  0xd9   :  { %5657 = vst [vmem:[#allocation29_spill] sm:$0xff] %v3994_v46  ;;  %v937_v59 = vand.u32 2147483647, %v2840_v13  ;;  %v2841_v27 = vadd.f32 -12.0, %v3915_v0  ;;  %v2842_v11 = vadd.f32 -12.0, %v3917_v48  ;;  %v915_v40 = vsub.f32 1.0, %v913_v3 }
  0xda   :  { %v922_v8 = vsub.f32 1.0, %v920_v58  ;;  %v2843_v37 = vadd.f32 -13.0, %v3915_v0  ;;  %v2844_v52 = vadd.f32 -13.0, %v3917_v48  ;;  %v923_v43 = vsub.f32 1.0, %v921_v33  ;;  %s4295_s8 = sld [smem:[#allocation11 + $0x31]] }
  0xdb   :  { %v930_v32 = vsub.f32 1.0, %v928_v39  ;;  %v944_v55 = vand.u32 2147483647, %v2841_v27  ;;  %v945_v31 = vand.u32 2147483647, %v2842_v11  ;;  %v2845_v35 = vadd.f32 -14.0, %v3915_v0 }
  0xdc   :  { %v952_v60 = vand.u32 2147483647, %v2843_v37  ;;  %v953_v1 = vand.u32 2147483647, %v2844_v52  ;;  %v2846_v30 = vadd.f32 -14.0, %v3917_v48  ;;  %v931_v63 = vsub.f32 1.0, %v929_v50 }
  0xdd   :  { %v938_v4 = vsub.f32 1.0, %v936_v14  ;;  %v939_v42 = vsub.f32 1.0, %v937_v59  ;;  %v2847_v47 = vadd.f32 -15.0, %v3915_v0  ;;  %v946_v54 = vsub.f32 1.0, %v944_v55 }
  0xde   :  { %v947_v5 = vsub.f32 1.0, %v945_v31  ;;  %v960_v6 = vand.u32 2147483647, %v2845_v35  ;;  %v961_v15 = vand.u32 2147483647, %v2846_v30  ;;  %v4009_v21 = vmax.f32 %v914_v28, 0.0 }
  0xdf   :  { %v4011_v23 = vmax.f32 %v915_v40, 0.0  ;;  %v954_v16 = vsub.f32 1.0, %v952_v60  ;;  %v955_v19 = vsub.f32 1.0, %v953_v1  ;;  %v4015_v26 = vmax.f32 %v922_v8, 0.0 }
  0xe0   :  { %v4017_v18 = vmax.f32 %v923_v43, 0.0  ;;  %v2848_v0 = vadd.f32 -15.0, %v3917_v48  ;;  %v968_v51 = vand.u32 2147483647, %v2847_v47  ;;  %v4020_v36 = vmax.f32 %v930_v32, 0.0 }
  0xe1   :  { %5658 = vst [vmem:[#allocation30_spill] sm:$0xff] %v4015_v26  ;;  %v4022_v9 = vmax.f32 %v931_v63, 0.0  ;;  %v962_v38 = vsub.f32 1.0, %v960_v6  ;;  %v963_v3 = vsub.f32 1.0, %v961_v15  ;;  %v4026_v58 = vmax.f32 %v938_v4, 0.0 }
  0xe2   :  { %5659 = vst [vmem:[#allocation31_spill] sm:$0xff] %v4017_v18  ;;  %v4028_v33 = vmax.f32 %v939_v42, 0.0  ;;  %v4030_v39 = vmax.f32 %v946_v54, 0.0  ;;  %v4032_v13 = vmax.f32 %v947_v5, 0.0  ;;  %v4036_v48 = vmax.f32 %v954_v16, 0.0 }
  0xe3   :  { %5660 = vst [vmem:[#allocation32_spill] sm:$0xff] %v4020_v36  ;;  %v4038_v28 = vmax.f32 %v955_v19, 0.0  ;;  %v982_v50 = vmul.f32 %v981_v12, %v3944_v2  ;;  %v983_v14 = vmul.f32 %v981_v12, %v3946_v29  ;;  %v969_v59 = vand.u32 2147483647, %v2848_v0 }
  0xe4   :  { %5661 = vst [vmem:[#allocation33_spill] sm:$0xff] %v4022_v9  ;;  %v970_v27 = vsub.f32 1.0, %v968_v51  ;;  %v974_v11 = vand.u32 2147483647, %v3931_v24  ;;  %v989_v40 = vstv %s3975_s4  ;;  %v4050_v8 = vmax.f32 %v962_v38, 0.0  ;;  %s4177_s4 = sld [smem:[#allocation11 + $0x1e]] }
  0xe5   :  { %5662 = vst [vmem:[#allocation34_spill] sm:$0xff] %v4026_v58  ;;  %v4052_v37 = vmax.f32 %v963_v3, 0.0  ;;  %v990_v52 = vmul.f32 %v989_v40, %v3949_v45  ;;  %v991_v43 = vmul.f32 %v989_v40, %v3955_v61  ;;  %v985_v32 = vstv %s3969_s3  ;;  %s4165_s3 = sld [smem:[#allocation11 + $0x1d]] }
  0xe6   :  { %5663 = vst [vmem:[#allocation35_spill] sm:$0xff] %v4028_v33  ;;  %v995_v55 = vstv %s3985_s14  ;;  %v1001_v12 = vstv %s4002_s15  ;;  %v1007_v31 = vstv %s4007_s16  ;;  %v971_v63 = vsub.f32 1.0, %v969_v59  ;;  %s4182_s14 = sld [smem:[#allocation11 + $0x1f]] }
  0xe7   :  { %5664 = vst [vmem:[#allocation36_spill] sm:$0xff] %v4052_v37  ;;  %v992_v60 = vadd.f32 %v990_v52, %v982_v50  ;;  %v993_v1 = vadd.f32 %v991_v43, %v983_v14  ;;  %v996_v35 = vmul.f32 %v995_v55, %v3957_v20  ;;  %v997_v30 = vmul.f32 %v995_v55, %v3959_v49  ;;  %s4191_s15 = sld [smem:[#allocation11 + $0x20]] }
  0xe8   :  { %v975_v4 = vand.u32 2147483647, %v3933_v7  ;;  %v1002_v42 = vmul.f32 %v1001_v12, %v3963_v62  ;;  %v1003_v47 = vmul.f32 %v1001_v12, %v3971_v41  ;;  %v4071_v54 = vmax.f32 %v970_v27, 0.0  ;;  %s4197_s16 = sld [smem:[#allocation11 + $0x21]] }
  0xe9   :  { %v998_v5 = vadd.f32 %v996_v35, %v992_v60  ;;  %v999_v6 = vadd.f32 %v997_v30, %v993_v1  ;;  %v1008_v15 = vmul.f32 %v1007_v31, %v3978_v22  ;;  %v4074_v16 = vsub.f32 1.0, %v974_v11 }
  0xea   :  { %5665 = vst [vmem:[#allocation37_spill] sm:$0xff] %v4071_v54  ;;  %v986_v19 = vmul.f32 %v985_v32, %v4009_v21  ;;  %v987_v0 = vmul.f32 %v985_v32, %v4011_v23  ;;  %v1013_v51 = vstv %s4013_s17  ;;  %v1009_v50 = vmul.f32 %v1007_v31, %v3980_v17  ;;  %s4205_s17 = sld [smem:[#allocation11 + $0x22]] }
  0xeb   :  { %v1004_v38 = vadd.f32 %v1002_v42, %v998_v5  ;;  %v1005_v3 = vadd.f32 %v1003_v47, %v999_v6  ;;  %v1031_v14 = vstv %s4034_s19  ;;  %v4085_v59 = vsub.f32 1.0, %v975_v4  ;;  %s4219_s19 = sld [smem:[#allocation11 + $0x23]] }
  0xec   :  { %v1019_v27 = vstv %s4024_s18  ;;  %v1032_v11 = vmul.f32 %v1031_v14, %v4015_v26  ;;  %v1033_v40 = vmul.f32 %v1031_v14, %v4017_v18  ;;  %v1014_v43 = vmul.f32 %v1013_v51, %v3982_v57  ;;  %s4213_s18 = sld [smem:[#allocation11 + $0x28]] }
  0xed   :  { %5666 = vst [vmem:[#allocation38_spill] sm:$0xff] %v4085_v59  ;;  %v1010_v52 = vadd.f32 %v1008_v15, %v1004_v38  ;;  %v1037_v32 = vstv %s4046_s20  ;;  %v1043_v55 = vstv %s4056_s21  ;;  %v1011_v35 = vadd.f32 %v1009_v50, %v1005_v3  ;;  %s4223_s20 = sld [smem:[#allocation11 + $0x24]] }
  0xee   :  { %v1034_v12 = vadd.f32 %v1032_v11, %v986_v19  ;;  %v1035_v31 = vadd.f32 %v1033_v40, %v987_v0  ;;  %v1038_v60 = vmul.f32 %v1037_v32, %v4020_v36  ;;  %v1039_v1 = vmul.f32 %v1037_v32, %v4022_v9  ;;  %s4229_s21 = sld [smem:[#allocation11 + $0x25]] }
  0xef   :  { %v1015_v30 = vmul.f32 %v1013_v51, %v3987_v53  ;;  %v1044_v4 = vmul.f32 %v1043_v55, %v4026_v58  ;;  %v1045_v42 = vmul.f32 %v1043_v55, %v4028_v33  ;;  %v1049_v6 = vstv %s4064_s22  ;;  %s4233_s22 = sld [smem:[#allocation11 + $0x26]] }
  0xf0   :  { %v1040_v47 = vadd.f32 %v1038_v60, %v1034_v12  ;;  %v1041_v5 = vadd.f32 %v1039_v1, %v1035_v31  ;;  %v1055_v15 = vstv %s4069_s23  ;;  %v1016_v19 = vadd.f32 %v1014_v43, %v1010_v52  ;;  %s4237_s23 = sld [smem:[#allocation11 + $0x29]] }
  0xf1   :  { %v1020_v0 = vmul.f32 %v1019_v27, %v3989_v10  ;;  %v1050_v38 = vmul.f32 %v1049_v6, %v4030_v39  ;;  %v1051_v3 = vmul.f32 %v1049_v6, %v4032_v13  ;;  %v1025_v51 = vstv %s4079_s24  ;;  %s4243_s24 = sld [smem:[#allocation11 + $0x2a]] }
  0xf2   :  { %v1046_v50 = vadd.f32 %v1044_v4, %v1040_v47  ;;  %v1047_v14 = vadd.f32 %v1045_v42, %v1041_v5  ;;  %v1056_v11 = vmul.f32 %v1055_v15, %v4036_v48  ;;  %v4115_v40 = vmax.f32 %v971_v63, 0.0 }
  0xf3   :  { %v1017_v32 = vadd.f32 %v1015_v30, %v1011_v35  ;;  %v1021_v52 = vmul.f32 %v1019_v27, %v3991_v25  ;;  %v1061_v43 = vstv %s4083_s25  ;;  %v1057_v60 = vmul.f32 %v1055_v15, %v4038_v28  ;;  %s4245_s25 = sld [smem:[#allocation11 + $0x2b]] }
  0xf4   :  { %5667 = vst [vmem:[#allocation39_spill] sm:$0xff] %v4115_v40  ;;  %v1052_v12 = vadd.f32 %v1050_v38, %v1046_v50  ;;  %v1053_v31 = vadd.f32 %v1051_v3, %v1047_v14  ;;  %v1022_v4 = vadd.f32 %v1020_v0, %v1016_v19  ;;  %v1026_v63 = vmul.f32 %v1025_v51, %v3994_v46 }
  0xf5   :  { %v2864_v42 = vadd.f32 -1.0, %v3931_v24  ;;  %v1062_v27 = vmul.f32 %v1061_v43, %v4050_v8  ;;  %v1067_v30 = vstv %s4093_s28  ;;  %v1087_v47 = vstv %s4097_s29  ;;  %s4252_s28 = sld [smem:[#allocation11 + $0x27]] }
  0xf6   :  { %v1058_v35 = vadd.f32 %v1056_v11, %v1052_v12  ;;  %v1023_v5 = vadd.f32 %v1021_v52, %v1017_v32  ;;  %v1027_v6 = vmul.f32 %v1025_v51, %v3996_v44  ;;  %v1063_v15 = vmul.f32 %v1061_v43, %v4052_v37  ;;  %s4257_s29 = sld [smem:[#allocation11 + $0x2c]] }
  0xf7   :  { %v2865_v19 = vadd.f32 -1.0, %v3933_v7  ;;  %v1059_v0 = vadd.f32 %v1057_v60, %v1053_v31  ;;  %v1080_v38 = vand.u32 2147483647, %v2864_v42  ;;  %v1088_v3 = vmul.f32 %v1087_v47, %v3944_v2 }
  0xf8   :  { %v1089_v50 = vmul.f32 %v1087_v47, %v3946_v29  ;;  %v1028_v14 = vadd.f32 %v1026_v63, %v1022_v4  ;;  %v1068_v11 = vmul.f32 %v1067_v30, %v4071_v54  ;;  %v1095_v32 = vstv %s4104_s30  ;;  %s4261_s30 = sld [smem:[#allocation11 + $0x2d]] }
  0xf9   :  { %v1101_v52 = vstv %s4109_s0  ;;  %v1064_v51 = vadd.f32 %v1062_v27, %v1058_v35  ;;  %v1091_v43 = vstv %s4113_s6  ;;  %v1096_v12 = vmul.f32 %v1095_v32, %v3949_v45  ;;  %s4277_s0 = sld [smem:[#allocation11 + $0x2e]] }
  0xfa   :  { %v1097_v31 = vmul.f32 %v1095_v32, %v3955_v61  ;;  %v1069_v60 = vmul.f32 %v1067_v30, %v4115_v40  ;;  %v1081_v42 = vand.u32 2147483647, %v2865_v19  ;;  %v1102_v4 = vmul.f32 %v1101_v52, %v3957_v20  ;;  %s4284_s6 = sld [smem:[#allocation11 + $0x2f]] }
  0xfb   :  { %v1103_v63 = vmul.f32 %v1101_v52, %v3959_v49  ;;  %v1065_v35 = vadd.f32 %v1063_v15, %v1059_v0  ;;  %v4157_v27 = vsub.f32 1.0, %v1080_v38  ;;  %v1098_v47 = vadd.f32 %v1096_v12, %v1088_v3 }
  0xfc   :  { %v1099_v1 = vadd.f32 %v1097_v31, %v1089_v50  ;;  %v1029_v55 = vadd.f32 %v1027_v6, %v1023_v5  ;;  %v1092_v32 = vmul.f32 %v1091_v43, %v4009_v21  ;;  %v1070_v30 = vadd.f32 %v1068_v11, %v1064_v51 }
  0xfd   :  { %v1104_v19 = vadd.f32 %v1102_v4, %v1098_v47  ;;  %v1119_v59 = vstv %s4131_s9  ;;  %v1093_v15 = vmul.f32 %v1091_v43, %v4011_v23  ;;  %v1108_v5 = vmul.f32 %v1107_v56, %v3963_v62  ;;  %s4299_s9 = sld [smem:[#allocation11 + $0x32]] }
  0xfe   :  { %v1105_v20 = vadd.f32 %v1103_v63, %v1099_v1  ;;  %v1109_v6 = vmul.f32 %v1107_v56, %v3971_v41  ;;  %v1114_v0 = vmul.f32 %v1113_v34, %v3978_v22  ;;  %v1071_v38 = vadd.f32 %v1069_v60, %v1065_v35 }
  0xff   :  { %v4171_v3 = vsub.f32 1.0, %v1081_v42  ;;  %v1125_v50 = vstv %s4136_s1  ;;  %v1110_v11 = vadd.f32 %v1108_v5, %v1104_v19  ;;  %v1115_v51 = vmul.f32 %v1113_v34, %v3980_v17  ;;  %s4309_s1 = sld [smem:[#allocation11 + $0x38]] }
 0x100   :  { %v1111_v52 = vadd.f32 %v1109_v6, %v1105_v20  ;;  %v1120_v43 = vmul.f32 %v1119_v59, %v3982_v57  ;;  %v1072_v12 = vadd.f32 %v1070_v30, %v1028_v14  ;;  %v1137_v31 = vstv %s4140_s10  ;;  %s4313_s10 = sld [smem:[#allocation11 + $0x33]] }
 0x101   :  { %v1143_v56 = vstv %s4145_s11  ;;  %v1149_v4 = vstv %s4150_s12  ;;  %v1116_v60 = vadd.f32 %v1114_v0, %v1110_v11  ;;  %v1121_v42 = vmul.f32 %v1119_v59, %v3987_v53  ;;  %s4319_s11 = sld [smem:[#allocation11 + $0x34]] }
 0x102   :  { %v1126_v63 = vmul.f32 %v1125_v50, %v3989_v10  ;;  %v1131_v20 = vstv %s4155_s13  ;;  %v1138_v34 = vmul.f32 %v1137_v31, %v4015_v26  ;;  %v1139_v35 = vmul.f32 %v1137_v31, %v4017_v18  ;;  %s4328_s12 = sld [smem:[#allocation11 + $0x35]] }
 0x103   :  { %v1144_v47 = vmul.f32 %v1143_v56, %v4020_v36  ;;  %v1145_v14 = vmul.f32 %v1143_v56, %v4022_v9  ;;  %v1117_v30 = vadd.f32 %v1115_v51, %v1111_v52  ;;  %v1122_v19 = vadd.f32 %v1120_v43, %v1116_v60  ;;  %s4333_s13 = sld [smem:[#allocation11 + $0x36]] }
 0x104   :  { %v1150_v5 = vmul.f32 %v1149_v4, %v4026_v58  ;;  %v1151_v6 = vmul.f32 %v1149_v4, %v4028_v33  ;;  %v1140_v59 = vadd.f32 %v1138_v34, %v1092_v32  ;;  %v1141_v0 = vadd.f32 %v1139_v35, %v1093_v15 }
 0x105   :  { %v1155_v11 = vstv %s4162_s2  ;;  %v1161_v1 = vstv %s4165_s3  ;;  %v1073_v31 = vadd.f32 %v1071_v38, %v1029_v55  ;;  %v5668_v10 = vmax.f32 %v4074_v16, 0.0  ;;  %s4336_s2 = sld [smem:[#allocation11 + $0x37]] }
 0x106   :  { %v1127_v52 = vmul.f32 %v1125_v50, %v3991_v25  ;;  %v1132_v51 = vmul.f32 %v1131_v20, %v3994_v46  ;;  %v1146_v43 = vadd.f32 %v1144_v47, %v1140_v59  ;;  %v1147_v32 = vadd.f32 %v1145_v14, %v1141_v0  ;;  %s4342_s3 = sld [smem:[#allocation11 + $0x39]] }
 0x107   :  { %v4201_v56 = vmul.f32 %v1072_v12, %v5668_v10  ;;  %v1156_v15 = vmul.f32 %v1155_v11, %v4030_v39  ;;  %v1157_v4 = vmul.f32 %v1155_v11, %v4032_v13  ;;  %v1123_v60 = vadd.f32 %v1121_v42, %v1117_v30 }
 0x108   :  { %v1128_v34 = vadd.f32 %v1126_v63, %v1122_v19  ;;  %v1162_v16 = vmul.f32 %v1161_v1, %v4036_v48  ;;  %v1167_v55 = vstv %s4177_s4  ;;  %v1152_v10 = vadd.f32 %v1150_v5, %v1146_v43  ;;  %s4346_s4 = sld [smem:[#allocation11 + $0x3a]] }
 0x109   :  { %v1153_v38 = vadd.f32 %v1151_v6, %v1147_v32  ;;  %v1163_v50 = vmul.f32 %v1161_v1, %v4038_v28  ;;  %v1173_v12 = vstv %s4182_s14  ;;  %v1133_v35 = vmul.f32 %v1131_v20, %v3996_v44  ;;  %s4350_s14 = sld [smem:[#allocation11 + $0x3b]] }
 0x10a   :  { %v1168_v47 = vmul.f32 %v1167_v55, %v4050_v8  ;;  %v2882_v14 = vadd.f32 -2.0, %v3931_v24  ;;  %v2883_v42 = vadd.f32 -2.0, %v3933_v7  ;;  %v1158_v63 = vadd.f32 %v1156_v15, %v1152_v10 }
 0x10b   :  { %v1159_v30 = vadd.f32 %v1157_v4, %v1153_v38  ;;  %v1169_v19 = vmul.f32 %v1167_v55, %v4052_v37  ;;  %v1193_v1 = vstv %s4191_s15  ;;  %v1129_v5 = vadd.f32 %v1127_v52, %v1123_v60  ;;  %s4359_s15 = sld [smem:[#allocation11 + $0x3c]] }
 0x10c   :  { %v1134_v6 = vadd.f32 %v1132_v51, %v1128_v34  ;;  %v1174_v20 = vmul.f32 %v1173_v12, %v4071_v54  ;;  %v1175_v59 = vmul.f32 %v1173_v12, %v4115_v40  ;;  %v1164_v0 = vadd.f32 %v1162_v16, %v1158_v63  ;;  %v5669_v16 = vld [vmem:[#allocation38_spill] sm:$0xff] }
 0x10d   :  { %v1165_v11 = vadd.f32 %v1163_v50, %v1159_v30  ;;  %v1194_v43 = vmul.f32 %v1193_v1, %v3944_v2  ;;  %v1195_v32 = vmul.f32 %v1193_v1, %v3946_v29  ;;  %v1186_v15 = vand.u32 2147483647, %v2882_v14  ;;  %v5671_v14 = vld [vmem:[#allocation25_spill] sm:$0xff] }
 0x10e   :  { %v1187_v4 = vand.u32 2147483647, %v2883_v42  ;;  %v1201_v55 = vstv %s4197_s16  ;;  %v1207_v10 = vstv %s4205_s17  ;;  %v1170_v52 = vadd.f32 %v1168_v47, %v1164_v0  ;;  %s4369_s16 = sld [smem:[#allocation11 + $0x3d]] }
 0x10f   :  { %v1171_v51 = vadd.f32 %v1169_v19, %v1165_v11  ;;  %v1202_v60 = vmul.f32 %v1201_v55, %v3949_v45  ;;  %v1203_v34 = vmul.f32 %v1201_v55, %v3955_v61  ;;  %v5670_v38 = vmax.f32 %v5669_v16, 0.0  ;;  %s4376_s17 = sld [smem:[#allocation11 + $0x3e]] }
 0x110   :  { %v1135_v12 = vadd.f32 %v1133_v35, %v1129_v5  ;;  %v1208_v42 = vmul.f32 %v1207_v10, %v5671_v14  ;;  %v1209_v63 = vmul.f32 %v1207_v10, %v3959_v49  ;;  %v1176_v47 = vadd.f32 %v1174_v20, %v1170_v52 }
 0x111   :  { %v1075_v50 = vmul.f32 %v1073_v31, %v5670_v38  ;;  %v1177_v30 = vadd.f32 %v1175_v59, %v1171_v51  ;;  %v1204_v19 = vadd.f32 %v1202_v60, %v1194_v43  ;;  %v1205_v1 = vadd.f32 %v1203_v34, %v1195_v32  ;;  %v5674_v32 = vld [vmem:[#allocation22_spill] sm:$0xff] }
 0x112   :  { %v1085_v0 = vmax.f32 %v4171_v3, 0.0  ;;  %v4248_v11 = vsub.f32 1.0, %v1186_v15  ;;  %v1197_v55 = vstv %s4213_s18  ;;  %v1213_v31 = vstv %s4219_s19  ;;  %s4380_s18 = sld [smem:[#allocation11 + $0x3f]] }
 0x113   :  { %v1178_v35 = vadd.f32 %v1176_v47, %v1134_v6  ;;  %v4254_v5 = vsub.f32 1.0, %v1187_v4  ;;  %v1210_v10 = vadd.f32 %v1208_v42, %v1204_v19  ;;  %v1219_v16 = vstv %s4223_s20  ;;  %v5675_v6 = vld [vmem:[#allocation23_spill] sm:$0xff]  ;;  %s4391_s19 = sld [smem:[#allocation11 + $0x40]] }
 0x114   :  { %5672 = vst [vmem:[#allocation38_spill] sm:$0xff] %v4248_v11  ;;  %v1179_v20 = vadd.f32 %v1177_v30, %v1135_v12  ;;  %v1211_v59 = vadd.f32 %v1209_v63, %v1205_v1  ;;  %v1214_v3 = vmul.f32 %v1213_v31, %v3963_v62  ;;  %v1215_v43 = vmul.f32 %v1213_v31, %v3971_v41  ;;  %s4398_s20 = sld [smem:[#allocation11 + $0x41]] }
 0x115   :  { %5673 = vst [vmem:[#allocation40_spill] sm:$0xff] %v4254_v5  ;;  %v1076_v15 = vadd.f32 %v4201_v56, %v5674_v32  ;;  %v4266_v4 = vadd.f32 %v1075_v50, %v5675_v6  ;;  %v1198_v52 = vmul.f32 %v1197_v55, %v4009_v21  ;;  %v1225_v51 = vstv %s4229_s21  ;;  %s4403_s21 = sld [smem:[#allocation11 + $0x42]] }
 0x116   :  { %v1199_v34 = vmul.f32 %v1197_v55, %v4011_v23  ;;  %v1216_v38 = vadd.f32 %v1214_v3, %v1210_v10  ;;  %v1220_v12 = vmul.f32 %v1219_v16, %v3978_v22  ;;  %v1221_v63 = vmul.f32 %v1219_v16, %v3980_v17 }
 0x117   :  { %v1231_v56 = vstv %s4233_s22  ;;  %v1243_v47 = vstv %s4237_s23  ;;  %v5676_v50 = vmax.f32 %v4157_v27, 0.0  ;;  %v4281_v19 = vmul.f32 %v1179_v20, %v1085_v0  ;;  %s4410_s22 = sld [smem:[#allocation11 + $0x43]] }
 0x118   :  { %v1217_v1 = vadd.f32 %v1215_v43, %v1211_v59  ;;  %v1226_v55 = vmul.f32 %v1225_v51, %v3982_v57  ;;  %v1244_v31 = vmul.f32 %v1243_v47, %v4015_v26  ;;  %v1245_v10 = vmul.f32 %v1243_v47, %v4017_v18  ;;  %s4414_s23 = sld [smem:[#allocation11 + $0x48]] }
 0x119   :  { %v1180_v30 = vmul.f32 %v1178_v35, %v5676_v50  ;;  %v1249_v16 = vstv %s4243_s24  ;;  %v1255_v3 = vstv %s4245_s25  ;;  %v1222_v27 = vadd.f32 %v1220_v12, %v1216_v38  ;;  %s4419_s24 = sld [smem:[#allocation11 + $0x44]] }
 0x11a   :  { %v1227_v0 = vmul.f32 %v1225_v51, %v3987_v53  ;;  %v1250_v35 = vmul.f32 %v1249_v16, %v4020_v36  ;;  %v1251_v20 = vmul.f32 %v1249_v16, %v4022_v9  ;;  %v1246_v59 = vadd.f32 %v1244_v31, %v1198_v52  ;;  %v5677_v52 = vld [vmem:[#allocation28_spill] sm:$0xff]  ;;  %s4426_s25 = sld [smem:[#allocation11 + $0x45]] }
 0x11b   :  { %v1247_v43 = vadd.f32 %v1245_v10, %v1199_v34  ;;  %v1256_v32 = vmul.f32 %v1255_v3, %v4026_v58  ;;  %v1257_v6 = vmul.f32 %v1255_v3, %v4028_v33  ;;  %v1223_v47 = vadd.f32 %v1221_v63, %v1217_v1 }
 0x11c   :  { %v1237_v50 = vstv %s4252_s28  ;;  %v1261_v38 = vstv %s4257_s29  ;;  %v1267_v12 = vstv %s4261_s30  ;;  %v1252_v51 = vadd.f32 %v1250_v35, %v1246_v59  ;;  %s4430_s28 = sld [smem:[#allocation11 + $0x49]] }
 0x11d   :  { %v1253_v42 = vadd.f32 %v1251_v20, %v1247_v43  ;;  %v1262_v60 = vmul.f32 %v1261_v38, %v4030_v39  ;;  %v1263_v16 = vmul.f32 %v1261_v38, %v4032_v13  ;;  %v1228_v5 = vadd.f32 %v1226_v55, %v1222_v27  ;;  %s4434_s29 = sld [smem:[#allocation11 + $0x46]] }
 0x11e   :  { %v1232_v34 = vmul.f32 %v1231_v56, %v5677_v52  ;;  %v1233_v31 = vmul.f32 %v1231_v56, %v3991_v25  ;;  %v1268_v10 = vmul.f32 %v1267_v12, %v4036_v48  ;;  %v1258_v63 = vadd.f32 %v1256_v32, %v1252_v51  ;;  %s4438_s30 = sld [smem:[#allocation11 + $0x4a]] }
 0x11f   :  { %v1259_v1 = vadd.f32 %v1257_v6, %v1253_v42  ;;  %v1269_v3 = vmul.f32 %v1267_v12, %v4038_v28  ;;  %v1273_v35 = vstv %s4277_s0  ;;  %v4315_v20 = vadd.f32 %v1180_v30, %v1076_v15  ;;  %s4445_s0 = sld [smem:[#allocation11 + $0x4b]] }
 0x120   :  { %v1229_v55 = vadd.f32 %v1227_v0, %v1223_v47  ;;  %v1238_v56 = vmul.f32 %v1237_v50, %v3994_v46  ;;  %v1274_v27 = vmul.f32 %v1273_v35, %v4050_v8  ;;  %v1264_v59 = vadd.f32 %v1262_v60, %v1258_v63 }
 0x121   :  { %5678 = vst [vmem:[#allocation22_spill] sm:$0xff] %v4315_v20  ;;  %v1265_v43 = vadd.f32 %v1263_v16, %v1259_v1  ;;  %v2900_v42 = vadd.f32 -3.0, %v3931_v24  ;;  %v2901_v32 = vadd.f32 -3.0, %v3933_v7  ;;  %v1234_v6 = vadd.f32 %v1232_v34, %v1228_v5 }
 0x122   :  { %v1275_v38 = vmul.f32 %v1273_v35, %v4052_v37  ;;  %v1279_v12 = vstv %s4284_s6  ;;  %v1299_v15 = vstv %s4290_s7  ;;  %v1270_v30 = vadd.f32 %v1268_v10, %v1264_v59  ;;  %s4454_s6 = sld [smem:[#allocation11 + $0x4c]] }
 0x123   :  { %v1271_v51 = vadd.f32 %v1269_v3, %v1265_v43  ;;  %v1307_v0 = vstv %s4295_s8  ;;  %v1313_v47 = vstv %s4299_s9  ;;  %v1235_v20 = vadd.f32 %v1233_v31, %v1229_v55  ;;  %s4457_s7 = sld [smem:[#allocation11 + $0x4d]] }
 0x124   :  { %v1239_v11 = vmul.f32 %v1237_v50, %v3996_v44  ;;  %v1300_v60 = vmul.f32 %v1299_v15, %v3944_v2  ;;  %v1301_v16 = vmul.f32 %v1299_v15, %v3946_v29  ;;  %v1276_v5 = vadd.f32 %v1274_v27, %v1270_v30  ;;  %s4464_s8 = sld [smem:[#allocation11 + $0x47]] }
 0x125   :  { %v1280_v34 = vmul.f32 %v1279_v12, %v4071_v54  ;;  %v1292_v10 = vand.u32 2147483647, %v2900_v42  ;;  %v1293_v63 = vand.u32 2147483647, %v2901_v32  ;;  %v1308_v31 = vmul.f32 %v1307_v0, %v3949_v45  ;;  %s4476_s9 = sld [smem:[#allocation11 + $0x4e]] }
 0x126   :  { %v1309_v50 = vmul.f32 %v1307_v0, %v3955_v61  ;;  %v1314_v1 = vmul.f32 %v1313_v47, %v5671_v14  ;;  %v1315_v3 = vmul.f32 %v1313_v47, %v3959_v49  ;;  %v1240_v35 = vadd.f32 %v1238_v56, %v1234_v6 }
 0x127   :  { %v1277_v55 = vadd.f32 %v1275_v38, %v1271_v51  ;;  %v1281_v27 = vmul.f32 %v1279_v12, %v4115_v40  ;;  %v1303_v59 = vstv %s4309_s1  ;;  %v1310_v43 = vadd.f32 %v1308_v31, %v1300_v60  ;;  %s4482_s1 = sld [smem:[#allocation11 + $0x50]] }
 0x128   :  { %v1311_v42 = vadd.f32 %v1309_v50, %v1301_v16  ;;  %v1319_v32 = vstv %s4313_s10  ;;  %v1325_v15 = vstv %s4319_s11  ;;  %v4352_v30 = vsub.f32 1.0, %v1292_v10  ;;  %s4487_s10 = sld [smem:[#allocation11 + $0x51]] }
 0x129   :  { %v4354_v0 = vsub.f32 1.0, %v1293_v63  ;;  %v1320_v56 = vmul.f32 %v1319_v32, %v3963_v62  ;;  %v1321_v6 = vmul.f32 %v1319_v32, %v3971_v41  ;;  %v1282_v38 = vadd.f32 %v1280_v34, %v1276_v5  ;;  %s4491_s11 = sld [smem:[#allocation11 + $0x52]] }
 0x12a   :  { %v1316_v12 = vadd.f32 %v1314_v1, %v1310_v43  ;;  %v1317_v51 = vadd.f32 %v1315_v3, %v1311_v42  ;;  %v1326_v47 = vmul.f32 %v1325_v15, %v3978_v22  ;;  %v4363_v60 = vadd.f32 %v4281_v19, %v4266_v4 }
 0x12b   :  { %v4365_v16 = vadd.f32 %v1239_v11, %v1235_v20  ;;  %v1304_v10 = vmul.f32 %v1303_v59, %v4009_v21  ;;  %v1331_v63 = vstv %s4328_s12  ;;  %v1327_v34 = vmul.f32 %v1325_v15, %v3980_v17  ;;  %s4496_s12 = sld [smem:[#allocation11 + $0x4f]] }
 0x12c   :  { %v1322_v31 = vadd.f32 %v1320_v56, %v1316_v12  ;;  %v1323_v5 = vadd.f32 %v1321_v6, %v1317_v51  ;;  %v1337_v50 = vstv %s4333_s13  ;;  %v1283_v1 = vadd.f32 %v1281_v27, %v1277_v55  ;;  %s4504_s13 = sld [smem:[#allocation11 + $0x58]] }
 0x12d   :  { %v1305_v4 = vmul.f32 %v1303_v59, %v4011_v23  ;;  %v1284_v19 = vadd.f32 %v1282_v38, %v1240_v35  ;;  %v1332_v43 = vmul.f32 %v1331_v63, %v3982_v57  ;;  %v1349_v42 = vstv %s4342_s3  ;;  %s4514_s3 = sld [smem:[#allocation11 + $0x54]] }
 0x12e   :  { %v1328_v20 = vadd.f32 %v1326_v47, %v1322_v31  ;;  %v1333_v32 = vmul.f32 %v1331_v63, %v3987_v53  ;;  %v1338_v55 = vmul.f32 %v1337_v50, %v5677_v52  ;;  %v1350_v27 = vmul.f32 %v1349_v42, %v4015_v26 }
 0x12f   :  { %v1351_v15 = vmul.f32 %v1349_v42, %v4017_v18  ;;  %v1329_v56 = vadd.f32 %v1327_v34, %v1323_v5  ;;  %v1343_v59 = vstv %s4336_s2  ;;  %v1355_v6 = vstv %s4346_s4  ;;  %s4509_s2 = sld [smem:[#allocation11 + $0x53]] }
 0x130   :  { %v1361_v35 = vstv %s4350_s14  ;;  %v1352_v38 = vadd.f32 %v1350_v27, %v1304_v10  ;;  %v1356_v51 = vmul.f32 %v1355_v6, %v4020_v36  ;;  %v1357_v47 = vmul.f32 %v1355_v6, %v4022_v9  ;;  %s4524_s4 = sld [smem:[#allocation11 + $0x55]] }
 0x131   :  { %v1353_v12 = vadd.f32 %v1351_v15, %v1305_v4  ;;  %v1334_v63 = vadd.f32 %v1332_v43, %v1328_v20  ;;  %v1339_v31 = vmul.f32 %v1337_v50, %v3991_v25  ;;  %v1362_v11 = vmul.f32 %v1361_v35, %v4026_v58  ;;  %s4530_s14 = sld [smem:[#allocation11 + $0x56]] }
 0x132   :  { %v1363_v42 = vmul.f32 %v1361_v35, %v4028_v33  ;;  %v1358_v5 = vadd.f32 %v1356_v51, %v1352_v38  ;;  %v1367_v3 = vstv %s4359_s15  ;;  %v1373_v10 = vstv %s4369_s16  ;;  %s4536_s15 = sld [smem:[#allocation11 + $0x59]] }
 0x133   :  { %v1359_v34 = vadd.f32 %v1357_v47, %v1353_v12  ;;  %v1335_v4 = vadd.f32 %v1333_v32, %v1329_v56  ;;  %v1344_v27 = vmul.f32 %v1343_v59, %v3994_v46  ;;  %v1368_v15 = vmul.f32 %v1367_v3, %v4030_v39  ;;  %s4541_s16 = sld [smem:[#allocation11 + $0x5a]] }
 0x134   :  { %v1369_v20 = vmul.f32 %v1367_v3, %v4032_v13  ;;  %v1364_v50 = vadd.f32 %v1362_v11, %v1358_v5  ;;  %v1374_v6 = vmul.f32 %v1373_v10, %v4036_v48  ;;  %v1375_v35 = vmul.f32 %v1373_v10, %v4038_v28 }
 0x135   :  { %v1365_v43 = vadd.f32 %v1363_v42, %v1359_v34  ;;  %v1340_v38 = vadd.f32 %v1338_v55, %v1334_v63  ;;  %v1379_v12 = vstv %s4376_s17  ;;  %v1385_v51 = vstv %s4380_s18  ;;  %s4545_s17 = sld [smem:[#allocation11 + $0x5b]] }
 0x136   :  { %v2918_v32 = vadd.f32 -4.0, %v3931_v24  ;;  %v1370_v56 = vadd.f32 %v1368_v15, %v1364_v50  ;;  %v1380_v3 = vmul.f32 %v1379_v12, %v4050_v8  ;;  %v1381_v46 = vmul.f32 %v1379_v12, %v4052_v37  ;;  %v5679_v50 = vld [vmem:[#allocation38_spill] sm:$0xff]  ;;  %s4551_s18 = sld [smem:[#allocation11 + $0x57]] }
 0x137   :  { %v1371_v47 = vadd.f32 %v1369_v20, %v1365_v43  ;;  %v1341_v11 = vadd.f32 %v1339_v31, %v1335_v4  ;;  %v1345_v42 = vmul.f32 %v1343_v59, %v3996_v44  ;;  %v1386_v55 = vmul.f32 %v1385_v51, %v4071_v54 }
 0x138   :  { %v2919_v63 = vadd.f32 -4.0, %v3933_v7  ;;  %v1376_v5 = vadd.f32 %v1374_v6, %v1370_v56  ;;  %v1387_v10 = vmul.f32 %v1385_v51, %v4115_v40  ;;  %v1405_v15 = vstv %s4391_s19  ;;  %s4556_s19 = sld [smem:[#allocation11 + $0x5c]] }
 0x139   :  { %v1377_v34 = vadd.f32 %v1375_v35, %v1371_v47  ;;  %v1285_v20 = vadd.f32 %v1283_v1, %v4365_v16  ;;  %v5680_v43 = vmax.f32 %v5679_v50, 0.0  ;;  %v1346_v4 = vadd.f32 %v1344_v27, %v1340_v38 }
 0x13a   :  { %v1398_v59 = vand.u32 2147483647, %v2918_v32  ;;  %v1382_v12 = vadd.f32 %v1380_v3, %v1376_v5  ;;  %v1406_v37 = vmul.f32 %v1405_v15, %v3944_v2  ;;  %v1407_v6 = vmul.f32 %v1405_v15, %v3946_v29  ;;  %v5681_v32 = vld [vmem:[#allocation40_spill] sm:$0xff] }
 0x13b   :  { %v1286_v31 = vmul.f32 %v1284_v19, %v5680_v43  ;;  %v1383_v54 = vadd.f32 %v1381_v46, %v1377_v34  ;;  %v1347_v35 = vadd.f32 %v1345_v42, %v1341_v11  ;;  %v1399_v51 = vand.u32 2147483647, %v2919_v63 }
 0x13c   :  { %v1413_v16 = vstv %s4398_s20  ;;  %v1419_v1 = vstv %s4403_s21  ;;  %v1388_v19 = vadd.f32 %v1386_v55, %v1382_v12  ;;  %v5682_v56 = vmax.f32 %v5681_v32, 0.0  ;;  %s4559_s20 = sld [smem:[#allocation11 + $0x5d]] }
 0x13d   :  { %v1389_v27 = vadd.f32 %v1387_v10, %v1383_v54  ;;  %v1414_v38 = vmul.f32 %v1413_v16, %v3949_v45  ;;  %v1415_v46 = vmul.f32 %v1413_v16, %v3955_v61  ;;  %v1420_v3 = vmul.f32 %v1419_v1, %v5671_v14  ;;  %s4569_s21 = sld [smem:[#allocation11 + $0x5e]] }
 0x13e   :  { %v1287_v47 = vmul.f32 %v1285_v20, %v5682_v56  ;;  %v1421_v11 = vmul.f32 %v1419_v1, %v3959_v49  ;;  %v1425_v42 = vstv %s4410_s22  ;;  %v4447_v63 = vsub.f32 1.0, %v1398_v59  ;;  %v5683_v59 = vld [vmem:[#allocation22_spill] sm:$0xff]  ;;  %s4574_s22 = sld [smem:[#allocation11 + $0x5f]] }
 0x13f   :  { %v1409_v54 = vstv %s4414_s23  ;;  %v1416_v55 = vadd.f32 %v1414_v38, %v1406_v37  ;;  %v1417_v5 = vadd.f32 %v1415_v46, %v1407_v6  ;;  %v1390_v34 = vadd.f32 %v1388_v19, %v1346_v4  ;;  %s4581_s23 = sld [smem:[#allocation11 + $0x60]] }
 0x140   :  { %v4450_v10 = vsub.f32 1.0, %v1399_v51  ;;  %v1426_v15 = vmul.f32 %v1425_v42, %v3963_v62  ;;  %v1431_v50 = vstv %s4419_s24  ;;  %v1391_v20 = vadd.f32 %v1389_v27, %v1347_v35  ;;  %s4588_s24 = sld [smem:[#allocation11 + $0x61]] }
 0x141   :  { %v1422_v43 = vadd.f32 %v1420_v3, %v1416_v55  ;;  %v1423_v12 = vadd.f32 %v1421_v11, %v1417_v5  ;;  %v1427_v16 = vmul.f32 %v1425_v42, %v3971_v41  ;;  %v1288_v37 = vadd.f32 %v1286_v31, %v5683_v59 }
 0x142   :  { %v1289_v4 = vadd.f32 %v1287_v47, %v4363_v60  ;;  %v1410_v6 = vmul.f32 %v1409_v54, %v4009_v21  ;;  %v1411_v51 = vmul.f32 %v1409_v54, %v4011_v23  ;;  %v1432_v35 = vmul.f32 %v1431_v50, %v3978_v22 }
 0x143   :  { %v1428_v1 = vadd.f32 %v1426_v15, %v1422_v43  ;;  %v1455_v19 = vstv %s4430_s28  ;;  %v1433_v31 = vmul.f32 %v1431_v50, %v3980_v17  ;;  %v1437_v46 = vstv %s4426_s25  ;;  %s4593_s25 = sld [smem:[#allocation11 + $0x62]] }
 0x144   :  { %v5684_v60 = vmax.f32 %v4352_v30, 0.0  ;;  %v5685_v56 = vmax.f32 %v4354_v0, 0.0  ;;  %v1429_v3 = vadd.f32 %v1427_v16, %v1423_v12  ;;  %v1443_v11 = vstv %s4434_s29  ;;  %s4597_s28 = sld [smem:[#allocation11 + $0x63]] }
 0x145   :  { %v1456_v42 = vmul.f32 %v1455_v19, %v4015_v26  ;;  %v1457_v54 = vmul.f32 %v1455_v19, %v4017_v18  ;;  %v1461_v55 = vstv %s4438_s30  ;;  %v1467_v5 = vstv %s4445_s0  ;;  %s4601_s29 = sld [smem:[#allocation11 + $0x64]] }
 0x146   :  { %v1392_v32 = vmul.f32 %v1390_v34, %v5684_v60  ;;  %v1393_v47 = vmul.f32 %v1391_v20, %v5685_v56  ;;  %v1434_v15 = vadd.f32 %v1432_v35, %v1428_v1  ;;  %v1438_v30 = vmul.f32 %v1437_v46, %v3982_v57  ;;  %s4605_s30 = sld [smem:[#allocation11 + $0x68]] }
 0x147   :  { %v1462_v0 = vmul.f32 %v1461_v55, %v4020_v36  ;;  %v1463_v34 = vmul.f32 %v1461_v55, %v4022_v9  ;;  %v1458_v50 = vadd.f32 %v1456_v42, %v1410_v6  ;;  %v1459_v20 = vadd.f32 %v1457_v54, %v1411_v51  ;;  %s4612_s0 = sld [smem:[#allocation11 + $0x65]] }
 0x148   :  { %v1468_v43 = vmul.f32 %v1467_v5, %v4026_v58  ;;  %v1469_v12 = vmul.f32 %v1467_v5, %v4028_v33  ;;  %v1435_v16 = vadd.f32 %v1433_v31, %v1429_v3  ;;  %v1439_v59 = vmul.f32 %v1437_v46, %v3987_v53 }
 0x149   :  { %v1473_v1 = vstv %s4454_s6  ;;  %v1479_v35 = vstv %s4457_s7  ;;  %v1464_v19 = vadd.f32 %v1462_v0, %v1458_v50  ;;  %v1465_v60 = vadd.f32 %v1463_v34, %v1459_v20  ;;  %v5688_v20 = vld [vmem:[#allocation29_spill] sm:$0xff]  ;;  %s4619_s6 = sld [smem:[#allocation11 + $0x66]] }
 0x14a   :  { %v1474_v6 = vmul.f32 %v1473_v1, %v4030_v39  ;;  %v1475_v51 = vmul.f32 %v1473_v1, %v4032_v13  ;;  %v4500_v56 = vadd.f32 %v1392_v32, %v1288_v37  ;;  %v1440_v42 = vadd.f32 %v1438_v30, %v1434_v15  ;;  %s4624_s7 = sld [smem:[#allocation11 + $0x69]] }
 0x14b   :  { %v1444_v54 = vmul.f32 %v1443_v11, %v5677_v52  ;;  %v1449_v55 = vstv %s4464_s8  ;;  %v4506_v31 = vadd.f32 %v1393_v47, %v1289_v4  ;;  %v1470_v46 = vadd.f32 %v1468_v43, %v1464_v19  ;;  %s4628_s8 = sld [smem:[#allocation11 + $0x67]] }
 0x14c   :  { %5686 = vst [vmem:[#allocation23_spill] sm:$0xff] %v4500_v56  ;;  %v1471_v3 = vadd.f32 %v1469_v12, %v1465_v60  ;;  %v1480_v5 = vmul.f32 %v1479_v35, %v4036_v48  ;;  %v1441_v0 = vadd.f32 %v1439_v59, %v1435_v16  ;;  %v1445_v37 = vmul.f32 %v1443_v11, %v3991_v25 }
 0x14d   :  { %5687 = vst [vmem:[#allocation28_spill] sm:$0xff] %v4506_v31  ;;  %v1481_v32 = vmul.f32 %v1479_v35, %v4038_v28  ;;  %v1485_v15 = vstv %s4476_s9  ;;  %v1476_v4 = vadd.f32 %v1474_v6, %v1470_v46  ;;  %v2936_v30 = vadd.f32 -5.0, %v3931_v24  ;;  %s4632_s9 = sld [smem:[#allocation11 + $0x6a]] }
 0x14e   :  { %v1477_v47 = vadd.f32 %v1475_v51, %v1471_v3  ;;  %v2937_v34 = vadd.f32 -5.0, %v3933_v7  ;;  %v1446_v50 = vadd.f32 %v1444_v54, %v1440_v42  ;;  %v1450_v43 = vmul.f32 %v1449_v55, %v5688_v20  ;;  %v5689_v54 = vld [vmem:[#allocation36_spill] sm:$0xff] }
 0x14f   :  { %v1451_v12 = vmul.f32 %v1449_v55, %v3996_v44  ;;  %v1511_v16 = vstv %s4482_s1  ;;  %v1482_v59 = vadd.f32 %v1480_v5, %v1476_v4  ;;  %v1486_v11 = vmul.f32 %v1485_v15, %v4050_v8  ;;  %s4638_s1 = sld [smem:[#allocation11 + $0x6b]] }
 0x150   :  { %v1519_v1 = vstv %s4487_s10  ;;  %v1525_v35 = vstv %s4491_s11  ;;  %v1447_v19 = vadd.f32 %v1445_v37, %v1441_v0  ;;  %v1491_v60 = vstv %s4496_s12  ;;  %s4645_s10 = sld [smem:[#allocation11 + $0x6c]] }
 0x151   :  { %v1512_v6 = vmul.f32 %v1511_v16, %v3944_v2  ;;  %v1513_v51 = vmul.f32 %v1511_v16, %v3946_v29  ;;  %v1483_v42 = vadd.f32 %v1481_v32, %v1477_v47  ;;  %v1487_v46 = vmul.f32 %v1485_v15, %v5689_v54  ;;  %v5690_v32 = vld [vmem:[#allocation37_spill] sm:$0xff]  ;;  %s4651_s11 = sld [smem:[#allocation11 + $0x6d]] }
 0x152   :  { %v1504_v55 = vand.u32 2147483647, %v2936_v30  ;;  %v1505_v3 = vand.u32 2147483647, %v2937_v34  ;;  %v1520_v5 = vmul.f32 %v1519_v1, %v3949_v45  ;;  %v1521_v4 = vmul.f32 %v1519_v1, %v3955_v61  ;;  %s4662_s12 = sld [smem:[#allocation11 + $0x6e]] }
 0x153   :  { %v1526_v0 = vmul.f32 %v1525_v35, %v5671_v14  ;;  %v1527_v37 = vmul.f32 %v1525_v35, %v3959_v49  ;;  %v1488_v16 = vadd.f32 %v1486_v11, %v1482_v59  ;;  %v1492_v47 = vmul.f32 %v1491_v60, %v5690_v32 }
 0x154   :  { %v1493_v15 = vmul.f32 %v1491_v60, %v4115_v40  ;;  %v1515_v30 = vstv %s4504_s13  ;;  %v1522_v34 = vadd.f32 %v1520_v5, %v1512_v6  ;;  %v1523_v38 = vadd.f32 %v1521_v4, %v1513_v51  ;;  %s4668_s13 = sld [smem:[#allocation11 + $0x6f]] }
 0x155   :  { %v1531_v27 = vstv %s4509_s2  ;;  %v1537_v31 = vstv %s4514_s3  ;;  %v1489_v1 = vadd.f32 %v1487_v46, %v1483_v42  ;;  %v4547_v56 = vsub.f32 1.0, %v1504_v55  ;;  %s4677_s2 = sld [smem:[#allocation11 + $0x70]] }
 0x156   :  { %v1532_v35 = vmul.f32 %v1531_v27, %v3963_v62  ;;  %v1533_v59 = vmul.f32 %v1531_v27, %v3971_v41  ;;  %v4553_v11 = vsub.f32 1.0, %v1505_v3  ;;  %v1528_v60 = vadd.f32 %v1526_v0, %v1522_v34  ;;  %s4682_s3 = sld [smem:[#allocation11 + $0x71]] }
 0x157   :  { %v1529_v6 = vadd.f32 %v1527_v37, %v1523_v38  ;;  %v1538_v51 = vmul.f32 %v1537_v31, %v3978_v22  ;;  %v1452_v5 = vadd.f32 %v1450_v43, %v1446_v50  ;;  %v1453_v42 = vadd.f32 %v1451_v12, %v1447_v19 }
 0x158   :  { %5691 = vst [vmem:[#allocation38_spill] sm:$0xff] %v4553_v11  ;;  %v1494_v46 = vadd.f32 %v1492_v47, %v1488_v16  ;;  %v1543_v55 = vstv %s4524_s4  ;;  %v1516_v27 = vmul.f32 %v1515_v30, %v4009_v21  ;;  %v1534_v4 = vadd.f32 %v1532_v35, %v1528_v60  ;;  %s4686_s4 = sld [smem:[#allocation11 + $0x72]] }
 0x159   :  { %v1535_v41 = vadd.f32 %v1533_v59, %v1529_v6  ;;  %v1539_v3 = vmul.f32 %v1537_v31, %v3980_v17  ;;  %v1495_v0 = vadd.f32 %v1493_v15, %v1489_v1  ;;  %v1517_v37 = vmul.f32 %v1515_v30, %v4011_v23 }
 0x15a   :  { %v1549_v50 = vstv %s4530_s14  ;;  %v1540_v12 = vadd.f32 %v1538_v51, %v1534_v4  ;;  %v1544_v19 = vmul.f32 %v1543_v55, %v3982_v57  ;;  %v1561_v16 = vstv %s4536_s15  ;;  %s4698_s14 = sld [smem:[#allocation11 + $0x78]] }
 0x15b   :  { %v1496_v47 = vadd.f32 %v1494_v46, %v1452_v5  ;;  %v1545_v31 = vmul.f32 %v1543_v55, %v3987_v53  ;;  %v1562_v15 = vmul.f32 %v1561_v16, %v4015_v26  ;;  %v1563_v34 = vmul.f32 %v1561_v16, %v4017_v18  ;;  %s4704_s15 = sld [smem:[#allocation11 + $0x73]] }
 0x15c   :  { %v1541_v30 = vadd.f32 %v1539_v3, %v1535_v41  ;;  %v1550_v1 = vmul.f32 %v1549_v50, %v5677_v52  ;;  %v1567_v35 = vstv %s4541_s16  ;;  %v1573_v59 = vstv %s4545_s17  ;;  %s4708_s16 = sld [smem:[#allocation11 + $0x74]] }
 0x15d   :  { %v1564_v60 = vadd.f32 %v1562_v15, %v1516_v27  ;;  %v1565_v6 = vadd.f32 %v1563_v34, %v1517_v37  ;;  %v1568_v51 = vmul.f32 %v1567_v35, %v4020_v36  ;;  %v1569_v5 = vmul.f32 %v1567_v35, %v4022_v9  ;;  %s4718_s17 = sld [smem:[#allocation11 + $0x75]] }
 0x15e   :  { %v1546_v46 = vadd.f32 %v1544_v19, %v1540_v12  ;;  %v1555_v55 = vstv %s4551_s18  ;;  %v1574_v4 = vmul.f32 %v1573_v59, %v4026_v58  ;;  %v1575_v16 = vmul.f32 %v1573_v59, %v4028_v33  ;;  %s4721_s18 = sld [smem:[#allocation11 + $0x76]] }
 0x15f   :  { %v1570_v41 = vadd.f32 %v1568_v51, %v1564_v60  ;;  %v1571_v3 = vadd.f32 %v1569_v5, %v1565_v6  ;;  %v1579_v43 = vstv %s4556_s19  ;;  %v1585_v38 = vstv %s4559_s20  ;;  %s4727_s19 = sld [smem:[#allocation11 + $0x79]] }
 0x160   :  { %v1547_v27 = vadd.f32 %v1545_v31, %v1541_v30  ;;  %v1551_v37 = vmul.f32 %v1549_v50, %v3991_v25  ;;  %v1580_v15 = vmul.f32 %v1579_v43, %v4030_v39  ;;  %v1581_v12 = vmul.f32 %v1579_v43, %v4032_v13  ;;  %s4733_s20 = sld [smem:[#allocation11 + $0x7a]] }
 0x161   :  { %v1576_v19 = vadd.f32 %v1574_v4, %v1570_v41  ;;  %v1577_v34 = vadd.f32 %v1575_v16, %v1571_v3  ;;  %v1586_v35 = vmul.f32 %v1585_v38, %v4036_v48  ;;  %v1587_v59 = vmul.f32 %v1585_v38, %v4038_v28 }
 0x162   :  { %v1497_v60 = vadd.f32 %v1495_v0, %v1453_v42  ;;  %v1552_v6 = vadd.f32 %v1550_v1, %v1546_v46  ;;  %v1556_v50 = vmul.f32 %v1555_v55, %v5688_v20  ;;  %v1591_v31 = vstv %s4569_s21  ;;  %s4736_s21 = sld [smem:[#allocation11 + $0x7b]] }
 0x163   :  { %v1582_v30 = vadd.f32 %v1580_v15, %v1576_v19  ;;  %v1583_v43 = vadd.f32 %v1581_v12, %v1577_v34  ;;  %v1597_v51 = vstv %s4574_s22  ;;  %v2954_v5 = vadd.f32 -6.0, %v3931_v24  ;;  %s4743_s22 = sld [smem:[#allocation11 + $0x7c]] }
 0x164   :  { %v1553_v4 = vadd.f32 %v1551_v37, %v1547_v27  ;;  %v1557_v38 = vmul.f32 %v1555_v55, %v3996_v44  ;;  %v1592_v16 = vmul.f32 %v1591_v31, %v4050_v8  ;;  %v1593_v42 = vmul.f32 %v1591_v31, %v5689_v54 }
 0x165   :  { %v1588_v0 = vadd.f32 %v1586_v35, %v1582_v30  ;;  %v1589_v1 = vadd.f32 %v1587_v59, %v1583_v43  ;;  %v2955_v46 = vadd.f32 -6.0, %v3933_v7  ;;  %v1617_v41 = vstv %s4581_s23  ;;  %s4752_s23 = sld [smem:[#allocation11 + $0x7d]] }
 0x166   :  { %v5692_v3 = vmax.f32 %v4447_v63, 0.0  ;;  %v5693_v27 = vmax.f32 %v4450_v10, 0.0  ;;  %v1558_v55 = vadd.f32 %v1556_v50, %v1552_v6  ;;  %v1598_v12 = vmul.f32 %v1597_v51, %v5690_v32 }
 0x167   :  { %v1599_v19 = vmul.f32 %v1597_v51, %v4115_v40  ;;  %v1610_v34 = vand.u32 2147483647, %v2954_v5  ;;  %v1618_v35 = vmul.f32 %v1617_v41, %v3944_v2  ;;  %v1619_v59 = vmul.f32 %v1617_v41, %v3946_v29 }
 0x168   :  { %v1498_v15 = vmul.f32 %v1496_v47, %v5692_v3  ;;  %v1499_v37 = vmul.f32 %v1497_v60, %v5693_v27  ;;  %v1594_v63 = vadd.f32 %v1592_v16, %v1588_v0  ;;  %v1595_v10 = vadd.f32 %v1593_v42, %v1589_v1  ;;  %v5694_v3 = vld [vmem:[#allocation27_spill] sm:$0xff] }
 0x169   :  { %v1625_v47 = vstv %s4588_s24  ;;  %v1631_v60 = vstv %s4593_s25  ;;  %v1559_v6 = vadd.f32 %v1557_v38, %v1553_v4  ;;  %v1611_v50 = vand.u32 2147483647, %v2955_v46  ;;  %s4757_s24 = sld [smem:[#allocation11 + $0x77]] }
 0x16a   :  { %v1626_v31 = vmul.f32 %v1625_v47, %v3949_v45  ;;  %v1627_v30 = vmul.f32 %v1625_v47, %v3955_v61  ;;  %v1632_v43 = vmul.f32 %v1631_v60, %v5671_v14  ;;  %v1633_v51 = vmul.f32 %v1631_v60, %v3959_v49  ;;  %v5695_v47 = vld [vmem:[#allocation23_spill] sm:$0xff]  ;;  %s4763_s25 = sld [smem:[#allocation11 + $0x7e]] }
 0x16b   :  { %v1637_v5 = vstv %s4597_s28  ;;  %v1643_v16 = vstv %s4601_s29  ;;  %v4640_v42 = vsub.f32 1.0, %v1610_v34  ;;  %v1621_v0 = vstv %s4605_s30  ;;  %s4771_s28 = sld [smem:[#allocation11 + $0x7f]] }
 0x16c   :  { %v1628_v4 = vadd.f32 %v1626_v31, %v1618_v35  ;;  %v1629_v38 = vadd.f32 %v1627_v30, %v1619_v59  ;;  %v1600_v1 = vadd.f32 %v1598_v12, %v1594_v63  ;;  %v1601_v46 = vadd.f32 %v1599_v19, %v1595_v10  ;;  %v5696_v35 = vld [vmem:[#allocation28_spill] sm:$0xff]  ;;  %s4782_s29 = sld [smem:[#allocation11 + $0x80]] }
 0x16d   :  { %v1638_v41 = vmul.f32 %v1637_v5, %v3963_v62  ;;  %v1639_v27 = vmul.f32 %v1637_v5, %v5694_v3  ;;  %v4648_v60 = vadd.f32 %v1498_v15, %v5695_v47  ;;  %v1644_v34 = vmul.f32 %v1643_v16, %v3978_v22  ;;  %s4789_s30 = sld [smem:[#allocation11 + $0x81]] }
 0x16e   :  { %v1634_v11 = vadd.f32 %v1632_v43, %v1628_v4  ;;  %v1635_v49 = vadd.f32 %v1633_v51, %v1629_v38  ;;  %v4654_v59 = vadd.f32 %v1499_v37, %v5696_v35  ;;  %v4656_v12 = vsub.f32 1.0, %v1611_v50 }
 0x16f   :  { %v1622_v19 = vmul.f32 %v1621_v0, %v4009_v21  ;;  %v1649_v63 = vstv %s4612_s0  ;;  %v1645_v31 = vmul.f32 %v1643_v16, %v3980_v17  ;;  %v1667_v30 = vstv %s4624_s7  ;;  %s4794_s0 = sld [smem:[#allocation11 + $0x82]] }
 0x170   :  { %v1640_v10 = vadd.f32 %v1638_v41, %v1634_v11  ;;  %v1641_v15 = vadd.f32 %v1639_v27, %v1635_v49  ;;  %v1602_v43 = vadd.f32 %v1600_v1, %v1558_v55  ;;  %v4664_v51 = vadd.f32 %v1601_v46, %v1559_v6  ;;  %s4805_s7 = sld [smem:[#allocation11 + $0x88]] }
 0x171   :  { %v1623_v50 = vmul.f32 %v1621_v0, %v4011_v23  ;;  %v1650_v11 = vmul.f32 %v1649_v63, %v3982_v57  ;;  %v1655_v4 = vstv %s4619_s6  ;;  %v1661_v49 = vstv %s4628_s8  ;;  %s4801_s6 = sld [smem:[#allocation11 + $0x83]] }
 0x172   :  { %v1646_v5 = vadd.f32 %v1644_v34, %v1640_v10  ;;  %v1668_v38 = vmul.f32 %v1667_v30, %v4015_v26  ;;  %v1669_v16 = vmul.f32 %v1667_v30, %v4017_v18  ;;  %v1673_v41 = vstv %s4632_s9  ;;  %s4810_s8 = sld [smem:[#allocation11 + $0x84]] }
 0x173   :  { %v1679_v55 = vstv %s4638_s1  ;;  %v1647_v6 = vadd.f32 %v1645_v31, %v1641_v15  ;;  %v1651_v0 = vmul.f32 %v1649_v63, %v3987_v53  ;;  %v1674_v1 = vmul.f32 %v1673_v41, %v4020_v36  ;;  %s4820_s9 = sld [smem:[#allocation11 + $0x89]] }
 0x174   :  { %v1675_v46 = vmul.f32 %v1673_v41, %v4022_v9  ;;  %v1670_v27 = vadd.f32 %v1668_v38, %v1622_v19  ;;  %v1671_v47 = vadd.f32 %v1669_v16, %v1623_v50  ;;  %v1680_v34 = vmul.f32 %v1679_v55, %v4026_v58  ;;  %s4824_s1 = sld [smem:[#allocation11 + $0x85]] }
 0x175   :  { %v1681_v35 = vmul.f32 %v1679_v55, %v4028_v33  ;;  %v1652_v10 = vadd.f32 %v1650_v11, %v1646_v5  ;;  %v1656_v15 = vmul.f32 %v1655_v4, %v5677_v52  ;;  %v1685_v63 = vstv %s4645_s10  ;;  %s4828_s10 = sld [smem:[#allocation11 + $0x8a]] }
 0x176   :  { %v1691_v31 = vstv %s4651_s11  ;;  %v1676_v30 = vadd.f32 %v1674_v1, %v1670_v27  ;;  %v1677_v37 = vadd.f32 %v1675_v46, %v1671_v47  ;;  %v1686_v41 = vmul.f32 %v1685_v63, %v4030_v39  ;;  %s4833_s11 = sld [smem:[#allocation11 + $0x8b]] }
 0x177   :  { %v1687_v19 = vmul.f32 %v1685_v63, %v4032_v13  ;;  %v1653_v50 = vadd.f32 %v1651_v0, %v1647_v6  ;;  %v1657_v38 = vmul.f32 %v1655_v4, %v3991_v25  ;;  %v1692_v16 = vmul.f32 %v1691_v31, %v4036_v48 }
 0x178   :  { %v1693_v55 = vmul.f32 %v1691_v31, %v4038_v28  ;;  %v1682_v33 = vadd.f32 %v1680_v34, %v1676_v30  ;;  %v1683_v58 = vadd.f32 %v1681_v35, %v1677_v37  ;;  %v1697_v5 = vstv %s4662_s12  ;;  %s4838_s12 = sld [smem:[#allocation11 + $0x86]] }
 0x179   :  { %v1703_v11 = vstv %s4668_s13  ;;  %v5697_v1 = vmax.f32 %v4547_v56, 0.0  ;;  %v1658_v27 = vadd.f32 %v1656_v15, %v1652_v10  ;;  %v1662_v6 = vmul.f32 %v1661_v49, %v5688_v20  ;;  %s4844_s13 = sld [smem:[#allocation11 + $0x8c]] }
 0x17a   :  { %v1698_v4 = vmul.f32 %v1697_v5, %v4050_v8  ;;  %v1688_v0 = vadd.f32 %v1686_v41, %v1682_v33  ;;  %v1689_v47 = vadd.f32 %v1687_v19, %v1683_v58  ;;  %v1699_v37 = vmul.f32 %v1697_v5, %v5689_v54 }
 0x17b   :  { %v1604_v46 = vmul.f32 %v1602_v43, %v5697_v1  ;;  %v2972_v34 = vadd.f32 -7.0, %v3931_v24  ;;  %v1659_v35 = vadd.f32 %v1657_v38, %v1653_v50  ;;  %v1663_v56 = vmul.f32 %v1661_v49, %v3996_v44 }
 0x17c   :  { %v1704_v43 = vmul.f32 %v1703_v11, %v5690_v32  ;;  %v1723_v10 = vstv %s4677_s2  ;;  %v1694_v15 = vadd.f32 %v1692_v16, %v1688_v0  ;;  %v1695_v63 = vadd.f32 %v1693_v55, %v1689_v47  ;;  %v5699_v0 = vld [vmem:[#allocation38_spill] sm:$0xff]  ;;  %s4847_s2 = sld [smem:[#allocation11 + $0x8d]] }
 0x17d   :  { %v1731_v31 = vstv %s4682_s3  ;;  %v1737_v30 = vstv %s4686_s4  ;;  %v1664_v1 = vadd.f32 %v1662_v6, %v1658_v27  ;;  %v2973_v33 = vadd.f32 -7.0, %v3933_v7  ;;  %v5698_v27 = vld [vmem:[#allocation26_spill] sm:$0xff]  ;;  %s4855_s3 = sld [smem:[#allocation11 + $0x87]] }
 0x17e   :  { %v1724_v58 = vmul.f32 %v1723_v10, %v3944_v2  ;;  %v1725_v41 = vmul.f32 %v1723_v10, %v3946_v29  ;;  %v1700_v19 = vadd.f32 %v1698_v4, %v1694_v15  ;;  %v1701_v50 = vadd.f32 %v1699_v37, %v1695_v63  ;;  %s4862_s4 = sld [smem:[#allocation11 + $0x90]] }
 0x17f   :  { %v1705_v49 = vmul.f32 %v1703_v11, %v4115_v40  ;;  %v1716_v38 = vand.u32 2147483647, %v2972_v34  ;;  %v1732_v16 = vmul.f32 %v1731_v31, %v3949_v45  ;;  %v1733_v55 = vmul.f32 %v1731_v31, %v3955_v61 }
 0x180   :  { %v1738_v5 = vmul.f32 %v1737_v30, %v5671_v14  ;;  %v1739_v6 = vmul.f32 %v1737_v30, %v5698_v27  ;;  %v5700_v4 = vmax.f32 %v5699_v0, 0.0  ;;  %v1665_v11 = vadd.f32 %v1663_v56, %v1659_v35 }
 0x181   :  { %v1706_v37 = vadd.f32 %v1704_v43, %v1700_v19  ;;  %v1727_v34 = vstv %s4698_s14  ;;  %v1717_v10 = vand.u32 2147483647, %v2973_v33  ;;  %v1734_v15 = vadd.f32 %v1732_v16, %v1724_v58  ;;  %s4867_s14 = sld [smem:[#allocation11 + $0x8e]] }
 0x182   :  { %v1605_v47 = vmul.f32 %v4664_v51, %v5700_v4  ;;  %v1735_v63 = vadd.f32 %v1733_v55, %v1725_v41  ;;  %v1743_v31 = vstv %s4704_s15  ;;  %v1707_v14 = vadd.f32 %v1705_v49, %v1701_v50  ;;  %s4873_s15 = sld [smem:[#allocation11 + $0x8f]] }
 0x183   :  { %v4738_v30 = vsub.f32 1.0, %v1716_v38  ;;  %v1744_v27 = vmul.f32 %v1743_v31, %v3963_v62  ;;  %v1749_v0 = vstv %s4708_s16  ;;  %v1708_v61 = vadd.f32 %v1706_v37, %v1664_v1  ;;  %s4878_s16 = sld [smem:[#allocation11 + $0x91]] }
 0x184   :  { %v1740_v51 = vadd.f32 %v1738_v5, %v1734_v15  ;;  %v1741_v35 = vadd.f32 %v1739_v6, %v1735_v63  ;;  %v1745_v56 = vmul.f32 %v1743_v31, %v5694_v3  ;;  %v4746_v43 = vadd.f32 %v1604_v46, %v4648_v60 }
 0x185   :  { %v4749_v33 = vadd.f32 %v1605_v47, %v4654_v59  ;;  %v1615_v58 = vmax.f32 %v4656_v12, 0.0  ;;  %v1728_v41 = vmul.f32 %v1727_v34, %v4009_v21  ;;  %v1750_v19 = vmul.f32 %v1749_v0, %v3978_v22 }
 0x186   :  { %v1746_v1 = vadd.f32 %v1744_v27, %v1740_v51  ;;  %v1755_v50 = vstv %s4718_s17  ;;  %v1709_v49 = vadd.f32 %v1707_v14, %v1665_v11  ;;  %v4759_v60 = vsub.f32 1.0, %v1717_v10  ;;  %v5702_v51 = vld [vmem:[#allocation34_spill] sm:$0xff]  ;;  %s4882_s17 = sld [smem:[#allocation11 + $0x92]] }
 0x187   :  { %v1729_v46 = vmul.f32 %v1727_v34, %v4011_v23  ;;  %v5701_v38 = vmax.f32 %v4640_v42, 0.0  ;;  %v1747_v55 = vadd.f32 %v1745_v56, %v1741_v35  ;;  %v1751_v5 = vmul.f32 %v1749_v0, %v3980_v17  ;;  %v5703_v56 = vld [vmem:[#allocation35_spill] sm:$0xff] }
 0x188   :  { %v1773_v27 = vstv %s4727_s19  ;;  %v1756_v14 = vmul.f32 %v1755_v50, %v3982_v57  ;;  %v1761_v6 = vstv %s4721_s18  ;;  %v1752_v11 = vadd.f32 %v1750_v19, %v1746_v1  ;;  %s4893_s18 = sld [smem:[#allocation11 + $0x98]] }
 0x189   :  { %v4767_v16 = vmul.f32 %v1708_v61, %v5701_v38  ;;  %v1774_v4 = vmul.f32 %v1773_v27, %v4015_v26  ;;  %v1775_v47 = vmul.f32 %v1773_v27, %v4017_v18  ;;  %v1757_v42 = vmul.f32 %v1755_v50, %v3987_v53  ;;  %s4896_s19 = sld [smem:[#allocation11 + $0x93]] }
 0x18a   :  { %v1779_v61 = vstv %s4733_s20  ;;  %v1785_v37 = vstv %s4736_s21  ;;  %v1753_v31 = vadd.f32 %v1751_v5, %v1747_v55  ;;  %v1762_v0 = vmul.f32 %v1761_v6, %v5677_v52  ;;  %s4903_s20 = sld [smem:[#allocation11 + $0x94]] }
 0x18b   :  { %v1776_v34 = vadd.f32 %v1774_v4, %v1728_v41  ;;  %v1777_v10 = vadd.f32 %v1775_v47, %v1729_v46  ;;  %v1780_v15 = vmul.f32 %v1779_v61, %v4020_v36  ;;  %v1781_v63 = vmul.f32 %v1779_v61, %v4022_v9  ;;  %s4913_s21 = sld [smem:[#allocation11 + $0x95]] }
 0x18c   :  { %v1786_v35 = vmul.f32 %v1785_v37, %v5702_v51  ;;  %v1787_v1 = vmul.f32 %v1785_v37, %v5703_v56  ;;  %v1791_v38 = vstv %s4743_s22  ;;  %v1797_v41 = vstv %s4752_s23  ;;  %s4919_s22 = sld [smem:[#allocation11 + $0x96]] }
 0x18d   :  { %v1782_v19 = vadd.f32 %v1780_v15, %v1776_v34  ;;  %v1783_v50 = vadd.f32 %v1781_v63, %v1777_v10  ;;  %v1758_v46 = vadd.f32 %v1756_v14, %v1752_v11  ;;  %v1767_v27 = vstv %s4757_s24  ;;  %s4926_s23 = sld [smem:[#allocation11 + $0x99]] }
 0x18e   :  { %v1792_v4 = vmul.f32 %v1791_v38, %v4030_v39  ;;  %v1793_v55 = vmul.f32 %v1791_v38, %v4032_v13  ;;  %v1798_v61 = vmul.f32 %v1797_v41, %v4036_v48  ;;  %v1799_v37 = vmul.f32 %v1797_v41, %v4038_v28  ;;  %s4931_s24 = sld [smem:[#allocation11 + $0x9a]] }
 0x18f   :  { %v1788_v5 = vadd.f32 %v1786_v35, %v1782_v19  ;;  %v1789_v47 = vadd.f32 %v1787_v1, %v1783_v50  ;;  %v1759_v34 = vadd.f32 %v1757_v42, %v1753_v31  ;;  %v1763_v10 = vmul.f32 %v1761_v6, %v3991_v25 }
 0x190   :  { %v1803_v15 = vstv %s4763_s25  ;;  %v1809_v63 = vstv %s4771_s28  ;;  %v2990_v59 = vadd.f32 -8.0, %v3931_v24  ;;  %v1764_v35 = vadd.f32 %v1762_v0, %v1758_v46  ;;  %s4935_s25 = sld [smem:[#allocation11 + $0x9b]] }
 0x191   :  { %v1794_v14 = vadd.f32 %v1792_v4, %v1788_v5  ;;  %v1795_v11 = vadd.f32 %v1793_v55, %v1789_v47  ;;  %v1804_v38 = vmul.f32 %v1803_v15, %v4050_v8  ;;  %v1768_v1 = vmul.f32 %v1767_v27, %v5688_v20  ;;  %s4939_s28 = sld [smem:[#allocation11 + $0x97]] }
 0x192   :  { %v1805_v42 = vmul.f32 %v1803_v15, %v5689_v54  ;;  %v2991_v6 = vadd.f32 -8.0, %v3933_v7  ;;  %v1810_v50 = vmul.f32 %v1809_v63, %v5690_v32  ;;  %v1829_v41 = vstv %s4782_s29  ;;  %s4943_s29 = sld [smem:[#allocation11 + $0x9c]] }
 0x193   :  { %v1800_v31 = vadd.f32 %v1798_v61, %v1794_v14  ;;  %v1801_v19 = vadd.f32 %v1799_v37, %v1795_v11  ;;  %v1711_v4 = vmul.f32 %v1709_v49, %v1615_v58  ;;  %v1765_v55 = vadd.f32 %v1763_v10, %v1759_v34  ;;  %v5704_v34 = vld [vmem:[#allocation24_spill] sm:$0xff] }
 0x194   :  { %v1769_v0 = vmul.f32 %v1767_v27, %v3996_v44  ;;  %v1811_v46 = vmul.f32 %v1809_v63, %v4115_v40  ;;  %v1822_v47 = vand.u32 2147483647, %v2990_v59  ;;  %v1830_v15 = vmul.f32 %v1829_v41, %v3944_v2  ;;  %v5705_v63 = vld [vmem:[#allocation25_spill] sm:$0xff] }
 0x195   :  { %v1806_v5 = vadd.f32 %v1804_v38, %v1800_v31  ;;  %v1831_v61 = vmul.f32 %v1829_v41, %v3946_v29  ;;  %v1807_v37 = vadd.f32 %v1805_v42, %v1801_v19  ;;  %v1823_v14 = vand.u32 2147483647, %v2991_v6  ;;  %v5706_v31 = vld [vmem:[#allocation26_spill] sm:$0xff] }
 0x196   :  { %v1837_v11 = vstv %s4789_s30  ;;  %v1843_v12 = vstv %s4794_s0  ;;  %v1770_v58 = vadd.f32 %v1768_v1, %v1764_v35  ;;  %v1771_v10 = vadd.f32 %v1769_v0, %v1765_v55  ;;  %s4947_s30 = sld [smem:[#allocation11 + $0x9d]] }
 0x197   :  { %v1812_v49 = vadd.f32 %v1810_v50, %v1806_v5  ;;  %v1838_v27 = vmul.f32 %v1837_v11, %v3949_v45  ;;  %v1839_v59 = vmul.f32 %v1837_v11, %v5704_v34  ;;  %v1844_v38 = vmul.f32 %v1843_v12, %v5705_v63  ;;  %s4958_s0 = sld [smem:[#allocation11 + $0x9e]] }
 0x198   :  { %v1845_v42 = vmul.f32 %v1843_v12, %v5706_v31  ;;  %v1849_v19 = vstv %s4801_s6  ;;  %v4835_v6 = vsub.f32 1.0, %v1822_v47  ;;  %v1833_v41 = vstv %s4805_s7  ;;  %s4964_s6 = sld [smem:[#allocation11 + $0x9f]] }
 0x199   :  { %v1840_v35 = vadd.f32 %v1838_v27, %v1830_v15  ;;  %v1841_v1 = vadd.f32 %v1839_v59, %v1831_v61  ;;  %v1813_v50 = vadd.f32 %v1811_v46, %v1807_v37  ;;  %v4840_v5 = vsub.f32 1.0, %v1823_v14  ;;  %s4970_s7 = sld [smem:[#allocation11 + $0xa0]] }
 0x19a   :  { %v1850_v55 = vmul.f32 %v1849_v19, %v3963_v62  ;;  %v1855_v0 = vstv %s4810_s8  ;;  %v1814_v11 = vadd.f32 %v1812_v49, %v1770_v58  ;;  %v1851_v47 = vmul.f32 %v1849_v19, %v5694_v3  ;;  %s4978_s8 = sld [smem:[#allocation11 + $0xa1]] }
 0x19b   :  { %5707 = vst [vmem:[#allocation40_spill] sm:$0xff] %v4840_v5  ;;  %v1846_v12 = vadd.f32 %v1844_v38, %v1840_v35  ;;  %v1847_v40 = vadd.f32 %v1845_v42, %v1841_v1  ;;  %v1712_v15 = vadd.f32 %v4767_v16, %v4746_v43  ;;  %v1713_v46 = vadd.f32 %v1711_v4, %v4749_v33 }
 0x19c   :  { %v1721_v61 = vmax.f32 %v4759_v60, 0.0  ;;  %v1834_v37 = vmul.f32 %v1833_v41, %v4009_v21  ;;  %v1856_v58 = vmul.f32 %v1855_v0, %v3978_v22  ;;  %v1879_v49 = vstv %s4820_s9  ;;  %s4982_s9 = sld [smem:[#allocation11 + $0xa2]] }
 0x19d   :  { %v1852_v14 = vadd.f32 %v1850_v55, %v1846_v12  ;;  %v1835_v43 = vmul.f32 %v1833_v41, %v4011_v23  ;;  %v1861_v16 = vstv %s4824_s1  ;;  %v1815_v33 = vadd.f32 %v1813_v50, %v1771_v10  ;;  %s4988_s1 = sld [smem:[#allocation11 + $0xa3]] }
 0x19e   :  { %v5708_v60 = vmax.f32 %v4738_v30, 0.0  ;;  %v1853_v38 = vadd.f32 %v1851_v47, %v1847_v40  ;;  %v1857_v42 = vmul.f32 %v1855_v0, %v3980_v17  ;;  %v1880_v19 = vmul.f32 %v1879_v49, %v4015_v26 }
 0x19f   :  { %v1881_v35 = vmul.f32 %v1879_v49, %v4017_v18  ;;  %v1885_v1 = vstv %s4828_s10  ;;  %v1891_v41 = vstv %s4833_s11  ;;  %v1858_v10 = vadd.f32 %v1856_v58, %v1852_v14  ;;  %s4992_s10 = sld [smem:[#allocation11 + $0xa8]] }
 0x1a0   :  { %v1816_v4 = vmul.f32 %v1814_v11, %v5708_v60  ;;  %v1862_v30 = vmul.f32 %v1861_v16, %v3982_v57  ;;  %v1886_v40 = vmul.f32 %v1885_v1, %v4020_v36  ;;  %v1887_v50 = vmul.f32 %v1885_v1, %v4022_v9  ;;  %s4997_s11 = sld [smem:[#allocation11 + $0xa4]] }
 0x1a1   :  { %v1882_v55 = vadd.f32 %v1880_v19, %v1834_v37  ;;  %v1883_v0 = vadd.f32 %v1881_v35, %v1835_v43  ;;  %v1892_v11 = vmul.f32 %v1891_v41, %v5702_v51  ;;  %v1893_v12 = vmul.f32 %v1891_v41, %v5703_v56 }
 0x1a2   :  { %v1817_v47 = vmul.f32 %v1815_v33, %v1721_v61  ;;  %v1867_v49 = vstv %s4838_s12  ;;  %v1897_v14 = vstv %s4844_s13  ;;  %v1903_v58 = vstv %s4847_s2  ;;  %s5000_s12 = sld [smem:[#allocation11 + $0xa9]] }
 0x1a3   :  { %v1888_v60 = vadd.f32 %v1886_v40, %v1882_v55  ;;  %v1889_v59 = vadd.f32 %v1887_v50, %v1883_v0  ;;  %v1898_v27 = vmul.f32 %v1897_v14, %v4030_v39  ;;  %v1899_v1 = vmul.f32 %v1897_v14, %v4032_v13  ;;  %s5008_s13 = sld [smem:[#allocation11 + $0xa5]] }
 0x1a4   :  { %v4889_v5 = vadd.f32 %v1816_v4, %v1712_v15  ;;  %v1859_v37 = vadd.f32 %v1857_v42, %v1853_v38  ;;  %v1863_v43 = vmul.f32 %v1861_v16, %v3987_v53  ;;  %v1873_v19 = vstv %s4855_s3  ;;  %s5013_s2 = sld [smem:[#allocation11 + $0xa6]] }
 0x1a5   :  { %v1864_v35 = vadd.f32 %v1862_v30, %v1858_v10  ;;  %v1868_v61 = vmul.f32 %v1867_v49, %v5677_v52  ;;  %v1894_v33 = vadd.f32 %v1892_v11, %v1888_v60  ;;  %v1895_v41 = vadd.f32 %v1893_v12, %v1889_v59  ;;  %s5017_s3 = sld [smem:[#allocation11 + $0xaa]] }
 0x1a6   :  { %5709 = vst [vmem:[#allocation22_spill] sm:$0xff] %v4889_v5  ;;  %v4898_v40 = vadd.f32 %v1817_v47, %v1713_v46  ;;  %v1869_v15 = vmul.f32 %v1867_v49, %v3991_v25  ;;  %v1904_v16 = vmul.f32 %v1903_v58, %v4036_v48  ;;  %v1905_v4 = vmul.f32 %v1903_v58, %v4038_v28 }
 0x1a7   :  { %v1900_v38 = vadd.f32 %v1898_v27, %v1894_v33  ;;  %v1901_v42 = vadd.f32 %v1899_v1, %v1895_v41  ;;  %v1909_v10 = vstv %s4867_s14  ;;  %v3008_v59 = vadd.f32 -9.0, %v3931_v24  ;;  %s5026_s14 = sld [smem:[#allocation11 + $0xab]] }
 0x1a8   :  { %5710 = vst [vmem:[#allocation29_spill] sm:$0xff] %v4898_v40  ;;  %v1865_v30 = vadd.f32 %v1863_v43, %v1859_v37  ;;  %v1874_v50 = vmul.f32 %v1873_v19, %v5688_v20  ;;  %v1875_v46 = vmul.f32 %v1873_v19, %v3996_v44  ;;  %v1935_v55 = vstv %s4862_s4  ;;  %s5021_s4 = sld [smem:[#allocation11 + $0xa7]] }
 0x1a9   :  { %v1870_v0 = vadd.f32 %v1868_v61, %v1864_v35  ;;  %v1915_v11 = vstv %s4873_s15  ;;  %v1943_v12 = vstv %s4878_s16  ;;  %v1949_v47 = vstv %s4882_s17  ;;  %s5033_s15 = sld [smem:[#allocation11 + $0xac]] }
 0x1aa   :  { %v1910_v49 = vmul.f32 %v1909_v10, %v4050_v8  ;;  %v1911_v27 = vmul.f32 %v1909_v10, %v5689_v54  ;;  %v1936_v14 = vmul.f32 %v1935_v55, %v3944_v2  ;;  %v1937_v58 = vmul.f32 %v1935_v55, %v3946_v29  ;;  %s5037_s16 = sld [smem:[#allocation11 + $0xad]] }
 0x1ab   :  { %v1906_v60 = vadd.f32 %v1904_v16, %v1900_v38  ;;  %v1907_v1 = vadd.f32 %v1905_v4, %v1901_v42  ;;  %v3009_v37 = vadd.f32 -9.0, %v3933_v7  ;;  %v1928_v43 = vand.u32 2147483647, %v3008_v59  ;;  %v5711_v16 = vld [vmem:[#allocation39_spill] sm:$0xff]  ;;  %s5053_s17 = sld [smem:[#allocation11 + $0xae]] }
 0x1ac   :  { %v1944_v19 = vmul.f32 %v1943_v12, %v3949_v45  ;;  %v1945_v35 = vmul.f32 %v1943_v12, %v5704_v34  ;;  %v1950_v61 = vmul.f32 %v1949_v47, %v5705_v63  ;;  %v1951_v33 = vmul.f32 %v1949_v47, %v5706_v31 }
 0x1ad   :  { %v1871_v41 = vadd.f32 %v1869_v15, %v1865_v30  ;;  %v1916_v10 = vmul.f32 %v1915_v11, %v5690_v32  ;;  %v1917_v38 = vmul.f32 %v1915_v11, %v5711_v16  ;;  %v1939_v4 = vstv %s4893_s18  ;;  %s5058_s18 = sld [smem:[#allocation11 + $0xb0]] }
 0x1ae   :  { %v1946_v42 = vadd.f32 %v1944_v19, %v1936_v14  ;;  %v1947_v59 = vadd.f32 %v1945_v35, %v1937_v58  ;;  %v1955_v55 = vstv %s4896_s19  ;;  %v1961_v40 = vstv %s4903_s20  ;;  %s5064_s19 = sld [smem:[#allocation11 + $0xaf]] }
 0x1af   :  { %v1912_v12 = vadd.f32 %v1910_v49, %v1906_v60  ;;  %v1929_v5 = vand.u32 2147483647, %v3009_v37  ;;  %v1956_v47 = vmul.f32 %v1955_v55, %v3963_v62  ;;  %v1957_v15 = vmul.f32 %v1955_v55, %v5694_v3  ;;  %s5069_s20 = sld [smem:[#allocation11 + $0xb1]] }
 0x1b0   :  { %v1913_v30 = vadd.f32 %v1911_v27, %v1907_v1  ;;  %v4941_v11 = vsub.f32 1.0, %v1928_v43  ;;  %v1952_v31 = vadd.f32 %v1950_v61, %v1946_v42  ;;  %v1953_v14 = vadd.f32 %v1951_v33, %v1947_v59 }
 0x1b1   :  { %v1876_v58 = vadd.f32 %v1874_v50, %v1870_v0  ;;  %v1877_v19 = vadd.f32 %v1875_v46, %v1871_v41  ;;  %v1962_v49 = vmul.f32 %v1961_v40, %v3978_v22  ;;  %v1967_v60 = vstv %s4913_s21  ;;  %v5717_v0 = vld [vmem:[#allocation27_spill] sm:$0xff]  ;;  %s5073_s21 = sld [smem:[#allocation11 + $0xb2]] }
 0x1b2   :  { %v1958_v37 = vadd.f32 %v1956_v47, %v1952_v31  ;;  %v1959_v35 = vadd.f32 %v1957_v15, %v1953_v14  ;;  %v1963_v55 = vmul.f32 %v1961_v40, %v3980_v17  ;;  %v1973_v3 = vstv %s4919_s22  ;;  %s5086_s22 = sld [smem:[#allocation11 + $0xb8]] }
 0x1b3   :  { %v1918_v27 = vadd.f32 %v1916_v10, %v1912_v12  ;;  %v4951_v1 = vsub.f32 1.0, %v1929_v5  ;;  %v1940_v43 = vmul.f32 %v1939_v4, %v4009_v21  ;;  %v1941_v50 = vmul.f32 %v1939_v4, %v4011_v23 }
 0x1b4   :  { %v1919_v46 = vadd.f32 %v1917_v38, %v1913_v30  ;;  %v1968_v61 = vmul.f32 %v1967_v60, %v3982_v57  ;;  %v1985_v33 = vstv %s4926_s23  ;;  %v1969_v31 = vmul.f32 %v1967_v60, %v3987_v53  ;;  %s5091_s23 = sld [smem:[#allocation11 + $0xb3]] }
 0x1b5   :  { %v1974_v40 = vmul.f32 %v1973_v3, %v5677_v52  ;;  %v1986_v5 = vmul.f32 %v1985_v33, %v4015_v26  ;;  %v1987_v41 = vmul.f32 %v1985_v33, %v4017_v18  ;;  %v1964_v10 = vadd.f32 %v1962_v49, %v1958_v37 }
 0x1b6   :  { %v1965_v38 = vadd.f32 %v1963_v55, %v1959_v35  ;;  %v1991_v4 = vstv %s4931_s24  ;;  %v1997_v42 = vstv %s4935_s25  ;;  %v1975_v30 = vmul.f32 %v1973_v3, %v3991_v25  ;;  %s5095_s24 = sld [smem:[#allocation11 + $0xb4]] }
 0x1b7   :  { %v1988_v59 = vadd.f32 %v1986_v5, %v1940_v43  ;;  %v1989_v12 = vadd.f32 %v1987_v41, %v1941_v50  ;;  %v1992_v47 = vmul.f32 %v1991_v4, %v4020_v36  ;;  %v1993_v15 = vmul.f32 %v1991_v4, %v4022_v9  ;;  %s5107_s25 = sld [smem:[#allocation11 + $0xb9]] }
 0x1b8   :  { %v1979_v14 = vstv %s4939_s28  ;;  %v1998_v60 = vmul.f32 %v1997_v42, %v5702_v51  ;;  %v1999_v33 = vmul.f32 %v1997_v42, %v5703_v56  ;;  %v2003_v35 = vstv %s4943_s29  ;;  %s5110_s28 = sld [smem:[#allocation11 + $0xb5]] }
 0x1b9   :  { %v1994_v49 = vadd.f32 %v1992_v47, %v1988_v59  ;;  %v1995_v37 = vadd.f32 %v1993_v15, %v1989_v12  ;;  %v2009_v55 = vstv %s4947_s30  ;;  %v1970_v43 = vadd.f32 %v1968_v61, %v1964_v10  ;;  %s5116_s29 = sld [smem:[#allocation11 + $0xb6]] }
 0x1ba   :  { %v1971_v50 = vadd.f32 %v1969_v31, %v1965_v38  ;;  %v2004_v5 = vmul.f32 %v2003_v35, %v4030_v39  ;;  %v2005_v41 = vmul.f32 %v2003_v35, %v4032_v13  ;;  %v2010_v42 = vmul.f32 %v2009_v55, %v4036_v48  ;;  %s5119_s30 = sld [smem:[#allocation11 + $0xba]] }
 0x1bb   :  { %v2000_v3 = vadd.f32 %v1998_v60, %v1994_v49  ;;  %v2001_v4 = vadd.f32 %v1999_v33, %v1995_v37  ;;  %v2011_v59 = vmul.f32 %v2009_v55, %v4038_v28  ;;  %v1920_v12 = vadd.f32 %v1918_v27, %v1876_v58 }
 0x1bc   :  { %v1921_v47 = vadd.f32 %v1919_v46, %v1877_v19  ;;  %v1980_v15 = vmul.f32 %v1979_v14, %v5688_v20  ;;  %v2015_v61 = vstv %s4958_s0  ;;  %v2021_v38 = vstv %s4964_s6  ;;  %s5123_s0 = sld [smem:[#allocation11 + $0xbb]] }
 0x1bd   :  { %v2006_v31 = vadd.f32 %v2004_v5, %v2000_v3  ;;  %v2007_v10 = vadd.f32 %v2005_v41, %v2001_v4  ;;  %v3026_v35 = vadd.f32 -10.0, %v3931_v24  ;;  %v1976_v60 = vadd.f32 %v1974_v40, %v1970_v43  ;;  %v5713_v40 = vld [vmem:[#allocation40_spill] sm:$0xff]  ;;  %s5132_s6 = sld [smem:[#allocation11 + $0xbc]] }
 0x1be   :  { %v1981_v33 = vmul.f32 %v1979_v14, %v3996_v44  ;;  %v2016_v49 = vmul.f32 %v2015_v61, %v4050_v8  ;;  %v2017_v58 = vmul.f32 %v2015_v61, %v5689_v54  ;;  %v1977_v19 = vadd.f32 %v1975_v30, %v1971_v50 }
 0x1bf   :  { %v2012_v27 = vadd.f32 %v2010_v42, %v2006_v31  ;;  %v2013_v46 = vadd.f32 %v2011_v59, %v2007_v10  ;;  %v2041_v37 = vstv %s4970_s7  ;;  %v5712_v55 = vmax.f32 %v4835_v6, 0.0  ;;  %s5138_s7 = sld [smem:[#allocation11 + $0xbd]] }
 0x1c0   :  { %v5714_v43 = vmax.f32 %v5713_v40, 0.0  ;;  %v2022_v41 = vmul.f32 %v2021_v38, %v5690_v32  ;;  %v3027_v3 = vadd.f32 -10.0, %v3933_v7  ;;  %v2023_v30 = vmul.f32 %v2021_v38, %v5711_v16 }
 0x1c1   :  { %v1922_v5 = vmul.f32 %v1920_v12, %v5712_v55  ;;  %v2034_v50 = vand.u32 2147483647, %v3026_v35  ;;  %v2042_v4 = vmul.f32 %v2041_v37, %v3944_v2  ;;  %v2043_v42 = vmul.f32 %v2041_v37, %v3946_v29  ;;  %v5715_v55 = vld [vmem:[#allocation26_spill] sm:$0xff] }
 0x1c2   :  { %v1923_v14 = vmul.f32 %v1921_v47, %v5714_v43  ;;  %v2018_v6 = vadd.f32 %v2016_v49, %v2012_v27  ;;  %v2019_v59 = vadd.f32 %v2017_v58, %v2013_v46  ;;  %v2049_v12 = vstv %s4978_s8  ;;  %s5149_s8 = sld [smem:[#allocation11 + $0xb7]] }
 0x1c3   :  { %v2055_v47 = vstv %s4982_s9  ;;  %v1982_v61 = vadd.f32 %v1980_v15, %v1976_v60  ;;  %v1983_v31 = vadd.f32 %v1981_v33, %v1977_v19  ;;  %v2050_v10 = vmul.f32 %v2049_v12, %v3949_v45  ;;  %s5153_s9 = sld [smem:[#allocation11 + $0xbe]] }
 0x1c4   :  { %v2051_v38 = vmul.f32 %v2049_v12, %v5704_v34  ;;  %v2035_v35 = vand.u32 2147483647, %v3027_v3  ;;  %v2056_v37 = vmul.f32 %v2055_v47, %v5705_v63  ;;  %v2057_v49 = vmul.f32 %v2055_v47, %v5715_v55 }
 0x1c5   :  { %v2061_v27 = vstv %s4988_s1  ;;  %v5028_v58 = vsub.f32 1.0, %v2034_v50  ;;  %v2045_v46 = vstv %s4992_s10  ;;  %v2052_v15 = vadd.f32 %v2050_v10, %v2042_v4  ;;  %v5718_v50 = vld [vmem:[#allocation22_spill] sm:$0xff]  ;;  %s5158_s1 = sld [smem:[#allocation11 + $0xbf]] }
 0x1c6   :  { %v2053_v60 = vadd.f32 %v2051_v38, %v2043_v42  ;;  %v2024_v33 = vadd.f32 %v2022_v41, %v2018_v6  ;;  %v2025_v19 = vadd.f32 %v2023_v30, %v2019_v59  ;;  %v2062_v40 = vmul.f32 %v2061_v27, %v3963_v62  ;;  %v5719_v41 = vld [vmem:[#allocation29_spill] sm:$0xff]  ;;  %s5165_s10 = sld [smem:[#allocation11 + $0xc0]] }
 0x1c7   :  { %5716 = vst [vmem:[#allocation36_spill] sm:$0xff] %v5028_v58  ;;  %v2067_v43 = vstv %s4997_s11  ;;  %v2058_v12 = vadd.f32 %v2056_v37, %v2052_v15  ;;  %v2063_v16 = vmul.f32 %v2061_v27, %v5717_v0  ;;  %v5040_v4 = vadd.f32 %v1922_v5, %v5718_v50  ;;  %s5172_s11 = sld [smem:[#allocation11 + $0xc1]] }
 0x1c8   :  { %v2059_v47 = vadd.f32 %v2057_v49, %v2053_v60  ;;  %v5043_v30 = vadd.f32 %v1923_v14, %v5719_v41  ;;  %v5045_v42 = vsub.f32 1.0, %v2035_v35  ;;  %v2046_v6 = vmul.f32 %v2045_v46, %v4009_v21 }
 0x1c9   :  { %v2047_v59 = vmul.f32 %v2045_v46, %v4011_v23  ;;  %v2064_v10 = vadd.f32 %v2062_v40, %v2058_v12  ;;  %v2068_v38 = vmul.f32 %v2067_v43, %v3978_v22  ;;  %v2091_v37 = vstv %s5000_s12  ;;  %s5181_s12 = sld [smem:[#allocation11 + $0xc2]] }
 0x1ca   :  { %v2026_v49 = vadd.f32 %v2024_v33, %v1982_v61  ;;  %v2027_v27 = vadd.f32 %v2025_v19, %v1983_v31  ;;  %v2073_v15 = vstv %s5008_s13  ;;  %v2065_v14 = vadd.f32 %v2063_v16, %v2059_v47  ;;  %s5184_s13 = sld [smem:[#allocation11 + $0xc8]] }
 0x1cb   :  { %v2069_v35 = vmul.f32 %v2067_v43, %v3980_v17  ;;  %v2079_v60 = vstv %s5013_s2  ;;  %v2085_v50 = vstv %s5021_s4  ;;  %v2092_v46 = vmul.f32 %v2091_v37, %v4015_v26  ;;  %s5189_s2 = sld [smem:[#allocation11 + $0xc3]] }
 0x1cc   :  { %v2093_v40 = vmul.f32 %v2091_v37, %v4017_v18  ;;  %v2097_v12 = vstv %s5017_s3  ;;  %v2103_v61 = vstv %s5026_s14  ;;  %v2070_v31 = vadd.f32 %v2068_v38, %v2064_v10  ;;  %s5196_s3 = sld [smem:[#allocation11 + $0xc4]] }
 0x1cd   :  { %v2074_v33 = vmul.f32 %v2073_v15, %v3982_v57  ;;  %v2098_v16 = vmul.f32 %v2097_v12, %v4020_v36  ;;  %v2099_v19 = vmul.f32 %v2097_v12, %v4022_v9  ;;  %v2094_v43 = vadd.f32 %v2092_v46, %v2046_v6  ;;  %s5200_s4 = sld [smem:[#allocation11 + $0xc9]] }
 0x1ce   :  { %v2095_v47 = vadd.f32 %v2093_v40, %v2047_v59  ;;  %v2104_v41 = vmul.f32 %v2103_v61, %v5702_v51  ;;  %v2105_v37 = vmul.f32 %v2103_v61, %v5703_v56  ;;  %v2071_v5 = vadd.f32 %v2069_v35, %v2065_v14  ;;  %s5205_s14 = sld [smem:[#allocation11 + $0xc5]] }
 0x1cf   :  { %v2075_v10 = vmul.f32 %v2073_v15, %v3987_v53  ;;  %v2109_v38 = vstv %s5033_s15  ;;  %v2115_v3 = vstv %s5037_s16  ;;  %v2100_v58 = vadd.f32 %v2098_v16, %v2094_v43  ;;  %s5209_s15 = sld [smem:[#allocation11 + $0xc6]] }
 0x1d0   :  { %v2101_v36 = vadd.f32 %v2099_v19, %v2095_v47  ;;  %v2110_v12 = vmul.f32 %v2109_v38, %v4030_v39  ;;  %v2111_v9 = vmul.f32 %v2109_v38, %v4032_v13  ;;  %v5720_v6 = vmax.f32 %v4941_v11, 0.0  ;;  %s5213_s16 = sld [smem:[#allocation11 + $0xca]] }
 0x1d1   :  { %v2076_v46 = vadd.f32 %v2074_v33, %v2070_v31  ;;  %v2080_v40 = vmul.f32 %v2079_v60, %v5677_v52  ;;  %v2116_v61 = vmul.f32 %v2115_v3, %v4036_v48  ;;  %v2106_v56 = vadd.f32 %v2104_v41, %v2100_v58 }
 0x1d2   :  { %v2028_v59 = vmul.f32 %v2026_v49, %v5720_v6  ;;  %v2107_v14 = vadd.f32 %v2105_v37, %v2101_v36  ;;  %v2117_v15 = vmul.f32 %v2115_v3, %v4038_v28  ;;  %v2121_v35 = vstv %s5053_s17  ;;  %s5218_s17 = sld [smem:[#allocation11 + $0xc7]] }
 0x1d3   :  { %v2077_v16 = vadd.f32 %v2075_v10, %v2071_v5  ;;  %v2081_v19 = vmul.f32 %v2079_v60, %v3991_v25  ;;  %v2086_v11 = vmul.f32 %v2085_v50, %v5688_v20  ;;  %v2122_v49 = vmul.f32 %v2121_v35, %v4050_v8 }
 0x1d4   :  { %v2112_v58 = vadd.f32 %v2110_v12, %v2106_v56  ;;  %v2113_v36 = vadd.f32 %v2111_v9, %v2107_v14  ;;  %v3044_v31 = vadd.f32 -11.0, %v3931_v24  ;;  %v3045_v3 = vadd.f32 -11.0, %v3933_v7 }
 0x1d5   :  { %v2082_v33 = vadd.f32 %v2080_v40, %v2076_v46  ;;  %v2123_v5 = vmul.f32 %v2121_v35, %v5689_v54  ;;  %v2127_v43 = vstv %s5064_s19  ;;  %v2147_v60 = vstv %s5058_s18  ;;  %s5224_s18 = sld [smem:[#allocation11 + $0xcb]] }
 0x1d6   :  { %v2118_v47 = vadd.f32 %v2116_v61, %v2112_v58  ;;  %v2119_v41 = vadd.f32 %v2117_v15, %v2113_v36  ;;  %v2155_v37 = vstv %s5069_s20  ;;  %v2161_v10 = vstv %s5073_s21  ;;  %v5722_v36 = vld [vmem:[#allocation39_spill] sm:$0xff]  ;;  %s5232_s19 = sld [smem:[#allocation11 + $0xcc]] }
 0x1d7   :  { %v5721_v38 = vmax.f32 %v4951_v1, 0.0  ;;  %v2087_v9 = vmul.f32 %v2085_v50, %v3996_v44  ;;  %v2148_v56 = vmul.f32 %v2147_v60, %v3944_v2  ;;  %v2149_v12 = vmul.f32 %v2147_v60, %v3946_v29  ;;  %s5239_s20 = sld [smem:[#allocation11 + $0xcd]] }
 0x1d8   :  { %v2124_v46 = vadd.f32 %v2122_v49, %v2118_v47  ;;  %v2128_v40 = vmul.f32 %v2127_v43, %v5690_v32  ;;  %v2140_v14 = vand.u32 2147483647, %v3044_v31  ;;  %v2141_v61 = vand.u32 2147483647, %v3045_v3  ;;  %s5249_s21 = sld [smem:[#allocation11 + $0xce]] }
 0x1d9   :  { %v2029_v6 = vmul.f32 %v2027_v27, %v5721_v38  ;;  %v2156_v1 = vmul.f32 %v2155_v37, %v3949_v45  ;;  %v2157_v27 = vmul.f32 %v2155_v37, %v5704_v34  ;;  %v2162_v50 = vmul.f32 %v2161_v10, %v5705_v63 }
 0x1da   :  { %v2163_v15 = vmul.f32 %v2161_v10, %v5715_v55  ;;  %v2083_v35 = vadd.f32 %v2081_v19, %v2077_v16  ;;  %v2088_v49 = vadd.f32 %v2086_v11, %v2082_v33  ;;  %v2125_v58 = vadd.f32 %v2123_v5, %v2119_v41 }
 0x1db   :  { %v2129_v31 = vmul.f32 %v2127_v43, %v5722_v36  ;;  %v2151_v3 = vstv %s5086_s22  ;;  %v2158_v60 = vadd.f32 %v2156_v1, %v2148_v56  ;;  %v2159_v47 = vadd.f32 %v2157_v27, %v2149_v12  ;;  %s5253_s22 = sld [smem:[#allocation11 + $0xcf]] }
 0x1dc   :  { %v2167_v38 = vstv %s5091_s23  ;;  %v5125_v37 = vsub.f32 1.0, %v2140_v14  ;;  %v5127_v63 = vsub.f32 1.0, %v2141_v61  ;;  %v2173_v55 = vstv %s5095_s24  ;;  %s5262_s23 = sld [smem:[#allocation11 + $0xd0]] }
 0x1dd   :  { %v2168_v10 = vmul.f32 %v2167_v38, %v3963_v62  ;;  %v2130_v16 = vadd.f32 %v2128_v40, %v2124_v46  ;;  %v2164_v19 = vadd.f32 %v2162_v50, %v2158_v60  ;;  %v2165_v11 = vadd.f32 %v2163_v15, %v2159_v47  ;;  %v5723_v47 = vld [vmem:[#allocation32_spill] sm:$0xff]  ;;  %s5267_s24 = sld [smem:[#allocation11 + $0xd1]] }
 0x1de   :  { %v2169_v33 = vmul.f32 %v2167_v38, %v5717_v0  ;;  %v5135_v5 = vadd.f32 %v2028_v59, %v5040_v4  ;;  %v2039_v43 = vmax.f32 %v5045_v42, 0.0  ;;  %v2089_v41 = vadd.f32 %v2087_v9, %v2083_v35 }
 0x1df   :  { %v2131_v56 = vadd.f32 %v2129_v31, %v2125_v58  ;;  %v5141_v12 = vadd.f32 %v2029_v6, %v5043_v30  ;;  %v2152_v46 = vmul.f32 %v2151_v3, %v4009_v21  ;;  %v2170_v40 = vadd.f32 %v2168_v10, %v2164_v19  ;;  %v5724_v10 = vld [vmem:[#allocation33_spill] sm:$0xff] }
 0x1e0   :  { %v2174_v14 = vmul.f32 %v2173_v55, %v3978_v22  ;;  %v2153_v42 = vmul.f32 %v2151_v3, %v4011_v23  ;;  %v2179_v59 = vstv %s5110_s28  ;;  %v2132_v9 = vadd.f32 %v2130_v16, %v2088_v49  ;;  %s5283_s28 = sld [smem:[#allocation11 + $0xd3]] }
 0x1e1   :  { %v2171_v1 = vadd.f32 %v2169_v33, %v2165_v11  ;;  %v2175_v30 = vmul.f32 %v2173_v55, %v3980_v17  ;;  %v2197_v6 = vstv %s5107_s25  ;;  %v2133_v27 = vadd.f32 %v2131_v56, %v2089_v41  ;;  %v5725_v41 = vld [vmem:[#allocation35_spill] sm:$0xff]  ;;  %s5271_s25 = sld [smem:[#allocation11 + $0xd2]] }
 0x1e2   :  { %v2185_v50 = vstv %s5116_s29  ;;  %v2198_v15 = vmul.f32 %v2197_v6, %v4015_v26  ;;  %v2199_v35 = vmul.f32 %v2197_v6, %v4017_v18  ;;  %v2176_v58 = vadd.f32 %v2174_v14, %v2170_v40  ;;  %s5289_s29 = sld [smem:[#allocation11 + $0xd4]] }
 0x1e3   :  { %v2180_v31 = vmul.f32 %v2179_v59, %v3982_v57  ;;  %v2203_v49 = vstv %s5119_s30  ;;  %v2209_v3 = vstv %s5123_s0  ;;  %v2177_v19 = vadd.f32 %v2175_v30, %v2171_v1  ;;  %s5292_s30 = sld [smem:[#allocation11 + $0xd8]] }
 0x1e4   :  { %v2200_v60 = vadd.f32 %v2198_v15, %v2152_v46  ;;  %v2201_v55 = vadd.f32 %v2199_v35, %v2153_v42  ;;  %v2204_v38 = vmul.f32 %v2203_v49, %v5723_v47  ;;  %v2205_v16 = vmul.f32 %v2203_v49, %v5724_v10  ;;  %v5726_v42 = vld [vmem:[#allocation36_spill] sm:$0xff]  ;;  %s5299_s0 = sld [smem:[#allocation11 + $0xd5]] }
 0x1e5   :  { %v2181_v11 = vmul.f32 %v2179_v59, %v3987_v53  ;;  %v2210_v33 = vmul.f32 %v2209_v3, %v5702_v51  ;;  %v2211_v56 = vmul.f32 %v2209_v3, %v5725_v41  ;;  %v2215_v6 = vstv %s5132_s6  ;;  %s5310_s6 = sld [smem:[#allocation11 + $0xd6]] }
 0x1e6   :  { %v2206_v40 = vadd.f32 %v2204_v38, %v2200_v60  ;;  %v2207_v14 = vadd.f32 %v2205_v16, %v2201_v55  ;;  %v2221_v46 = vstv %s5138_s7  ;;  %v5727_v15 = vmax.f32 %v5726_v42, 0.0  ;;  %s5316_s7 = sld [smem:[#allocation11 + $0xd9]] }
 0x1e7   :  { %v2186_v1 = vmul.f32 %v2185_v50, %v5677_v52  ;;  %v2216_v59 = vmul.f32 %v2215_v6, %v4030_v39  ;;  %v2217_v30 = vmul.f32 %v2215_v6, %v4032_v13  ;;  %v2182_v49 = vadd.f32 %v2180_v31, %v2176_v58 }
 0x1e8   :  { %v5176_v35 = vmul.f32 %v2132_v9, %v5727_v15  ;;  %v2212_v3 = vadd.f32 %v2210_v33, %v2206_v40  ;;  %v2213_v60 = vadd.f32 %v2211_v56, %v2207_v14  ;;  %v2222_v55 = vmul.f32 %v2221_v46, %v4036_v48 }
 0x1e9   :  { %v2183_v38 = vadd.f32 %v2181_v11, %v2177_v19  ;;  %v2187_v9 = vmul.f32 %v2185_v50, %v3991_v25  ;;  %v2191_v16 = vstv %s5149_s8  ;;  %v2227_v42 = vstv %s5153_s9  ;;  %s5319_s8 = sld [smem:[#allocation11 + $0xda]] }
 0x1ea   :  { %v2218_v15 = vadd.f32 %v2216_v59, %v2212_v3  ;;  %v2233_v4 = vstv %s5158_s1  ;;  %v3062_v6 = vadd.f32 -12.0, %v3931_v24  ;;  %v3063_v58 = vadd.f32 -12.0, %v3933_v7  ;;  %v5729_v7 = vld [vmem:[#allocation26_spill] sm:$0xff]  ;;  %s5323_s9 = sld [smem:[#allocation11 + $0xdb]] }
 0x1eb   :  { %v2135_v31 = vmul.f32 %v2133_v27, %v2039_v43  ;;  %v2219_v33 = vadd.f32 %v2217_v30, %v2213_v60  ;;  %v2223_v56 = vmul.f32 %v2221_v46, %v4038_v28  ;;  %v2228_v40 = vmul.f32 %v2227_v42, %v4050_v8  ;;  %s5329_s1 = sld [smem:[#allocation11 + $0xd7]] }
 0x1ec   :  { %v2188_v50 = vadd.f32 %v2186_v1, %v2182_v49  ;;  %v2192_v19 = vmul.f32 %v2191_v16, %v5688_v20  ;;  %v2224_v11 = vadd.f32 %v2222_v55, %v2218_v15  ;;  %v2253_v14 = vstv %s5165_s10  ;;  %s5332_s10 = sld [smem:[#allocation11 + $0xdc]] }
 0x1ed   :  { %v2189_v59 = vadd.f32 %v2187_v9, %v2183_v38  ;;  %v2193_v3 = vmul.f32 %v2191_v16, %v3996_v44  ;;  %v2229_v43 = vmul.f32 %v2227_v42, %v5689_v54  ;;  %v2234_v27 = vmul.f32 %v2233_v4, %v5690_v32 }
 0x1ee   :  { %v2246_v46 = vand.u32 2147483647, %v3062_v6  ;;  %v2247_v1 = vand.u32 2147483647, %v3063_v58  ;;  %v2254_v30 = vmul.f32 %v2253_v14, %v3944_v2  ;;  %v2255_v49 = vmul.f32 %v2253_v14, %v3946_v29  ;;  %v5728_v14 = vld [vmem:[#allocation25_spill] sm:$0xff] }
 0x1ef   :  { %v2225_v60 = vadd.f32 %v2223_v56, %v2219_v33  ;;  %v2230_v55 = vadd.f32 %v2228_v40, %v2224_v11  ;;  %v2261_v38 = vstv %s5172_s11  ;;  %v2267_v9 = vstv %s5181_s12  ;;  %s5337_s11 = sld [smem:[#allocation11 + $0xdd]] }
 0x1f0   :  { %v2194_v16 = vadd.f32 %v2192_v19, %v2188_v50  ;;  %v2235_v42 = vmul.f32 %v2233_v4, %v5722_v36  ;;  %v2262_v15 = vmul.f32 %v2261_v38, %v3949_v45  ;;  %v2263_v6 = vmul.f32 %v2261_v38, %v5704_v34  ;;  %s5355_s12 = sld [smem:[#allocation11 + $0xde]] }
 0x1f1   :  { %v2257_v58 = vstv %s5184_s13  ;;  %v2268_v61 = vmul.f32 %v2267_v9, %v5728_v14  ;;  %v2269_v33 = vmul.f32 %v2267_v9, %v5729_v7  ;;  %v2273_v56 = vstv %s5189_s2  ;;  %s5359_s13 = sld [smem:[#allocation11 + $0xe0]] }
 0x1f2   :  { %v5226_v40 = vsub.f32 1.0, %v2246_v46  ;;  %v5228_v50 = vsub.f32 1.0, %v2247_v1  ;;  %v2264_v4 = vadd.f32 %v2262_v15, %v2254_v30  ;;  %v2265_v19 = vadd.f32 %v2263_v6, %v2255_v49  ;;  %s5363_s2 = sld [smem:[#allocation11 + $0xdf]] }
 0x1f3   :  { %v2231_v11 = vadd.f32 %v2229_v43, %v2225_v60  ;;  %v2236_v36 = vadd.f32 %v2234_v27, %v2230_v55  ;;  %v2274_v38 = vmul.f32 %v2273_v56, %v3963_v62  ;;  %v2279_v34 = vstv %s5196_s3  ;;  %s5367_s3 = sld [smem:[#allocation11 + $0xe1]] }
 0x1f4   :  { %5730 = vst [vmem:[#allocation23_spill] sm:$0xff] %v5228_v50  ;;  %v5236_v9 = vadd.f32 %v5176_v35, %v5135_v5  ;;  %v2270_v7 = vadd.f32 %v2268_v61, %v2264_v4  ;;  %v2271_v46 = vadd.f32 %v2269_v33, %v2265_v19  ;;  %v2275_v1 = vmul.f32 %v2273_v56, %v5717_v0 }
 0x1f5   :  { %v5242_v43 = vadd.f32 %v2135_v31, %v5141_v12  ;;  %v2195_v27 = vadd.f32 %v2193_v3, %v2189_v59  ;;  %v2258_v30 = vmul.f32 %v2257_v58, %v4009_v21  ;;  %v2259_v49 = vmul.f32 %v2257_v58, %v4011_v23 }
 0x1f6   :  { %v2276_v61 = vadd.f32 %v2274_v38, %v2270_v7  ;;  %v2280_v35 = vmul.f32 %v2279_v34, %v3978_v22  ;;  %v2303_v60 = vstv %s5200_s4  ;;  %v2237_v55 = vadd.f32 %v2235_v42, %v2231_v11  ;;  %s5372_s4 = sld [smem:[#allocation11 + $0xe2]] }
 0x1f7   :  { %5731 = vst [vmem:[#allocation28_spill] sm:$0xff] %v5242_v43  ;;  %v2238_v12 = vadd.f32 %v2236_v36, %v2194_v16  ;;  %v2285_v59 = vstv %s5205_s14  ;;  %v2277_v3 = vadd.f32 %v2275_v1, %v2271_v46  ;;  %v2281_v15 = vmul.f32 %v2279_v34, %v3980_v17  ;;  %s5378_s14 = sld [smem:[#allocation11 + $0xe3]] }
 0x1f8   :  { %v2291_v6 = vstv %s5209_s15  ;;  %v2297_v58 = vstv %s5218_s17  ;;  %v2304_v7 = vmul.f32 %v2303_v60, %v4015_v26  ;;  %v2305_v33 = vmul.f32 %v2303_v60, %v4017_v18  ;;  %s5382_s15 = sld [smem:[#allocation11 + $0xe4]] }
 0x1f9   :  { %v2309_v56 = vstv %s5213_s16  ;;  %v2315_v4 = vstv %s5224_s18  ;;  %v2282_v36 = vadd.f32 %v2280_v35, %v2276_v61  ;;  %v2286_v16 = vmul.f32 %v2285_v59, %v3982_v57  ;;  %s5391_s16 = sld [smem:[#allocation11 + $0xe8]] }
 0x1fa   :  { %v2310_v42 = vmul.f32 %v2309_v56, %v5723_v47  ;;  %v2311_v19 = vmul.f32 %v2309_v56, %v5724_v10  ;;  %v2306_v34 = vadd.f32 %v2304_v7, %v2258_v30  ;;  %v2307_v11 = vadd.f32 %v2305_v33, %v2259_v49  ;;  %s5398_s17 = sld [smem:[#allocation11 + $0xe9]] }
 0x1fb   :  { %v2316_v38 = vmul.f32 %v2315_v4, %v5702_v51  ;;  %v2317_v46 = vmul.f32 %v2315_v4, %v5725_v41  ;;  %v2283_v1 = vadd.f32 %v2281_v15, %v2277_v3  ;;  %v2287_v61 = vmul.f32 %v2285_v59, %v3987_v53  ;;  %s5404_s18 = sld [smem:[#allocation11 + $0xe5]] }
 0x1fc   :  { %v2321_v35 = vstv %s5232_s19  ;;  %v2327_v60 = vstv %s5239_s20  ;;  %v2312_v31 = vadd.f32 %v2310_v42, %v2306_v34  ;;  %v2313_v5 = vadd.f32 %v2311_v19, %v2307_v11  ;;  %s5410_s19 = sld [smem:[#allocation11 + $0xe6]] }
 0x1fd   :  { %v2322_v56 = vmul.f32 %v2321_v35, %v4030_v39  ;;  %v2323_v30 = vmul.f32 %v2321_v35, %v4032_v13  ;;  %v2288_v49 = vadd.f32 %v2286_v16, %v2282_v36  ;;  %v2292_v7 = vmul.f32 %v2291_v6, %v5677_v52  ;;  %s5414_s20 = sld [smem:[#allocation11 + $0xea]] }
 0x1fe   :  { %v2328_v33 = vmul.f32 %v2327_v60, %v4036_v48  ;;  %v2329_v4 = vmul.f32 %v2327_v60, %v4038_v28  ;;  %v2318_v50 = vadd.f32 %v2316_v38, %v2312_v31  ;;  %v2319_v43 = vadd.f32 %v2317_v46, %v2313_v5 }
 0x1ff   :  { %v2333_v3 = vstv %s5249_s21  ;;  %v2339_v59 = vstv %s5253_s22  ;;  %v2239_v15 = vadd.f32 %v2237_v55, %v2195_v27  ;;  %v5732_v42 = vmax.f32 %v5125_v37, 0.0  ;;  %s5418_s21 = sld [smem:[#allocation11 + $0xe7]] }
 0x200   :  { %v2293_v36 = vmul.f32 %v2291_v6, %v3991_v25  ;;  %v2298_v16 = vmul.f32 %v2297_v58, %v5688_v20  ;;  %v2289_v34 = vadd.f32 %v2287_v61, %v2283_v1  ;;  %v2324_v31 = vadd.f32 %v2322_v56, %v2318_v50  ;;  %s5424_s22 = sld [smem:[#allocation11 + $0xeb]] }
 0x201   :  { %v2240_v19 = vmul.f32 %v2238_v12, %v5732_v42  ;;  %v2325_v5 = vadd.f32 %v2323_v30, %v2319_v43  ;;  %v2334_v11 = vmul.f32 %v2333_v3, %v4050_v8  ;;  %v2294_v38 = vadd.f32 %v2292_v7, %v2288_v49  ;;  %v5734_v7 = vld [vmem:[#allocation21_spill] sm:$0xff] }
 0x202   :  { %v2335_v27 = vmul.f32 %v2333_v3, %v5689_v54  ;;  %v2340_v37 = vmul.f32 %v2339_v59, %v5690_v32  ;;  %v2359_v55 = vstv %s5262_s23  ;;  %v2330_v12 = vadd.f32 %v2328_v33, %v2324_v31  ;;  %v5737_v31 = vld [vmem:[#allocation39_spill] sm:$0xff]  ;;  %s5430_s23 = sld [smem:[#allocation11 + $0xec]] }
 0x203   :  { %v2331_v46 = vadd.f32 %v2329_v4, %v2325_v5  ;;  %v2367_v6 = vstv %s5267_s24  ;;  %v2373_v35 = vstv %s5271_s25  ;;  %v5733_v1 = vmax.f32 %v5127_v63, 0.0  ;;  %v5735_v4 = vld [vmem:[#allocation24_spill] sm:$0xff]  ;;  %s5434_s24 = sld [smem:[#allocation11 + $0xed]] }
 0x204   :  { %v2299_v43 = vmul.f32 %v2297_v58, %v3996_v44  ;;  %v2360_v61 = vmul.f32 %v2359_v55, %v3944_v2  ;;  %v2361_v60 = vmul.f32 %v2359_v55, %v3946_v29  ;;  %v2295_v56 = vadd.f32 %v2293_v36, %v2289_v34  ;;  %s5446_s25 = sld [smem:[#allocation11 + $0xee]] }
 0x205   :  { %v5303_v50 = vmul.f32 %v2239_v15, %v5733_v1  ;;  %v2336_v30 = vadd.f32 %v2334_v11, %v2330_v12  ;;  %v3080_v49 = vadd.f32 -13.0, %v3931_v24  ;;  %v3081_v33 = vadd.f32 -13.0, %v5734_v7  ;;  %v5736_v15 = vld [vmem:[#allocation26_spill] sm:$0xff] }
 0x206   :  { %v2368_v63 = vmul.f32 %v2367_v6, %v3949_v45  ;;  %v2369_v3 = vmul.f32 %v2367_v6, %v5735_v4  ;;  %v2374_v58 = vmul.f32 %v2373_v35, %v5728_v14  ;;  %v2375_v42 = vmul.f32 %v2373_v35, %v5736_v15 }
 0x207   :  { %v2300_v36 = vadd.f32 %v2298_v16, %v2294_v38  ;;  %v2337_v34 = vadd.f32 %v2335_v27, %v2331_v46  ;;  %v2341_v5 = vmul.f32 %v2339_v59, %v5737_v31  ;;  %v2342_v11 = vadd.f32 %v2340_v37, %v2336_v30 }
 0x208   :  { %v2370_v55 = vadd.f32 %v2368_v63, %v2360_v61  ;;  %v2371_v12 = vadd.f32 %v2369_v3, %v2361_v60  ;;  %v2379_v1 = vstv %s5283_s28  ;;  %v2385_v32 = vstv %s5289_s29  ;;  %s5450_s28 = sld [smem:[#allocation11 + $0xf0]] }
 0x209   :  { %v2352_v6 = vand.u32 2147483647, %v3080_v49  ;;  %v2353_v14 = vand.u32 2147483647, %v3081_v33  ;;  %v2363_v4 = vstv %s5292_s30  ;;  %v2380_v35 = vmul.f32 %v2379_v1, %v3963_v62  ;;  %s5456_s29 = sld [smem:[#allocation11 + $0xef]] }
 0x20a   :  { %v2376_v15 = vadd.f32 %v2374_v58, %v2370_v55  ;;  %v2377_v16 = vadd.f32 %v2375_v42, %v2371_v12  ;;  %v2381_v38 = vmul.f32 %v2379_v1, %v5717_v0  ;;  %v2386_v59 = vmul.f32 %v2385_v32, %v3978_v22  ;;  %s5462_s30 = sld [smem:[#allocation11 + $0xf1]] }
 0x20b   :  { %v2301_v27 = vadd.f32 %v2299_v43, %v2295_v56  ;;  %v2343_v37 = vadd.f32 %v2341_v5, %v2337_v34  ;;  %v2344_v46 = vadd.f32 %v2342_v11, %v2300_v36  ;;  %v2391_v61 = vstv %s5299_s0  ;;  %s5466_s0 = sld [smem:[#allocation11 + $0xf2]] }
 0x20c   :  { %v2242_v60 = vadd.f32 %v2240_v19, %v5236_v9  ;;  %v2364_v30 = vmul.f32 %v2363_v4, %v4009_v21  ;;  %v2365_v49 = vmul.f32 %v2363_v4, %v4011_v23  ;;  %v2382_v33 = vadd.f32 %v2380_v35, %v2376_v15 }
 0x20d   :  { %v5339_v63 = vsub.f32 1.0, %v2352_v6  ;;  %v5341_v43 = vsub.f32 1.0, %v2353_v14  ;;  %v2387_v56 = vmul.f32 %v2385_v32, %v3980_v17  ;;  %v2397_v3 = vstv %s5310_s6  ;;  %s5478_s6 = sld [smem:[#allocation11 + $0xf3]] }
 0x20e   :  { %v2383_v58 = vadd.f32 %v2381_v38, %v2377_v16  ;;  %v2388_v42 = vadd.f32 %v2386_v59, %v2382_v33  ;;  %v2392_v9 = vmul.f32 %v2391_v61, %v3982_v57  ;;  %v2409_v19 = vstv %s5316_s7  ;;  %s5482_s7 = sld [smem:[#allocation11 + $0xf4]] }
 0x20f   :  { %v2345_v36 = vadd.f32 %v2343_v37, %v2301_v27  ;;  %v5738_v4 = vmax.f32 %v5226_v40, 0.0  ;;  %v2410_v34 = vmul.f32 %v2409_v19, %v4015_v26  ;;  %v2411_v5 = vmul.f32 %v2409_v19, %v4017_v18 }
 0x210   :  { %v2393_v14 = vmul.f32 %v2391_v61, %v3987_v53  ;;  %v2398_v11 = vmul.f32 %v2397_v3, %v5677_v52  ;;  %v2415_v32 = vstv %s5319_s8  ;;  %v2421_v55 = vstv %s5323_s9  ;;  %s5485_s8 = sld [smem:[#allocation11 + $0xf8]] }
 0x211   :  { %v2346_v15 = vmul.f32 %v2344_v46, %v5738_v4  ;;  %v2412_v12 = vadd.f32 %v2410_v34, %v2364_v30  ;;  %v2413_v1 = vadd.f32 %v2411_v5, %v2365_v49  ;;  %v2416_v40 = vmul.f32 %v2415_v32, %v5723_v47  ;;  %s5496_s9 = sld [smem:[#allocation11 + $0xf5]] }
 0x212   :  { %v2417_v6 = vmul.f32 %v2415_v32, %v5724_v10  ;;  %v2389_v35 = vadd.f32 %v2387_v56, %v2383_v58  ;;  %v2394_v16 = vadd.f32 %v2392_v9, %v2388_v42  ;;  %v2422_v38 = vmul.f32 %v2421_v55, %v5702_v51  ;;  %v5739_v56 = vld [vmem:[#allocation28_spill] sm:$0xff]  ;;  %v5740_v42 = vld [vmem:[#allocation23_spill] sm:$0xff] }
 0x213   :  { %v2423_v59 = vmul.f32 %v2421_v55, %v5725_v41  ;;  %v2403_v27 = vstv %s5329_s1  ;;  %v2418_v37 = vadd.f32 %v2416_v40, %v2412_v12  ;;  %v2427_v61 = vstv %s5332_s10  ;;  %s5505_s1 = sld [smem:[#allocation11 + $0xf6]] }
 0x214   :  { %v2419_v46 = vadd.f32 %v2417_v6, %v2413_v1  ;;  %v2428_v30 = vmul.f32 %v2427_v61, %v4030_v39  ;;  %v2429_v49 = vmul.f32 %v2427_v61, %v4032_v13  ;;  %v2433_v33 = vstv %s5337_s11  ;;  %s5508_s10 = sld [smem:[#allocation11 + $0xf9]] }
 0x215   :  { %v2243_v58 = vadd.f32 %v5303_v50, %v5739_v56  ;;  %v5741_v9 = vmax.f32 %v5740_v42, 0.0  ;;  %v2424_v4 = vadd.f32 %v2422_v38, %v2418_v37  ;;  %v2395_v5 = vadd.f32 %v2393_v14, %v2389_v35  ;;  %s5514_s11 = sld [smem:[#allocation11 + $0xfa]] }
 0x216   :  { %v2425_v34 = vadd.f32 %v2423_v59, %v2419_v46  ;;  %v2399_v32 = vmul.f32 %v2397_v3, %v3991_v25  ;;  %v2400_v55 = vadd.f32 %v2398_v11, %v2394_v16  ;;  %v2404_v12 = vmul.f32 %v2403_v27, %v5688_v20 }
 0x217   :  { %v2347_v19 = vmul.f32 %v2345_v36, %v5741_v9  ;;  %v5384_v1 = vadd.f32 %v2346_v15, %v2242_v60  ;;  %v2434_v40 = vmul.f32 %v2433_v33, %v4036_v48  ;;  %v2430_v6 = vadd.f32 %v2428_v30, %v2424_v4 }
 0x218   :  { %v2431_v38 = vadd.f32 %v2429_v49, %v2425_v34  ;;  %v2435_v14 = vmul.f32 %v2433_v33, %v4038_v28  ;;  %v2439_v3 = vstv %s5355_s12  ;;  %v3098_v35 = vadd.f32 -14.0, %v3931_v24  ;;  %v5744_v34 = vld [vmem:[#allocation24_spill] sm:$0xff]  ;;  %s5523_s12 = sld [smem:[#allocation11 + $0xf7]] }
 0x219   :  { %5742 = vst [vmem:[#allocation38_spill] sm:$0xff] %v5384_v1  ;;  %v5393_v11 = vadd.f32 %v2347_v19, %v2243_v58  ;;  %v3099_v60 = vadd.f32 -14.0, %v5734_v7  ;;  %v2465_v15 = vstv %s5359_s13  ;;  %v2401_v16 = vadd.f32 %v2399_v32, %v2395_v5  ;;  %v5745_v32 = vld [vmem:[#allocation25_spill] sm:$0xff]  ;;  %s5527_s13 = sld [smem:[#allocation11 + $0xfb]] }
 0x21a   :  { %v2405_v59 = vmul.f32 %v2403_v27, %v3996_v44  ;;  %v5401_v37 = vadd.f32 %v2404_v12, %v2400_v55  ;;  %v2445_v46 = vstv %s5363_s2  ;;  %v2440_v61 = vmul.f32 %v2439_v3, %v4050_v8  ;;  %v5746_v12 = vld [vmem:[#allocation26_spill] sm:$0xff]  ;;  %s5534_s2 = sld [smem:[#allocation11 + $0xfc]] }
 0x21b   :  { %5743 = vst [vmem:[#allocation34_spill] sm:$0xff] %v5393_v11  ;;  %v2441_v30 = vmul.f32 %v2439_v3, %v5689_v54  ;;  %v2466_v49 = vmul.f32 %v2465_v15, %v3944_v2  ;;  %v2467_v33 = vmul.f32 %v2465_v15, %v3946_v29  ;;  %v2436_v56 = vadd.f32 %v2434_v40, %v2430_v6  ;;  %v5747_v6 = vld [vmem:[#allocation37_spill] sm:$0xff] }
 0x21c   :  { %v2437_v58 = vadd.f32 %v2435_v14, %v2431_v38  ;;  %v2473_v27 = vstv %s5367_s3  ;;  %v2479_v42 = vstv %s5372_s4  ;;  %v2458_v9 = vand.u32 2147483647, %v3098_v35  ;;  %s5538_s3 = sld [smem:[#allocation11 + $0xfd]] }
 0x21d   :  { %v2459_v19 = vand.u32 2147483647, %v3099_v60  ;;  %v2474_v4 = vmul.f32 %v2473_v27, %v3949_v45  ;;  %v2475_v5 = vmul.f32 %v2473_v27, %v5744_v34  ;;  %v2480_v55 = vmul.f32 %v2479_v42, %v5745_v32  ;;  %s5545_s4 = sld [smem:[#allocation11 + $0xfe]] }
 0x21e   :  { %v2481_v3 = vmul.f32 %v2479_v42, %v5746_v12  ;;  %v2485_v15 = vstv %s5378_s14  ;;  %v2491_v40 = vstv %s5382_s15  ;;  %v2446_v38 = vmul.f32 %v2445_v46, %v5747_v6  ;;  %s5549_s14 = sld [smem:[#allocation11 + $0xff]]  ;;  %s3261_s15 = smov [#allocation13]  }
 0x21f   :  { %v2447_v14 = vmul.f32 %v2445_v46, %v5737_v31  ;;  %v2476_v35 = vadd.f32 %v2474_v4, %v2466_v49  ;;  %v2477_v60 = vadd.f32 %v2475_v5, %v2467_v33  ;;  %v2442_v36 = vadd.f32 %v2440_v61, %v2436_v56 }
 0x220   :  { %v2443_v50 = vadd.f32 %v2441_v30, %v2437_v58  ;;  %v2469_v27 = vstv %s5391_s16  ;;  %v2486_v11 = vmul.f32 %v2485_v15, %v3963_v62  ;;  %v2487_v7 = vmul.f32 %v2485_v15, %v5717_v0  ;;  %s2674_s16 = sshll.u32 %s3261_s15, 4  ;;  %s2675_s16 = int_to_ptr.vmem [resolvable:$true] %s2674_s16 }
 0x221   :  { %v2482_v42 = vadd.f32 %v2480_v55, %v2476_v35  ;;  %v2483_v1 = vadd.f32 %v2481_v3, %v2477_v60  ;;  %v2492_v24 = vmul.f32 %v2491_v40, %v3978_v22  ;;  %v2407_v46 = vadd.f32 %v2405_v59, %v2401_v16 }
 0x222   :  { %v5436_v49 = vsub.f32 1.0, %v2458_v9  ;;  %v5438_v61 = vsub.f32 1.0, %v2459_v19  ;;  %v2497_v30 = vstv %s5404_s18  ;;  %v2470_v33 = vmul.f32 %v2469_v27, %v4009_v21 }
 0x223   :  { %v2471_v56 = vmul.f32 %v2469_v27, %v4011_v23  ;;  %v2488_v58 = vadd.f32 %v2486_v11, %v2482_v42  ;;  %v2515_v4 = vstv %s5398_s17  ;;  %v2448_v5 = vadd.f32 %v2446_v38, %v2442_v36 }
 0x224   :  { %v2449_v55 = vadd.f32 %v2447_v14, %v2443_v50  ;;  %v2493_v3 = vmul.f32 %v2491_v40, %v3980_v17  ;;  %v2503_v15 = vstv %s5410_s19  ;;  %v2489_v16 = vadd.f32 %v2487_v7, %v2483_v1  ;;  %s2676_s19 = sshll.u32 %s5595_s5, 4  ;;  %s2677_s19 = int_to_ptr.hbm [resolvable:$true] %s2676_s19 }
 0x225   :  { %v2494_v59 = vadd.f32 %v2492_v24, %v2488_v58  ;;  %v2498_v9 = vmul.f32 %v2497_v30, %v3982_v57  ;;  %v2509_v19 = vstv %s5418_s21  ;;  %v2516_v35 = vmul.f32 %v2515_v4, %v4015_v26 }
 0x226   :  { %v2517_v60 = vmul.f32 %v2515_v4, %v4017_v18  ;;  %v2521_v11 = vstv %s5414_s20  ;;  %v2527_v50 = vstv %s5424_s22  ;;  %v2499_v36 = vmul.f32 %v2497_v30, %v3987_v53 }
 0x227   :  { %v2504_v7 = vmul.f32 %v2503_v15, %v5677_v52  ;;  %v2522_v24 = vmul.f32 %v2521_v11, %v5723_v47  ;;  %v2523_v1 = vmul.f32 %v2521_v11, %v5724_v10  ;;  %v2518_v40 = vadd.f32 %v2516_v35, %v2470_v33 }
 0x228   :  { %v2519_v38 = vadd.f32 %v2517_v60, %v2471_v56  ;;  %v2528_v14 = vmul.f32 %v2527_v50, %v5702_v51  ;;  %v2529_v27 = vmul.f32 %v2527_v50, %v5725_v41  ;;  %v2495_v42 = vadd.f32 %v2493_v3, %v2489_v16 }
 0x229   :  { %v2500_v58 = vadd.f32 %v2498_v9, %v2494_v59  ;;  %v2533_v30 = vstv %s5430_s23  ;;  %v2539_v4 = vstv %s5434_s24  ;;  %v2524_v18 = vadd.f32 %v2522_v24, %v2518_v40 }
 0x22a   :  { %v2525_v26 = vadd.f32 %v2523_v1, %v2519_v38  ;;  %v2534_v47 = vmul.f32 %v2533_v30, %v4030_v39  ;;  %v2535_v11 = vmul.f32 %v2533_v30, %v4032_v13  ;;  %v2450_v33 = vadd.f32 %v2448_v5, %v5401_v37 }
 0x22b   :  { %v2462_v56 = vmax.f32 %v5436_v49, 0.0  ;;  %v2463_v35 = vmax.f32 %v5438_v61, 0.0  ;;  %v2540_v60 = vmul.f32 %v2539_v4, %v4036_v48  ;;  %v2530_v50 = vadd.f32 %v2528_v14, %v2524_v18 }
 0x22c   :  { %v2531_v41 = vadd.f32 %v2529_v27, %v2525_v26  ;;  %v2541_v3 = vmul.f32 %v2539_v4, %v4038_v28  ;;  %v2545_v16 = vstv %s5446_s25  ;;  %v2451_v59 = vadd.f32 %v2449_v55, %v2407_v46 }
 0x22d   :  { %v2501_v9 = vadd.f32 %v2499_v36, %v2495_v42  ;;  %v2505_v37 = vmul.f32 %v2503_v15, %v3991_v25  ;;  %v2510_v5 = vmul.f32 %v2509_v19, %v5688_v20  ;;  %v2506_v24 = vadd.f32 %v2504_v7, %v2500_v58 }
 0x22e   :  { %v2536_v18 = vadd.f32 %v2534_v47, %v2530_v50  ;;  %v2537_v26 = vadd.f32 %v2535_v11, %v2531_v41  ;;  %v2546_v1 = vmul.f32 %v2545_v16, %v4050_v8  ;;  %v5748_v40 = vmax.f32 %v5339_v63, 0.0 }
 0x22f   :  { %v2547_v46 = vmul.f32 %v2545_v16, %v5689_v54  ;;  %v2551_v55 = vstv %s5456_s29  ;;  %v2571_v36 = vstv %s5450_s28  ;;  %v2579_v27 = vstv %s5462_s30 }
 0x230   :  { %v5489_v38 = vmul.f32 %v2450_v33, %v5748_v40  ;;  %v2542_v15 = vadd.f32 %v2540_v60, %v2536_v18  ;;  %v2543_v14 = vadd.f32 %v2541_v3, %v2537_v26  ;;  %v2585_v42 = vstv %s5466_s0  ;;  %v5750_v3 = vld [vmem:[#allocation20_spill] sm:$0xff] }
 0x231   :  { %v5749_v47 = vmax.f32 %v5341_v43, 0.0  ;;  %v2511_v7 = vmul.f32 %v2509_v19, %v3996_v44  ;;  %v2572_v63 = vmul.f32 %v2571_v36, %v3944_v2  ;;  %v2573_v58 = vmul.f32 %v2571_v36, %v3946_v29 }
 0x232   :  { %v2507_v30 = vadd.f32 %v2505_v37, %v2501_v9  ;;  %v2512_v4 = vadd.f32 %v2510_v5, %v2506_v24  ;;  %v2548_v11 = vadd.f32 %v2546_v1, %v2542_v15  ;;  %v2552_v33 = vmul.f32 %v2551_v55, %v5747_v6 }
 0x233   :  { %v5500_v41 = vmul.f32 %v2451_v59, %v5749_v47  ;;  %v2580_v43 = vmul.f32 %v2579_v27, %v3949_v45  ;;  %v2581_v19 = vmul.f32 %v2579_v27, %v5744_v34  ;;  %v2586_v2 = vmul.f32 %v2585_v42, %v5745_v32  ;;  %v5751_v59 = vld [vmem:[#allocation21_spill] sm:$0xff] }
 0x234   :  { %v2587_v29 = vmul.f32 %v2585_v42, %v5746_v12  ;;  %v2549_v60 = vadd.f32 %v2547_v46, %v2543_v14  ;;  %v2553_v50 = vmul.f32 %v2551_v55, %v5737_v31  ;;  %v5518_v16 = vadd.f32 -15.0, %v5750_v3 }
 0x235   :  { %v5521_v9 = vadd.f32 -15.0, %v5751_v59  ;;  %v2582_v45 = vadd.f32 %v2580_v43, %v2572_v63  ;;  %v2583_v37 = vadd.f32 %v2581_v19, %v2573_v58  ;;  %v2591_v34 = vstv %s5478_s6  ;;  %v5752_v43 = vld [vmem:[#allocation30_spill] sm:$0xff] }
 0x236   :  { %v2597_v32 = vstv %s5482_s7  ;;  %v2554_v12 = vadd.f32 %v2552_v33, %v2548_v11  ;;  %v2575_v5 = vstv %s5485_s8  ;;  %v2592_v24 = vmul.f32 %v2591_v34, %v3963_v62 }
 0x237   :  { %v2593_v18 = vmul.f32 %v2591_v34, %v5717_v0  ;;  %v2588_v26 = vadd.f32 %v2586_v2, %v2582_v45  ;;  %v2589_v1 = vadd.f32 %v2587_v29, %v2583_v37  ;;  %v2598_v40 = vmul.f32 %v2597_v32, %v3978_v22  ;;  %v5755_v37 = vld [vmem:[#allocation35_spill] sm:$0xff] }
 0x238   :  { %v2599_v46 = vmul.f32 %v2597_v32, %v3980_v17  ;;  %v2513_v55 = vadd.f32 %v2511_v7, %v2507_v30  ;;  %v2555_v36 = vadd.f32 %v2553_v50, %v2549_v60  ;;  %v2564_v15 = vand.u32 2147483647, %v5518_v16 }
 0x239   :  { %v2603_v14 = vstv %s5496_s9  ;;  %v2565_v62 = vand.u32 2147483647, %v5521_v9  ;;  %v2594_v27 = vadd.f32 %v2592_v24, %v2588_v26  ;;  %v2595_v0 = vadd.f32 %v2593_v18, %v2589_v1 }
 0x23a   :  { %v2609_v42 = vstv %s5505_s1  ;;  %v2556_v47 = vadd.f32 %v2554_v12, %v2512_v4  ;;  %v2576_v22 = vmul.f32 %v2575_v5, %v4009_v21  ;;  %v2577_v17 = vmul.f32 %v2575_v5, %v4011_v23  ;;  %v5753_v21 = vld [vmem:[#allocation31_spill] sm:$0xff] }
 0x23b   :  { %v2604_v7 = vmul.f32 %v2603_v14, %v3982_v57  ;;  %v2600_v63 = vadd.f32 %v2598_v40, %v2594_v27  ;;  %v2601_v58 = vadd.f32 %v2599_v46, %v2595_v0  ;;  %v2605_v30 = vmul.f32 %v2603_v14, %v3987_v53  ;;  %v5754_v53 = vld [vmem:[#allocation32_spill] sm:$0xff] }
 0x23c   :  { %v2621_v11 = vstv %s5508_s10  ;;  %v2557_v33 = vadd.f32 %v2555_v36, %v2513_v55  ;;  %v2610_v4 = vmul.f32 %v2609_v42, %v5677_v52  ;;  %v2611_v57 = vmul.f32 %v2609_v42, %v3991_v25 }
 0x23d   :  { %v2622_v19 = vmul.f32 %v2621_v11, %v5752_v43  ;;  %v2623_v2 = vmul.f32 %v2621_v11, %v5753_v21  ;;  %v2615_v23 = vstv %s5523_s12  ;;  %v2627_v29 = vstv %s5514_s11 }
 0x23e   :  { %v2633_v60 = vstv %s5527_s13  ;;  %v2628_v16 = vmul.f32 %v2627_v29, %v5754_v53  ;;  %v2629_v59 = vmul.f32 %v2627_v29, %v5724_v10  ;;  %v2606_v9 = vadd.f32 %v2604_v7, %v2600_v63  ;;  %v5756_v63 = vld [vmem:[#allocation38_spill] sm:$0xff] }
 0x23f   :  { %v2624_v50 = vadd.f32 %v2622_v19, %v2576_v22  ;;  %v2625_v3 = vadd.f32 %v2623_v2, %v2577_v17  ;;  %v2607_v45 = vadd.f32 %v2605_v30, %v2601_v58  ;;  %v2634_v52 = vmul.f32 %v2633_v60, %v5702_v51  ;;  %v5757_v58 = vld [vmem:[#allocation34_spill] sm:$0xff] }
 0x240   :  { %v2635_v34 = vmul.f32 %v2633_v60, %v5755_v37  ;;  %v2639_v25 = vstv %s5534_s2  ;;  %v2645_v5 = vstv %s5538_s3  ;;  %v2616_v24 = vmul.f32 %v2615_v23, %v5688_v20 }
 0x241   :  { %v2630_v32 = vadd.f32 %v2628_v16, %v2624_v50  ;;  %v2631_v12 = vadd.f32 %v2629_v59, %v2625_v3  ;;  %v2617_v18 = vmul.f32 %v2615_v23, %v3996_v44  ;;  %v2640_v26 = vmul.f32 %v2639_v25, %v4030_v39 }
 0x242   :  { %v2641_v10 = vmul.f32 %v2639_v25, %v4032_v13  ;;  %v2646_v51 = vmul.f32 %v2645_v5, %v4036_v48  ;;  %v2647_v46 = vmul.f32 %v2645_v5, %v4038_v28  ;;  %v2612_v55 = vadd.f32 %v2610_v4, %v2606_v9 }
 0x243   :  { %v2636_v1 = vadd.f32 %v2634_v52, %v2630_v32  ;;  %v2637_v40 = vadd.f32 %v2635_v34, %v2631_v12  ;;  %v2613_v36 = vadd.f32 %v2611_v57, %v2607_v45  ;;  %v2651_v14 = vstv %s5545_s4 }
 0x244   :  { %v2657_v27 = vstv %s5549_s14  ;;  %v2652_v20 = vmul.f32 %v2651_v14, %v4050_v8  ;;  %v2653_v44 = vmul.f32 %v2651_v14, %v5689_v54  ;;  %v2566_v22 = vsub.f32 1.0, %v2564_v15 }
 0x245   :  { %v2642_v0 = vadd.f32 %v2640_v26, %v2636_v1  ;;  %v2643_v42 = vadd.f32 %v2641_v10, %v2637_v40  ;;  %v2567_v39 = vsub.f32 1.0, %v2565_v62  ;;  %v2658_v7 = vmul.f32 %v2657_v27, %v5747_v6 }
 0x246   :  { %v2659_v48 = vmul.f32 %v2657_v27, %v5737_v31  ;;  %v2454_v28 = vadd.f32 %v5489_v38, %v5756_v63  ;;  %v2455_v30 = vadd.f32 %v5500_v41, %v5757_v58  ;;  %v2558_v11 = vmul.f32 %v2556_v47, %v2462_v56 }
 0x247   :  { %v2648_v17 = vadd.f32 %v2646_v51, %v2642_v0  ;;  %v2649_v13 = vadd.f32 %v2647_v46, %v2643_v42  ;;  %v2559_v8 = vmul.f32 %v2557_v33, %v2463_v35  ;;  %v2618_v54 = vadd.f32 %v2616_v24, %v2612_v55 }
 0x248   :  { %v2619_v15 = vadd.f32 %v2617_v18, %v2613_v36  ;;  %v2568_v43 = vmax.f32 %v2566_v22, 0.0  ;;  %v2569_v6 = vmax.f32 %v2567_v39, 0.0  ;;  %v2560_v21 = vadd.f32 %v2558_v11, %v2454_v28 }
 0x249   :  { %v2654_v62 = vadd.f32 %v2652_v20, %v2648_v17  ;;  %v2655_v4 = vadd.f32 %v2653_v44, %v2649_v13  ;;  %v2561_v2 = vadd.f32 %v2559_v8, %v2455_v30 }
 0x24b   :  { %v2660_v19 = vadd.f32 %v2658_v7, %v2654_v62  ;;  %v2661_v31 = vadd.f32 %v2659_v48, %v2655_v4 }
 0x24d   :  { %v2662_v38 = vadd.f32 %v2660_v19, %v2618_v54  ;;  %v2663_v57 = vadd.f32 %v2661_v31, %v2619_v15 }
 0x24f   :  { %v2664_v23 = vmul.f32 %v2662_v38, %v2568_v43  ;;  %v2665_v41 = vmul.f32 %v2663_v57, %v2569_v6 }
 0x251   :  { %v2666_v49 = vadd.f32 %v2664_v23, %v2560_v21  ;;  %v2667_v61 = vadd.f32 %v2665_v41, %v2561_v2 }
 0x253   :  { %2668 = vst [vmem:[#allocation13] sm:$0xff] %v2666_v49 }
 0x254   :  { %2669 = vst [vmem:[#allocation13 + $0x8] sm:$0xff] %v2667_v61 }
 0x255   :  { %2682 = dma.vmem_to_hbm [thread:$0]  %s2675_s16, 256, %s2677_s19, [#allocation4], %s3255_s26, %s3255_s26, %s3256_s27  }
 0x256   :  { %3252 = dma.done.wait [#allocation4], 256  }
 0x257   :  { %3253 = vsyncadd [#allocation4], 4294967040 }
 0x258   :  { %2687 = vsyncpa [#allocation3], 1 }
 0x259   :  { %2688 = vsyncpa [#allocation4], 1 }
 0x25a   :  { %2689 = vsyncpa [#allocation5], 1 }
 0x25b   :  { %2690 = vsyncpa [#allocation10], 1 }
 0x25c   :  { %2691 = vsyncpa [#allocation6], 1 }
 0x25d   :  { %2692 = vsyncpa [#allocation12], 1 }

</bundles_post_ra>
